<compile_context>
chip_gen: v5e
topology: v5e:2x2
jax: 0.10.0
libtpu: 0.0.40
codegen_flags: <defaults>
</compile_context>

<pallas_src>
import functools

import jax
import jax.numpy as jnp
from jax import lax
from jax.experimental import pallas as pl
from jax.experimental.pallas import tpu as pltpu

NEG_SLOPE = 0.01          # nn.LeakyReLU default
GAT_ALPHA = 0.2           # GAT leaky-relu slope
BN_EPS = 1e-5
COLSUM_EPS = 1e-12


def _vmem_limit_bytes():
    """~3/4 of physical VMEM, capped at 100 MiB (96 MiB on v5e/v6e, 48 MiB on v7x)."""
    cap = 64 * 1024 * 1024
    try:
        info = pltpu.get_tpu_info()
        cap = int(getattr(info, "vmem_capacity_bytes", cap))
    except Exception:
        pass
    return min(cap * 3 // 4, 100 * 1024 * 1024)


VMEM_LIMIT = _vmem_limit_bytes()


def _leaky_relu(x, slope):
    return jnp.where(x > 0, x, slope * x)


def _elu(x):
    return jnp.where(x > 0, x, jnp.exp(jnp.minimum(x, 0.0)) - 1.0)


def pick_tile_p(P, N_pad, C, vmem_limit, n_split=2):
    """Largest power-of-two tile that fits comfortably in the scoped VMEM budget,
    capped so small problems are not over-padded."""
    budget = int(0.55 * vmem_limit)
    best = 128
    for t in (128, 256, 512, 1024, 2048, 4096):
        need = (2 * t * N_pad * 2        # bf16 Q / Q^T block, double-buffered
                + 2 * t * C * 4          # f32 x block, double-buffered
                + 4 * t * 128 * 4        # f32 activations in flight (clean, etc.)
                + 2 * (N_pad * 128 + N_pad) * 4)   # resident partial outputs
        if need <= budget:
            best = t
    cap = max(128, pl.next_power_of_2(pl.cdiv(P, n_split)))
    return min(best, cap)


# ----------------------------------------------------------------------------
# Kernel 1: CNN_denoise fused with superpixel pooling (per-core partial sums).
#   For each P-tile: clean = denoise(x_tile); accumulate Q^T_tile @ clean and the
#   Q column sums into the current core's resident partial output slab.
# ----------------------------------------------------------------------------
def denoise_pool_kernel(x_ref, qt_ref, s0_ref, t0_ref, w0_ref, b0_ref,
                        s1_ref, t1_ref, w1_ref, b1_ref,
                        pooled_ref, colsum_ref):
    i = pl.program_id(1)

    @pl.when(i == 0)
    def _init():
        pooled_ref[...] = jnp.zeros_like(pooled_ref)
        colsum_ref[...] = jnp.zeros_like(colsum_ref)

    x = x_ref[...]                                            # (tile_p, C) f32
    y = x * s0_ref[...] + t0_ref[...]                         # BatchNorm2d(C), folded
    # NOTE: K=C underfills the MXU for tiny band counts (demo C=4); fine for real
    # hyperspectral band counts (~100-200).
    y = jnp.dot(y.astype(jnp.bfloat16), w0_ref[...],
                preferred_element_type=jnp.float32) + b0_ref[...]
    y = _leaky_relu(y, NEG_SLOPE)
    y = y * s1_ref[...] + t1_ref[...]                         # BatchNorm2d(128), folded
    y = jnp.dot(y.astype(jnp.bfloat16), w1_ref[...],
                preferred_element_type=jnp.float32) + b1_ref[...]
    clean = _leaky_relu(y, NEG_SLOPE)                         # (tile_p, 128) f32

    qt = qt_ref[...]                                          # (N, tile_p) bf16
    # pooled_partial += Q^T_tile @ clean_tile  (standard MXU matmul, f32 acc)
    pooled_ref[...] += jnp.dot(qt, clean.astype(jnp.bfloat16),
                               preferred_element_type=jnp.float32)
    colsum_ref[...] += jnp.sum(qt.astype(jnp.float32), axis=1, keepdims=True)  # (N,1)


def denoise_pool(x_flat, Qt_bf, p, *, tile_p, n_split=2):
    P, C = x_flat.shape
    N = Qt_bf.shape[0]
    D = p["w0_bf"].shape[1]
    chunk = n_split * tile_p
    P_pad = pl.cdiv(P, chunk) * chunk
    if P_pad != P:   # zero columns of Q^T contribute nothing to pooled/colsum
        x_flat = jnp.pad(x_flat, ((0, P_pad - P), (0, 0)))
        Qt_bf = jnp.pad(Qt_bf, ((0, 0), (0, P_pad - P)))
    spc = P_pad // chunk          # P-tiles per core

    def full(shape):
        return pl.BlockSpec(shape, lambda c, i: (0, 0))

    pooled, colsum = pl.pallas_call(
        denoise_pool_kernel,
        out_shape=(jax.ShapeDtypeStruct((n_split, N, D), jnp.float32),
                   jax.ShapeDtypeStruct((n_split, N, 1), jnp.float32)),
        grid=(n_split, spc),
        in_specs=[
            pl.BlockSpec((tile_p, C), lambda c, i: (c * spc + i, 0)),
            pl.BlockSpec((N, tile_p), lambda c, i: (0, c * spc + i)),
            full((1, C)), full((1, C)),
            full((C, D)), full((1, D)),
            full((1, D)), full((1, D)),
            full((D, D)), full((1, D)),
        ],
        out_specs=(pl.BlockSpec((None, N, D), lambda c, i: (c, 0, 0)),
                   pl.BlockSpec((None, N, 1), lambda c, i: (c, 0, 0))),
        compiler_params=pltpu.CompilerParams(
            dimension_semantics=("parallel", "arbitrary"),   # core split, P reduction
            vmem_limit_bytes=VMEM_LIMIT),
    )(x_flat, Qt_bf, p["s0"], p["t0"], p["w0_bf"], p["b0"],
      p["s1"], p["t1"], p["w1_bf"], p["b1"])
    return pooled, colsum


# ----------------------------------------------------------------------------
# Kernel 2: H0 normalization + full GAT branch in one launch.
#   Reduces the per-core pooled/colsum partials, normalizes, runs 4 heads
#   (width 30 zero-padded to 32, lane-dense 128-wide concat) + output layer + ELU.
# ----------------------------------------------------------------------------
def gat_kernel(pooled_ref, colsum_ref, adj_ref, w_ref, a1_ref, a2_ref,
               wo_ref, a1o_ref, a2o_ref, o_ref, *, n_heads, head_pad):
    pooled = jnp.sum(pooled_ref[...], axis=0)                 # (N, 128) f32
    colsum = jnp.sum(colsum_ref[...], axis=0)                 # (N, 1)   f32
    h0 = pooled / jnp.maximum(colsum, COLSUM_EPS)             # norm_col_Q pooling

    adj = adj_ref[...]                                        # (N, N)
    bias = jnp.where(adj > 0, 0.0, jnp.float32(-9e15))        # hoisted adjacency mask

    def attend(f1, f2, feat_bf):
        e = _leaky_relu(f1 + f2.T, GAT_ALPHA) + bias          # (N, N)
        m = jnp.max(e, axis=-1, keepdims=True)
        ex = jnp.exp(e - m)
        inv = pl.reciprocal(jnp.sum(ex, axis=-1, keepdims=True), approx=True)
        # normalize AFTER the matmul: N*head_dim multiplies instead of N*N
        return jnp.dot(ex.astype(jnp.bfloat16), feat_bf,
                       preferred_element_type=jnp.float32) * inv

    wh = jnp.dot(h0.astype(jnp.bfloat16), w_ref[...],
                 preferred_element_type=jnp.float32)          # (N, n_heads*head_pad)
    f1 = jnp.dot(wh, a1_ref[...], preferred_element_type=jnp.float32)   # (N, n_heads)
    f2 = jnp.dot(wh, a2_ref[...], preferred_element_type=jnp.float32)   # (N, n_heads)
    wh_bf = wh.astype(jnp.bfloat16)

    head_outs = []
    for hd in range(n_heads):
        feat = wh_bf[:, hd * head_pad:(hd + 1) * head_pad]    # padded cols are zero
        hp = attend(f1[:, hd:hd + 1], f2[:, hd:hd + 1], feat)
        head_outs.append(_elu(hp))                            # concat heads: ELU inside
    hcat = jnp.concatenate(head_outs, axis=1)                 # (N, 128), pad lanes = 0

    # output GAT layer (concat=False) + outer F.elu of GAT.forward
    who = jnp.dot(hcat.astype(jnp.bfloat16), wo_ref[...],
                  preferred_element_type=jnp.float32)         # (N, 64)
    g1 = jnp.dot(who, a1o_ref[...], preferred_element_type=jnp.float32)
    g2 = jnp.dot(who, a2o_ref[...], preferred_element_type=jnp.float32)
    o_ref[...] = _elu(attend(g1, g2, who.astype(jnp.bfloat16)))


def gat_forward(pooled_part, colsum_part, adj, gp, *, n_heads, head_pad):
    N = adj.shape[0]
    out_dim = gp["W_out_bf"].shape[1]
    kern = functools.partial(gat_kernel, n_heads=n_heads, head_pad=head_pad)
    return pl.pallas_call(
        kern,
        out_shape=jax.ShapeDtypeStruct((N, out_dim), jnp.float32),
        compiler_params=pltpu.CompilerParams(vmem_limit_bytes=VMEM_LIMIT),
    )(pooled_part, colsum_part, adj, gp["W_stack_bf"], gp["a1_stack"], gp["a2_stack"],
      gp["W_out_bf"], gp["a1_out"], gp["a2_out"])


# ----------------------------------------------------------------------------
# Kernel 3: Q @ H -> BatchNorm1d (folded) -> LeakyReLU -> Linear -> softmax,
#           tiled over P (parallel grid axis), bf16 streams, f32 accumulation.
# ----------------------------------------------------------------------------
def final_kernel(q_ref, h_ref, s_ref, t_ref, w_ref, b_ref, o_ref):
    g = jnp.dot(q_ref[...], h_ref[...],
                preferred_element_type=jnp.float32)           # (tile_p, 64)
    g = _leaky_relu(g * s_ref[...] + t_ref[...], NEG_SLOPE)
    logits = jnp.dot(g.astype(jnp.bfloat16), w_ref[...],
                     preferred_element_type=jnp.float32) + b_ref[...]
    m = jnp.max(logits, axis=-1, keepdims=True)
    ex = jnp.exp(logits - m)
    inv = pl.reciprocal(jnp.sum(ex, axis=-1, keepdims=True), approx=True)
    o_ref[...] = ex * inv


def final_head(Q_bf, Hout_bf, bn_s, bn_t, lin_w_bf, lin_b, *, tile_p):
    P, N = Q_bf.shape
    D = Hout_bf.shape[1]
    n_cls = lin_w_bf.shape[1]
    P_pad = pl.cdiv(P, tile_p) * tile_p
    if P_pad != P:
        Q_bf = jnp.pad(Q_bf, ((0, P_pad - P), (0, 0)))

    def full(shape):
        return pl.BlockSpec(shape, lambda i: (0, 0))

    out = pl.pallas_call(
        final_kernel,
        out_shape=jax.ShapeDtypeStruct((P_pad, n_cls), jnp.float32),
        grid=(P_pad // tile_p,),
        in_specs=[
            pl.BlockSpec((tile_p, N), lambda i: (i, 0)),
            full((N, D)), full((1, D)), full((1, D)),
            full((D, n_cls)), full((1, n_cls)),
        ],
        out_specs=pl.BlockSpec((tile_p, n_cls), lambda i: (i, 0)),
        compiler_params=pltpu.CompilerParams(
            dimension_semantics=("parallel",),
            vmem_limit_bytes=VMEM_LIMIT),
    )(Q_bf, Hout_bf, bn_s, bn_t, lin_w_bf, lin_b)
    return out[:P]


# ----------------------------------------------------------------------------
# Parameter construction (deterministic, synthetic).  Matmul weights pre-cast to
# bf16 once here (resident operands: no per-grid-step casts, half the DMA bytes).
# ----------------------------------------------------------------------------
def fold_bn(gamma, beta, rm, rv):
    s = gamma / jnp.sqrt(rv + BN_EPS)
    t = beta - rm * s
    return s[None, :], t[None, :]


def make_params(key, c, n_hid=128, gat_hid=30, head_pad=32, gat_heads=4,
                gat_out=64, n_cls=5):
    ks = iter(jax.random.split(key, 64))
    nrm = lambda shape, sc=0.1: sc * jax.random.normal(next(ks), shape, jnp.float32)
    uni = lambda shape: jax.random.uniform(next(ks), shape, jnp.float32, 0.5, 1.5)

    denoise = {}
    denoise["s0"], denoise["t0"] = fold_bn(uni((c,)), nrm((c,)), nrm((c,)), uni((c,)))
    denoise["w0_bf"] = nrm((c, n_hid)).astype(jnp.bfloat16)
    denoise["b0"] = nrm((1, n_hid))
    denoise["s1"], denoise["t1"] = fold_bn(uni((n_hid,)), nrm((n_hid,)),
                                           nrm((n_hid,)), uni((n_hid,)))
    denoise["w1_bf"] = nrm((n_hid, n_hid)).astype(jnp.bfloat16)
    denoise["b1"] = nrm((1, n_hid))

    # GAT heads: width 30 zero-padded to 32 -> 4*32 = 128 lane-dense concat.
    # Pad columns/rows are exactly zero so numerics match the 30-wide reference.
    in_dim = gat_heads * head_pad
    W_stack = jnp.zeros((n_hid, in_dim), jnp.float32)
    a1_stack = jnp.zeros((in_dim, gat_heads), jnp.float32)
    a2_stack = jnp.zeros((in_dim, gat_heads), jnp.float32)
    W_out = jnp.zeros((in_dim, gat_out), jnp.float32)
    for hd in range(gat_heads):
        lo = hd * head_pad
        W_stack = W_stack.at[:, lo:lo + gat_hid].set(nrm((n_hid, gat_hid)))
        a1_stack = a1_stack.at[lo:lo + gat_hid, hd].set(nrm((gat_hid,)))
        a2_stack = a2_stack.at[lo:lo + gat_hid, hd].set(nrm((gat_hid,)))
        W_out = W_out.at[lo:lo + gat_hid, :].set(nrm((gat_hid, gat_out)))
    gat = dict(W_stack_bf=W_stack.astype(jnp.bfloat16),
               a1_stack=a1_stack, a2_stack=a2_stack,
               W_out_bf=W_out.astype(jnp.bfloat16),
               a1_out=nrm((gat_out, 1)), a2_out=nrm((gat_out, 1)))

    bn1_s, bn1_t = fold_bn(uni((gat_out,)), nrm((gat_out,)),
                           nrm((gat_out,)), uni((gat_out,)))
    lin_w_bf = nrm((gat_out, n_cls)).astype(jnp.bfloat16)
    lin_b = nrm((1, n_cls))

    return dict(denoise=denoise, gat=gat, bn1_s=bn1_s, bn1_t=bn1_t,
                lin_w_bf=lin_w_bf, lin_b=lin_b)


# ----------------------------------------------------------------------------
# WFCG forward
# ----------------------------------------------------------------------------
@functools.partial(jax.jit, static_argnames=("tile_p",))
def wfcg_forward(x_hwc, Q, A, params, *, tile_p):
    h, w, c = x_hwc.shape
    P = h * w
    N = Q.shape[1]
    N_pad = max(128, pl.cdiv(N, 128) * 128)    # lane-dense superpixel axis
    x_flat = x_hwc.reshape(P, c).astype(jnp.float32)

    # bf16 Q once (dominant HBM stream, read by kernels 1 and 3); padded columns
    # of Q / rows+cols of A are inert (zero pooling weight, -9e15 attention bias).
    Q_bf = Q.astype(jnp.bfloat16)
    if N_pad != N:
        Q_bf = jnp.pad(Q_bf, ((0, 0), (0, N_pad - N)))
        A = jnp.pad(A, ((0, N_pad - N), (0, N_pad - N)))
    Qt_bf = Q_bf.T    # one-time transpose; Q is a constant of the model in practice

    # CNN_denoise fused with superpixel pooling; per-core partial sums.
    pooled_part, colsum_part = denoise_pool(x_flat, Qt_bf, params["denoise"],
                                            tile_p=tile_p)

    # GAT branch: partial-sum reduce + normalization + 4 heads + out layer + ELU.
    Hout = gat_forward(pooled_part, colsum_part, A, params["gat"],
                       n_heads=4, head_pad=32)                 # (N_pad, 64)

    # Q @ H -> bn1 -> LeakyReLU -> Linear -> softmax, tiled over P.
    return final_head(Q_bf, Hout.astype(jnp.bfloat16),
                      params["bn1_s"], params["bn1_t"],
                      params["lin_w_bf"], params["lin_b"], tile_p=tile_p)


# ----------------------------------------------------------------------------
if __name__ == "__main__":
    key = jax.random.PRNGKey(0)
    k_x, k_q, k_a, k_p = jax.random.split(key, 4)

    H_img, W_img, C_in = 16, 16, 4          # small spatial / spectral dims
    N_sp = 16                               # number of superpixels
    n_classes = 5
    P = H_img * W_img

    x = jax.random.normal(k_x, (H_img, W_img, C_in), jnp.float32)
    Q = jax.random.uniform(k_q, (P, N_sp), jnp.float32) + 0.01
    A_rand = jax.random.uniform(k_a, (N_sp, N_sp), jnp.float32)
    A = ((A_rand + A_rand.T) > 1.0).astype(jnp.float32) + jnp.eye(N_sp, dtype=jnp.float32)

    params = make_params(k_p, C_in, n_cls=n_classes)

    N_pad = max(128, pl.cdiv(N_sp, 128) * 128)
    tile_p = pick_tile_p(P, N_pad, C_in, VMEM_LIMIT)

    y = wfcg_forward(x, Q, A, params, tile_p=tile_p)
    y = jax.block_until_ready(y)

    assert y.shape == (P, n_classes)
    assert bool(jnp.all(jnp.isfinite(y)))
    assert bool(jnp.max(jnp.abs(jnp.sum(y, axis=-1) - 1.0)) < 3e-3)
    print("KERNEL_OK")
</pallas_src>

<mosaic_0001>
module attributes {stable_mosaic.version = 11 : i64} {
  func.func @denoise_pool_kernel(%arg0: i32, %arg1: i32, %arg2: memref<128x4xf32, #tpu.memory_space<vmem>>, %arg3: memref<128x128xbf16, #tpu.memory_space<vmem>>, %arg4: memref<1x4xf32, #tpu.memory_space<vmem>>, %arg5: memref<1x4xf32, #tpu.memory_space<vmem>>, %arg6: memref<4x128xbf16, #tpu.memory_space<vmem>>, %arg7: memref<1x128xf32, #tpu.memory_space<vmem>>, %arg8: memref<1x128xf32, #tpu.memory_space<vmem>>, %arg9: memref<1x128xf32, #tpu.memory_space<vmem>>, %arg10: memref<128x128xbf16, #tpu.memory_space<vmem>>, %arg11: memref<1x128xf32, #tpu.memory_space<vmem>>, %arg12: memref<1x128x128xf32, #tpu.memory_space<vmem>>, %arg13: memref<1x128x1xf32, #tpu.memory_space<vmem>>) attributes {dimension_semantics = [#tpu.dimension_semantics<parallel>, #tpu.dimension_semantics<arbitrary>], iteration_bounds = array<i64: 2, 1>, scalar_prefetch = 0 : i64, scratch_operands = 0 : i64, tpu.core_type = #tpu.core_type<tc>, window_params = [{transform_indices = @transform_0, window_bounds = array<i64: 128, 4>}, {transform_indices = @transform_1, window_bounds = array<i64: 128, 128>}, {pipeline_mode = #tpu.pipeline_mode<synchronous>, transform_indices = @transform_2, window_bounds = array<i64: 1, 4>}, {pipeline_mode = #tpu.pipeline_mode<synchronous>, transform_indices = @transform_3, window_bounds = array<i64: 1, 4>}, {pipeline_mode = #tpu.pipeline_mode<synchronous>, transform_indices = @transform_4, window_bounds = array<i64: 4, 128>}, {pipeline_mode = #tpu.pipeline_mode<synchronous>, transform_indices = @transform_5, window_bounds = array<i64: 1, 128>}, {pipeline_mode = #tpu.pipeline_mode<synchronous>, transform_indices = @transform_6, window_bounds = array<i64: 1, 128>}, {pipeline_mode = #tpu.pipeline_mode<synchronous>, transform_indices = @transform_7, window_bounds = array<i64: 1, 128>}, {pipeline_mode = #tpu.pipeline_mode<synchronous>, transform_indices = @transform_8, window_bounds = array<i64: 128, 128>}, {pipeline_mode = #tpu.pipeline_mode<synchronous>, transform_indices = @transform_9, window_bounds = array<i64: 1, 128>}, {transform_indices = @transform_10, window_bounds = array<i64: 1, 128, 128>}, {transform_indices = @transform_11, window_bounds = array<i64: 1, 128, 1>}]} {
    %c0_i32 = arith.constant 0 : i32
    %0 = arith.cmpi eq, %arg1, %c0_i32 : i32
    %1 = arith.extui %0 : i1 to i32
    %c0_i32_0 = arith.constant 0 : i32
    %2 = arith.cmpi ne, %1, %c0_i32_0 : i32
    scf.if %2 {
      %cst_39 = arith.constant 0.000000e+00 : f32
      %56 = vector.broadcast %cst_39 : f32 to vector<128x128xf32>
      %c0_40 = arith.constant 0 : index
      %c0_41 = arith.constant 0 : index
      %c0_42 = arith.constant 0 : index
      %57 = vector.load %arg12[%c0_40, %c0_41, %c0_42] : memref<1x128x128xf32, #tpu.memory_space<vmem>>, vector<1x128x128xf32>
      %58 = vector.shape_cast %57 : vector<1x128x128xf32> to vector<128x128xf32>
      %59 = vector.shape_cast %56 : vector<128x128xf32> to vector<1x128x128xf32>
      tpu.vector_store %arg12[%c0_40, %c0_41, %c0_42], %59 {strides = array<i32>} : memref<1x128x128xf32, #tpu.memory_space<vmem>>, vector<1x128x128xf32>,
      %cst_43 = arith.constant 0.000000e+00 : f32
      %60 = vector.broadcast %cst_43 : f32 to vector<128x1xf32>
      %c0_44 = arith.constant 0 : index
      %c0_45 = arith.constant 0 : index
      %c0_46 = arith.constant 0 : index
      %61 = vector.load %arg13[%c0_44, %c0_45, %c0_46] : memref<1x128x1xf32, #tpu.memory_space<vmem>>, vector<1x128x1xf32>
      %62 = vector.shape_cast %61 : vector<1x128x1xf32> to vector<128x1xf32>
      %63 = vector.shape_cast %60 : vector<128x1xf32> to vector<1x128x1xf32>
      tpu.vector_store %arg13[%c0_44, %c0_45, %c0_46], %63 {strides = array<i32>} : memref<1x128x1xf32, #tpu.memory_space<vmem>>, vector<1x128x1xf32>,
    } else {
    }
    %c0 = arith.constant 0 : index
    %c0_1 = arith.constant 0 : index
    %3 = vector.load %arg2[%c0, %c0_1] : memref<128x4xf32, #tpu.memory_space<vmem>>, vector<128x4xf32>
    %c0_2 = arith.constant 0 : index
    %c0_3 = arith.constant 0 : index
    %4 = vector.load %arg4[%c0_2, %c0_3] : memref<1x4xf32, #tpu.memory_space<vmem>>, vector<1x4xf32>
    %5 = vector.broadcast %4 : vector<1x4xf32> to vector<128x4xf32>
    %6 = arith.mulf %3, %5 : vector<128x4xf32>
    %c0_4 = arith.constant 0 : index
    %c0_5 = arith.constant 0 : index
    %7 = vector.load %arg5[%c0_4, %c0_5] : memref<1x4xf32, #tpu.memory_space<vmem>>, vector<1x4xf32>
    %8 = vector.broadcast %7 : vector<1x4xf32> to vector<128x4xf32>
    %9 = arith.addf %6, %8 : vector<128x4xf32>
    %10 = arith.truncf %9 : vector<128x4xf32> to vector<128x4xbf16>
    %c0_6 = arith.constant 0 : index
    %c0_7 = arith.constant 0 : index
    %11 = vector.load %arg6[%c0_6, %c0_7] : memref<4x128xbf16, #tpu.memory_space<vmem>>, vector<4x128xbf16>
    %cst = arith.constant dense<0.000000e+00> : vector<128x128xf32>
    %12 = tpu.matmul %10, %11, %cst {dimension_numbers = #tpu.dot_dimension_numbers<[1], [0], [0], [1], [0, 0, 1, 1], [], []>} : vector<128x4xbf16>, vector<4x128xbf16>, vector<128x128xf32> -> vector<128x128xf32>
    %c0_8 = arith.constant 0 : index
    %c0_9 = arith.constant 0 : index
    %13 = vector.load %arg7[%c0_8, %c0_9] : memref<1x128xf32, #tpu.memory_space<vmem>>, vector<1x128xf32>
    %14 = vector.broadcast %13 : vector<1x128xf32> to vector<128x128xf32>
    %15 = arith.addf %12, %14 : vector<128x128xf32>
    %cst_10 = arith.constant 0.000000e+00 : f32
    %16 = vector.broadcast %cst_10 : f32 to vector<128x128xf32>
    %17 = arith.cmpf ogt, %15, %16 : vector<128x128xf32>
    %cst_11 = arith.constant 0.00999999977 : f32
    %18 = vector.broadcast %cst_11 : f32 to vector<128x128xf32>
    %19 = arith.mulf %18, %15 : vector<128x128xf32>
    %20 = arith.select %17, %15, %19 : vector<128x128xi1>, vector<128x128xf32>
    %c0_12 = arith.constant 0 : index
    %c0_13 = arith.constant 0 : index
    %21 = vector.load %arg8[%c0_12, %c0_13] : memref<1x128xf32, #tpu.memory_space<vmem>>, vector<1x128xf32>
    %22 = vector.broadcast %21 : vector<1x128xf32> to vector<128x128xf32>
    %23 = arith.mulf %20, %22 : vector<128x128xf32>
    %c0_14 = arith.constant 0 : index
    %c0_15 = arith.constant 0 : index
    %24 = vector.load %arg9[%c0_14, %c0_15] : memref<1x128xf32, #tpu.memory_space<vmem>>, vector<1x128xf32>
    %25 = vector.broadcast %24 : vector<1x128xf32> to vector<128x128xf32>
    %26 = arith.addf %23, %25 : vector<128x128xf32>
    %27 = arith.truncf %26 : vector<128x128xf32> to vector<128x128xbf16>
    %c0_16 = arith.constant 0 : index
    %c0_17 = arith.constant 0 : index
    %28 = vector.load %arg10[%c0_16, %c0_17] : memref<128x128xbf16, #tpu.memory_space<vmem>>, vector<128x128xbf16>
    %cst_18 = arith.constant dense<0.000000e+00> : vector<128x128xf32>
    %29 = tpu.matmul %27, %28, %cst_18 {dimension_numbers = #tpu.dot_dimension_numbers<[1], [0], [0], [1], [0, 0, 1, 1], [], []>} : vector<128x128xbf16>, vector<128x128xbf16>, vector<128x128xf32> -> vector<128x128xf32>
    %c0_19 = arith.constant 0 : index
    %c0_20 = arith.constant 0 : index
    %30 = vector.load %arg11[%c0_19, %c0_20] : memref<1x128xf32, #tpu.memory_space<vmem>>, vector<1x128xf32>
    %31 = vector.broadcast %30 : vector<1x128xf32> to vector<128x128xf32>
    %32 = arith.addf %29, %31 : vector<128x128xf32>
    %cst_21 = arith.constant 0.000000e+00 : f32
    %33 = vector.broadcast %cst_21 : f32 to vector<128x128xf32>
    %34 = arith.cmpf ogt, %32, %33 : vector<128x128xf32>
    %cst_22 = arith.constant 0.00999999977 : f32
    %35 = vector.broadcast %cst_22 : f32 to vector<128x128xf32>
    %36 = arith.mulf %35, %32 : vector<128x128xf32>
    %37 = arith.select %34, %32, %36 : vector<128x128xi1>, vector<128x128xf32>
    %c0_23 = arith.constant 0 : index
    %c0_24 = arith.constant 0 : index
    %38 = vector.load %arg3[%c0_23, %c0_24] : memref<128x128xbf16, #tpu.memory_space<vmem>>, vector<128x128xbf16>
    %c0_25 = arith.constant 0 : index
    %c0_26 = arith.constant 0 : index
    %c0_27 = arith.constant 0 : index
    %39 = vector.load %arg12[%c0_25, %c0_26, %c0_27] : memref<1x128x128xf32, #tpu.memory_space<vmem>>, vector<1x128x128xf32>
    %40 = vector.shape_cast %39 : vector<1x128x128xf32> to vector<128x128xf32>
    %41 = arith.truncf %37 : vector<128x128xf32> to vector<128x128xbf16>
    %cst_28 = arith.constant dense<0.000000e+00> : vector<128x128xf32>
    %42 = tpu.matmul %38, %41, %cst_28 {dimension_numbers = #tpu.dot_dimension_numbers<[1], [0], [0], [1], [0, 0, 1, 1], [], []>} : vector<128x128xbf16>, vector<128x128xbf16>, vector<128x128xf32> -> vector<128x128xf32>
    %43 = arith.addf %40, %42 : vector<128x128xf32>
    %c0_29 = arith.constant 0 : index
    %c0_30 = arith.constant 0 : index
    %c0_31 = arith.constant 0 : index
    %44 = vector.load %arg12[%c0_29, %c0_30, %c0_31] : memref<1x128x128xf32, #tpu.memory_space<vmem>>, vector<1x128x128xf32>
    %45 = vector.shape_cast %44 : vector<1x128x128xf32> to vector<128x128xf32>
    %46 = vector.shape_cast %43 : vector<128x128xf32> to vector<1x128x128xf32>
    tpu.vector_store %arg12[%c0_29, %c0_30, %c0_31], %46 {strides = array<i32>} : memref<1x128x128xf32, #tpu.memory_space<vmem>>, vector<1x128x128xf32>,
    %c0_32 = arith.constant 0 : index
    %c0_33 = arith.constant 0 : index
    %c0_34 = arith.constant 0 : index
    %47 = vector.load %arg13[%c0_32, %c0_33, %c0_34] : memref<1x128x1xf32, #tpu.memory_space<vmem>>, vector<1x128x1xf32>
    %48 = vector.shape_cast %47 : vector<1x128x1xf32> to vector<128x1xf32>
    %49 = arith.extf %38 : vector<128x128xbf16> to vector<128x128xf32>
    %cst_35 = arith.constant dense<0.000000e+00> : vector<128xf32>
    %50 = vector.multi_reduction <add>, %49, %cst_35 [1] : vector<128x128xf32> to vector<128xf32>
    %51 = vector.shape_cast %50 : vector<128xf32> to vector<128x1xf32>
    %52 = arith.addf %48, %51 : vector<128x1xf32>
    %c0_36 = arith.constant 0 : index
    %c0_37 = arith.constant 0 : index
    %c0_38 = arith.constant 0 : index
    %53 = vector.load %arg13[%c0_36, %c0_37, %c0_38] : memref<1x128x1xf32, #tpu.memory_space<vmem>>, vector<1x128x1xf32>
    %54 = vector.shape_cast %53 : vector<1x128x1xf32> to vector<128x1xf32>
    %55 = vector.shape_cast %52 : vector<128x1xf32> to vector<1x128x1xf32>
    tpu.vector_store %arg13[%c0_36, %c0_37, %c0_38], %55 {strides = array<i32>} : memref<1x128x1xf32, #tpu.memory_space<vmem>>, vector<1x128x1xf32>,
    return
  }
  func.func @transform_0(%arg0: i32, %arg1: i32) -> (i32, i32) {
    %c1_i32 = arith.constant 1 : i32
    %0 = arith.muli %arg0, %c1_i32 : i32
    %1 = arith.addi %0, %arg1 : i32
    %c0_i32 = arith.constant 0 : i32
    %c0_i32_0 = arith.constant 0 : i32
    return %1, %c0_i32 : i32, i32
  }
  func.func @transform_1(%arg0: i32, %arg1: i32) -> (i32, i32) {
    %c1_i32 = arith.constant 1 : i32
    %0 = arith.muli %arg0, %c1_i32 : i32
    %1 = arith.addi %0, %arg1 : i32
    %c0_i32 = arith.constant 0 : i32
    %c0_i32_0 = arith.constant 0 : i32
    return %c0_i32, %1 : i32, i32
  }
  func.func @transform_2(%arg0: i32, %arg1: i32) -> (i32, i32) {
    %c0_i32 = arith.constant 0 : i32
    %c0_i32_0 = arith.constant 0 : i32
    %c0_i32_1 = arith.constant 0 : i32
    return %c0_i32, %c0_i32_0 : i32, i32
  }
  func.func @transform_3(%arg0: i32, %arg1: i32) -> (i32, i32) {
    %c0_i32 = arith.constant 0 : i32
    %c0_i32_0 = arith.constant 0 : i32
    %c0_i32_1 = arith.constant 0 : i32
    return %c0_i32, %c0_i32_0 : i32, i32
  }
  func.func @transform_4(%arg0: i32, %arg1: i32) -> (i32, i32) {
    %c0_i32 = arith.constant 0 : i32
    %c0_i32_0 = arith.constant 0 : i32
    %c0_i32_1 = arith.constant 0 : i32
    return %c0_i32, %c0_i32_0 : i32, i32
  }
  func.func @transform_5(%arg0: i32, %arg1: i32) -> (i32, i32) {
    %c0_i32 = arith.constant 0 : i32
    %c0_i32_0 = arith.constant 0 : i32
    %c0_i32_1 = arith.constant 0 : i32
    return %c0_i32, %c0_i32_0 : i32, i32
  }
  func.func @transform_6(%arg0: i32, %arg1: i32) -> (i32, i32) {
    %c0_i32 = arith.constant 0 : i32
    %c0_i32_0 = arith.constant 0 : i32
    %c0_i32_1 = arith.constant 0 : i32
    return %c0_i32, %c0_i32_0 : i32, i32
  }
  func.func @transform_7(%arg0: i32, %arg1: i32) -> (i32, i32) {
    %c0_i32 = arith.constant 0 : i32
    %c0_i32_0 = arith.constant 0 : i32
    %c0_i32_1 = arith.constant 0 : i32
    return %c0_i32, %c0_i32_0 : i32, i32
  }
  func.func @transform_8(%arg0: i32, %arg1: i32) -> (i32, i32) {
    %c0_i32 = arith.constant 0 : i32
    %c0_i32_0 = arith.constant 0 : i32
    %c0_i32_1 = arith.constant 0 : i32
    return %c0_i32, %c0_i32_0 : i32, i32
  }
  func.func @transform_9(%arg0: i32, %arg1: i32) -> (i32, i32) {
    %c0_i32 = arith.constant 0 : i32
    %c0_i32_0 = arith.constant 0 : i32
    %c0_i32_1 = arith.constant 0 : i32
    return %c0_i32, %c0_i32_0 : i32, i32
  }
  func.func @transform_10(%arg0: i32, %arg1: i32) -> (i32, i32, i32) {
    %c0_i32 = arith.constant 0 : i32
    %c0_i32_0 = arith.constant 0 : i32
    %c0_i32_1 = arith.constant 0 : i32
    return %arg0, %c0_i32, %c0_i32_0 : i32, i32, i32
  }
  func.func @transform_11(%arg0: i32, %arg1: i32) -> (i32, i32, i32) {
    %c0_i32 = arith.constant 0 : i32
    %c0_i32_0 = arith.constant 0 : i32
    %c0_i32_1 = arith.constant 0 : i32
    return %arg0, %c0_i32, %c0_i32_0 : i32, i32, i32
  }
}

module attributes {stable_mosaic.version = 11 : i64} {
  func.func @gat_kernel(%arg0: memref<2x128x128xf32, #tpu.memory_space<vmem>>, %arg1: memref<2x128x1xf32, #tpu.memory_space<vmem>>, %arg2: memref<128x128xf32, #tpu.memory_space<vmem>>, %arg3: memref<128x128xbf16, #tpu.memory_space<vmem>>, %arg4: memref<128x4xf32, #tpu.memory_space<vmem>>, %arg5: memref<128x4xf32, #tpu.memory_space<vmem>>, %arg6: memref<128x64xbf16, #tpu.memory_space<vmem>>, %arg7: memref<64x1xf32, #tpu.memory_space<vmem>>, %arg8: memref<64x1xf32, #tpu.memory_space<vmem>>, %arg9: memref<128x64xf32, #tpu.memory_space<vmem>>) attributes {dimension_semantics = [], scalar_prefetch = 0 : i64, scratch_operands = 0 : i64, tpu.core_type = #tpu.core_type<tc>} {
    %c0 = arith.constant 0 : index
    %c0_0 = arith.constant 0 : index
    %c0_1 = arith.constant 0 : index
    %0 = vector.load %arg0[%c0, %c0_0, %c0_1] : memref<2x128x128xf32, #tpu.memory_space<vmem>>, vector<2x128x128xf32>
    %cst = arith.constant dense<0.000000e+00> : vector<128x128xf32>
    %1 = vector.multi_reduction <add>, %0, %cst [0] : vector<2x128x128xf32> to vector<128x128xf32>
    %c0_2 = arith.constant 0 : index
    %c0_3 = arith.constant 0 : index
    %c0_4 = arith.constant 0 : index
    %2 = vector.load %arg1[%c0_2, %c0_3, %c0_4] : memref<2x128x1xf32, #tpu.memory_space<vmem>>, vector<2x128x1xf32>
    %cst_5 = arith.constant dense<0.000000e+00> : vector<128x1xf32>
    %3 = vector.multi_reduction <add>, %2, %cst_5 [0] : vector<2x128x1xf32> to vector<128x1xf32>
    %cst_6 = arith.constant 9.99999996E-13 : f32
    %4 = vector.broadcast %cst_6 : f32 to vector<128x1xf32>
    %5 = arith.maximumf %3, %4 : vector<128x1xf32>
    %6 = vector.broadcast %5 : vector<128x1xf32> to vector<128x128xf32>
    %7 = arith.divf %1, %6 : vector<128x128xf32>
    %c0_7 = arith.constant 0 : index
    %c0_8 = arith.constant 0 : index
    %8 = vector.load %arg2[%c0_7, %c0_8] : memref<128x128xf32, #tpu.memory_space<vmem>>, vector<128x128xf32>
    %cst_9 = arith.constant 0.000000e+00 : f32
    %9 = vector.broadcast %cst_9 : f32 to vector<128x128xf32>
    %10 = arith.cmpf ogt, %8, %9 : vector<128x128xf32>
    %cst_10 = arith.constant 0.000000e+00 : f32
    %cst_11 = arith.constant -9.000000e+15 : f32
    %11 = vector.broadcast %cst_10 : f32 to vector<128x128xf32>
    %12 = vector.broadcast %cst_11 : f32 to vector<128x128xf32>
    %13 = arith.select %10, %11, %12 : vector<128x128xi1>, vector<128x128xf32>
    %14 = arith.truncf %7 : vector<128x128xf32> to vector<128x128xbf16>
    %c0_12 = arith.constant 0 : index
    %c0_13 = arith.constant 0 : index
    %15 = vector.load %arg3[%c0_12, %c0_13] : memref<128x128xbf16, #tpu.memory_space<vmem>>, vector<128x128xbf16>
    %cst_14 = arith.constant dense<0.000000e+00> : vector<128x128xf32>
    %16 = tpu.matmul %14, %15, %cst_14 {dimension_numbers = #tpu.dot_dimension_numbers<[1], [0], [0], [1], [0, 0, 1, 1], [], []>} : vector<128x128xbf16>, vector<128x128xbf16>, vector<128x128xf32> -> vector<128x128xf32>
    %c0_15 = arith.constant 0 : index
    %c0_16 = arith.constant 0 : index
    %17 = vector.load %arg4[%c0_15, %c0_16] : memref<128x4xf32, #tpu.memory_space<vmem>>, vector<128x4xf32>
    %cst_17 = arith.constant dense<0.000000e+00> : vector<128x4xf32>
    %18 = tpu.matmul %16, %17, %cst_17 {dimension_numbers = #tpu.dot_dimension_numbers<[1], [0], [0], [1], [0, 0, 1, 1], [], []>} : vector<128x128xf32>, vector<128x4xf32>, vector<128x4xf32> -> vector<128x4xf32>
    %c0_18 = arith.constant 0 : index
    %c0_19 = arith.constant 0 : index
    %19 = vector.load %arg5[%c0_18, %c0_19] : memref<128x4xf32, #tpu.memory_space<vmem>>, vector<128x4xf32>
    %cst_20 = arith.constant dense<0.000000e+00> : vector<128x4xf32>
    %20 = tpu.matmul %16, %19, %cst_20 {dimension_numbers = #tpu.dot_dimension_numbers<[1], [0], [0], [1], [0, 0, 1, 1], [], []>} : vector<128x128xf32>, vector<128x4xf32>, vector<128x4xf32> -> vector<128x4xf32>
    %21 = arith.truncf %16 : vector<128x128xf32> to vector<128x128xbf16>
    %22 = vector.extract_strided_slice %21 {offsets = [0, 0], sizes = [128, 32], strides = [1, 1]} : vector<128x128xbf16> to vector<128x32xbf16>
    %23 = vector.extract_strided_slice %18 {offsets = [0, 0], sizes = [128, 1], strides = [1, 1]} : vector<128x4xf32> to vector<128x1xf32>
    %24 = vector.extract_strided_slice %20 {offsets = [0, 0], sizes = [128, 1], strides = [1, 1]} : vector<128x4xf32> to vector<128x1xf32>
    %25 = tpu.transpose %24, [1, 0] : vector<128x1xf32> -> vector<1x128xf32>
    %26 = vector.broadcast %23 : vector<128x1xf32> to vector<128x128xf32>
    %27 = vector.broadcast %25 : vector<1x128xf32> to vector<128x128xf32>
    %28 = arith.addf %26, %27 : vector<128x128xf32>
    %cst_21 = arith.constant 0.000000e+00 : f32
    %29 = vector.broadcast %cst_21 : f32 to vector<128x128xf32>
    %30 = arith.cmpf ogt, %28, %29 : vector<128x128xf32>
    %cst_22 = arith.constant 2.000000e-01 : f32
    %31 = vector.broadcast %cst_22 : f32 to vector<128x128xf32>
    %32 = arith.mulf %31, %28 : vector<128x128xf32>
    %33 = arith.select %30, %28, %32 : vector<128x128xi1>, vector<128x128xf32>
    %34 = arith.addf %33, %13 : vector<128x128xf32>
    %cst_23 = arith.constant dense<0xFF800000> : vector<128xf32>
    %35 = vector.multi_reduction <maximumf>, %34, %cst_23 [1] : vector<128x128xf32> to vector<128xf32>
    %36 = vector.shape_cast %35 : vector<128xf32> to vector<128x1xf32>
    %37 = vector.broadcast %36 : vector<128x1xf32> to vector<128x128xf32>
    %38 = arith.subf %34, %37 : vector<128x128xf32>
    %39 = math.exp %38 : vector<128x128xf32>
    %cst_24 = arith.constant dense<0.000000e+00> : vector<128xf32>
    %40 = vector.multi_reduction <add>, %39, %cst_24 [1] : vector<128x128xf32> to vector<128xf32>
    %41 = vector.shape_cast %40 : vector<128xf32> to vector<128x1xf32>
    %42 = tpu.reciprocal %41 {approx = true} : vector<128x1xf32> -> vector<128x1xf32>
    %43 = arith.truncf %39 : vector<128x128xf32> to vector<128x128xbf16>
    %cst_25 = arith.constant dense<0.000000e+00> : vector<128x32xf32>
    %44 = tpu.matmul %43, %22, %cst_25 {dimension_numbers = #tpu.dot_dimension_numbers<[1], [0], [0], [1], [0, 0, 1, 1], [], []>} : vector<128x128xbf16>, vector<128x32xbf16>, vector<128x32xf32> -> vector<128x32xf32>
    %45 = vector.broadcast %42 : vector<128x1xf32> to vector<128x32xf32>
    %46 = arith.mulf %44, %45 : vector<128x32xf32>
    %cst_26 = arith.constant 0.000000e+00 : f32
    %47 = vector.broadcast %cst_26 : f32 to vector<128x32xf32>
    %48 = arith.cmpf ogt, %46, %47 : vector<128x32xf32>
    %cst_27 = arith.constant 0.000000e+00 : f32
    %49 = vector.broadcast %cst_27 : f32 to vector<128x32xf32>
    %50 = arith.minimumf %46, %49 : vector<128x32xf32>
    %51 = math.exp %50 : vector<128x32xf32>
    %cst_28 = arith.constant 1.000000e+00 : f32
    %52 = vector.broadcast %cst_28 : f32 to vector<128x32xf32>
    %53 = arith.subf %51, %52 : vector<128x32xf32>
    %54 = arith.select %48, %46, %53 : vector<128x32xi1>, vector<128x32xf32>
    %55 = vector.extract_strided_slice %21 {offsets = [0, 32], sizes = [128, 32], strides = [1, 1]} : vector<128x128xbf16> to vector<128x32xbf16>
    %56 = vector.extract_strided_slice %18 {offsets = [0, 1], sizes = [128, 1], strides = [1, 1]} : vector<128x4xf32> to vector<128x1xf32>
    %57 = vector.extract_strided_slice %20 {offsets = [0, 1], sizes = [128, 1], strides = [1, 1]} : vector<128x4xf32> to vector<128x1xf32>
    %58 = tpu.transpose %57, [1, 0] : vector<128x1xf32> -> vector<1x128xf32>
    %59 = vector.broadcast %56 : vector<128x1xf32> to vector<128x128xf32>
    %60 = vector.broadcast %58 : vector<1x128xf32> to vector<128x128xf32>
    %61 = arith.addf %59, %60 : vector<128x128xf32>
    %cst_29 = arith.constant 0.000000e+00 : f32
    %62 = vector.broadcast %cst_29 : f32 to vector<128x128xf32>
    %63 = arith.cmpf ogt, %61, %62 : vector<128x128xf32>
    %cst_30 = arith.constant 2.000000e-01 : f32
    %64 = vector.broadcast %cst_30 : f32 to vector<128x128xf32>
    %65 = arith.mulf %64, %61 : vector<128x128xf32>
    %66 = arith.select %63, %61, %65 : vector<128x128xi1>, vector<128x128xf32>
    %67 = arith.addf %66, %13 : vector<128x128xf32>
    %cst_31 = arith.constant dense<0xFF800000> : vector<128xf32>
    %68 = vector.multi_reduction <maximumf>, %67, %cst_31 [1] : vector<128x128xf32> to vector<128xf32>
    %69 = vector.shape_cast %68 : vector<128xf32> to vector<128x1xf32>
    %70 = vector.broadcast %69 : vector<128x1xf32> to vector<128x128xf32>
    %71 = arith.subf %67, %70 : vector<128x128xf32>
    %72 = math.exp %71 : vector<128x128xf32>
    %cst_32 = arith.constant dense<0.000000e+00> : vector<128xf32>
    %73 = vector.multi_reduction <add>, %72, %cst_32 [1] : vector<128x128xf32> to vector<128xf32>
    %74 = vector.shape_cast %73 : vector<128xf32> to vector<128x1xf32>
    %75 = tpu.reciprocal %74 {approx = true} : vector<128x1xf32> -> vector<128x1xf32>
    %76 = arith.truncf %72 : vector<128x128xf32> to vector<128x128xbf16>
    %cst_33 = arith.constant dense<0.000000e+00> : vector<128x32xf32>
    %77 = tpu.matmul %76, %55, %cst_33 {dimension_numbers = #tpu.dot_dimension_numbers<[1], [0], [0], [1], [0, 0, 1, 1], [], []>} : vector<128x128xbf16>, vector<128x32xbf16>, vector<128x32xf32> -> vector<128x32xf32>
    %78 = vector.broadcast %75 : vector<128x1xf32> to vector<128x32xf32>
    %79 = arith.mulf %77, %78 : vector<128x32xf32>
    %cst_34 = arith.constant 0.000000e+00 : f32
    %80 = vector.broadcast %cst_34 : f32 to vector<128x32xf32>
    %81 = arith.cmpf ogt, %79, %80 : vector<128x32xf32>
    %cst_35 = arith.constant 0.000000e+00 : f32
    %82 = vector.broadcast %cst_35 : f32 to vector<128x32xf32>
    %83 = arith.minimumf %79, %82 : vector<128x32xf32>
    %84 = math.exp %83 : vector<128x32xf32>
    %cst_36 = arith.constant 1.000000e+00 : f32
    %85 = vector.broadcast %cst_36 : f32 to vector<128x32xf32>
    %86 = arith.subf %84, %85 : vector<128x32xf32>
    %87 = arith.select %81, %79, %86 : vector<128x32xi1>, vector<128x32xf32>
    %88 = vector.extract_strided_slice %21 {offsets = [0, 64], sizes = [128, 32], strides = [1, 1]} : vector<128x128xbf16> to vector<128x32xbf16>
    %89 = vector.extract_strided_slice %18 {offsets = [0, 2], sizes = [128, 1], strides = [1, 1]} : vector<128x4xf32> to vector<128x1xf32>
    %90 = vector.extract_strided_slice %20 {offsets = [0, 2], sizes = [128, 1], strides = [1, 1]} : vector<128x4xf32> to vector<128x1xf32>
    %91 = tpu.transpose %90, [1, 0] : vector<128x1xf32> -> vector<1x128xf32>
    %92 = vector.broadcast %89 : vector<128x1xf32> to vector<128x128xf32>
    %93 = vector.broadcast %91 : vector<1x128xf32> to vector<128x128xf32>
    %94 = arith.addf %92, %93 : vector<128x128xf32>
    %cst_37 = arith.constant 0.000000e+00 : f32
    %95 = vector.broadcast %cst_37 : f32 to vector<128x128xf32>
    %96 = arith.cmpf ogt, %94, %95 : vector<128x128xf32>
    %cst_38 = arith.constant 2.000000e-01 : f32
    %97 = vector.broadcast %cst_38 : f32 to vector<128x128xf32>
    %98 = arith.mulf %97, %94 : vector<128x128xf32>
    %99 = arith.select %96, %94, %98 : vector<128x128xi1>, vector<128x128xf32>
    %100 = arith.addf %99, %13 : vector<128x128xf32>
    %cst_39 = arith.constant dense<0xFF800000> : vector<128xf32>
    %101 = vector.multi_reduction <maximumf>, %100, %cst_39 [1] : vector<128x128xf32> to vector<128xf32>
    %102 = vector.shape_cast %101 : vector<128xf32> to vector<128x1xf32>
    %103 = vector.broadcast %102 : vector<128x1xf32> to vector<128x128xf32>
    %104 = arith.subf %100, %103 : vector<128x128xf32>
    %105 = math.exp %104 : vector<128x128xf32>
    %cst_40 = arith.constant dense<0.000000e+00> : vector<128xf32>
    %106 = vector.multi_reduction <add>, %105, %cst_40 [1] : vector<128x128xf32> to vector<128xf32>
    %107 = vector.shape_cast %106 : vector<128xf32> to vector<128x1xf32>
    %108 = tpu.reciprocal %107 {approx = true} : vector<128x1xf32> -> vector<128x1xf32>
    %109 = arith.truncf %105 : vector<128x128xf32> to vector<128x128xbf16>
    %cst_41 = arith.constant dense<0.000000e+00> : vector<128x32xf32>
    %110 = tpu.matmul %109, %88, %cst_41 {dimension_numbers = #tpu.dot_dimension_numbers<[1], [0], [0], [1], [0, 0, 1, 1], [], []>} : vector<128x128xbf16>, vector<128x32xbf16>, vector<128x32xf32> -> vector<128x32xf32>
    %111 = vector.broadcast %108 : vector<128x1xf32> to vector<128x32xf32>
    %112 = arith.mulf %110, %111 : vector<128x32xf32>
    %cst_42 = arith.constant 0.000000e+00 : f32
    %113 = vector.broadcast %cst_42 : f32 to vector<128x32xf32>
    %114 = arith.cmpf ogt, %112, %113 : vector<128x32xf32>
    %cst_43 = arith.constant 0.000000e+00 : f32
    %115 = vector.broadcast %cst_43 : f32 to vector<128x32xf32>
    %116 = arith.minimumf %112, %115 : vector<128x32xf32>
    %117 = math.exp %116 : vector<128x32xf32>
    %cst_44 = arith.constant 1.000000e+00 : f32
    %118 = vector.broadcast %cst_44 : f32 to vector<128x32xf32>
    %119 = arith.subf %117, %118 : vector<128x32xf32>
    %120 = arith.select %114, %112, %119 : vector<128x32xi1>, vector<128x32xf32>
    %121 = vector.extract_strided_slice %21 {offsets = [0, 96], sizes = [128, 32], strides = [1, 1]} : vector<128x128xbf16> to vector<128x32xbf16>
    %122 = vector.extract_strided_slice %18 {offsets = [0, 3], sizes = [128, 1], strides = [1, 1]} : vector<128x4xf32> to vector<128x1xf32>
    %123 = vector.extract_strided_slice %20 {offsets = [0, 3], sizes = [128, 1], strides = [1, 1]} : vector<128x4xf32> to vector<128x1xf32>
    %124 = tpu.transpose %123, [1, 0] : vector<128x1xf32> -> vector<1x128xf32>
    %125 = vector.broadcast %122 : vector<128x1xf32> to vector<128x128xf32>
    %126 = vector.broadcast %124 : vector<1x128xf32> to vector<128x128xf32>
    %127 = arith.addf %125, %126 : vector<128x128xf32>
    %cst_45 = arith.constant 0.000000e+00 : f32
    %128 = vector.broadcast %cst_45 : f32 to vector<128x128xf32>
    %129 = arith.cmpf ogt, %127, %128 : vector<128x128xf32>
    %cst_46 = arith.constant 2.000000e-01 : f32
    %130 = vector.broadcast %cst_46 : f32 to vector<128x128xf32>
    %131 = arith.mulf %130, %127 : vector<128x128xf32>
    %132 = arith.select %129, %127, %131 : vector<128x128xi1>, vector<128x128xf32>
    %133 = arith.addf %132, %13 : vector<128x128xf32>
    %cst_47 = arith.constant dense<0xFF800000> : vector<128xf32>
    %134 = vector.multi_reduction <maximumf>, %133, %cst_47 [1] : vector<128x128xf32> to vector<128xf32>
    %135 = vector.shape_cast %134 : vector<128xf32> to vector<128x1xf32>
    %136 = vector.broadcast %135 : vector<128x1xf32> to vector<128x128xf32>
    %137 = arith.subf %133, %136 : vector<128x128xf32>
    %138 = math.exp %137 : vector<128x128xf32>
    %cst_48 = arith.constant dense<0.000000e+00> : vector<128xf32>
    %139 = vector.multi_reduction <add>, %138, %cst_48 [1] : vector<128x128xf32> to vector<128xf32>
    %140 = vector.shape_cast %139 : vector<128xf32> to vector<128x1xf32>
    %141 = tpu.reciprocal %140 {approx = true} : vector<128x1xf32> -> vector<128x1xf32>
    %142 = arith.truncf %138 : vector<128x128xf32> to vector<128x128xbf16>
    %cst_49 = arith.constant dense<0.000000e+00> : vector<128x32xf32>
    %143 = tpu.matmul %142, %121, %cst_49 {dimension_numbers = #tpu.dot_dimension_numbers<[1], [0], [0], [1], [0, 0, 1, 1], [], []>} : vector<128x128xbf16>, vector<128x32xbf16>, vector<128x32xf32> -> vector<128x32xf32>
    %144 = vector.broadcast %141 : vector<128x1xf32> to vector<128x32xf32>
    %145 = arith.mulf %143, %144 : vector<128x32xf32>
    %cst_50 = arith.constant 0.000000e+00 : f32
    %146 = vector.broadcast %cst_50 : f32 to vector<128x32xf32>
    %147 = arith.cmpf ogt, %145, %146 : vector<128x32xf32>
    %cst_51 = arith.constant 0.000000e+00 : f32
    %148 = vector.broadcast %cst_51 : f32 to vector<128x32xf32>
    %149 = arith.minimumf %145, %148 : vector<128x32xf32>
    %150 = math.exp %149 : vector<128x32xf32>
    %cst_52 = arith.constant 1.000000e+00 : f32
    %151 = vector.broadcast %cst_52 : f32 to vector<128x32xf32>
    %152 = arith.subf %150, %151 : vector<128x32xf32>
    %153 = arith.select %147, %145, %152 : vector<128x32xi1>, vector<128x32xf32>
    %154 = tpu.concatenate %54, %87, %120, %153 in 1 : vector<128x32xf32>, vector<128x32xf32>, vector<128x32xf32>, vector<128x32xf32> -> vector<128x128xf32>
    %155 = arith.truncf %154 : vector<128x128xf32> to vector<128x128xbf16>
    %c0_53 = arith.constant 0 : index
    %c0_54 = arith.constant 0 : index
    %156 = vector.load %arg6[%c0_53, %c0_54] : memref<128x64xbf16, #tpu.memory_space<vmem>>, vector<128x64xbf16>
    %cst_55 = arith.constant dense<0.000000e+00> : vector<128x64xf32>
    %157 = tpu.matmul %155, %156, %cst_55 {dimension_numbers = #tpu.dot_dimension_numbers<[1], [0], [0], [1], [0, 0, 1, 1], [], []>} : vector<128x128xbf16>, vector<128x64xbf16>, vector<128x64xf32> -> vector<128x64xf32>
    %c0_56 = arith.constant 0 : index
    %c0_57 = arith.constant 0 : index
    %158 = vector.load %arg7[%c0_56, %c0_57] : memref<64x1xf32, #tpu.memory_space<vmem>>, vector<64x1xf32>
    %cst_58 = arith.constant dense<0.000000e+00> : vector<128x1xf32>
    %159 = tpu.matmul %157, %158, %cst_58 {dimension_numbers = #tpu.dot_dimension_numbers<[1], [0], [0], [1], [0, 0, 1, 1], [], []>} : vector<128x64xf32>, vector<64x1xf32>, vector<128x1xf32> -> vector<128x1xf32>
    %c0_59 = arith.constant 0 : index
    %c0_60 = arith.constant 0 : index
    %160 = vector.load %arg8[%c0_59, %c0_60] : memref<64x1xf32, #tpu.memory_space<vmem>>, vector<64x1xf32>
    %cst_61 = arith.constant dense<0.000000e+00> : vector<128x1xf32>
    %161 = tpu.matmul %157, %160, %cst_61 {dimension_numbers = #tpu.dot_dimension_numbers<[1], [0], [0], [1], [0, 0, 1, 1], [], []>} : vector<128x64xf32>, vector<64x1xf32>, vector<128x1xf32> -> vector<128x1xf32>
    %162 = arith.truncf %157 : vector<128x64xf32> to vector<128x64xbf16>
    %163 = tpu.transpose %161, [1, 0] : vector<128x1xf32> -> vector<1x128xf32>
    %164 = vector.broadcast %159 : vector<128x1xf32> to vector<128x128xf32>
    %165 = vector.broadcast %163 : vector<1x128xf32> to vector<128x128xf32>
    %166 = arith.addf %164, %165 : vector<128x128xf32>
    %cst_62 = arith.constant 0.000000e+00 : f32
    %167 = vector.broadcast %cst_62 : f32 to vector<128x128xf32>
    %168 = arith.cmpf ogt, %166, %167 : vector<128x128xf32>
    %cst_63 = arith.constant 2.000000e-01 : f32
    %169 = vector.broadcast %cst_63 : f32 to vector<128x128xf32>
    %170 = arith.mulf %169, %166 : vector<128x128xf32>
    %171 = arith.select %168, %166, %170 : vector<128x128xi1>, vector<128x128xf32>
    %172 = arith.addf %171, %13 : vector<128x128xf32>
    %cst_64 = arith.constant dense<0xFF800000> : vector<128xf32>
    %173 = vector.multi_reduction <maximumf>, %172, %cst_64 [1] : vector<128x128xf32> to vector<128xf32>
    %174 = vector.shape_cast %173 : vector<128xf32> to vector<128x1xf32>
    %175 = vector.broadcast %174 : vector<128x1xf32> to vector<128x128xf32>
    %176 = arith.subf %172, %175 : vector<128x128xf32>
    %177 = math.exp %176 : vector<128x128xf32>
    %cst_65 = arith.constant dense<0.000000e+00> : vector<128xf32>
    %178 = vector.multi_reduction <add>, %177, %cst_65 [1] : vector<128x128xf32> to vector<128xf32>
    %179 = vector.shape_cast %178 : vector<128xf32> to vector<128x1xf32>
    %180 = tpu.reciprocal %179 {approx = true} : vector<128x1xf32> -> vector<128x1xf32>
    %181 = arith.truncf %177 : vector<128x128xf32> to vector<128x128xbf16>
    %cst_66 = arith.constant dense<0.000000e+00> : vector<128x64xf32>
    %182 = tpu.matmul %181, %162, %cst_66 {dimension_numbers = #tpu.dot_dimension_numbers<[1], [0], [0], [1], [0, 0, 1, 1], [], []>} : vector<128x128xbf16>, vector<128x64xbf16>, vector<128x64xf32> -> vector<128x64xf32>
    %183 = vector.broadcast %180 : vector<128x1xf32> to vector<128x64xf32>
    %184 = arith.mulf %182, %183 : vector<128x64xf32>
    %cst_67 = arith.constant 0.000000e+00 : f32
    %185 = vector.broadcast %cst_67 : f32 to vector<128x64xf32>
    %186 = arith.cmpf ogt, %184, %185 : vector<128x64xf32>
    %cst_68 = arith.constant 0.000000e+00 : f32
    %187 = vector.broadcast %cst_68 : f32 to vector<128x64xf32>
    %188 = arith.minimumf %184, %187 : vector<128x64xf32>
    %189 = math.exp %188 : vector<128x64xf32>
    %cst_69 = arith.constant 1.000000e+00 : f32
    %190 = vector.broadcast %cst_69 : f32 to vector<128x64xf32>
    %191 = arith.subf %189, %190 : vector<128x64xf32>
    %192 = arith.select %186, %184, %191 : vector<128x64xi1>, vector<128x64xf32>
    %c0_70 = arith.constant 0 : index
    %c0_71 = arith.constant 0 : index
    %193 = vector.load %arg9[%c0_70, %c0_71] : memref<128x64xf32, #tpu.memory_space<vmem>>, vector<128x64xf32>
    tpu.vector_store %arg9[%c0_70, %c0_71], %192 {strides = array<i32>} : memref<128x64xf32, #tpu.memory_space<vmem>>, vector<128x64xf32>,
    return
  }
}

module attributes {stable_mosaic.version = 11 : i64} {
  func.func @final_kernel(%arg0: i32, %arg1: memref<128x128xbf16, #tpu.memory_space<vmem>>, %arg2: memref<128x64xbf16, #tpu.memory_space<vmem>>, %arg3: memref<1x64xf32, #tpu.memory_space<vmem>>, %arg4: memref<1x64xf32, #tpu.memory_space<vmem>>, %arg5: memref<64x5xbf16, #tpu.memory_space<vmem>>, %arg6: memref<1x5xf32, #tpu.memory_space<vmem>>, %arg7: memref<128x5xf32, #tpu.memory_space<vmem>>) attributes {dimension_semantics = [#tpu.dimension_semantics<parallel>], iteration_bounds = array<i64: 2>, scalar_prefetch = 0 : i64, scratch_operands = 0 : i64, tpu.core_type = #tpu.core_type<tc>, window_params = [{transform_indices = @transform_0, window_bounds = array<i64: 128, 128>}, {pipeline_mode = #tpu.pipeline_mode<synchronous>, transform_indices = @transform_1, window_bounds = array<i64: 128, 64>}, {pipeline_mode = #tpu.pipeline_mode<synchronous>, transform_indices = @transform_2, window_bounds = array<i64: 1, 64>}, {pipeline_mode = #tpu.pipeline_mode<synchronous>, transform_indices = @transform_3, window_bounds = array<i64: 1, 64>}, {pipeline_mode = #tpu.pipeline_mode<synchronous>, transform_indices = @transform_4, window_bounds = array<i64: 64, 5>}, {pipeline_mode = #tpu.pipeline_mode<synchronous>, transform_indices = @transform_5, window_bounds = array<i64: 1, 5>}, {transform_indices = @transform_6, window_bounds = array<i64: 128, 5>}]} {
    %c0 = arith.constant 0 : index
    %c0_0 = arith.constant 0 : index
    %0 = vector.load %arg1[%c0, %c0_0] : memref<128x128xbf16, #tpu.memory_space<vmem>>, vector<128x128xbf16>
    %c0_1 = arith.constant 0 : index
    %c0_2 = arith.constant 0 : index
    %1 = vector.load %arg2[%c0_1, %c0_2] : memref<128x64xbf16, #tpu.memory_space<vmem>>, vector<128x64xbf16>
    %cst = arith.constant dense<0.000000e+00> : vector<128x64xf32>
    %2 = tpu.matmul %0, %1, %cst {dimension_numbers = #tpu.dot_dimension_numbers<[1], [0], [0], [1], [0, 0, 1, 1], [], []>} : vector<128x128xbf16>, vector<128x64xbf16>, vector<128x64xf32> -> vector<128x64xf32>
    %c0_3 = arith.constant 0 : index
    %c0_4 = arith.constant 0 : index
    %3 = vector.load %arg3[%c0_3, %c0_4] : memref<1x64xf32, #tpu.memory_space<vmem>>, vector<1x64xf32>
    %4 = vector.broadcast %3 : vector<1x64xf32> to vector<128x64xf32>
    %5 = arith.mulf %2, %4 : vector<128x64xf32>
    %c0_5 = arith.constant 0 : index
    %c0_6 = arith.constant 0 : index
    %6 = vector.load %arg4[%c0_5, %c0_6] : memref<1x64xf32, #tpu.memory_space<vmem>>, vector<1x64xf32>
    %7 = vector.broadcast %6 : vector<1x64xf32> to vector<128x64xf32>
    %8 = arith.addf %5, %7 : vector<128x64xf32>
    %cst_7 = arith.constant 0.000000e+00 : f32
    %9 = vector.broadcast %cst_7 : f32 to vector<128x64xf32>
    %10 = arith.cmpf ogt, %8, %9 : vector<128x64xf32>
    %cst_8 = arith.constant 0.00999999977 : f32
    %11 = vector.broadcast %cst_8 : f32 to vector<128x64xf32>
    %12 = arith.mulf %11, %8 : vector<128x64xf32>
    %13 = arith.select %10, %8, %12 : vector<128x64xi1>, vector<128x64xf32>
    %14 = arith.truncf %13 : vector<128x64xf32> to vector<128x64xbf16>
    %c0_9 = arith.constant 0 : index
    %c0_10 = arith.constant 0 : index
    %15 = vector.load %arg5[%c0_9, %c0_10] : memref<64x5xbf16, #tpu.memory_space<vmem>>, vector<64x5xbf16>
    %cst_11 = arith.constant dense<0.000000e+00> : vector<128x5xf32>
    %16 = tpu.matmul %14, %15, %cst_11 {dimension_numbers = #tpu.dot_dimension_numbers<[1], [0], [0], [1], [0, 0, 1, 1], [], []>} : vector<128x64xbf16>, vector<64x5xbf16>, vector<128x5xf32> -> vector<128x5xf32>
    %c0_12 = arith.constant 0 : index
    %c0_13 = arith.constant 0 : index
    %17 = vector.load %arg6[%c0_12, %c0_13] : memref<1x5xf32, #tpu.memory_space<vmem>>, vector<1x5xf32>
    %18 = vector.broadcast %17 : vector<1x5xf32> to vector<128x5xf32>
    %19 = arith.addf %16, %18 : vector<128x5xf32>
    %cst_14 = arith.constant dense<0xFF800000> : vector<128xf32>
    %20 = vector.multi_reduction <maximumf>, %19, %cst_14 [1] : vector<128x5xf32> to vector<128xf32>
    %21 = vector.shape_cast %20 : vector<128xf32> to vector<128x1xf32>
    %22 = vector.broadcast %21 : vector<128x1xf32> to vector<128x5xf32>
    %23 = arith.subf %19, %22 : vector<128x5xf32>
    %24 = math.exp %23 : vector<128x5xf32>
    %cst_15 = arith.constant dense<0.000000e+00> : vector<128xf32>
    %25 = vector.multi_reduction <add>, %24, %cst_15 [1] : vector<128x5xf32> to vector<128xf32>
    %26 = vector.shape_cast %25 : vector<128xf32> to vector<128x1xf32>
    %27 = tpu.reciprocal %26 {approx = true} : vector<128x1xf32> -> vector<128x1xf32>
    %28 = vector.broadcast %27 : vector<128x1xf32> to vector<128x5xf32>
    %29 = arith.mulf %24, %28 : vector<128x5xf32>
    %c0_16 = arith.constant 0 : index
    %c0_17 = arith.constant 0 : index
    %30 = vector.load %arg7[%c0_16, %c0_17] : memref<128x5xf32, #tpu.memory_space<vmem>>, vector<128x5xf32>
    tpu.vector_store %arg7[%c0_16, %c0_17], %29 {strides = array<i32>} : memref<128x5xf32, #tpu.memory_space<vmem>>, vector<128x5xf32>,
    return
  }
  func.func @transform_0(%arg0: i32) -> (i32, i32) {
    %c0_i32 = arith.constant 0 : i32
    %c0_i32_0 = arith.constant 0 : i32
    return %arg0, %c0_i32 : i32, i32
  }
  func.func @transform_1(%arg0: i32) -> (i32, i32) {
    %c0_i32 = arith.constant 0 : i32
    %c0_i32_0 = arith.constant 0 : i32
    %c0_i32_1 = arith.constant 0 : i32
    return %c0_i32, %c0_i32_0 : i32, i32
  }
  func.func @transform_2(%arg0: i32) -> (i32, i32) {
    %c0_i32 = arith.constant 0 : i32
    %c0_i32_0 = arith.constant 0 : i32
    %c0_i32_1 = arith.constant 0 : i32
    return %c0_i32, %c0_i32_0 : i32, i32
  }
  func.func @transform_3(%arg0: i32) -> (i32, i32) {
    %c0_i32 = arith.constant 0 : i32
    %c0_i32_0 = arith.constant 0 : i32
    %c0_i32_1 = arith.constant 0 : i32
    return %c0_i32, %c0_i32_0 : i32, i32
  }
  func.func @transform_4(%arg0: i32) -> (i32, i32) {
    %c0_i32 = arith.constant 0 : i32
    %c0_i32_0 = arith.constant 0 : i32
    %c0_i32_1 = arith.constant 0 : i32
    return %c0_i32, %c0_i32_0 : i32, i32
  }
  func.func @transform_5(%arg0: i32) -> (i32, i32) {
    %c0_i32 = arith.constant 0 : i32
    %c0_i32_0 = arith.constant 0 : i32
    %c0_i32_1 = arith.constant 0 : i32
    return %c0_i32, %c0_i32_0 : i32, i32
  }
  func.func @transform_6(%arg0: i32) -> (i32, i32) {
    %c0_i32 = arith.constant 0 : i32
    %c0_i32_0 = arith.constant 0 : i32
    return %arg0, %c0_i32 : i32, i32
  }
}

</mosaic_0001>

<bundles_post_ra>
// kernel: wfcg_forward.3
= control target key start
LH: loop header
LB: loop body
LE: loop exit
PB: predicated region body
PF: predicated region fallthrough
CT: control target
= control target key end

     0   :  { %s1645_s17 = smov 0   ;;  %s1647_s18 = smov 0   ;;  %s2042_s0 = inlined_call_operand.vmem [shape: f32[256,4], index: 0, kind: input, shape index: {}]   ;;  %s2043_s1 = inlined_call_operand.vmem [shape: bf16[128,256], index: 1, kind: input, shape index: {}]   ;;  %s2044_s2 = inlined_call_operand.vmem [shape: f32[1,4], index: 2, kind: input, shape index: {}]   ;;  %s2045_s3 = inlined_call_operand.vmem [shape: f32[1,4], index: 3, kind: input, shape index: {}]   ;;  %s2046_s4 = inlined_call_operand.vmem [shape: bf16[4,128], index: 4, kind: input, shape index: {}]   ;;  %s2047_s5 = inlined_call_operand.vmem [shape: f32[1,128], index: 5, kind: input, shape index: {}]   ;;  %s2048_s6 = inlined_call_operand.vmem [shape: f32[1,128], index: 6, kind: input, shape index: {}]   ;;  %s2049_s7 = inlined_call_operand.vmem [shape: f32[1,128], index: 7, kind: input, shape index: {}]   ;;  %s2050_s8 = inlined_call_operand.vmem [shape: bf16[128,128], index: 8, kind: input, shape index: {}]   ;;  %s2051_s9 = inlined_call_operand.vmem [shape: f32[1,128], index: 9, kind: input, shape index: {}]   ;;  %s2052_s10 = inlined_call_operand.vmem [shape: f32[2,128,128], index: 10, kind: output, shape index: {0}]   ;;  %s2053_s11 = inlined_call_operand.vmem [shape: f32[2,128,1], index: 11, kind: output, shape index: {1}]  }
   0x1   :  { %s1649_s19 = smov 0   ;;  %s1651_s20 = smov 0  }
   0x2   :  { %s1653_s21 = smov 0  }
   0x3 LB: > { %s34_s22 = sadd.s32 1, %s1578_s20  ;;  %p78_p1 = scmp.ne.s32.totalorder %s1570_s18, %s1566_s17  ;;  %s1582_s21 = sphi %s1653_s21, %s22_s21   ;;  %s1578_s20 = sphi %s1651_s20, %s2057_s20   ;;  %s1574_s19 = sphi %s1649_s19, %s2056_s19   ;;  %s1570_s18 = sphi %s1647_s18, %s2055_s18   ;;  %s1566_s17 = sphi %s1645_s17, %s2054_s17  }
   0x4   : > { %p36_p0 = scmp.ge.s32.totalorder %s34_s22, 2  ;;  %p79_p2 = scmp.eq.s32.totalorder %s1582_s21, 0 }
   0x5   : > { %s71_s24 = sadd.s32 1, %s1570_s18  ;;  %p1378_p5 = scmp.ge.s32.totalorder %s1582_s21, 2 }
   0x6   : > { %s2059_s22 = smov (%p36_p0, %s34_s22), 0  ;;  %p80_p3 = por %p79_p2, %p78_p1 }
   0x7   : > { %s68_s23 = ssub.s32 %s1578_s20, %s2059_s22  ;;  %348 = sbr.rel (%p1378_p5) target bundleno = 32 (0x20), region = 48 }
   0x8   : > { %p69_p4 = scmp.eq.s32.totalorder %s68_s23, 0 }
   0xa   : > { %s1680_s25 = scalar_select %p69_p4, %s1570_s18, %s71_s24  }
   0xc   : > { %362 = sbr.rel (!%p80_p3) target bundleno = 32 (0x20), region = 56  ;;  %s364_s26 = sand.u32 (%p80_p3), 1, %s1570_s18  }
   0xd   : > { %s1380_s27 = sshll.u32 (%p80_p3), %s1578_s20, 2  ;;  %s1379_s28 = sshll.u32 (%p80_p3), %s364_s26, 6 }
   0xe   : > { %s1688_s12 = scalar_lea.vmem (%p80_p3), %s2043_s1, %s1380_s27  ;;  %s366_s13 = scalar_lea.vmem (%p80_p3), [#allocation2], %s1379_s28 }
   0xf   : > { %v386_v0 = vld [vmem:[%s1688_s12] sm:$0xf] (%p80_p3)  ;;  %v388_v1 = vld [vmem:[%s1688_s12 + $0x8] sm:$0xf] (%p80_p3)  ;;  %v390_v2 = vld [vmem:[%s1688_s12 + $0x10] sm:$0xf] (%p80_p3) }
  0x10   : > { %387 = vst [vmem:[%s366_s13] sm:$0xf] (%p80_p3), %v386_v0  ;;  %v392_v3 = vld [vmem:[%s1688_s12 + $0x18] sm:$0xf] (%p80_p3)  ;;  %v394_v4 = vld [vmem:[%s1688_s12 + $0x20] sm:$0xf] (%p80_p3) }
  0x11   : > { %389 = vst [vmem:[%s366_s13 + $0x4] sm:$0xf] %v388_v1  ;;  %v396_v5 = vld [vmem:[%s1688_s12 + $0x28] sm:$0xf]  ;;  %v398_v6 = vld [vmem:[%s1688_s12 + $0x30] sm:$0xf] }
  0x12   : > { %391 = vst [vmem:[%s366_s13 + $0x8] sm:$0xf] %v390_v2  ;;  %v400_v7 = vld [vmem:[%s1688_s12 + $0x38] sm:$0xf]  ;;  %v402_v8 = vld [vmem:[%s1688_s12 + $0x40] sm:$0xf] }
  0x13   : > { %393 = vst [vmem:[%s366_s13 + $0xc] sm:$0xf] %v392_v3  ;;  %v404_v9 = vld [vmem:[%s1688_s12 + $0x48] sm:$0xf]  ;;  %v406_v10 = vld [vmem:[%s1688_s12 + $0x50] sm:$0xf] }
  0x14   : > { %395 = vst [vmem:[%s366_s13 + $0x10] sm:$0xf] %v394_v4  ;;  %v408_v11 = vld [vmem:[%s1688_s12 + $0x58] sm:$0xf]  ;;  %v410_v12 = vld [vmem:[%s1688_s12 + $0x60] sm:$0xf] }
  0x15   : > { %397 = vst [vmem:[%s366_s13 + $0x14] sm:$0xf] %v396_v5  ;;  %v412_v13 = vld [vmem:[%s1688_s12 + $0x68] sm:$0xf]  ;;  %v414_v14 = vld [vmem:[%s1688_s12 + $0x70] sm:$0xf] }
  0x16   : > { %399 = vst [vmem:[%s366_s13 + $0x18] sm:$0xf] %v398_v6  ;;  %v416_v15 = vld [vmem:[%s1688_s12 + $0x78] sm:$0xf] }
  0x17   : > { %401 = vst [vmem:[%s366_s13 + $0x1c] sm:$0xf] %v400_v7 }
  0x18   : > { %403 = vst [vmem:[%s366_s13 + $0x20] sm:$0xf] %v402_v8 }
  0x19   : > { %405 = vst [vmem:[%s366_s13 + $0x24] sm:$0xf] %v404_v9 }
  0x1a   : > { %407 = vst [vmem:[%s366_s13 + $0x28] sm:$0xf] %v406_v10 }
  0x1b   : > { %409 = vst [vmem:[%s366_s13 + $0x2c] sm:$0xf] %v408_v11 }
  0x1c   : > { %411 = vst [vmem:[%s366_s13 + $0x30] sm:$0xf] %v410_v12 }
  0x1d   : > { %413 = vst [vmem:[%s366_s13 + $0x34] sm:$0xf] %v412_v13 }
  0x1e   : > { %415 = vst [vmem:[%s366_s13 + $0x38] sm:$0xf] %v414_v14 }
  0x1f   : > { %417 = vst [vmem:[%s366_s13 + $0x3c] sm:$0xf] %v416_v15 }
  0x20 PF: > { %p1381_p6 = scmp.ge.s32.totalorder %s1582_s21, 1  ;;  %p472_p7 = scmp.lt.s32.totalorder %s1582_s21, 3 }
  0x22   : > { %p473_p8 = pnand %p1381_p6, %p472_p7 }
  0x23   : > { %s1383_s16 = sshll.u32 (!%p473_p8), %s1574_s19, 4  ;;  %s479_s14 = sand.u32 (!%p473_p8), 1, %s1566_s17  }
  0x24   : > { %476 = sbr.rel (%p473_p8) target bundleno = 707 (0x2c3), region = 97  ;;  %p531_p9 = scmp.lt.s32.totalorder (!%p473_p8), %s1383_s16, 31 }
  0x25   : > { %s1382_s15 = sshll.u32 (!%p473_p8), %s479_s14, 6  ;;  %p538_p10 = scmp.lt.s32.totalorder (!%p473_p8), %s1574_s19, 1 }
  0x29   : > { %v650_v16 = vld [vmem:[%s2046_s4] sm:$0x3]  ;;  %vm680_vm0 = vcmask 1041408   ;;  %s2061_s16 = smov (!%p531_p9, %s1383_s16), 31  ;;  %vm655_vm1 = vcmask 31744   ;;  %v1472_v62 = vld [vmem:[%s2050_s8 + $0x38] sm:$0xff] }
  0x2a   : > { %v682_v17 = vsel %vm680_vm0, %v650_v16, 0  ;;  %v1715_v18 = vld [vmem:[%s2044_s2] ss:$0 sm:$0xff]  ;;  %s1384_s26 = sshll.u32 %s2061_s16, 3  ;;  %897 = vmatpush.bf16.msra.mxu1 %v1472_v62  ;;  %v1471_v1 = vld [vmem:[%s2050_s8 + $0x30] sm:$0xff]  ;;  %1481 = vmatpush.bf16.msra.mxu3 %v1472_v62  ;;  %v1470_v4 = vld [vmem:[%s2050_s8 + $0x28] sm:$0xff] }
  0x2b   : > { %691 = vmatpush.bf16.msra.mxu0 %v682_v17  ;;  %s1720_s29 = scalar_lea.vmem %s2042_s0, %s1384_s26  ;;  %v1725_v19 = vld [vmem:[%s2045_s3] ss:$0 sm:$0xff]  ;;  %v1468_v9 = vld [vmem:[%s2050_s8 + $0x18] sm:$0xff]  ;;  %v1467_v14 = vld [vmem:[%s2050_s8 + $0x10] sm:$0xff]  ;;  %s2063_s19 = smov (!%p538_p10, %s1574_s19), 1 }
  0x2c   : > { %v586_v20 = vld [vmem:[%s1720_s29] sm:$0xff]  ;;  %v587_v21 = vld [vmem:[%s1720_s29 + $0x8] sm:$0xff]  ;;  %v588_v27 = vld [vmem:[%s1720_s29 + $0x10] sm:$0xff]  ;;  %s1463_s17 = sshll.u32 %s2063_s19, 7 }
  0x2d   : > { %v606_v22 = vmul.f32 %v1715_v18, %v586_v20  ;;  %v607_v23 = vmul.f32 %v1715_v18, %v587_v21  ;;  %v589_v28 = vld [vmem:[%s1720_s29 + $0x18] sm:$0xff]  ;;  %v608_v29 = vmul.f32 %v1715_v18, %v588_v27  ;;  %v590_v34 = vld [vmem:[%s1720_s29 + $0x20] sm:$0xff]  ;;  %v591_v35 = vld [vmem:[%s1720_s29 + $0x28] sm:$0xff]  ;;  %s1924_s24 = scalar_lea.vmem %s2052_s10, %s1463_s17  ;;  %s1930_s28 = scalar_lea.vmem %s2053_s11, %s1463_s17 }
  0x2e   : > { %v609_v30 = vmul.f32 %v1715_v18, %v589_v28  ;;  %v610_v36 = vmul.f32 %v1715_v18, %v590_v34  ;;  %v611_v37 = vmul.f32 %v1715_v18, %v591_v35  ;;  %v592_v41 = vld [vmem:[%s1720_s29 + $0x30] sm:$0xff]  ;;  %v593_v42 = vld [vmem:[%s1720_s29 + $0x38] sm:$0xff]  ;;  %v594_v48 = vld [vmem:[%s1720_s29 + $0x40] sm:$0xff]  ;;  %898 = vmatpush.bf16.msra.mxu1 %v1471_v1  ;;  %1482 = vmatpush.bf16.msra.mxu3 %v1471_v1 }
  0x2f   : > { %v626_v24 = vadd.f32 %v1725_v19, %v606_v22  ;;  %v627_v25 = vadd.f32 %v1725_v19, %v607_v23  ;;  %v628_v31 = vadd.f32 %v1725_v19, %v608_v29  ;;  %v612_v43 = vmul.f32 %v1715_v18, %v592_v41  ;;  %v595_v49 = vld [vmem:[%s1720_s29 + $0x48] sm:$0xff]  ;;  %v596_v55 = vld [vmem:[%s1720_s29 + $0x50] sm:$0xff]  ;;  %v597_v56 = vld [vmem:[%s1720_s29 + $0x58] sm:$0xff] }
  0x30   : > { %v629_v32 = vadd.f32 %v1725_v19, %v609_v30  ;;  %v630_v38 = vadd.f32 %v1725_v19, %v610_v36  ;;  %v631_v39 = vadd.f32 %v1725_v19, %v611_v37  ;;  %v613_v44 = vmul.f32 %v1715_v18, %v593_v42  ;;  %v598_v63 = vld [vmem:[%s1720_s29 + $0x60] sm:$0xff]  ;;  %v599_v0 = vld [vmem:[%s1720_s29 + $0x68] sm:$0xff]  ;;  %v600_v10 = vld [vmem:[%s1720_s29 + $0x70] sm:$0xff] }
  0x31   : > { %v642_v26 = vpack.c.bf16 %v627_v25, %v626_v24  ;;  %v632_v45 = vadd.f32 %v1725_v19, %v612_v43  ;;  %v614_v50 = vmul.f32 %v1715_v18, %v594_v48  ;;  %v615_v51 = vmul.f32 %v1715_v18, %v595_v49  ;;  %v1469_v8 = vld [vmem:[%s2050_s8 + $0x20] sm:$0xff]  ;;  %v601_v11 = vld [vmem:[%s1720_s29 + $0x78] sm:$0xff]  ;;  %v1466_v17 = vld [vmem:[%s2050_s8 + $0x8] sm:$0xff]  ;;  %s1898_s29 = scalar_lea.vmem [#allocation2], %s1382_s15 }
  0x32   : > { %v643_v33 = vpack.c.bf16 %v629_v32, %v628_v31  ;;  %v644_v40 = vpack.c.bf16 %v631_v39, %v630_v38  ;;  %v633_v46 = vadd.f32 %v1725_v19, %v613_v44  ;;  %v616_v57 = vmul.f32 %v1715_v18, %v596_v55  ;;  %899 = vmatpush.bf16.msra.mxu1 %v1470_v4  ;;  %v1810_v21 = vld [vmem:[%s2047_s5] ss:$0 sm:$0xff] }
  0x33   : > { %1389 = vmatmul.msk.bf16.vlgmr.msra.gmra.mxu0 %vm655_vm1, %v642_v26  ;;  %v634_v52 = vadd.f32 %v1725_v19, %v614_v50  ;;  %v635_v53 = vadd.f32 %v1725_v19, %v615_v51  ;;  %v617_v58 = vmul.f32 %v1715_v18, %v597_v56  ;;  %v618_v2 = vmul.f32 %v1715_v18, %v598_v63  ;;  %v1816_v25 = vld [vmem:[%s2048_s6] ss:$0 sm:$0xff] }
  0x34   : > { %v645_v47 = vpack.c.bf16 %v633_v46, %v632_v45  ;;  %v636_v59 = vadd.f32 %v1725_v19, %v616_v57  ;;  %v619_v3 = vmul.f32 %v1715_v18, %v599_v0  ;;  %1483 = vmatpush.bf16.msra.mxu3 %v1470_v4  ;;  %v620_v12 = vmul.f32 %v1715_v18, %v600_v10  ;;  %v1823_v30 = vld [vmem:[%s2049_s7] ss:$0 sm:$0xff] }
  0x35   : > { %v646_v54 = vpack.c.bf16 %v635_v53, %v634_v52  ;;  %v637_v60 = vadd.f32 %v1725_v19, %v617_v58  ;;  %v638_v5 = vadd.f32 %v1725_v19, %v618_v2  ;;  %v621_v13 = vmul.f32 %v1715_v18, %v601_v11  ;;  %v1465_v18 = vld [vmem:[%s2050_s8] sm:$0xff] }
  0x36   : > { %v639_v6 = vadd.f32 %v1725_v19, %v619_v3  ;;  %900 = vmatpush.bf16.msra.mxu1 %v1469_v8  ;;  %v640_v15 = vadd.f32 %v1725_v19, %v620_v12 }
  0x37   : > { %v647_v61 = vpack.c.bf16 %v637_v60, %v636_v59  ;;  %v641_v16 = vadd.f32 %v1725_v19, %v621_v13 }
  0x38   : > { %v648_v7 = vpack.c.bf16 %v639_v6, %v638_v5  ;;  %1484 = vmatpush.bf16.msra.mxu3 %v1469_v8 }
  0x39   : > { %v649_v20 = vpack.c.bf16 %v641_v16, %v640_v15 }
  0x3a   : > { %901 = vmatpush.bf16.msra.mxu1 %v1468_v9 }
  0x3c   : > { %1485 = vmatpush.bf16.msra.mxu3 %v1468_v9 }
  0x3e   : > { %902 = vmatpush.bf16.msra.mxu1 %v1467_v14 }
  0x40   : > { %1486 = vmatpush.bf16.msra.mxu3 %v1467_v14 }
  0x42   : > { %903 = vmatpush.bf16.msra.mxu1 %v1466_v17 }
  0x43   : > { %1390 = vmatmul.msk.bf16.gmra.mxu0 %vm655_vm1, %v643_v33 }
  0x44   : > { %1487 = vmatpush.bf16.msra.mxu3 %v1466_v17 }
  0x46   : > { %904 = vmatpush.bf16.msra.mxu1 %v1465_v18 }
  0x48   : > { %1488 = vmatpush.bf16.msra.mxu3 %v1465_v18 }
  0x53   : > { %1391 = vmatmul.msk.bf16.gmra.mxu0 %vm655_vm1, %v644_v40 }
  0x63   : > { %1392 = vmatmul.msk.bf16.gmra.mxu0 %vm655_vm1, %v645_v47 }
  0x73   : > { %1393 = vmatmul.msk.bf16.gmra.mxu0 %vm655_vm1, %v646_v54 }
  0x83   : > { %1394 = vmatmul.msk.bf16.gmra.mxu0 %vm655_vm1, %v647_v61 }
  0x93   : > { %1395 = vmatmul.msk.bf16.gmra.mxu0 %vm655_vm1, %v648_v7 }
  0xa3   : > { %1396 = vmatmul.msk.bf16.gmra.mxu0 %vm655_vm1, %v649_v20 }
  0xb0   : > { %v693_v19 = vpop.f32.mrf.mxu0 }
  0xb1   : > { %v694_v22 = vadd.f32 %v1810_v21, %v693_v19 }
  0xb3   : > { %v749_v23 = vmul.f32 0.01, %v694_v22  ;;  %vm733_vm2 = vcmp.gt.f32.partialorder %v694_v22, 0.0 }
  0xb5   : > { %v765_v26 = vsel %vm733_vm2, %v694_v22, %v749_v23 }
  0xb6   : > { %v785_v29 = vmul.f32 %v1816_v25, %v765_v26 }
  0xb8   : > { %v695_v24 = vpop.f32.mrf.mxu0  ;;  %v805_v34 = vadd.f32 %v1823_v30, %v785_v29 }
  0xb9   : > { %v696_v27 = vadd.f32 %v1810_v21, %v695_v24 }
  0xbb   : > { %vm734_vm3 = vcmp.gt.f32.partialorder %v696_v27, 0.0  ;;  %v750_v28 = vmul.f32 0.01, %v696_v27 }
  0xbd   : > { %v766_v31 = vsel %vm734_vm3, %v696_v27, %v750_v28 }
  0xbe   : > { %v786_v32 = vmul.f32 %v1816_v25, %v766_v31 }
  0xc0   : > { %v698_v33 = vpop.f32.mrf.mxu0  ;;  %v806_v35 = vadd.f32 %v1823_v30, %v786_v32 }
  0xc1   : > { %v699_v36 = vadd.f32 %v1810_v21, %v698_v33 }
  0xc2   : > { %v821_v37 = vpack.c.bf16 %v806_v35, %v805_v34 }
  0xc3   : > { %v751_v38 = vmul.f32 0.01, %v699_v36  ;;  %vm735_vm4 = vcmp.gt.f32.partialorder %v699_v36, 0.0 }
  0xc4   : > { %905 = vmatmul.bf16.vlgmr.msra.gmra.mxu1 %v821_v37 }
  0xc5   : > { %v767_v40 = vsel %vm735_vm4, %v699_v36, %v751_v38 }
  0xc6   : > { %v787_v43 = vmul.f32 %v1816_v25, %v767_v40 }
  0xc8   : > { %v700_v39 = vpop.f32.mrf.mxu0  ;;  %v807_v47 = vadd.f32 %v1823_v30, %v787_v43 }
  0xc9   : > { %v701_v41 = vadd.f32 %v1810_v21, %v700_v39 }
  0xcb   : > { %vm736_vm5 = vcmp.gt.f32.partialorder %v701_v41, 0.0  ;;  %v752_v42 = vmul.f32 0.01, %v701_v41 }
  0xcd   : > { %v768_v44 = vsel %vm736_vm5, %v701_v41, %v752_v42 }
  0xce   : > { %v788_v45 = vmul.f32 %v1816_v25, %v768_v44 }
  0xd0   : > { %v703_v46 = vpop.f32.mrf.mxu0  ;;  %v808_v48 = vadd.f32 %v1823_v30, %v788_v45 }
  0xd1   : > { %v704_v49 = vadd.f32 %v1810_v21, %v703_v46 }
  0xd2   : > { %v822_v50 = vpack.c.bf16 %v808_v48, %v807_v47 }
  0xd3   : > { %v753_v51 = vmul.f32 0.01, %v704_v49  ;;  %vm737_vm6 = vcmp.gt.f32.partialorder %v704_v49, 0.0 }
  0xd4   : > { %910 = vmatmul.bf16.gmra.mxu1 %v822_v50 }
  0xd5   : > { %v769_v53 = vsel %vm737_vm6, %v704_v49, %v753_v51 }
  0xd6   : > { %v789_v56 = vmul.f32 %v1816_v25, %v769_v53 }
  0xd8   : > { %v705_v52 = vpop.f32.mrf.mxu0  ;;  %v809_v60 = vadd.f32 %v1823_v30, %v789_v56 }
  0xd9   : > { %v706_v54 = vadd.f32 %v1810_v21, %v705_v52 }
  0xdb   : > { %vm738_vm7 = vcmp.gt.f32.partialorder %v706_v54, 0.0  ;;  %v754_v55 = vmul.f32 0.01, %v706_v54 }
  0xdd   : > { %v770_v57 = vsel %vm738_vm7, %v706_v54, %v754_v55 }
  0xde   : > { %v790_v58 = vmul.f32 %v1816_v25, %v770_v57 }
  0xe0   : > { %v708_v59 = vpop.f32.mrf.mxu0  ;;  %v810_v61 = vadd.f32 %v1823_v30, %v790_v58 }
  0xe1   : > { %v709_v62 = vadd.f32 %v1810_v21, %v708_v59 }
  0xe2   : > { %v823_v63 = vpack.c.bf16 %v810_v61, %v809_v60 }
  0xe3   : > { %v755_v0 = vmul.f32 0.01, %v709_v62  ;;  %vm739_vm8 = vcmp.gt.f32.partialorder %v709_v62, 0.0 }
  0xe4   : > { %915 = vmatmul.bf16.gmra.mxu1 %v823_v63 }
  0xe5   : > { %v771_v2 = vsel %vm739_vm8, %v709_v62, %v755_v0 }
  0xe6   : > { %v791_v5 = vmul.f32 %v1816_v25, %v771_v2 }
  0xe8   : > { %v710_v1 = vpop.f32.mrf.mxu0  ;;  %v811_v9 = vadd.f32 %v1823_v30, %v791_v5 }
  0xe9   : > { %v711_v3 = vadd.f32 %v1810_v21, %v710_v1 }
  0xeb   : > { %vm740_vm9 = vcmp.gt.f32.partialorder %v711_v3, 0.0  ;;  %v756_v4 = vmul.f32 0.01, %v711_v3 }
  0xed   : > { %v772_v6 = vsel %vm740_vm9, %v711_v3, %v756_v4  ;;  %v1873_v3 = vld [vmem:[%s2051_s9] ss:$0 sm:$0xff] }
  0xee   : > { %v792_v7 = vmul.f32 %v1816_v25, %v772_v6 }
  0xf0   : > { %v713_v8 = vpop.f32.mrf.mxu0  ;;  %v812_v10 = vadd.f32 %v1823_v30, %v792_v7 }
  0xf1   : > { %v714_v11 = vadd.f32 %v1810_v21, %v713_v8 }
  0xf2   : > { %v824_v12 = vpack.c.bf16 %v812_v10, %v811_v9 }
  0xf3   : > { %v757_v13 = vmul.f32 0.01, %v714_v11  ;;  %vm741_vm10 = vcmp.gt.f32.partialorder %v714_v11, 0.0 }
  0xf4   : > { %920 = vmatmul.bf16.gmra.mxu1 %v824_v12 }
  0xf5   : > { %v773_v15 = vsel %vm741_vm10, %v714_v11, %v757_v13 }
  0xf6   : > { %v793_v20 = vmul.f32 %v1816_v25, %v773_v15 }
  0xf8   : > { %v715_v14 = vpop.f32.mrf.mxu0  ;;  %v813_v23 = vadd.f32 %v1823_v30, %v793_v20 }
  0xf9   : > { %v716_v16 = vadd.f32 %v1810_v21, %v715_v14 }
  0xfb   : > { %vm742_vm11 = vcmp.gt.f32.partialorder %v716_v16, 0.0  ;;  %v758_v17 = vmul.f32 0.01, %v716_v16 }
  0xfd   : > { %v774_v18 = vsel %vm742_vm11, %v716_v16, %v758_v17 }
  0xfe   : > { %v794_v19 = vmul.f32 %v1816_v25, %v774_v18 }
 0x100   : > { %v718_v22 = vpop.f32.mrf.mxu0  ;;  %v814_v24 = vadd.f32 %v1823_v30, %v794_v19 }
 0x101   : > { %v719_v26 = vadd.f32 %v1810_v21, %v718_v22 }
 0x102   : > { %v825_v27 = vpack.c.bf16 %v814_v24, %v813_v23 }
 0x103   : > { %v759_v28 = vmul.f32 0.01, %v719_v26  ;;  %vm743_vm12 = vcmp.gt.f32.partialorder %v719_v26, 0.0 }
 0x104   : > { %925 = vmatmul.bf16.gmra.mxu1 %v825_v27 }
 0x105   : > { %v775_v31 = vsel %vm743_vm12, %v719_v26, %v759_v28 }
 0x106   : > { %v795_v34 = vmul.f32 %v1816_v25, %v775_v31 }
 0x108   : > { %v720_v29 = vpop.f32.mrf.mxu0  ;;  %v815_v38 = vadd.f32 %v1823_v30, %v795_v34 }
 0x109   : > { %v721_v32 = vadd.f32 %v1810_v21, %v720_v29 }
 0x10b   : > { %vm744_vm13 = vcmp.gt.f32.partialorder %v721_v32, 0.0  ;;  %v760_v33 = vmul.f32 0.01, %v721_v32 }
 0x10d   : > { %v776_v35 = vsel %vm744_vm13, %v721_v32, %v760_v33 }
 0x10e   : > { %v796_v36 = vmul.f32 %v1816_v25, %v776_v35 }
 0x110   : > { %v723_v37 = vpop.f32.mrf.mxu0  ;;  %v816_v39 = vadd.f32 %v1823_v30, %v796_v36 }
 0x111   : > { %v724_v40 = vadd.f32 %v1810_v21, %v723_v37 }
 0x112   : > { %v826_v41 = vpack.c.bf16 %v816_v39, %v815_v38 }
 0x113   : > { %v761_v42 = vmul.f32 0.01, %v724_v40  ;;  %vm745_vm14 = vcmp.gt.f32.partialorder %v724_v40, 0.0 }
 0x114   : > { %930 = vmatmul.bf16.gmra.mxu1 %v826_v41 }
 0x115   : > { %v777_v44 = vsel %vm745_vm14, %v724_v40, %v761_v42 }
 0x116   : > { %v797_v47 = vmul.f32 %v1816_v25, %v777_v44 }
 0x118   : > { %v725_v43 = vpop.f32.mrf.mxu0  ;;  %v817_v51 = vadd.f32 %v1823_v30, %v797_v47 }
 0x119   : > { %v726_v45 = vadd.f32 %v1810_v21, %v725_v43 }
 0x11b   : > { %vm746_vm15 = vcmp.gt.f32.partialorder %v726_v45, 0.0  ;;  %v762_v46 = vmul.f32 0.01, %v726_v45 }
 0x11d   : > { %v778_v48 = vsel %vm746_vm15, %v726_v45, %v762_v46 }
 0x11e   : > { %v798_v49 = vmul.f32 %v1816_v25, %v778_v48 }
 0x120   : > { %v728_v50 = vpop.f32.mrf.mxu0  ;;  %v818_v52 = vadd.f32 %v1823_v30, %v798_v49 }
 0x121   : > { %v729_v53 = vadd.f32 %v1810_v21, %v728_v50 }
 0x122   : > { %v827_v54 = vpack.c.bf16 %v818_v52, %v817_v51 }
 0x123   : > { %v763_v55 = vmul.f32 0.01, %v729_v53  ;;  %vm747_vm0 = vcmp.gt.f32.partialorder %v729_v53, 0.0 }
 0x124   : > { %935 = vmatmul.bf16.vlgmr.msra.gmra.mxu3 %v827_v54 }
 0x125   : > { %v779_v57 = vsel %vm747_vm0, %v729_v53, %v763_v55 }
 0x126   : > { %v799_v60 = vmul.f32 %v1816_v25, %v779_v57 }
 0x128   : > { %v730_v56 = vpop.f32.mrf.mxu0  ;;  %v819_v63 = vadd.f32 %v1823_v30, %v799_v60 }
 0x129   : > { %v731_v58 = vadd.f32 %v1810_v21, %v730_v56 }
 0x12b   : > { %vm748_vm1 = vcmp.gt.f32.partialorder %v731_v58, 0.0  ;;  %v764_v59 = vmul.f32 0.01, %v731_v58 }
 0x12d   : > { %v780_v61 = vsel %vm748_vm1, %v731_v58, %v764_v59 }
 0x12e   : > { %v800_v62 = vmul.f32 %v1816_v25, %v780_v61 }
 0x130   : > { %v820_v0 = vadd.f32 %v1823_v30, %v800_v62 }
 0x132   : > { %v828_v1 = vpack.c.bf16 %v820_v0, %v819_v63 }
 0x134   : > { %940 = vmatmul.bf16.gmra.mxu3 %v828_v1 }
 0x141   : > { %v906_v2 = vpop.f32.mrf.mxu1 }
 0x142   : > { %v907_v21 = vadd.f32 %v1873_v3, %v906_v2 }
 0x144   : > { %v962_v5 = vmul.f32 0.01, %v907_v21  ;;  %vm946_vm2 = vcmp.gt.f32.partialorder %v907_v21, 0.0 }
 0x146   : > { %v978_v7 = vsel %vm946_vm2, %v907_v21, %v962_v5  ;;  %vm569_vm2 = vcmask 7168  }
 0x149   : > { %v908_v4 = vpop.f32.mrf.mxu1 }
 0x14a   : > { %v909_v6 = vadd.f32 %v1873_v3, %v908_v4 }
 0x14c   : > { %v963_v25 = vmul.f32 0.01, %v909_v6  ;;  %vm947_vm3 = vcmp.gt.f32.partialorder %v909_v6, 0.0 }
 0x14e   : > { %v979_v8 = vsel %vm947_vm3, %v909_v6, %v963_v25 }
 0x14f   : > { %v1877_v30 = vpack.c.bf16 %v979_v8, %v978_v7 }
 0x151   : > { %v911_v9 = vpop.f32.mrf.mxu1 }
 0x152   : > { %v912_v10 = vadd.f32 %v1873_v3, %v911_v9 }
 0x154   : > { %v964_v12 = vmul.f32 0.01, %v912_v10  ;;  %vm948_vm4 = vcmp.gt.f32.partialorder %v912_v10, 0.0 }
 0x156   : > { %v980_v15 = vsel %vm948_vm4, %v912_v10, %v964_v12  ;;  %v1474_v10 = vld [vmem:[%s1898_s29 + $0x8] sm:$0xff]  ;;  %v1475_v12 = vld [vmem:[%s1898_s29 + $0x10] sm:$0xff] }
 0x159   : > { %v913_v11 = vpop.f32.mrf.mxu1 }
 0x15a   : > { %v914_v13 = vadd.f32 %v1873_v3, %v913_v11  ;;  %v1479_v11 = vld [vmem:[%s1898_s29 + $0x30] sm:$0xff] }
 0x15c   : > { %v965_v14 = vmul.f32 0.01, %v914_v13  ;;  %vm949_vm5 = vcmp.gt.f32.partialorder %v914_v13, 0.0 }
 0x15e   : > { %v981_v16 = vsel %vm949_vm5, %v914_v13, %v965_v14  ;;  %v994_v13 = vld [vmem:[%s1898_s29] sm:$0xff]  }
 0x15f   : > { %v1881_v17 = vpack.c.bf16 %v981_v16, %v980_v15  ;;  %v1179_v14 = vunpack.c.l.bf16 %v994_v13  ;;  %v1480_v15 = vld [vmem:[%s1898_s29 + $0x38] sm:$0xff]  ;;  %v998_v16 = vld [vmem:[%s1898_s29 + $0x10] sm:$0xff]  }
 0x161   : > { %v916_v20 = vpop.f32.mrf.mxu1  ;;  %1195 = vadd.xlane.f32.xlu0 %v1179_v14 }
 0x162   : > { %v917_v63 = vadd.f32 %v1873_v3, %v916_v20  ;;  %v1183_v20 = vunpack.c.l.bf16 %v998_v16 }
 0x164   : > { %v966_v5 = vmul.f32 0.01, %v917_v63  ;;  %vm950_vm1 = vcmp.gt.f32.partialorder %v917_v63, 0.0  ;;  %1203 = vadd.xlane.f32.xlu2 %v1183_v20 }
 0x166   : > { %v982_v8 = vsel %vm950_vm1, %v917_v63, %v966_v5 }
 0x169   : > { %v918_v18 = vpop.f32.mrf.mxu1 }
 0x16a   : > { %v919_v60 = vadd.f32 %v1873_v3, %v918_v18 }
 0x16c   : > { %v967_v21 = vmul.f32 0.01, %v919_v60  ;;  %vm951_vm0 = vcmp.gt.f32.partialorder %v919_v60, 0.0 }
 0x16e   : > { %v983_v7 = vsel %vm951_vm0, %v919_v60, %v967_v21 }
 0x16f   : > { %v1028_v9 = vpack.c.bf16 %v983_v7, %v982_v8 }
 0x171   : > { %v921_v19 = vpop.f32.mrf.mxu1 }
 0x172   : > { %v922_v56 = vadd.f32 %v1873_v3, %v921_v19  ;;  %v1184_v19 = vunpack.c.h.bf16 %v998_v16 }
 0x174   : > { %v968_v0 = vmul.f32 0.01, %v922_v56  ;;  %vm952_vm15 = vcmp.gt.f32.partialorder %v922_v56, 0.0  ;;  %1205 = vadd.xlane.f32.xlu2 %v1184_v19 }
 0x176   : > { %v984_v6 = vsel %vm952_vm15, %v922_v56, %v968_v0 }
 0x179   : > { %v923_v22 = vpop.f32.mrf.mxu1 }
 0x17a   : > { %v924_v53 = vadd.f32 %v1873_v3, %v923_v22 }
 0x17c   : > { %v969_v61 = vmul.f32 0.01, %v924_v53  ;;  %vm953_vm14 = vcmp.gt.f32.partialorder %v924_v53, 0.0 }
 0x17e   : > { %v985_v4 = vsel %vm953_vm14, %v924_v53, %v969_v61 }
 0x17f   : > { %v1029_v25 = vpack.c.bf16 %v985_v4, %v984_v6 }
 0x181   : > { %v926_v23 = vpop.f32.mrf.mxu1 }
 0x182   : > { %v927_v49 = vadd.f32 %v1873_v3, %v926_v23  ;;  %v1476_v23 = vld [vmem:[%s1898_s29 + $0x18] sm:$0xff] }
 0x184   : > { %v970_v57 = vmul.f32 0.01, %v927_v49  ;;  %vm954_vm13 = vcmp.gt.f32.partialorder %v927_v49, 0.0 }
 0x186   : > { %v986_v1 = vsel %vm954_vm13, %v927_v49, %v970_v57 }
 0x189   : > { %v928_v26 = vpop.f32.mrf.mxu1 }
 0x18a   : > { %v929_v46 = vadd.f32 %v1873_v3, %v928_v26 }
 0x18c   : > { %v971_v54 = vmul.f32 0.01, %v929_v46  ;;  %vm955_vm12 = vcmp.gt.f32.partialorder %v929_v46, 0.0 }
 0x18e   : > { %v987_v62 = vsel %vm955_vm12, %v929_v46, %v971_v54  ;;  %v1584_v46 = vmov 0.0  }
 0x18f   : > { %v1030_v2 = vpack.c.bf16 %v987_v62, %v986_v1  ;;  %570 = vst.msk [vmem:[%s1930_s28] sm:$0xff] %vm569_vm2, %v1584_v46 }
 0x190   : > { %571 = vst.msk [vmem:[%s1930_s28 + $0x8] sm:$0xff] %vm569_vm2, %v1584_v46 }
 0x191   : > { %v931_v28 = vpop.f32.mrf.mxu1  ;;  %572 = vst.msk [vmem:[%s1930_s28 + $0x10] sm:$0xff] %vm569_vm2, %v1584_v46 }
 0x192   : > { %v932_v41 = vadd.f32 %v1873_v3, %v931_v28  ;;  %573 = vst.msk [vmem:[%s1930_s28 + $0x18] sm:$0xff] %vm569_vm2, %v1584_v46 }
 0x193   : > { %574 = vst.msk [vmem:[%s1930_s28 + $0x20] sm:$0xff] %vm569_vm2, %v1584_v46 }
 0x194   : > { %v972_v50 = vmul.f32 0.01, %v932_v41  ;;  %vm956_vm11 = vcmp.gt.f32.partialorder %v932_v41, 0.0  ;;  %575 = vst.msk [vmem:[%s1930_s28 + $0x28] sm:$0xff] %vm569_vm2, %v1584_v46 }
 0x195   : > { %576 = vst.msk [vmem:[%s1930_s28 + $0x30] sm:$0xff] %vm569_vm2, %v1584_v46 }
 0x196   : > { %v988_v58 = vsel %vm956_vm11, %v932_v41, %v972_v50  ;;  %577 = vst.msk [vmem:[%s1930_s28 + $0x38] sm:$0xff] %vm569_vm2, %v1584_v46 }
 0x197   : > { %578 = vst.msk [vmem:[%s1930_s28 + $0x40] sm:$0xff] %vm569_vm2, %v1584_v46 }
 0x198   : > { %579 = vst.msk [vmem:[%s1930_s28 + $0x48] sm:$0xff] %vm569_vm2, %v1584_v46  ;;  %v1165_v56 = vld [vmem:[%s1930_s28 + $0x10] sm:$0xff] }
 0x199   : > { %v933_v33 = vpop.f32.mrf.mxu1  ;;  %580 = vst.msk [vmem:[%s1930_s28 + $0x50] sm:$0xff] %vm569_vm2, %v1584_v46 }
 0x19a   : > { %v934_v38 = vadd.f32 %v1873_v3, %v933_v33  ;;  %v1004_v33 = vld [vmem:[%s1898_s29 + $0x28] sm:$0xf]  ;;  %581 = vst.msk [vmem:[%s1930_s28 + $0x58] sm:$0xff] %vm569_vm2, %v1584_v46  ;;  %v1167_v54 = vld [vmem:[%s1930_s28 + $0x20] sm:$0xff] }
 0x19b   : > { %582 = vst.msk [vmem:[%s1930_s28 + $0x60] sm:$0xff] %vm569_vm2, %v1584_v46  ;;  %v1168_v62 = vld [vmem:[%s1930_s28 + $0x28] sm:$0xff] }
 0x19c   : > { %v973_v47 = vmul.f32 0.01, %v934_v38  ;;  %vm957_vm10 = vcmp.gt.f32.partialorder %v934_v38, 0.0  ;;  %583 = vst.msk [vmem:[%s1930_s28 + $0x68] sm:$0xff] %vm569_vm2, %v1584_v46  ;;  %v1169_v6 = vld [vmem:[%s1930_s28 + $0x30] sm:$0xff] }
 0x19d   : > { %584 = vst.msk [vmem:[%s1930_s28 + $0x70] sm:$0xff] %vm569_vm2, %v1584_v46 }
 0x19e   : > { %v989_v55 = vsel %vm957_vm10, %v934_v38, %v973_v47  ;;  %v1008_v38 = vld [vmem:[%s1898_s29 + $0x38] sm:$0xff]   ;;  %585 = vst.msk [vmem:[%s1930_s28 + $0x78] sm:$0xff] %vm569_vm2, %v1584_v46 }
 0x19f   : > { %v1031_v59 = vpack.c.bf16 %v989_v55, %v988_v58  ;;  %v1164_v58 = vld [vmem:[%s1930_s28 + $0x8] sm:$0xff] }
 0x1a0   : > { %v1173_v19 = vld [vmem:[%s1930_s28 + $0x50] sm:$0xff] }
 0x1a7   : > { %v936_v24 = vpop.f32.mrf.mxu3 }
 0x1a8   : > { %v937_v35 = vadd.f32 %v1873_v3, %v936_v24  ;;  %v1000_v24 = vld [vmem:[%s1898_s29 + $0x18] sm:$0xff]  }
 0x1a9   : > { %v1185_v26 = vunpack.c.l.bf16 %v1000_v24  ;;  %v1186_v28 = vunpack.c.h.bf16 %v1000_v24 }
 0x1aa   : > { %v974_v42 = vmul.f32 0.01, %v937_v35  ;;  %vm958_vm9 = vcmp.gt.f32.partialorder %v937_v35, 0.0 }
 0x1ac   : > { %v990_v51 = vsel %vm958_vm9, %v937_v35, %v974_v42  ;;  %v1189_v35 = vunpack.c.l.bf16 %v1004_v33  ;;  %v1194_v42 = vunpack.c.h.bf16 %v1008_v38  ;;  %v1176_v33 = vld [vmem:[%s1930_s28 + $0x68] sm:$0xff] }
 0x1af   : > { %v938_v27 = vpop.f32.mrf.mxu3 }
 0x1b0   : > { %v939_v32 = vadd.f32 %v1873_v3, %v938_v27  ;;  %v1002_v27 = vld [vmem:[%s1898_s29 + $0x20] sm:$0xff]  }
 0x1b2   : > { %v975_v39 = vmul.f32 0.01, %v939_v32  ;;  %vm959_vm8 = vcmp.gt.f32.partialorder %v939_v32, 0.0 }
 0x1b4   : > { %v991_v48 = vsel %vm959_vm8, %v939_v32, %v975_v39  ;;  %v1005_v32 = vld [vmem:[%s1898_s29 + $0x2c] sm:$0xff]   ;;  %v1007_v39 = vld [vmem:[%s1898_s29 + $0x34] sm:$0xf] }
 0x1b5   : > { %v1032_v52 = vpack.c.bf16 %v991_v48, %v990_v51  ;;  %v1192_v41 = vunpack.c.l.bf16 %v1007_v39  ;;  %v1163_v48 = vld [vmem:[%s1930_s28] sm:$0xff] }
 0x1b7   : > { %v941_v29 = vpop.f32.mrf.mxu3 }
 0x1b8   : > { %v942_v31 = vadd.f32 %v1873_v3, %v941_v29  ;;  %v1187_v29 = vunpack.c.l.bf16 %v1002_v27 }
 0x1ba   : > { %v976_v36 = vmul.f32 0.01, %v942_v31  ;;  %vm960_vm6 = vcmp.gt.f32.partialorder %v942_v31, 0.0  ;;  %1211 = vadd.xlane.f32.xlu2 %v1187_v29 }
 0x1bc   : > { %v992_v43 = vsel %vm960_vm6, %v942_v31, %v976_v36  ;;  %v1188_v31 = vunpack.c.h.bf16 %v1002_v27  ;;  %v1477_v36 = vld [vmem:[%s1898_s29 + $0x20] sm:$0xff] }
 0x1bd   : > { %v1175_v27 = vld [vmem:[%s1930_s28 + $0x60] sm:$0xff] }
 0x1bf   : > { %v943_v34 = vpop.f32.mrf.mxu3 }
 0x1c0   : > { %v944_v37 = vadd.f32 %v1873_v3, %v943_v34  ;;  %v1473_v3 = vld [vmem:[%s1898_s29] sm:$0xff]  ;;  %v1190_v34 = vunpack.c.l.bf16 %v1005_v32 }
 0x1c2   : > { %v977_v40 = vmul.f32 0.01, %v944_v37  ;;  %vm961_vm7 = vcmp.gt.f32.partialorder %v944_v37, 0.0  ;;  %1217 = vadd.xlane.f32.xlu2 %v1190_v34 }
 0x1c4   : > { %v993_v44 = vsel %vm961_vm7, %v944_v37, %v977_v40  ;;  %v1191_v37 = vunpack.c.h.bf16 %v1005_v32  ;;  %v1193_v40 = vunpack.c.l.bf16 %v1008_v38  ;;  %v1178_v38 = vld [vmem:[%s1930_s28 + $0x78] sm:$0xff] }
 0x1c5   : > { %v1033_v45 = vpack.c.bf16 %v993_v44, %v992_v43  ;;  %v1478_v43 = vld [vmem:[%s1898_s29 + $0x28] sm:$0xff] }
 0x1c7   : > { %1082 = vmatpush.bf16.msra.mxu2 %v1033_v45  ;;  %1489 = vmatpush.bf16.msrb.mxu3 %v1033_v45 }
 0x1ca   : > { %1223 = vadd.xlane.f32.xlu2 %v1193_v40 }
 0x1cb   : > { %1083 = vmatpush.bf16.msra.mxu2 %v1032_v52  ;;  %1490 = vmatpush.bf16.msrb.mxu3 %v1032_v52 }
 0x1cf   : > { %1084 = vmatpush.bf16.msra.mxu2 %v1031_v59  ;;  %1491 = vmatpush.bf16.msrb.mxu3 %v1031_v59 }
 0x1d3   : > { %1085 = vmatpush.bf16.msra.mxu2 %v1030_v2  ;;  %1492 = vmatpush.bf16.msrb.mxu3 %v1030_v2  ;;  %v1166_v2 = vld [vmem:[%s1930_s28 + $0x18] sm:$0xff] }
 0x1d4   : > { %v1196_v49 = vpop.xlane.xlu0 %1195 }
 0x1d5   : > { %v1227_v50 = vadd.f32 %v1196_v49, %v1163_v48 }
 0x1d7   : > { %1086 = vmatpush.bf16.msra.mxu2 %v1029_v25  ;;  %1493 = vmatpush.bf16.msrb.mxu3 %v1029_v25  ;;  %v1204_v52 = vpop.xlane.xlu2 %1203  ;;  %1244 = vst.msk [vmem:[%s1930_s28] sm:$0xff] %vm569_vm2, %v1227_v50 }
 0x1d8   : > { %v1231_v59 = vadd.f32 %v1204_v52, %v1167_v54 }
 0x1da   : > { %1248 = vst.msk [vmem:[%s1930_s28 + $0x20] sm:$0xff] %vm569_vm2, %v1231_v59 }
 0x1db   : > { %1087 = vmatpush.bf16.msra.mxu2 %v1028_v9  ;;  %1494 = vmatpush.bf16.msrb.mxu3 %v1028_v9  ;;  %v1171_v9 = vld [vmem:[%s1930_s28 + $0x40] sm:$0xff] }
 0x1df   : > { %1088 = vmatpush.bf16.msra.mxu2 %v1881_v17  ;;  %1495 = vmatpush.bf16.msrb.mxu3 %v1881_v17  ;;  %v996_v17 = vld [vmem:[%s1898_s29 + $0x8] sm:$0xff]  }
 0x1e0   : > { %v1181_v18 = vunpack.c.l.bf16 %v996_v17  ;;  %v1182_v22 = vunpack.c.h.bf16 %v996_v17 }
 0x1e2   : > { %1199 = vadd.xlane.f32.xlu1 %v1181_v18  ;;  %v1174_v18 = vld [vmem:[%s1930_s28 + $0x58] sm:$0xff] }
 0x1e3   : > { %1089 = vmatpush.bf16.msra.mxu2 %v1877_v30  ;;  %1496 = vmatpush.bf16.msrb.mxu3 %v1877_v30  ;;  %v1180_v30 = vunpack.c.h.bf16 %v994_v13 }
 0x1e5   : > { %1197 = vadd.xlane.f32.xlu0 %v1180_v30 }
 0x1e6   : > { %1090 = vmatmul.bf16.vlgmr.msra.gmra.mxu2 %v1473_v3  ;;  %1120 = vmatmul.bf16.vlgmr.msrb.gmra.mxu3 %v1479_v11 }
 0x1e7   : > { %v1206_v63 = vpop.xlane.xlu2 %1205 }
 0x1e8   : > { %v1232_v21 = vadd.f32 %v1206_v63, %v1168_v62 }
 0x1ea   : > { %1201 = vadd.xlane.f32.xlu1 %v1182_v22  ;;  %1249 = vst.msk [vmem:[%s1930_s28 + $0x28] sm:$0xff] %vm569_vm2, %v1232_v21 }
 0x1ed   : > { %1207 = vadd.xlane.f32.xlu0 %v1185_v26 }
 0x1f2   : > { %1209 = vadd.xlane.f32.xlu1 %v1186_v28 }
 0x1f5   : > { %1213 = vadd.xlane.f32.xlu0 %v1188_v31  ;;  %v1177_v31 = vld [vmem:[%s1930_s28 + $0x70] sm:$0xff] }
 0x1f6   : > { %1095 = vmatmul.bf16.gmra.mxu2 %v1474_v10  ;;  %1125 = vmatmul.bf16.gmra.mxu3 %v1480_v15  ;;  %v1170_v10 = vld [vmem:[%s1930_s28 + $0x38] sm:$0xff]  ;;  %v1172_v15 = vld [vmem:[%s1930_s28 + $0x48] sm:$0xff] }
 0x1fa   : > { %1215 = vadd.xlane.f32.xlu1 %v1189_v35 }
 0x1fd   : > { %1219 = vadd.xlane.f32.xlu0 %v1191_v37 }
 0x202   : > { %1221 = vadd.xlane.f32.xlu1 %v1192_v41 }
 0x205   : > { %1225 = vadd.xlane.f32.xlu0 %v1194_v42 }
 0x206   : > { %1100 = vmatmul.bf16.gmra.mxu2 %v1475_v12 }
 0x216   : > { %1105 = vmatmul.bf16.gmra.mxu2 %v1476_v23 }
 0x226   : > { %1110 = vmatmul.bf16.gmra.mxu2 %v1477_v36 }
 0x22d   : > { %v1212_v3 = vpop.xlane.xlu2 %1211 }
 0x22e   : > { %v1235_v11 = vadd.f32 %v1212_v3, %v1171_v9 }
 0x230   : > { %1252 = vst.msk [vmem:[%s1930_s28 + $0x40] sm:$0xff] %vm569_vm2, %v1235_v11 }
 0x235   : > { %v1218_v30 = vpop.xlane.xlu2 %1217 }
 0x236   : > { %1115 = vmatmul.bf16.gmra.mxu2 %v1478_v43  ;;  %v1238_v22 = vadd.f32 %v1218_v30, %v1174_v18 }
 0x238   : > { %1255 = vst.msk [vmem:[%s1930_s28 + $0x58] sm:$0xff] %vm569_vm2, %v1238_v22 }
 0x23d   : > { %v1224_v32 = vpop.xlane.xlu2 %1223 }
 0x23e   : > { %v1241_v34 = vadd.f32 %v1224_v32, %v1177_v31 }
 0x240   : > { %1258 = vst.msk [vmem:[%s1930_s28 + $0x70] sm:$0xff] %vm569_vm2, %v1241_v34 }
 0x255   : > { %v1200_v53 = vpop.xlane.xlu1 %1199 }
 0x256   : > { %v1229_v60 = vadd.f32 %v1200_v53, %v1165_v56 }
 0x258   : > { %v1198_v57 = vpop.xlane.xlu0 %1197  ;;  %1246 = vst.msk [vmem:[%s1930_s28 + $0x10] sm:$0xff] %vm569_vm2, %v1229_v60 }
 0x259   : > { %v1228_v0 = vadd.f32 %v1198_v57, %v1164_v58 }
 0x25b   : > { %1245 = vst.msk [vmem:[%s1930_s28 + $0x8] sm:$0xff] %vm569_vm2, %v1228_v0 }
 0x25d   : > { %v1202_v1 = vpop.xlane.xlu1 %1201 }
 0x25e   : > { %v1230_v5 = vadd.f32 %v1202_v1, %v1166_v2 }
 0x260   : > { %v1208_v25 = vpop.xlane.xlu0 %1207  ;;  %1247 = vst.msk [vmem:[%s1930_s28 + $0x18] sm:$0xff] %vm569_vm2, %v1230_v5 }
 0x261   : > { %v1233_v7 = vadd.f32 %v1208_v25, %v1169_v6 }
 0x263   : > { %1250 = vst.msk [vmem:[%s1930_s28 + $0x30] sm:$0xff] %vm569_vm2, %v1233_v7 }
 0x265   : > { %v1210_v12 = vpop.xlane.xlu1 %1209 }
 0x266   : > { %v1234_v13 = vadd.f32 %v1210_v12, %v1170_v10 }
 0x268   : > { %1251 = vst.msk [vmem:[%s1930_s28 + $0x38] sm:$0xff] %vm569_vm2, %v1234_v13  ;;  %v1214_v16 = vpop.xlane.xlu0 %1213 }
 0x269   : > { %v1091_v44 = vpop.f32.mrf.mxu2  ;;  %v1121_v51 = vpop.f32.mrf.mxu3  ;;  %v1236_v17 = vadd.f32 %v1214_v16, %v1172_v15 }
 0x26a   : > { %1147 = vst [vmem:[%s1924_s24] sm:$0xff] %v1091_v44 }
 0x26b   : > { %1159 = vst [vmem:[%s1924_s24 + $0x60] sm:$0xff] %v1121_v51 }
 0x26c   : > { %1253 = vst.msk [vmem:[%s1930_s28 + $0x48] sm:$0xff] %vm569_vm2, %v1236_v17 }
 0x26d   : > { %v1216_v23 = vpop.xlane.xlu1 %1215 }
 0x26e   : > { %v1237_v24 = vadd.f32 %v1216_v23, %v1173_v19 }
 0x270   : > { %1254 = vst.msk [vmem:[%s1930_s28 + $0x50] sm:$0xff] %vm569_vm2, %v1237_v24  ;;  %v1220_v28 = vpop.xlane.xlu0 %1219 }
 0x271   : > { %v1093_v45 = vpop.f32.mrf.mxu2  ;;  %v1123_v61 = vpop.f32.mrf.mxu3  ;;  %v1239_v29 = vadd.f32 %v1220_v28, %v1175_v27 }
 0x272   : > { %1148 = vst [vmem:[%s1924_s24 + $0x8] sm:$0xff] %v1093_v45 }
 0x273   : > { %1160 = vst [vmem:[%s1924_s24 + $0x68] sm:$0xff] %v1123_v61 }
 0x274   : > { %1256 = vst.msk [vmem:[%s1930_s28 + $0x60] sm:$0xff] %vm569_vm2, %v1239_v29 }
 0x275   : > { %v1222_v35 = vpop.xlane.xlu1 %1221 }
 0x276   : > { %v1240_v36 = vadd.f32 %v1222_v35, %v1176_v33 }
 0x278   : > { %1257 = vst.msk [vmem:[%s1930_s28 + $0x68] sm:$0xff] %vm569_vm2, %v1240_v36  ;;  %v1226_v39 = vpop.xlane.xlu0 %1225 }
 0x279   : > { %v1096_v47 = vpop.f32.mrf.mxu2  ;;  %v1126_v8 = vpop.f32.mrf.mxu3  ;;  %v1242_v40 = vadd.f32 %v1226_v39, %v1178_v38 }
 0x27a   : > { %1149 = vst [vmem:[%s1924_s24 + $0x10] sm:$0xff] %v1096_v47 }
 0x27b   : > { %1161 = vst [vmem:[%s1924_s24 + $0x70] sm:$0xff] %v1126_v8 }
 0x27c   : > { %1259 = vst.msk [vmem:[%s1930_s28 + $0x78] sm:$0xff] %vm569_vm2, %v1242_v40 }
 0x281   : > { %v1098_v55 = vpop.f32.mrf.mxu2  ;;  %v1128_v20 = vpop.f32.mrf.mxu3 }
 0x282   : > { %1150 = vst [vmem:[%s1924_s24 + $0x18] sm:$0xff] %v1098_v55 }
 0x283   : > { %1162 = vst [vmem:[%s1924_s24 + $0x78] sm:$0xff] %v1128_v20 }
 0x289   : > { %v1101_v4 = vpop.f32.mrf.mxu2 }
 0x28a   : > { %1151 = vst [vmem:[%s1924_s24 + $0x20] sm:$0xff] %v1101_v4 }
 0x291   : > { %v1103_v14 = vpop.f32.mrf.mxu2 }
 0x292   : > { %1152 = vst [vmem:[%s1924_s24 + $0x28] sm:$0xff] %v1103_v14 }
 0x299   : > { %v1106_v26 = vpop.f32.mrf.mxu2 }
 0x29a   : > { %1153 = vst [vmem:[%s1924_s24 + $0x30] sm:$0xff] %v1106_v26 }
 0x2a1   : > { %v1108_v37 = vpop.f32.mrf.mxu2 }
 0x2a2   : > { %1154 = vst [vmem:[%s1924_s24 + $0x38] sm:$0xff] %v1108_v37 }
 0x2a9   : > { %v1111_v41 = vpop.f32.mrf.mxu2 }
 0x2aa   : > { %1155 = vst [vmem:[%s1924_s24 + $0x40] sm:$0xff] %v1111_v41 }
 0x2b1   : > { %v1113_v42 = vpop.f32.mrf.mxu2 }
 0x2b2   : > { %1156 = vst [vmem:[%s1924_s24 + $0x48] sm:$0xff] %v1113_v42 }
 0x2b9   : > { %v1116_v43 = vpop.f32.mrf.mxu2 }
 0x2ba   : > { %1157 = vst [vmem:[%s1924_s24 + $0x50] sm:$0xff] %v1116_v43 }
 0x2c1   : > { %v1118_v44 = vpop.f32.mrf.mxu2 }
 0x2c2   : > { %1158 = vst [vmem:[%s1924_s24 + $0x58] sm:$0xff] %v1118_v44 }
 0x2c3 PF: > { %s22_s21 = sadd.s32 1, %s1582_s21   ;;  %s2054_s17 = smov %s1570_s18 }
 0x2c4   : > { %p19_p11 = scmp.ge.s32.totalorder %s22_s21, 4   ;;  %s2055_s18 = smov %s1680_s25 }
 0x2c5   : > { %s2056_s19 = smov %s1578_s20  ;;  %s2057_s20 = smov %s2059_s22 }
 0x2c6   :  { %21 = sbr.rel (!%p19_p11) target bundleno = 3 (0x3), region = 155 }

// kernel: wfcg_forward.5
= control target key start
LH: loop header
LB: loop body
LE: loop exit
PB: predicated region body
PF: predicated region fallthrough
CT: control target
= control target key end

     0   :  { %s1137_s21 = smov 0   ;;  %s1468_s0 = inlined_call_operand.vmem [shape: bf16[256,128], index: 0, kind: input, shape index: {}]   ;;  %s1469_s1 = inlined_call_operand.vmem [shape: bf16[128,64], index: 1, kind: input, shape index: {}]   ;;  %s1470_s2 = inlined_call_operand.vmem [shape: f32[1,64], index: 2, kind: input, shape index: {}]   ;;  %s1471_s3 = inlined_call_operand.vmem [shape: f32[1,64], index: 3, kind: input, shape index: {}]   ;;  %s1472_s4 = inlined_call_operand.vmem [shape: bf16[64,5], index: 4, kind: input, shape index: {}]   ;;  %s1473_s5 = inlined_call_operand.vmem [shape: f32[1,5], index: 5, kind: input, shape index: {}]   ;;  %s1474_s6 = inlined_call_operand.vmem [shape: f32[256,5], index: 6, kind: output, shape index: {}]  }
   0x1 LB: > { %s888_s22 = sadd.s32 4294967295, %s1100_s21   ;;  %p892_p0 = scmp.ge.s32.totalorder %s1100_s21, 1  ;;  %s1100_s21 = sphi %s1137_s21, %s16_s21  }
   0x2   : > { %p213_p1 = scmp.lt.s32.totalorder %s1100_s21, 3 }
   0x4   : > { %p214_p2 = pnand %p892_p0, %p213_p1 }
   0x5   : > { %s893_s7 = sshll.u32 (!%p214_p2), %s888_s22, 4 }
   0x6   : > { %217 = sbr.rel (%p214_p2) target bundleno = 650 (0x28a), region = 44  ;;  %p244_p3 = scmp.lt.s32.totalorder (!%p214_p2), %s893_s7, 31 }
   0xb   : > { %v1002_v0 = vld [vmem:[%s1469_s1 + $0x38] sm:$0xff]  ;;  %v1001_v1 = vld [vmem:[%s1469_s1 + $0x30] sm:$0xff]  ;;  %v1000_v2 = vld [vmem:[%s1469_s1 + $0x28] sm:$0xff]  ;;  %s1476_s7 = smov (!%p244_p3, %s893_s7), 31  ;;  %vm565_vm2 = vcmask 523264  }
   0xc   : > { %384 = vmatpush.bf16.msra.mxu0 %v1002_v0  ;;  %1007 = vmatpush.bf16.msra.mxu2 %v1002_v0  ;;  %v999_v3 = vld [vmem:[%s1469_s1 + $0x20] sm:$0xff]  ;;  %v998_v4 = vld [vmem:[%s1469_s1 + $0x18] sm:$0xff]  ;;  %v997_v5 = vld [vmem:[%s1469_s1 + $0x10] sm:$0xff]  ;;  %s894_s14 = sshll.u32 %s1476_s7, 2  ;;  %s896_s12 = sshll.u32 %s1476_s7, 3 }
   0xd   : > { %v996_v6 = vld [vmem:[%s1469_s1 + $0x8] sm:$0xff]  ;;  %v995_v7 = vld [vmem:[%s1469_s1] sm:$0xff]  ;;  %s247_s19 = scalar_lea.vmem %s1468_s0, %s894_s14  ;;  %v1006_v16 = vld [vmem:[%s1472_s4 + $0x18] sm:$0xff]  ;;  %s1415_s15 = scalar_lea.vmem %s1474_s6, %s896_s12 }
   0xe   : > { %v987_v8 = vld [vmem:[%s247_s19] sm:$0xff]  ;;  %v988_v10 = vld [vmem:[%s247_s19 + $0x8] sm:$0xff]  ;;  %v989_v12 = vld [vmem:[%s247_s19 + $0x10] sm:$0xff]  ;;  %594 = vmatpush.bf16.msra.mxu1 %v1006_v16  ;;  %1015 = vmatpush.bf16.msra.mxu3 %v1006_v16 }
   0xf   : > { %v991_v9 = vld [vmem:[%s247_s19 + $0x20] sm:$0xff]  ;;  %v992_v11 = vld [vmem:[%s247_s19 + $0x28] sm:$0xff]  ;;  %v993_v13 = vld [vmem:[%s247_s19 + $0x30] sm:$0xff] }
  0x10   : > { %385 = vmatpush.bf16.msra.mxu0 %v1001_v1  ;;  %1008 = vmatpush.bf16.msra.mxu2 %v1001_v1  ;;  %v990_v14 = vld [vmem:[%s247_s19 + $0x18] sm:$0xff]  ;;  %v1005_v17 = vld [vmem:[%s1472_s4 + $0x10] sm:$0xff]  ;;  %v1004_v18 = vld [vmem:[%s1472_s4 + $0x8] sm:$0xff] }
  0x11   : > { %v994_v15 = vld [vmem:[%s247_s19 + $0x38] sm:$0xff]  ;;  %v1003_v19 = vld [vmem:[%s1472_s4] sm:$0xff] }
  0x12   : > { %595 = vmatpush.bf16.msra.mxu1 %v1005_v17  ;;  %1016 = vmatpush.bf16.msra.mxu3 %v1005_v17  ;;  %v1190_v20 = vld [vmem:[%s1470_s2] ss:$0 sm:$0xff] }
  0x13   : > { %v1196_v23 = vld [vmem:[%s1471_s3] ss:$0 sm:$0xff] }
  0x14   : > { %386 = vmatpush.bf16.msra.mxu0 %v1000_v2  ;;  %1009 = vmatpush.bf16.msra.mxu2 %v1000_v2 }
  0x16   : > { %596 = vmatpush.bf16.msra.mxu1 %v1004_v18  ;;  %1017 = vmatpush.bf16.msra.mxu3 %v1004_v18 }
  0x18   : > { %387 = vmatpush.bf16.msra.mxu0 %v999_v3  ;;  %1010 = vmatpush.bf16.msra.mxu2 %v999_v3 }
  0x1a   : > { %597 = vmatpush.bf16.msra.mxu1 %v1003_v19  ;;  %1018 = vmatpush.bf16.msra.mxu3 %v1003_v19 }
  0x1c   : > { %388 = vmatpush.bf16.msra.mxu0 %v998_v4  ;;  %1011 = vmatpush.bf16.msra.mxu2 %v998_v4 }
  0x20   : > { %389 = vmatpush.bf16.msra.mxu0 %v997_v5  ;;  %1012 = vmatpush.bf16.msra.mxu2 %v997_v5 }
  0x24   : > { %390 = vmatpush.bf16.msra.mxu0 %v996_v6  ;;  %1013 = vmatpush.bf16.msra.mxu2 %v996_v6 }
  0x28   : > { %391 = vmatpush.bf16.msra.mxu0 %v995_v7  ;;  %1014 = vmatpush.bf16.msra.mxu2 %v995_v7 }
  0x2b   : > { %392 = vmatmul.bf16.vlgmr.msra.gmra.mxu0 %v987_v8  ;;  %412 = vmatmul.bf16.vlgmr.msra.gmra.mxu2 %v991_v9 }
  0x3b   : > { %397 = vmatmul.bf16.gmra.mxu0 %v988_v10  ;;  %417 = vmatmul.bf16.gmra.mxu2 %v992_v11 }
  0x4b   : > { %402 = vmatmul.bf16.gmra.mxu0 %v989_v12  ;;  %422 = vmatmul.bf16.gmra.mxu2 %v993_v13 }
  0x5b   : > { %407 = vmatmul.bf16.gmra.mxu0 %v990_v14  ;;  %427 = vmatmul.bf16.gmra.mxu2 %v994_v15 }
  0xa8   : > { %v393_v21 = vpop.f32.mrf.mxu0 }
  0xa9   : > { %v437_v22 = vmul.f32 %v1190_v20, %v393_v21 }
  0xab   : > { %v457_v25 = vadd.f32 %v1196_v23, %v437_v22 }
  0xad   : > { %v489_v30 = vmul.f32 0.01, %v457_v25  ;;  %vm473_vm0 = vcmp.gt.f32.partialorder %v457_v25, 0.0 }
  0xae   : > { %v413_v24 = vpop.f32.mrf.mxu2 }
  0xaf   : > { %v445_v26 = vmul.f32 %v1190_v20, %v413_v24  ;;  %v505_v36 = vsel %vm473_vm0, %v457_v25, %v489_v30 }
  0xb0   : > { %v395_v27 = vpop.f32.mrf.mxu0 }
  0xb1   : > { %v465_v28 = vadd.f32 %v1196_v23, %v445_v26  ;;  %v438_v29 = vmul.f32 %v1190_v20, %v395_v27 }
  0xb3   : > { %v458_v31 = vadd.f32 %v1196_v23, %v438_v29  ;;  %v497_v34 = vmul.f32 0.01, %v465_v28  ;;  %vm481_vm3 = vcmp.gt.f32.partialorder %v465_v28, 0.0 }
  0xb5   : > { %vm474_vm1 = vcmp.gt.f32.partialorder %v458_v31, 0.0  ;;  %v490_v32 = vmul.f32 0.01, %v458_v31  ;;  %v1207_v43 = vsel %vm481_vm3, %v465_v28, %v497_v34 }
  0xb6   : > { %v415_v33 = vpop.f32.mrf.mxu2 }
  0xb7   : > { %v446_v35 = vmul.f32 %v1190_v20, %v415_v33  ;;  %v506_v37 = vsel %vm474_vm1, %v458_v31, %v490_v32  ;;  %vm639_vm1 = vcmask 39936  }
  0xb8   : > { %v398_v38 = vpop.f32.mrf.mxu0  ;;  %v521_v39 = vpack.c.bf16 %v506_v37, %v505_v36 }
  0xb9   : > { %v466_v40 = vadd.f32 %v1196_v23, %v446_v35  ;;  %v439_v42 = vmul.f32 %v1190_v20, %v398_v38 }
  0xba   : > { %977 = vmatmul.msk.bf16.vlgmr.msra.gmra.mxu1 %vm565_vm2, %v521_v39 }
  0xbb   : > { %vm482_vm4 = vcmp.gt.f32.partialorder %v466_v40, 0.0  ;;  %v498_v41 = vmul.f32 0.01, %v466_v40  ;;  %v459_v47 = vadd.f32 %v1196_v23, %v439_v42 }
  0xbd   : > { %v1209_v44 = vsel %vm482_vm4, %v466_v40, %v498_v41  ;;  %v491_v51 = vmul.f32 0.01, %v459_v47  ;;  %vm475_vm5 = vcmp.gt.f32.partialorder %v459_v47, 0.0 }
  0xbe   : > { %v418_v45 = vpop.f32.mrf.mxu2  ;;  %v525_v46 = vpack.c.bf16 %v1209_v44, %v1207_v43 }
  0xbf   : > { %v447_v48 = vmul.f32 %v1190_v20, %v418_v45  ;;  %v507_v58 = vsel %vm475_vm5, %v459_v47, %v491_v51 }
  0xc0   : > { %v400_v49 = vpop.f32.mrf.mxu0 }
  0xc1   : > { %v440_v50 = vmul.f32 %v1190_v20, %v400_v49  ;;  %v467_v52 = vadd.f32 %v1196_v23, %v447_v48 }
  0xc3   : > { %v460_v53 = vadd.f32 %v1196_v23, %v440_v50  ;;  %v499_v56 = vmul.f32 0.01, %v467_v52  ;;  %vm483_vm7 = vcmp.gt.f32.partialorder %v467_v52, 0.0 }
  0xc5   : > { %vm476_vm6 = vcmp.gt.f32.partialorder %v460_v53, 0.0  ;;  %v492_v54 = vmul.f32 0.01, %v460_v53  ;;  %v515_v1 = vsel %vm483_vm7, %v467_v52, %v499_v56 }
  0xc6   : > { %v420_v55 = vpop.f32.mrf.mxu2 }
  0xc7   : > { %v448_v57 = vmul.f32 %v1190_v20, %v420_v55  ;;  %v508_v59 = vsel %vm476_vm6, %v460_v53, %v492_v54 }
  0xc8   : > { %v403_v60 = vpop.f32.mrf.mxu0  ;;  %v522_v61 = vpack.c.bf16 %v508_v59, %v507_v58 }
  0xc9   : > { %v468_v62 = vadd.f32 %v1196_v23, %v448_v57  ;;  %v441_v0 = vmul.f32 %v1190_v20, %v403_v60 }
  0xca   : > { %978 = vmatmul.msk.bf16.gmra.mxu1 %vm565_vm2, %v522_v61 }
  0xcb   : > { %vm484_vm8 = vcmp.gt.f32.partialorder %v468_v62, 0.0  ;;  %v500_v63 = vmul.f32 0.01, %v468_v62  ;;  %v461_v5 = vadd.f32 %v1196_v23, %v441_v0 }
  0xcd   : > { %v516_v2 = vsel %vm484_vm8, %v468_v62, %v500_v63  ;;  %v493_v9 = vmul.f32 0.01, %v461_v5  ;;  %vm477_vm9 = vcmp.gt.f32.partialorder %v461_v5, 0.0 }
  0xce   : > { %v423_v3 = vpop.f32.mrf.mxu2  ;;  %v526_v4 = vpack.c.bf16 %v516_v2, %v515_v1 }
  0xcf   : > { %v449_v6 = vmul.f32 %v1190_v20, %v423_v3  ;;  %v509_v16 = vsel %vm477_vm9, %v461_v5, %v493_v9 }
  0xd0   : > { %v405_v7 = vpop.f32.mrf.mxu0  ;;  %982 = vmatmul.msk.bf16.vlgmr.msra.gmra.mxu3 %vm565_vm2, %v526_v4 }
  0xd1   : > { %v442_v8 = vmul.f32 %v1190_v20, %v405_v7  ;;  %v469_v10 = vadd.f32 %v1196_v23, %v449_v6 }
  0xd3   : > { %v462_v11 = vadd.f32 %v1196_v23, %v442_v8  ;;  %v501_v14 = vmul.f32 0.01, %v469_v10  ;;  %vm485_vm11 = vcmp.gt.f32.partialorder %v469_v10, 0.0 }
  0xd5   : > { %vm478_vm10 = vcmp.gt.f32.partialorder %v462_v11, 0.0  ;;  %v494_v12 = vmul.f32 0.01, %v462_v11  ;;  %v517_v25 = vsel %vm485_vm11, %v469_v10, %v501_v14 }
  0xd6   : > { %v425_v13 = vpop.f32.mrf.mxu2 }
  0xd7   : > { %v450_v15 = vmul.f32 %v1190_v20, %v425_v13  ;;  %v510_v17 = vsel %vm478_vm10, %v462_v11, %v494_v12 }
  0xd8   : > { %v408_v18 = vpop.f32.mrf.mxu0  ;;  %v523_v19 = vpack.c.bf16 %v510_v17, %v509_v16 }
  0xd9   : > { %v470_v21 = vadd.f32 %v1196_v23, %v450_v15  ;;  %v443_v24 = vmul.f32 %v1190_v20, %v408_v18 }
  0xda   : > { %979 = vmatmul.msk.bf16.gmra.mxu1 %vm565_vm2, %v523_v19 }
  0xdb   : > { %vm486_vm12 = vcmp.gt.f32.partialorder %v470_v21, 0.0  ;;  %v502_v22 = vmul.f32 0.01, %v470_v21  ;;  %v463_v29 = vadd.f32 %v1196_v23, %v443_v24 }
  0xdd   : > { %v518_v26 = vsel %vm486_vm12, %v470_v21, %v502_v22  ;;  %v495_v33 = vmul.f32 0.01, %v463_v29  ;;  %vm479_vm13 = vcmp.gt.f32.partialorder %v463_v29, 0.0 }
  0xde   : > { %v428_v27 = vpop.f32.mrf.mxu2  ;;  %v527_v28 = vpack.c.bf16 %v518_v26, %v517_v25 }
  0xdf   : > { %v451_v30 = vmul.f32 %v1190_v20, %v428_v27  ;;  %v511_v40 = vsel %vm479_vm13, %v463_v29, %v495_v33 }
  0xe0   : > { %v410_v31 = vpop.f32.mrf.mxu0  ;;  %983 = vmatmul.msk.bf16.gmra.mxu3 %vm565_vm2, %v527_v28 }
  0xe1   : > { %v444_v32 = vmul.f32 %v1190_v20, %v410_v31  ;;  %v471_v34 = vadd.f32 %v1196_v23, %v451_v30 }
  0xe3   : > { %v464_v35 = vadd.f32 %v1196_v23, %v444_v32  ;;  %v503_v38 = vmul.f32 0.01, %v471_v34  ;;  %vm487_vm15 = vcmp.gt.f32.partialorder %v471_v34, 0.0 }
  0xe5   : > { %vm480_vm14 = vcmp.gt.f32.partialorder %v464_v35, 0.0  ;;  %v496_v36 = vmul.f32 0.01, %v464_v35  ;;  %v519_v48 = vsel %vm487_vm15, %v471_v34, %v503_v38 }
  0xe6   : > { %v430_v37 = vpop.f32.mrf.mxu2 }
  0xe7   : > { %v452_v39 = vmul.f32 %v1190_v20, %v430_v37  ;;  %v512_v41 = vsel %vm480_vm14, %v464_v35, %v496_v36  ;;  %v1249_v20 = vld [vmem:[%s1473_s5] ss:$0 sm:$0xff] }
  0xe8   : > { %v524_v42 = vpack.c.bf16 %v512_v41, %v511_v40 }
  0xe9   : > { %v472_v45 = vadd.f32 %v1196_v23, %v452_v39 }
  0xea   : > { %980 = vmatmul.msk.bf16.gmra.mxu1 %vm565_vm2, %v524_v42 }
  0xeb   : > { %vm488_vm0 = vcmp.gt.f32.partialorder %v472_v45, 0.0  ;;  %v504_v47 = vmul.f32 0.01, %v472_v45 }
  0xed   : > { %v520_v49 = vsel %vm488_vm0, %v472_v45, %v504_v47 }
  0xee   : > { %v528_v50 = vpack.c.bf16 %v520_v49, %v519_v48 }
  0xf0   : > { %984 = vmatmul.msk.bf16.gmra.mxu3 %vm565_vm2, %v528_v50 }
  0xfa   : > { %981 = vmatmul.msk.bf16.gmra.mxu1 %vm565_vm2, %v525_v46 }
 0x137   : > { %v599_v23 = vpop.f32.mrf.mxu1 }
 0x138   : > { %v1252_v51 = vadd.f32 %v1249_v20, %v599_v23 }
 0x13a   : > { %v640_v52 = vsel %vm639_vm1, %v1252_v51, -inf }
 0x13b   : > { %641 = vmax.xlane.f32.xlu0 %v640_v52 }
 0x13f   : > { %v601_v53 = vpop.f32.mrf.mxu1 }
 0x140   : > { %v1257_v54 = vadd.f32 %v1249_v20, %v601_v53 }
 0x142   : > { %v643_v43 = vsel %vm639_vm1, %v1257_v54, -inf }
 0x143   : > { %644 = vmax.xlane.f32.xlu0 %v643_v43 }
 0x147   : > { %v604_v44 = vpop.f32.mrf.mxu1 }
 0x148   : > { %v1262_v46 = vadd.f32 %v1249_v20, %v604_v44 }
 0x14a   : > { %v646_v55 = vsel %vm639_vm1, %v1262_v46, -inf }
 0x14b   : > { %647 = vmax.xlane.f32.xlu1 %v646_v55 }
 0x14f   : > { %v606_v56 = vpop.f32.mrf.mxu1 }
 0x150   : > { %v1267_v57 = vadd.f32 %v1249_v20, %v606_v56 }
 0x152   : > { %v649_v58 = vsel %vm639_vm1, %v1267_v57, -inf }
 0x153   : > { %v624_v59 = vpop.f32.mrf.mxu3  ;;  %650 = vmax.xlane.f32.xlu1 %v649_v58 }
 0x154   : > { %v1272_v60 = vadd.f32 %v1249_v20, %v624_v59 }
 0x156   : > { %v670_v63 = vsel %vm639_vm1, %v1272_v60, -inf }
 0x157   : > { %v609_v61 = vpop.f32.mrf.mxu1 }
 0x158   : > { %v1275_v62 = vadd.f32 %v1249_v20, %v609_v61 }
 0x15a   : > { %v652_v0 = vsel %vm639_vm1, %v1275_v62, -inf }
 0x15b   : > { %v626_v1 = vpop.f32.mrf.mxu3  ;;  %671 = vmax.xlane.f32.xlu1 %v670_v63  ;;  %653 = vmax.xlane.f32.xlu2 %v652_v0 }
 0x15c   : > { %v1282_v2 = vadd.f32 %v1249_v20, %v626_v1 }
 0x15e   : > { %v673_v4 = vsel %vm639_vm1, %v1282_v2, -inf }
 0x15f   : > { %v611_v3 = vpop.f32.mrf.mxu1 }
 0x160   : > { %v1290_v7 = vadd.f32 %v1249_v20, %v611_v3 }
 0x162   : > { %v655_v11 = vsel %vm639_vm1, %v1290_v7, -inf }
 0x163   : > { %v629_v5 = vpop.f32.mrf.mxu3  ;;  %674 = vmax.xlane.f32.xlu2 %v673_v4 }
 0x164   : > { %v1287_v6 = vadd.f32 %v1249_v20, %v629_v5 }
 0x166   : > { %v676_v8 = vsel %vm639_vm1, %v1287_v6, -inf }
 0x167   : > { %677 = vmax.xlane.f32.xlu0 %v676_v8  ;;  %v614_v9 = vpop.f32.mrf.mxu1 }
 0x168   : > { %v1295_v10 = vadd.f32 %v1249_v20, %v614_v9 }
 0x16a   : > { %v658_v12 = vsel %vm639_vm1, %v1295_v10, -inf }
 0x16b   : > { %656 = vmax.xlane.f32.xlu2 %v655_v11  ;;  %v631_v13 = vpop.f32.mrf.mxu3 }
 0x16c   : > { %v1307_v17 = vadd.f32 %v1249_v20, %v631_v13 }
 0x16e   : > { %v679_v24 = vsel %vm639_vm1, %v1307_v17, -inf }
 0x16f   : > { %v616_v14 = vpop.f32.mrf.mxu1  ;;  %659 = vmax.xlane.f32.xlu0 %v658_v12 }
 0x170   : > { %v1302_v15 = vadd.f32 %v1249_v20, %v616_v14 }
 0x172   : > { %v661_v16 = vsel %vm639_vm1, %v1302_v15, -inf }
 0x173   : > { %662 = vmax.xlane.f32.xlu1 %v661_v16  ;;  %v634_v21 = vpop.f32.mrf.mxu3 }
 0x174   : > { %v1317_v25 = vadd.f32 %v1249_v20, %v634_v21 }
 0x176   : > { %v682_v28 = vsel %vm639_vm1, %v1317_v25, -inf }
 0x177   : > { %v619_v18 = vpop.f32.mrf.mxu1 }
 0x178   : > { %v1310_v19 = vadd.f32 %v1249_v20, %v619_v18 }
 0x17a   : > { %v664_v22 = vsel %vm639_vm1, %v1310_v19, -inf }
 0x17b   : > { %665 = vmax.xlane.f32.xlu2 %v664_v22  ;;  %680 = vmax.xlane.f32.xlu1 %v679_v24  ;;  %v636_v30 = vpop.f32.mrf.mxu3 }
 0x17c   : > { %v1327_v31 = vadd.f32 %v1249_v20, %v636_v30 }
 0x17e   : > { %v685_v32 = vsel %vm639_vm1, %v1327_v31, -inf }
 0x17f   : > { %v621_v26 = vpop.f32.mrf.mxu1 }
 0x180   : > { %v1320_v27 = vadd.f32 %v1249_v20, %v621_v26 }
 0x182   : > { %v667_v29 = vsel %vm639_vm1, %v1320_v27, -inf }
 0x183   : > { %683 = vmax.xlane.f32.xlu2 %v682_v28  ;;  %668 = vmax.xlane.f32.xlu0 %v667_v29 }
 0x18b   : > { %686 = vmax.xlane.f32.xlu0 %v685_v32 }
 0x1ae   : > { %v642_v33 = vpop.xlane.xlu0 %641 }
 0x1af   : > { %v688_v34 = vsub.f32 %v1252_v51, %v642_v33 }
 0x1b1   : > { %v704_v35 = vmul.f32 1.442695, %v688_v34 }
 0x1b3   : > { %1030 = vpow2.f32 %v704_v35 }
 0x1b6   : > { %v645_v36 = vpop.xlane.xlu0 %644 }
 0x1b7   : > { %v689_v37 = vsub.f32 %v1257_v54, %v645_v36 }
 0x1b9   : > { %v1333_v38 = vpop.eup %1030  ;;  %v706_v39 = vmul.f32 1.442695, %v689_v37 }
 0x1ba   : > { %v736_v40 = vsel %vm639_vm1, %v1333_v38, 0.0 }
 0x1bb   : > { %1032 = vpow2.f32 %v706_v39  ;;  %737 = vadd.xlane.f32.xlu1 %v736_v40 }
 0x1be   : > { %v648_v41 = vpop.xlane.xlu1 %647 }
 0x1bf   : > { %v690_v42 = vsub.f32 %v1262_v46, %v648_v41 }
 0x1c1   : > { %v1338_v45 = vpop.eup %1032  ;;  %v708_v47 = vmul.f32 1.442695, %v690_v42 }
 0x1c2   : > { %v739_v48 = vsel %vm639_vm1, %v1338_v45, 0.0 }
 0x1c3   : > { %1034 = vpow2.f32 %v708_v47  ;;  %740 = vadd.xlane.f32.xlu2 %v739_v48 }
 0x1c6   : > { %v651_v49 = vpop.xlane.xlu1 %650 }
 0x1c7   : > { %v691_v50 = vsub.f32 %v1267_v57, %v651_v49 }
 0x1c9   : > { %v1343_v20 = vpop.eup %1034  ;;  %v710_v23 = vmul.f32 1.442695, %v691_v50 }
 0x1ca   : > { %v742_v51 = vsel %vm639_vm1, %v1343_v20, 0.0 }
 0x1cb   : > { %1036 = vpow2.f32 %v710_v23  ;;  %743 = vadd.xlane.f32.xlu0 %v742_v51 }
 0x1ce   : > { %v672_v52 = vpop.xlane.xlu1 %671  ;;  %v654_v53 = vpop.xlane.xlu2 %653 }
 0x1cf   : > { %v698_v54 = vsub.f32 %v1272_v60, %v672_v52  ;;  %v692_v46 = vsub.f32 %v1275_v62, %v654_v53 }
 0x1d1   : > { %v1348_v43 = vpop.eup %1036  ;;  %v724_v44 = vmul.f32 1.442695, %v698_v54  ;;  %v712_v56 = vmul.f32 1.442695, %v692_v46 }
 0x1d2   : > { %v745_v55 = vsel %vm639_vm1, %v1348_v43, 0.0 }
 0x1d3   : > { %1038 = vpow2.f32 %v724_v44  ;;  %746 = vadd.xlane.f32.xlu1 %v745_v55 }
 0x1d4   : > { %1040 = vpow2.f32 %v712_v56 }
 0x1d6   : > { %v675_v57 = vpop.xlane.xlu2 %674 }
 0x1d7   : > { %v699_v58 = vsub.f32 %v1282_v2, %v675_v57 }
 0x1d9   : > { %v1354_v59 = vpop.eup %1038  ;;  %v726_v61 = vmul.f32 1.442695, %v699_v58 }
 0x1da   : > { %v678_v63 = vpop.xlane.xlu0 %677  ;;  %v766_v60 = vsel %vm639_vm1, %v1354_v59, 0.0  ;;  %v1359_v3 = vpop.eup %1040 }
 0x1db   : > { %1042 = vpow2.f32 %v726_v61  ;;  %v700_v62 = vsub.f32 %v1287_v6, %v678_v63  ;;  %767 = vadd.xlane.f32.xlu2 %v766_v60  ;;  %v748_v9 = vsel %vm639_vm1, %v1359_v3, 0.0 }
 0x1dd   : > { %v728_v0 = vmul.f32 1.442695, %v700_v62 }
 0x1de   : > { %v657_v1 = vpop.xlane.xlu2 %656 }
 0x1df   : > { %1044 = vpow2.f32 %v728_v0  ;;  %v693_v4 = vsub.f32 %v1290_v7, %v657_v1 }
 0x1e1   : > { %v1362_v2 = vpop.eup %1042  ;;  %v714_v5 = vmul.f32 1.442695, %v693_v4 }
 0x1e2   : > { %v660_v8 = vpop.xlane.xlu0 %659  ;;  %v769_v11 = vsel %vm639_vm1, %v1362_v2, 0.0 }
 0x1e3   : > { %1046 = vpow2.f32 %v714_v5  ;;  %v694_v6 = vsub.f32 %v1295_v10, %v660_v8  ;;  %749 = vadd.xlane.f32.xlu2 %v748_v9  ;;  %770 = vadd.xlane.f32.xlu0 %v769_v11 }
 0x1e5   : > { %v1369_v12 = vpop.eup %1044  ;;  %v716_v13 = vmul.f32 1.442695, %v694_v6 }
 0x1e6   : > { %v663_v14 = vpop.xlane.xlu1 %662  ;;  %v772_v7 = vsel %vm639_vm1, %v1369_v12, 0.0 }
 0x1e7   : > { %1048 = vpow2.f32 %v716_v13  ;;  %v695_v16 = vsub.f32 %v1302_v15, %v663_v14  ;;  %773 = vadd.xlane.f32.xlu1 %v772_v7 }
 0x1e9   : > { %v1374_v18 = vpop.eup %1046  ;;  %v718_v21 = vmul.f32 1.442695, %v695_v16 }
 0x1ea   : > { %v751_v22 = vsel %vm639_vm1, %v1374_v18, 0.0 }
 0x1eb   : > { %1050 = vpow2.f32 %v718_v21  ;;  %752 = vadd.xlane.f32.xlu0 %v751_v22 }
 0x1ed   : > { %v1378_v10 = vpop.eup %1048 }
 0x1ee   : > { %v666_v24 = vpop.xlane.xlu2 %665  ;;  %v681_v26 = vpop.xlane.xlu1 %680  ;;  %v754_v28 = vsel %vm639_vm1, %v1378_v10, 0.0 }
 0x1ef   : > { %v696_v29 = vsub.f32 %v1310_v19, %v666_v24  ;;  %v701_v15 = vsub.f32 %v1307_v17, %v681_v26  ;;  %755 = vadd.xlane.f32.xlu1 %v754_v28 }
 0x1f1   : > { %v1384_v30 = vpop.eup %1050  ;;  %v720_v32 = vmul.f32 1.442695, %v696_v29  ;;  %v730_v33 = vmul.f32 1.442695, %v701_v15 }
 0x1f2   : > { %v757_v34 = vsel %vm639_vm1, %v1384_v30, 0.0 }
 0x1f3   : > { %1052 = vpow2.f32 %v720_v32  ;;  %758 = vadd.xlane.f32.xlu2 %v757_v34 }
 0x1f4   : > { %1054 = vpow2.f32 %v730_v33 }
 0x1f6   : > { %v684_v35 = vpop.xlane.xlu2 %683  ;;  %v669_v36 = vpop.xlane.xlu0 %668 }
 0x1f7   : > { %v702_v37 = vsub.f32 %v1317_v25, %v684_v35  ;;  %v697_v39 = vsub.f32 %v1320_v27, %v669_v36 }
 0x1f9   : > { %v1390_v19 = vpop.eup %1052  ;;  %v732_v17 = vmul.f32 1.442695, %v702_v37  ;;  %v722_v40 = vmul.f32 1.442695, %v697_v39 }
 0x1fa   : > { %v1392_v41 = vpop.eup %1054  ;;  %v760_v42 = vsel %vm639_vm1, %v1390_v19, 0.0 }
 0x1fb   : > { %1056 = vpow2.f32 %v732_v17  ;;  %v775_v47 = vsel %vm639_vm1, %v1392_v41, 0.0  ;;  %761 = vadd.xlane.f32.xlu0 %v760_v42 }
 0x1fc   : > { %1058 = vpow2.f32 %v722_v40  ;;  %776 = vadd.xlane.f32.xlu2 %v775_v47 }
 0x1fe   : > { %v687_v25 = vpop.xlane.xlu0 %686 }
 0x1ff   : > { %v703_v27 = vsub.f32 %v1327_v31, %v687_v25 }
 0x201   : > { %v1399_v48 = vpop.eup %1056  ;;  %v734_v49 = vmul.f32 1.442695, %v703_v27 }
 0x202   : > { %v1401_v50 = vpop.eup %1058  ;;  %v778_v23 = vsel %vm639_vm1, %v1399_v48, 0.0 }
 0x203   : > { %1060 = vpow2.f32 %v734_v49  ;;  %779 = vadd.xlane.f32.xlu0 %v778_v23  ;;  %v763_v51 = vsel %vm639_vm1, %v1401_v50, 0.0 }
 0x204   : > { %764 = vadd.xlane.f32.xlu1 %v763_v51 }
 0x209   : > { %v1407_v52 = vpop.eup %1060 }
 0x20a   : > { %v781_v53 = vsel %vm639_vm1, %v1407_v52, 0.0 }
 0x20c   : > { %782 = vadd.xlane.f32.xlu1 %v781_v53 }
 0x22e   : > { %v738_v31 = vpop.xlane.xlu1 %737 }
 0x22f   : > { %1062 = vrcp.f32 %v738_v31 }
 0x235   : > { %v1063_v54 = vpop.eup %1062 }
 0x236   : > { %v800_v44 = vmul.f32 %v1063_v54, %v1333_v38  ;;  %v741_v46 = vpop.xlane.xlu2 %740 }
 0x237   : > { %1064 = vrcp.f32 %v741_v46 }
 0x238   : > { %816 = vst.msk [vmem:[%s1415_s15] sm:$0xff] %vm639_vm1, %v800_v44 }
 0x23d   : > { %v1065_v55 = vpop.eup %1064 }
 0x23e   : > { %v801_v56 = vmul.f32 %v1065_v55, %v1338_v45  ;;  %v744_v57 = vpop.xlane.xlu0 %743 }
 0x23f   : > { %1066 = vrcp.f32 %v744_v57 }
 0x240   : > { %817 = vst.msk [vmem:[%s1415_s15 + $0x8] sm:$0xff] %vm639_vm1, %v801_v56 }
 0x245   : > { %v1067_v58 = vpop.eup %1066 }
 0x246   : > { %v802_v61 = vmul.f32 %v1067_v58, %v1343_v20  ;;  %v747_v63 = vpop.xlane.xlu1 %746 }
 0x247   : > { %1068 = vrcp.f32 %v747_v63 }
 0x248   : > { %818 = vst.msk [vmem:[%s1415_s15 + $0x10] sm:$0xff] %vm639_vm1, %v802_v61 }
 0x24d   : > { %v1069_v38 = vpop.eup %1068 }
 0x24e   : > { %v803_v60 = vmul.f32 %v1069_v38, %v1348_v43  ;;  %v768_v62 = vpop.xlane.xlu2 %767 }
 0x24f   : > { %1070 = vrcp.f32 %v768_v62 }
 0x250   : > { %819 = vst.msk [vmem:[%s1415_s15 + $0x18] sm:$0xff] %vm639_vm1, %v803_v60 }
 0x255   : > { %v1071_v45 = vpop.eup %1070 }
 0x256   : > { %v810_v0 = vmul.f32 %v1071_v45, %v1354_v59  ;;  %v750_v1 = vpop.xlane.xlu2 %749  ;;  %v771_v4 = vpop.xlane.xlu0 %770 }
 0x257   : > { %1072 = vrcp.f32 %v750_v1 }
 0x258   : > { %826 = vst.msk [vmem:[%s1415_s15 + $0x50] sm:$0xff] %vm639_vm1, %v810_v0  ;;  %1074 = vrcp.f32 %v771_v4 }
 0x25a   : > { %v774_v20 = vpop.xlane.xlu1 %773 }
 0x25b   : > { %1076 = vrcp.f32 %v774_v20 }
 0x25d   : > { %v1073_v5 = vpop.eup %1072 }
 0x25e   : > { %v1075_v43 = vpop.eup %1074  ;;  %v804_v8 = vmul.f32 %v1073_v5, %v1359_v3  ;;  %v753_v9 = vpop.xlane.xlu0 %752 }
 0x25f   : > { %v811_v11 = vmul.f32 %v1075_v43, %v1362_v2  ;;  %1078 = vrcp.f32 %v753_v9 }
 0x260   : > { %820 = vst.msk [vmem:[%s1415_s15 + $0x20] sm:$0xff] %vm639_vm1, %v804_v8 }
 0x261   : > { %v1077_v59 = vpop.eup %1076  ;;  %827 = vst.msk [vmem:[%s1415_s15 + $0x58] sm:$0xff] %vm639_vm1, %v811_v11 }
 0x262   : > { %v812_v6 = vmul.f32 %v1077_v59, %v1369_v12  ;;  %v756_v13 = vpop.xlane.xlu1 %755 }
 0x263   : > { %1080 = vrcp.f32 %v756_v13 }
 0x264   : > { %828 = vst.msk [vmem:[%s1415_s15 + $0x60] sm:$0xff] %vm639_vm1, %v812_v6 }
 0x265   : > { %v1079_v14 = vpop.eup %1078 }
 0x266   : > { %v805_v3 = vmul.f32 %v1079_v14, %v1374_v18  ;;  %v759_v7 = vpop.xlane.xlu2 %758 }
 0x267   : > { %1082 = vrcp.f32 %v759_v7 }
 0x268   : > { %821 = vst.msk [vmem:[%s1415_s15 + $0x28] sm:$0xff] %vm639_vm1, %v805_v3 }
 0x269   : > { %v1081_v2 = vpop.eup %1080 }
 0x26a   : > { %v806_v16 = vmul.f32 %v1081_v2, %v1378_v10 }
 0x26c   : > { %822 = vst.msk [vmem:[%s1415_s15 + $0x30] sm:$0xff] %vm639_vm1, %v806_v16 }
 0x26d   : > { %v1083_v21 = vpop.eup %1082 }
 0x26e   : > { %v807_v12 = vmul.f32 %v1083_v21, %v1384_v30  ;;  %v762_v22 = vpop.xlane.xlu0 %761 }
 0x26f   : > { %v777_v24 = vpop.xlane.xlu2 %776  ;;  %1084 = vrcp.f32 %v762_v22 }
 0x270   : > { %823 = vst.msk [vmem:[%s1415_s15 + $0x38] sm:$0xff] %vm639_vm1, %v807_v12  ;;  %1086 = vrcp.f32 %v777_v24 }
 0x275   : > { %v1085_v18 = vpop.eup %1084 }
 0x276   : > { %v1087_v26 = vpop.eup %1086  ;;  %v808_v28 = vmul.f32 %v1085_v18, %v1390_v19  ;;  %v780_v10 = vpop.xlane.xlu0 %779 }
 0x277   : > { %v813_v29 = vmul.f32 %v1087_v26, %v1392_v41  ;;  %v765_v15 = vpop.xlane.xlu1 %764  ;;  %1088 = vrcp.f32 %v780_v10 }
 0x278   : > { %824 = vst.msk [vmem:[%s1415_s15 + $0x40] sm:$0xff] %vm639_vm1, %v808_v28  ;;  %1090 = vrcp.f32 %v765_v15 }
 0x279   : > { %829 = vst.msk [vmem:[%s1415_s15 + $0x68] sm:$0xff] %vm639_vm1, %v813_v29 }
 0x27d   : > { %v1089_v30 = vpop.eup %1088 }
 0x27e   : > { %v1091_v32 = vpop.eup %1090  ;;  %v814_v33 = vmul.f32 %v1089_v30, %v1399_v48 }
 0x27f   : > { %v809_v34 = vmul.f32 %v1091_v32, %v1401_v50  ;;  %v783_v35 = vpop.xlane.xlu1 %782 }
 0x280   : > { %830 = vst.msk [vmem:[%s1415_s15 + $0x70] sm:$0xff] %vm639_vm1, %v814_v33  ;;  %1092 = vrcp.f32 %v783_v35 }
 0x281   : > { %825 = vst.msk [vmem:[%s1415_s15 + $0x48] sm:$0xff] %vm639_vm1, %v809_v34 }
 0x286   : > { %v1093_v36 = vpop.eup %1092 }
 0x287   : > { %v815_v37 = vmul.f32 %v1093_v36, %v1407_v52 }
 0x289   : > { %831 = vst.msk [vmem:[%s1415_s15 + $0x78] sm:$0xff] %vm639_vm1, %v815_v37 }
 0x28a PF: > { %s16_s21 = sadd.s32 1, %s1100_s21  }
 0x28b   : > { %p13_p4 = scmp.ge.s32.totalorder %s16_s21, 4  }
 0x28d   :  { %15 = sbr.rel (!%p13_p4) target bundleno = 1 (0x1), region = 74 }

// kernel: wfcg_forward.4
= control target key start
LH: loop header
LB: loop body
LE: loop exit
PB: predicated region body
PF: predicated region fallthrough
CT: control target
= control target key end

     0   :  { %vm112_vm0 = vcmask 7168   ;;  %v7656_v0 = vmov 0   ;;  %s5040_s14 = smov 125   ;;  %s5041_s15 = smov 126   ;;  %s7646_s1 = inlined_call_operand.vmem [shape: f32[2,128,1], index: 1, kind: input, shape index: {}]   ;;  %s7647_s3 = inlined_call_operand.vmem [shape: bf16[128,128], index: 3, kind: input, shape index: {}]   ;;  %s7648_s0 = inlined_call_operand.vmem [shape: f32[2,128,128], index: 0, kind: input, shape index: {}]   ;;  %s7649_s4 = inlined_call_operand.vmem [shape: f32[128,4], index: 4, kind: input, shape index: {}]   ;;  %s7650_s5 = inlined_call_operand.vmem [shape: f32[128,4], index: 5, kind: input, shape index: {}]   ;;  %s7651_s2 = inlined_call_operand.vmem [shape: f32[128,128], index: 2, kind: input, shape index: {}]   ;;  %s7652_s6 = inlined_call_operand.vmem [shape: bf16[128,64], index: 6, kind: input, shape index: {}]   ;;  %s7653_s7 = inlined_call_operand.vmem [shape: f32[64,1], index: 7, kind: input, shape index: {}]   ;;  %s7654_s8 = inlined_call_operand.vmem [shape: f32[64,1], index: 8, kind: input, shape index: {}]   ;;  %s7655_s9 = inlined_call_operand.vmem [shape: f32[128,64], index: 9, kind: output, shape index: {}]  }
   0x1   :  { %4357 = vset.pattern.permute.xlu2 %v7656_v0  ;;  %4356 = vset.pattern.permute.xlu1 %v7656_v0  ;;  %v84_v1 = vld [vmem:[%s7646_s1 + $0x20] sm:$0xff]  ;;  %v82_v3 = vld [vmem:[%s7646_s1 + $0x10] sm:$0xff]  ;;  %v85_v14 = vld [vmem:[%s7646_s1 + $0x28] sm:$0xff]  ;;  %s5044_s23 = smov 64  }
   0x2   :  { %v100_v2 = vld [vmem:[%s7646_s1 + $0xa0] sm:$0xff]  ;;  %4355 = vset.pattern.permute.xlu0 %v7656_v0  ;;  %v125_v4 = vsel %vm112_vm0, %v84_v1, 0.0  ;;  %v98_v6 = vld [vmem:[%s7646_s1 + $0x90] sm:$0xff]  ;;  %v119_v7 = vsel %vm112_vm0, %v82_v3, 0.0  ;;  %v101_v15 = vld [vmem:[%s7646_s1 + $0xa8] sm:$0xff]  ;;  %v128_v19 = vsel %vm112_vm0, %v85_v14, 0.0 }
   0x3   :  { %v126_v5 = vsel %vm112_vm0, %v100_v2, 0.0  ;;  %v80_v8 = vld [vmem:[%s7646_s1] sm:$0xff]  ;;  %v120_v11 = vsel %vm112_vm0, %v98_v6, 0.0  ;;  %v83_v16 = vld [vmem:[%s7646_s1 + $0x18] sm:$0xff]  ;;  %v129_v20 = vsel %vm112_vm0, %v101_v15, 0.0  ;;  %v81_v22 = vld [vmem:[%s7646_s1 + $0x8] sm:$0xff] }
   0x4   :  { %v96_v9 = vld [vmem:[%s7646_s1 + $0x80] sm:$0xff]  ;;  %v127_v10 = vadd.f32 %v126_v5, %v125_v4  ;;  %v113_v12 = vsel %vm112_vm0, %v80_v8, 0.0  ;;  %v121_v17 = vadd.f32 %v120_v11, %v119_v7  ;;  %v99_v21 = vld [vmem:[%s7646_s1 + $0x98] sm:$0xff]  ;;  %v97_v23 = vld [vmem:[%s7646_s1 + $0x88] sm:$0xff]  ;;  %v122_v25 = vsel %vm112_vm0, %v83_v16, 0.0 }
   0x5   :  { %v114_v13 = vsel %vm112_vm0, %v96_v9, 0.0  ;;  %v123_v26 = vsel %vm112_vm0, %v99_v21, 0.0  ;;  %v116_v29 = vsel %vm112_vm0, %v81_v22, 0.0  ;;  %v130_v30 = vadd.f32 %v129_v20, %v128_v19  ;;  %v88_v34 = vld [vmem:[%s7646_s1 + $0x40] sm:$0xff]  ;;  %v87_v36 = vld [vmem:[%s7646_s1 + $0x38] sm:$0xff]  ;;  %v86_v38 = vld [vmem:[%s7646_s1 + $0x30] sm:$0xff] }
   0x6   :  { %v115_v18 = vadd.f32 %v114_v13, %v113_v12  ;;  %v165_v24 = vmax.f32 %v127_v10, 1e-12  ;;  %v163_v27 = vmax.f32 %v121_v17, 1e-12  ;;  %v117_v31 = vsel %vm112_vm0, %v97_v23, 0.0  ;;  %v104_v35 = vld [vmem:[%s7646_s1 + $0xc0] sm:$0xff] }
   0x7   :  { %v124_v32 = vadd.f32 %v123_v26, %v122_v25  ;;  %v118_v33 = vadd.f32 %v117_v31, %v116_v29  ;;  %v103_v37 = vld [vmem:[%s7646_s1 + $0xb8] sm:$0xff]  ;;  %v102_v39 = vld [vmem:[%s7646_s1 + $0xb0] sm:$0xff]  ;;  %v166_v40 = vmax.f32 %v130_v30, 1e-12  ;;  %v137_v43 = vsel %vm112_vm0, %v88_v34, 0.0  ;;  %v89_v57 = vld [vmem:[%s7646_s1 + $0x48] sm:$0xff] }
   0x8   :  { %v161_v28 = vmax.f32 %v115_v18, 1e-12  ;;  %199 = vperm.xlu2 %4357, %v165_v24   ;;  %189 = vperm.xlu1 %4356, %v163_v27   ;;  %v138_v44 = vsel %vm112_vm0, %v104_v35, 0.0  ;;  %v134_v45 = vsel %vm112_vm0, %v87_v36, 0.0  ;;  %v135_v46 = vsel %vm112_vm0, %v103_v37, 0.0  ;;  %v4295_v52 = vld [vmem:[%s7647_s3 + $0x38] sm:$0xff] }
   0x9   :  { %v164_v41 = vmax.f32 %v124_v32, 1e-12  ;;  %v162_v42 = vmax.f32 %v118_v33, 1e-12  ;;  %v131_v47 = vsel %vm112_vm0, %v86_v38, 0.0  ;;  %v132_v48 = vsel %vm112_vm0, %v102_v39, 0.0  ;;  %4304 = vmatpush.bf16.msra.mxu3 %v4295_v52  ;;  %617 = vmatpush.bf16.msra.mxu0 %v4295_v52 }
   0xa   :  { %179 = vperm.xlu0 %4355, %v161_v28   ;;  %v139_v49 = vadd.f32 %v138_v44, %v137_v43  ;;  %v136_v50 = vadd.f32 %v135_v46, %v134_v45  ;;  %v133_v51 = vadd.f32 %v132_v48, %v131_v47  ;;  %v91_v53 = vld [vmem:[%s7646_s1 + $0x58] sm:$0xff]  ;;  %v90_v55 = vld [vmem:[%s7646_s1 + $0x50] sm:$0xff]  ;;  %v105_v58 = vld [vmem:[%s7646_s1 + $0xc8] sm:$0xff]  ;;  %v140_v3 = vsel %vm112_vm0, %v89_v57, 0.0 }
   0xb   :  { %v107_v54 = vld [vmem:[%s7646_s1 + $0xd8] sm:$0xff]  ;;  %v106_v56 = vld [vmem:[%s7646_s1 + $0xd0] sm:$0xff]  ;;  %v146_v62 = vsel %vm112_vm0, %v91_v53, 0.0  ;;  %v143_v1 = vsel %vm112_vm0, %v90_v55, 0.0  ;;  %v141_v4 = vsel %vm112_vm0, %v105_v58, 0.0  ;;  %v93_v10 = vld [vmem:[%s7646_s1 + $0x68] sm:$0xff] }
   0xc   :  { %v169_v59 = vmax.f32 %v139_v49, 1e-12  ;;  %v168_v60 = vmax.f32 %v136_v50, 1e-12  ;;  %v167_v61 = vmax.f32 %v133_v51, 1e-12  ;;  %v142_v7 = vadd.f32 %v141_v4, %v140_v3 }
   0xd   :  { %v147_v63 = vsel %vm112_vm0, %v107_v54, 0.0  ;;  %v144_v2 = vsel %vm112_vm0, %v106_v56, 0.0  ;;  %v94_v8 = vld [vmem:[%s7646_s1 + $0x70] sm:$0xff]  ;;  %v109_v11 = vld [vmem:[%s7646_s1 + $0xe8] sm:$0xff]  ;;  %v92_v12 = vld [vmem:[%s7646_s1 + $0x60] sm:$0xff]  ;;  %v152_v19 = vsel %vm112_vm0, %v93_v10, 0.0 }
   0xe   :  { %v148_v5 = vadd.f32 %v147_v63, %v146_v62  ;;  %v145_v6 = vadd.f32 %v144_v2, %v143_v1  ;;  %v110_v9 = vld [vmem:[%s7646_s1 + $0xf0] sm:$0xff]  ;;  %v108_v13 = vld [vmem:[%s7646_s1 + $0xe0] sm:$0xff]  ;;  %v170_v16 = vmax.f32 %v142_v7, 1e-12  ;;  %v155_v17 = vsel %vm112_vm0, %v94_v8, 0.0  ;;  %v95_v26 = vld [vmem:[%s7646_s1 + $0x78] sm:$0xff] }
   0xf   :  { %v156_v18 = vsel %vm112_vm0, %v110_v9, 0.0  ;;  %v153_v20 = vsel %vm112_vm0, %v109_v11, 0.0  ;;  %v149_v21 = vsel %vm112_vm0, %v92_v12, 0.0  ;;  %v150_v22 = vsel %vm112_vm0, %v108_v13, 0.0  ;;  %v111_v27 = vld [vmem:[%s7646_s1 + $0xf8] sm:$0xff]  ;;  %v4294_v35 = vld [vmem:[%s7647_s3 + $0x30] sm:$0xff] }
  0x10   :  { %204 = vperm.xlu2 %4357, %v166_v40   ;;  %194 = vperm.xlu1 %4356, %v164_v41   ;;  %v172_v14 = vmax.f32 %v148_v5, 1e-12  ;;  %v171_v15 = vmax.f32 %v145_v6, 1e-12  ;;  %v157_v23 = vadd.f32 %v156_v18, %v155_v17  ;;  %v154_v24 = vadd.f32 %v153_v20, %v152_v19  ;;  %v4293_v36 = vld [vmem:[%s7647_s3 + $0x28] sm:$0xff]  ;;  %v4292_v37 = vld [vmem:[%s7647_s3 + $0x20] sm:$0xff] }
  0x11   :  { %v151_v25 = vadd.f32 %v150_v22, %v149_v21  ;;  %v158_v31 = vsel %vm112_vm0, %v95_v26, 0.0  ;;  %v159_v32 = vsel %vm112_vm0, %v111_v27, 0.0  ;;  %4305 = vmatpush.bf16.msra.mxu3 %v4294_v35  ;;  %618 = vmatpush.bf16.msra.mxu0 %v4294_v35  ;;  %v4291_v38 = vld [vmem:[%s7647_s3 + $0x18] sm:$0xff]  ;;  %v4290_v39 = vld [vmem:[%s7647_s3 + $0x10] sm:$0xff]  ;;  %v4289_v40 = vld [vmem:[%s7647_s3 + $0x8] sm:$0xff] }
  0x12   :  { %184 = vperm.xlu0 %4355, %v162_v42   ;;  %v175_v28 = vmax.f32 %v157_v23, 1e-12  ;;  %v174_v29 = vmax.f32 %v154_v24, 1e-12  ;;  %v160_v33 = vadd.f32 %v159_v32, %v158_v31  ;;  %v4288_v41 = vld [vmem:[%s7647_s3] sm:$0xff]  ;;  %v37_v56 = vld [vmem:[%s7648_s0 + $0x28] sm:$0xff] }
  0x13   :  { %v173_v30 = vmax.f32 %v151_v25, 1e-12  ;;  %v36_v55 = vld [vmem:[%s7648_s0 + $0x20] sm:$0xff]  ;;  %v53_v58 = vld [vmem:[%s7648_s0 + $0xa8] sm:$0xff]  ;;  %v38_v31 = vld [vmem:[%s7648_s0 + $0x30] sm:$0xff] }
  0x14   :  { %v176_v34 = vmax.f32 %v160_v33, 1e-12  ;;  %v52_v57 = vld [vmem:[%s7648_s0 + $0xa0] sm:$0xff]  ;;  %v69_v2 = vadd.f32 %v53_v58, %v37_v56  ;;  %v33_v23 = vld [vmem:[%s7648_s0 + $0x8] sm:$0xff]  ;;  %v54_v32 = vld [vmem:[%s7648_s0 + $0xb0] sm:$0xff] }
  0x15   :  { %4306 = vmatpush.bf16.msra.mxu3 %v4293_v36  ;;  %619 = vmatpush.bf16.msra.mxu0 %v4293_v36  ;;  %v68_v1 = vadd.f32 %v52_v57, %v36_v55  ;;  %v32_v20 = vld [vmem:[%s7648_s0] sm:$0xff]  ;;  %v49_v25 = vld [vmem:[%s7648_s0 + $0x88] sm:$0xff] }
  0x16   :  { %v48_v24 = vld [vmem:[%s7648_s0 + $0x80] sm:$0xff] }
  0x18   :  { %219 = vperm.xlu2 %4357, %v169_v59   ;;  %214 = vperm.xlu1 %4356, %v168_v60  }
  0x19   :  { %4307 = vmatpush.bf16.msra.mxu3 %v4292_v37  ;;  %620 = vmatpush.bf16.msra.mxu0 %v4292_v37 }
  0x1a   :  { %209 = vperm.xlu0 %4355, %v167_v61  }
  0x1d   :  { %4308 = vmatpush.bf16.msra.mxu3 %v4291_v38  ;;  %621 = vmatpush.bf16.msra.mxu0 %v4291_v38  ;;  %v39_v38 = vld [vmem:[%s7648_s0 + $0x38] sm:$0xff] }
  0x20   :  { %234 = vperm.xlu2 %4357, %v172_v14   ;;  %229 = vperm.xlu1 %4356, %v171_v15  }
  0x21   :  { %4309 = vmatpush.bf16.msra.mxu3 %v4290_v39  ;;  %622 = vmatpush.bf16.msra.mxu0 %v4290_v39  ;;  %v55_v39 = vld [vmem:[%s7648_s0 + $0xb8] sm:$0xff] }
  0x22   :  { %224 = vperm.xlu0 %4355, %v170_v16  }
  0x25   :  { %4310 = vmatpush.bf16.msra.mxu3 %v4289_v40  ;;  %623 = vmatpush.bf16.msra.mxu0 %v4289_v40 }
  0x28   :  { %249 = vperm.xlu2 %4357, %v175_v28   ;;  %244 = vperm.xlu1 %4356, %v174_v29   ;;  %v64_v29 = vadd.f32 %v48_v24, %v32_v20 }
  0x29   :  { %4311 = vmatpush.bf16.msra.mxu3 %v4288_v41  ;;  %624 = vmatpush.bf16.msra.mxu0 %v4288_v41 }
  0x2a   :  { %239 = vperm.xlu0 %4355, %v173_v30   ;;  %v65_v30 = vadd.f32 %v49_v25, %v33_v23 }
  0x32   :  { %254 = vperm.xlu0 %4355, %v176_v34  }
  0x62   :  { %v200_v42 = vpop.permute.xlu2 %199 }
  0x63   :  { %4524 = vrcp.f32 %v200_v42  ;;  %vm322_vm1 = vweird.f32 %v200_v42  ;;  %v326_v49 = vand.u32 2147483647, %v200_v42  ;;  %v328_v50 = vand.u32 2147483648, %v200_v42 }
  0x65   :  { %vm327_vm4 = vcmp.eq.f32.partialorder %v326_v49, 8.507059e+37  ;;  %v329_v59 = vor.u32 1.1754944e-38, %v328_v50  ;;  %v5338_v49 = vadd.f32 %v55_v39, %v39_v38 }
  0x69   :  { %v4525_v43 = vpop.eup %4524 }
  0x6a   :  { %v318_v44 = vmul.f32 %v4525_v43, %v200_v42  ;;  %v205_v45 = vpop.permute.xlu2 %204  ;;  %vm323_vm2 = vweird.f32 %v4525_v43 }
  0x6b   :  { %4526 = vrcp.f32 %v205_v45  ;;  %vm5252_vm3 = vmor %vm322_vm1, %vm323_vm2  ;;  %vm337_vm5 = vweird.f32 %v205_v45  ;;  %v343_v60 = vand.u32 2147483648, %v205_v45  ;;  %v341_v63 = vand.u32 2147483647, %v205_v45 }
  0x6c   :  { %v319_v46 = vsub.f32 1.0, %v318_v44  ;;  %v5329_v44 = vadd.f32 %v54_v32, %v38_v31 }
  0x6d   :  { %v344_v5 = vor.u32 1.1754944e-38, %v343_v60  ;;  %vm342_vm8 = vcmp.eq.f32.partialorder %v341_v63, 8.507059e+37 }
  0x6e   :  { %v320_v47 = vmul.f32 %v4525_v43, %v319_v46 }
  0x70   :  { %v321_v52 = vadd.f32 %v4525_v43, %v320_v47 }
  0x71   :  { %v4527_v48 = vpop.eup %4526 }
  0x72   :  { %v333_v51 = vmul.f32 %v4527_v48, %v205_v45  ;;  %v325_v61 = vsel %vm5252_vm3, %v4525_v43, %v321_v52  ;;  %vm338_vm6 = vweird.f32 %v4527_v48  ;;  %v5270_v6 = vpop.permute.xlu2 %219 }
  0x73   :  { %v330_v4 = vsel %vm327_vm4, %v329_v59, %v325_v61  ;;  %vm339_vm7 = vmor %vm337_vm5, %vm338_vm6 }
  0x74   :  { %v334_v54 = vsub.f32 1.0, %v333_v51  ;;  %v331_v11 = vmul.f32 %v330_v4, %v68_v1 }
  0x76   :  { %v335_v62 = vmul.f32 %v4527_v48, %v334_v54 }
  0x78   :  { %v336_v3 = vadd.f32 %v4527_v48, %v335_v62 }
  0x7a   :  { %v340_v7 = vsel %vm339_vm7, %v4527_v48, %v336_v3  ;;  %v5272_v8 = vpop.permute.xlu1 %189  ;;  %v5291_v22 = vpop.permute.xlu2 %234 }
  0x7b   :  { %v345_v10 = vsel %vm342_vm8, %v344_v5, %v340_v7  ;;  %v298_v45 = vand.u32 2147483648, %v5272_v8  ;;  %vm292_vm12 = vweird.f32 %v5272_v8  ;;  %v296_v53 = vand.u32 2147483647, %v5272_v8 }
  0x7c   :  { %v180_v9 = vpop.permute.xlu0 %179  ;;  %v346_v12 = vmul.f32 %v345_v10, %v69_v2 }
  0x7d   :  { %4528 = vrcp.f32 %v180_v9  ;;  %vm262_vm9 = vweird.f32 %v180_v9  ;;  %v268_v42 = vand.u32 2147483648, %v180_v9  ;;  %v266_v43 = vand.u32 2147483647, %v180_v9 }
  0x7e   :  { %4530 = vrcp.f32 %v5270_v6  ;;  %v547_v13 = vpack.c.bf16 %v346_v12, %v331_v11  ;;  %v5350_v58 = vor.u32 1.1754944e-38, %v298_v45  ;;  %vm5362_vm5 = vcmp.eq.f32.partialorder %v296_v53, 8.507059e+37 }
  0x7f   :  { %4532 = vrcp.f32 %v5272_v8  ;;  %v269_v56 = vor.u32 1.1754944e-38, %v268_v42  ;;  %vm267_vm14 = vcmp.eq.f32.partialorder %v266_v43, 8.507059e+37 }
  0x80   :  { %635 = vmatmul.bf16.vlgmr.msra.gmra.mxu3 %v547_v13 }
  0x82   :  { %v5276_v15 = vpop.permute.xlu1 %194 }
  0x83   :  { %v4529_v14 = vpop.eup %4528  ;;  %4534 = vrcp.f32 %v5276_v15  ;;  %vm307_vm1 = vweird.f32 %v5276_v15  ;;  %v311_v4 = vand.u32 2147483647, %v5276_v15 }
  0x84   :  { %v5278_v16 = vpop.permute.xlu0 %184  ;;  %v5280_v17 = vpop.eup %4530  ;;  %v258_v18 = vmul.f32 %v4529_v14, %v180_v9  ;;  %vm263_vm10 = vweird.f32 %v4529_v14 }
  0x85   :  { %4536 = vrcp.f32 %v5278_v16  ;;  %v5289_v21 = vmul.f32 %v5280_v17, %v5270_v6  ;;  %v5302_v27 = vpop.eup %4532  ;;  %vm5334_vm11 = vmor %vm262_vm9, %vm263_vm10  ;;  %v281_v51 = vand.u32 2147483647, %v5278_v16  ;;  %v283_v52 = vand.u32 2147483648, %v5278_v16 }
  0x86   :  { %v259_v19 = vsub.f32 1.0, %v258_v18  ;;  %4538 = vrcp.f32 %v5291_v22  ;;  %v288_v40 = vmul.f32 %v5302_v27, %v5272_v8  ;;  %vm277_vm15 = vweird.f32 %v5278_v16 }
  0x87   :  { %v379_v34 = vsub.f32 1.0, %v5289_v21  ;;  %vm293_vm0 = vweird.f32 %v5302_v27  ;;  %vm282_vm3 = vcmp.eq.f32.partialorder %v281_v51, 8.507059e+37  ;;  %v284_v3 = vor.u32 1.1754944e-38, %v283_v52  ;;  %v50_v51 = vld [vmem:[%s7648_s0 + $0x90] sm:$0xff]  ;;  %v51_v52 = vld [vmem:[%s7648_s0 + $0x98] sm:$0xff] }
  0x88   :  { %v260_v26 = vmul.f32 %v4529_v14, %v259_v19  ;;  %v289_v55 = vsub.f32 1.0, %v288_v40  ;;  %vm5374_vm8 = vmor %vm292_vm12, %vm293_vm0 }
  0x89   :  { %v5304_v28 = vpop.eup %4534 }
  0x8a   :  { %v5314_v35 = vpop.permute.xlu1 %214  ;;  %v261_v37 = vadd.f32 %v4529_v14, %v260_v26  ;;  %v303_v46 = vmul.f32 %v5304_v28, %v5276_v15  ;;  %v290_v9 = vmul.f32 %v5302_v27, %v289_v55  ;;  %vm308_vm4 = vweird.f32 %v5304_v28 }
  0x8b   :  { %v4537_v33 = vpop.eup %4536  ;;  %4540 = vrcp.f32 %v5314_v35  ;;  %v371_v24 = vand.u32 2147483647, %v5314_v35  ;;  %vm367_vm9 = vweird.f32 %v5314_v35  ;;  %vm5384_vm10 = vmor %vm307_vm1, %vm308_vm4 }
  0x8c   :  { %v5316_v36 = vpop.permute.xlu0 %209  ;;  %v273_v41 = vmul.f32 %v4537_v33, %v5278_v16  ;;  %v265_v50 = vsel %vm5334_vm11, %v4529_v14, %v261_v37  ;;  %v5346_v54 = vpop.eup %4538  ;;  %vm278_vm13 = vweird.f32 %v4537_v33  ;;  %v304_v60 = vsub.f32 1.0, %v303_v46  ;;  %v34_v46 = vld [vmem:[%s7648_s0 + $0x10] sm:$0xff] }
  0x8d   :  { %4542 = vrcp.f32 %v5316_v36  ;;  %v270_v61 = vsel %vm267_vm14, %v269_v56, %v265_v50  ;;  %vm279_vm2 = vmor %vm277_vm15, %vm278_vm13  ;;  %v373_v16 = vand.u32 2147483648, %v5314_v35  ;;  %v358_v20 = vand.u32 2147483648, %v5316_v36  ;;  %v35_v50 = vld [vmem:[%s7648_s0 + $0x18] sm:$0xff] }
  0x8e   :  { %v274_v47 = vsub.f32 1.0, %v273_v41  ;;  %v271_v11 = vmul.f32 %v270_v61, %v64_v29  ;;  %v305_v19 = vmul.f32 %v5304_v28, %v304_v60  ;;  %v356_v29 = vand.u32 2147483647, %v5316_v36 }
  0x8f   :  { %v291_v32 = vadd.f32 %v5302_v27, %v290_v9  ;;  %v313_v37 = vand.u32 2147483648, %v5276_v15  ;;  %vm352_vm11 = vweird.f32 %v5316_v36  ;;  %v359_v41 = vor.u32 1.1754944e-38, %v358_v20 }
  0x90   :  { %v275_v57 = vmul.f32 %v4537_v33, %v274_v47  ;;  %v306_v39 = vadd.f32 %v5304_v28, %v305_v19  ;;  %vm372_vm14 = vcmp.eq.f32.partialorder %v371_v24, 8.507059e+37  ;;  %vm5395_vm15 = vcmp.eq.f32.partialorder %v311_v4, 8.507059e+37 }
  0x91   :  { %v4541_v59 = vpop.eup %4540  ;;  %vm357_vm0 = vcmp.eq.f32.partialorder %v356_v29, 8.507059e+37  ;;  %v314_v53 = vor.u32 1.1754944e-38, %v313_v37  ;;  %v66_v61 = vadd.f32 %v50_v51, %v34_v46  ;;  %v388_v9 = vand.u32 2147483648, %v5270_v6  ;;  %v43_v51 = vld [vmem:[%s7648_s0 + $0x58] sm:$0xff] }
  0x92   :  { %v276_v62 = vadd.f32 %v4537_v33, %v275_v57  ;;  %v363_v1 = vmul.f32 %v4541_v59, %v5314_v35  ;;  %vm368_vm6 = vweird.f32 %v4541_v59  ;;  %v5389_v8 = vpop.permute.xlu1 %229  ;;  %v374_v35 = vor.u32 1.1754944e-38, %v373_v16  ;;  %v56_v16 = vld [vmem:[%s7648_s0 + $0xc0] sm:$0xff] }
  0x93   :  { %v4543_v63 = vpop.eup %4542  ;;  %vm369_vm12 = vmor %vm367_vm9, %vm368_vm6  ;;  %v310_v57 = vsel %vm5384_vm10, %v5304_v28, %v306_v39  ;;  %v389_v24 = vor.u32 1.1754944e-38, %v388_v9  ;;  %vm412_vm10 = vweird.f32 %v5389_v8  ;;  %v416_v43 = vand.u32 2147483647, %v5389_v8  ;;  %v45_v9 = vld [vmem:[%s7648_s0 + $0x68] sm:$0xff] }
  0x94   :  { %v5354_v2 = vpop.permute.xlu0 %224  ;;  %v348_v5 = vmul.f32 %v4543_v63, %v5316_v36  ;;  %v280_v7 = vsel %vm279_vm2, %v4537_v33, %v276_v62  ;;  %v364_v10 = vsub.f32 1.0, %v363_v1  ;;  %vm353_vm7 = vweird.f32 %v4543_v63 }
  0x95   :  { %4544 = vrcp.f32 %v5354_v2  ;;  %v285_v12 = vsel %vm282_vm3, %v284_v3, %v280_v7  ;;  %vm354_vm13 = vmor %vm352_vm11, %vm353_vm7  ;;  %v67_v62 = vadd.f32 %v51_v52, %v35_v50  ;;  %v315_v1 = vsel %vm5395_vm15, %v314_v53, %v310_v57  ;;  %v57_v7 = vld [vmem:[%s7648_s0 + $0xc8] sm:$0xff]  ;;  %v59_v52 = vld [vmem:[%s7648_s0 + $0xd8] sm:$0xff] }
  0x96   :  { %v349_v13 = vsub.f32 1.0, %v348_v5  ;;  %v286_v14 = vmul.f32 %v285_v12, %v65_v30  ;;  %v365_v23 = vmul.f32 %v4541_v59, %v364_v10  ;;  %4546 = vrcp.f32 %v5389_v8  ;;  %v41_v5 = vld [vmem:[%s7648_s0 + $0x48] sm:$0xff] }
  0x97   :  { %vm383_vm2 = vweird.f32 %v5280_v17  ;;  %v403_v28 = vand.u32 2147483648, %v5354_v2  ;;  %v316_v4 = vmul.f32 %v315_v1, %v67_v62  ;;  %vm397_vm3 = vweird.f32 %v5354_v2  ;;  %v5506_v62 = vpop.permute.xlu2 %249 }
  0x98   :  { %v545_v25 = vpack.c.bf16 %v286_v14, %v271_v11  ;;  %v350_v26 = vmul.f32 %v4543_v63, %v349_v13  ;;  %v366_v31 = vadd.f32 %v4541_v59, %v365_v23  ;;  %v423_v13 = vmul.f32 %v5346_v54, %v5291_v22  ;;  %v40_v14 = vld [vmem:[%s7648_s0 + $0x40] sm:$0xff] }
  0x99   :  { %v404_v18 = vor.u32 1.1754944e-38, %v403_v28  ;;  %v72_v30 = vadd.f32 %v56_v16, %v40_v14  ;;  %vm428_vm11 = vweird.f32 %v5346_v54  ;;  %v433_v46 = vand.u32 2147483648, %v5291_v22 }
  0x9a   :  { %625 = vmatmul.bf16.vlgmr.msra.gmra.mxu0 %v545_v25  ;;  %v351_v38 = vadd.f32 %v4543_v63, %v350_v26  ;;  %v370_v42 = vsel %vm369_vm12, %v4541_v59, %v366_v31  ;;  %v380_v59 = vmul.f32 %v5280_v17, %v379_v34  ;;  %v5464_v23 = vpop.permute.xlu1 %244  ;;  %v431_v50 = vand.u32 2147483647, %v5291_v22 }
  0x9b   :  { %v4545_v40 = vpop.eup %4544  ;;  %v375_v36 = vsel %vm372_vm14, %v374_v35, %v370_v42  ;;  %4548 = vrcp.f32 %v5464_v23  ;;  %v418_v42 = vand.u32 2147483648, %v5389_v8  ;;  %vm417_vm15 = vcmp.eq.f32.partialorder %v416_v43, 8.507059e+37  ;;  %v5610_v43 = vld [vmem:[%s7650_s5 + $0x50] sm:$0xff] }
  0x9c   :  { %v393_v15 = vmul.f32 %v4545_v40, %v5354_v2  ;;  %v355_v45 = vsel %vm354_vm13, %v4543_v63, %v351_v38  ;;  %v376_v48 = vmul.f32 %v375_v36, %v5338_v49  ;;  %v295_v49 = vsel %vm5374_vm8, %v5302_v27, %v291_v32  ;;  %v5429_v3 = vpop.eup %4546  ;;  %v5466_v29 = vpop.permute.xlu0 %239  ;;  %v58_v36 = vld [vmem:[%s7648_s0 + $0xd0] sm:$0xff] }
  0x9d   :  { %v360_v47 = vsel %vm357_vm0, %v359_v41, %v355_v45  ;;  %vm398_vm1 = vweird.f32 %v4545_v40  ;;  %v381_v21 = vadd.f32 %v5280_v17, %v380_v59  ;;  %v408_v11 = vmul.f32 %v5429_v3, %v5389_v8  ;;  %v42_v45 = vld [vmem:[%s7648_s0 + $0x50] sm:$0xff] }
  0x9e   :  { %v394_v55 = vsub.f32 1.0, %v393_v15  ;;  %v361_v56 = vmul.f32 %v360_v47, %v5329_v44  ;;  %v300_v44 = vsel %vm5362_vm5, %v5350_v58, %v295_v49  ;;  %v401_v58 = vand.u32 2147483647, %v5354_v2  ;;  %vm5443_vm4 = vmor %vm397_vm3, %vm398_vm1 }
  0x9f   :  { %v301_v34 = vmul.f32 %v300_v44, %v66_v61  ;;  %vm382_vm5 = vweird.f32 %v5270_v6  ;;  %v386_v2 = vand.u32 2147483647, %v5270_v6  ;;  %v73_v6 = vadd.f32 %v57_v7, %v41_v5  ;;  %v44_v7 = vld [vmem:[%s7648_s0 + $0x60] sm:$0xff] }
  0xa0   :  { %v548_v60 = vpack.c.bf16 %v376_v48, %v361_v56  ;;  %v395_v63 = vmul.f32 %v4545_v40, %v394_v55  ;;  %vm384_vm6 = vmor %vm382_vm5, %vm383_vm2  ;;  %vm402_vm7 = vcmp.eq.f32.partialorder %v401_v58, 8.507059e+37  ;;  %v409_v26 = vsub.f32 1.0, %v408_v11  ;;  %v680_v58 = vld [vmem:[%s7649_s4 + $0x70] sm:$0xff] }
  0xa1   :  { %v546_v19 = vpack.c.bf16 %v316_v4, %v301_v34  ;;  %v385_v20 = vsel %vm384_vm6, %v5280_v17, %v381_v21  ;;  %vm387_vm8 = vcmp.eq.f32.partialorder %v386_v2, 8.507059e+37  ;;  %v424_v32 = vsub.f32 1.0, %v423_v13  ;;  %v5472_v39 = vpop.eup %4548  ;;  %v681_v34 = vld [vmem:[%s7649_s4 + $0x78] sm:$0xff]  ;;  %v5542_v2 = vld [vmem:[%s7650_s5 + $0x70] sm:$0xff] }
  0xa2   :  { %640 = vmatmul.bf16.gmra.mxu3 %v548_v60  ;;  %v396_v27 = vadd.f32 %v4545_v40, %v395_v63  ;;  %v390_v31 = vsel %vm387_vm8, %v389_v24, %v385_v20  ;;  %4550 = vrcp.f32 %v5466_v29  ;;  %v410_v17 = vmul.f32 %v5429_v3, %v409_v26  ;;  %v5522_v4 = vld [vmem:[%s7650_s5 + $0x78] sm:$0xff]  ;;  %4312 = vmatpush.msra.mxu1 %v681_v34  ;;  %v61_v20 = vld [vmem:[%s7648_s0 + $0xe8] sm:$0xff] }
  0xa3   :  { %v391_v37 = vmul.f32 %v390_v31, %v72_v30  ;;  %v425_v35 = vmul.f32 %v5346_v54, %v424_v32  ;;  %vm413_vm9 = vweird.f32 %v5429_v3  ;;  %vm427_vm13 = vweird.f32 %v5291_v22  ;;  %4328 = vmatpush.msra.mxu2 %v5522_v4  ;;  %682 = vmatpush.msrb.mxu0 %v681_v34  ;;  %v5590_v30 = vld [vmem:[%s7650_s5 + $0x60] sm:$0xff] }
  0xa4   :  { %v400_v12 = vsel %vm5443_vm4, %v4545_v40, %v396_v27  ;;  %v411_v40 = vadd.f32 %v5429_v3, %v410_v17  ;;  %vm414_vm12 = vmor %vm412_vm10, %vm413_vm9  ;;  %v453_v8 = vmul.f32 %v5472_v39, %v5464_v23  ;;  %v419_v53 = vor.u32 1.1754944e-38, %v418_v42  ;;  %v5504_v61 = vpop.permute.xlu0 %254  ;;  %4313 = vmatpush.msra.mxu1 %v680_v58  ;;  %v676_v42 = vld [vmem:[%s7649_s4 + $0x50] sm:$0xff]  ;;  %v751_v34 = vld [vmem:[%s7650_s5 + $0x20] sm:$0xff] }
  0xa5   :  { %v405_v25 = vsel %vm402_vm7, %v404_v18, %v400_v12  ;;  %v426_v15 = vadd.f32 %v5346_v54, %v425_v35  ;;  %vm429_vm14 = vmor %vm427_vm13, %vm428_vm11  ;;  %v74_v55 = vadd.f32 %v58_v36, %v42_v45  ;;  %v434_v57 = vor.u32 1.1754944e-38, %v433_v46  ;;  %v679_v18 = vld [vmem:[%s7649_s4 + $0x68] sm:$0xff]  ;;  %4329 = vmatpush.msra.mxu2 %v5542_v2  ;;  %683 = vmatpush.msrb.mxu0 %v680_v58  ;;  %v5601_v35 = vld [vmem:[%s7650_s5 + $0x58] sm:$0xff] }
  0xa6   :  { %v406_v33 = vmul.f32 %v405_v25, %v73_v6  ;;  %v415_v48 = vsel %vm414_vm12, %v5429_v3, %v411_v40  ;;  %v454_v59 = vsub.f32 1.0, %v453_v8  ;;  %v75_v22 = vadd.f32 %v59_v52, %v43_v51  ;;  %v60_v6 = vld [vmem:[%s7648_s0 + $0xe0] sm:$0xff]  ;;  %4314 = vmatpush.msra.mxu1 %v679_v18  ;;  %v675_v46 = vld [vmem:[%s7649_s4 + $0x48] sm:$0xff]  ;;  %v46_v58 = vld [vmem:[%s7648_s0 + $0x70] sm:$0xff] }
  0xa7   :  { %v430_v56 = vsel %vm429_vm14, %v5346_v54, %v426_v15  ;;  %v420_v49 = vsel %vm417_vm15, %v419_v53, %v415_v48  ;;  %vm432_vm0 = vcmp.eq.f32.partialorder %v431_v50, 8.507059e+37  ;;  %4552 = vrcp.f32 %v5504_v61  ;;  %684 = vmatpush.msrb.mxu0 %v679_v18  ;;  %v5619_v8 = vld [vmem:[%s7650_s5 + $0x48] sm:$0xff]  ;;  %v674_v48 = vld [vmem:[%s7649_s4 + $0x40] sm:$0xff]  ;;  %v673_v53 = vld [vmem:[%s7649_s4 + $0x38] sm:$0xff] }
  0xa8   :  { %v549_v38 = vpack.c.bf16 %v406_v33, %v391_v37  ;;  %v5476_v41 = vpop.eup %4550  ;;  %v435_v63 = vsel %vm432_vm0, %v434_v57, %v430_v56  ;;  %v421_v44 = vmul.f32 %v420_v49, %v74_v55  ;;  %4554 = vrcp.f32 %v5506_v62  ;;  %v5629_v50 = vld [vmem:[%s7650_s5 + $0x40] sm:$0xff]  ;;  %v5639_v55 = vld [vmem:[%s7650_s5 + $0x38] sm:$0xff]  ;;  %v672_v49 = vld [vmem:[%s7649_s4 + $0x30] sm:$0xff] }
  0xa9   :  { %v438_v47 = vmul.f32 %v5476_v41, %v5466_v29  ;;  %v436_v1 = vmul.f32 %v435_v63, %v75_v22  ;;  %v455_v54 = vmul.f32 %v5472_v39, %v454_v59  ;;  %vm458_vm1 = vweird.f32 %v5472_v39  ;;  %v5650_v57 = vld [vmem:[%s7650_s5 + $0x30] sm:$0xff]  ;;  %v671_v63 = vld [vmem:[%s7649_s4 + $0x28] sm:$0xff] }
  0xaa   :  { %630 = vmatmul.bf16.gmra.mxu0 %v546_v19  ;;  %vm443_vm2 = vweird.f32 %v5476_v41  ;;  %v448_v10 = vand.u32 2147483648, %v5466_v29  ;;  %vm457_vm3 = vweird.f32 %v5464_v23  ;;  %v463_v11 = vand.u32 2147483648, %v5464_v23  ;;  %v5561_v19 = vld [vmem:[%s7650_s5 + $0x68] sm:$0xff] }
  0xab   :  { %v439_v60 = vsub.f32 1.0, %v438_v47  ;;  %v550_v3 = vpack.c.bf16 %v436_v1, %v421_v44  ;;  %v456_v28 = vadd.f32 %v5472_v39, %v455_v54  ;;  %vm442_vm4 = vweird.f32 %v5466_v29  ;;  %vm5550_vm5 = vmor %vm457_vm3, %vm458_vm1  ;;  %4330 = vmatpush.msra.mxu2 %v5561_v19  ;;  %v5664_v44 = vld [vmem:[%s7650_s5 + $0x28] sm:$0xff]  ;;  %v47_v1 = vld [vmem:[%s7648_s0 + $0x78] sm:$0xff] }
  0xac   :  { %v446_v13 = vand.u32 2147483647, %v5466_v29  ;;  %v461_v16 = vand.u32 2147483647, %v5464_v23  ;;  %vm5571_vm6 = vmor %vm442_vm4, %vm443_vm2  ;;  %v678_v29 = vld [vmem:[%s7649_s4 + $0x60] sm:$0xff]  ;;  %v449_v32 = vor.u32 1.1754944e-38, %v448_v10  ;;  %v76_v37 = vadd.f32 %v60_v6, %v44_v7 }
  0xad   :  { %v440_v27 = vmul.f32 %v5476_v41, %v439_v60  ;;  %v5527_v5 = vpop.eup %4552  ;;  %v460_v26 = vsel %vm5550_vm5, %v5472_v39, %v456_v28  ;;  %v464_v33 = vor.u32 1.1754944e-38, %v463_v11  ;;  %v77_v17 = vadd.f32 %v61_v20, %v45_v9  ;;  %4315 = vmatpush.msra.mxu1 %v678_v29  ;;  %4331 = vmatpush.msra.mxu2 %v5590_v30  ;;  %v670_v28 = vld [vmem:[%s7649_s4 + $0x20] sm:$0xff]  ;;  %v669_v11 = vld [vmem:[%s7649_s4 + $0x18] sm:$0xff]  ;;  %v749_v6 = vld [vmem:[%s7650_s5 + $0x10] sm:$0xff] }
  0xae   :  { %v5544_v12 = vpop.eup %4554  ;;  %v483_v24 = vmul.f32 %v5527_v5, %v5504_v61  ;;  %vm447_vm7 = vcmp.eq.f32.partialorder %v446_v13, 8.507059e+37  ;;  %vm462_vm8 = vcmp.eq.f32.partialorder %v461_v16, 8.507059e+37  ;;  %685 = vmatpush.msrb.mxu0 %v678_v29  ;;  %vm488_vm9 = vweird.f32 %v5527_v5  ;;  %v750_v13 = vld [vmem:[%s7650_s5 + $0x18] sm:$0xff] }
  0xaf   :  { %v441_v21 = vadd.f32 %v5476_v41, %v440_v27  ;;  %v468_v31 = vmul.f32 %v5544_v12, %v5506_v62  ;;  %v465_v40 = vsel %vm462_vm8, %v464_v33, %v460_v26  ;;  %4332 = vmatpush.msra.mxu2 %v5601_v35  ;;  %v493_v59 = vand.u32 2147483648, %v5504_v61  ;;  %v63_v27 = vld [vmem:[%s7648_s0 + $0xf8] sm:$0xff] }
  0xb0   :  { %v466_v36 = vmul.f32 %v465_v40, %v77_v17  ;;  %vm473_vm10 = vweird.f32 %v5544_v12  ;;  %vm487_vm11 = vweird.f32 %v5504_v61  ;;  %v491_v22 = vand.u32 2147483647, %v5504_v61 }
  0xb1   :  { %v445_v25 = vsel %vm5571_vm6, %v5476_v41, %v441_v21  ;;  %v484_v41 = vsub.f32 1.0, %v483_v24  ;;  %v469_v15 = vsub.f32 1.0, %v468_v31  ;;  %4333 = vmatpush.msra.mxu2 %v5610_v43  ;;  %v478_v61 = vand.u32 2147483648, %v5506_v62  ;;  %vm5675_vm12 = vmor %vm487_vm11, %vm488_vm9  ;;  %v667_v24 = vld [vmem:[%s7649_s4 + $0x8] sm:$0xff]  ;;  %v666_v31 = vld [vmem:[%s7649_s4] sm:$0xff] }
  0xb2   :  { %645 = vmatmul.bf16.gmra.mxu3 %v549_v38  ;;  %v677_v38 = vld [vmem:[%s7649_s4 + $0x58] sm:$0xff]  ;;  %v450_v39 = vsel %vm447_vm7, %v449_v32, %v445_v25  ;;  %vm472_vm13 = vweird.f32 %v5506_v62  ;;  %v494_v7 = vor.u32 1.1754944e-38, %v493_v59  ;;  %v79_v9 = vadd.f32 %v63_v27, %v47_v1  ;;  %v748_v25 = vld [vmem:[%s7650_s5 + $0x8] sm:$0xff]  ;;  %v747_v32 = vld [vmem:[%s7650_s5] sm:$0xff]  ;;  %s5039_s5 = smov 127  }
  0xb3   :  { %4316 = vmatpush.msra.mxu1 %v677_v38  ;;  %v451_v45 = vmul.f32 %v450_v39, %v76_v37  ;;  %686 = vmatpush.msrb.mxu0 %v677_v38  ;;  %v485_v47 = vmul.f32 %v5527_v5, %v484_v41  ;;  %v470_v52 = vmul.f32 %v5544_v12, %v469_v15  ;;  %vm5699_vm14 = vmor %vm472_vm13, %vm473_vm10  ;;  %vm492_vm15 = vcmp.eq.f32.partialorder %v491_v22, 8.507059e+37 }
  0xb4   :  { %4334 = vmatpush.msra.mxu2 %v5619_v8  ;;  %v479_v14 = vor.u32 1.1754944e-38, %v478_v61 }
  0xb5   :  { %4317 = vmatpush.msra.mxu1 %v676_v42  ;;  %687 = vmatpush.msrb.mxu0 %v676_v42  ;;  %v551_v51 = vpack.c.bf16 %v466_v36, %v451_v45  ;;  %v486_v56 = vadd.f32 %v5527_v5, %v485_v47  ;;  %v471_v60 = vadd.f32 %v5544_v12, %v470_v52 }
  0xb6   :  { %4335 = vmatpush.msra.mxu2 %v5629_v50 }
  0xb7   :  { %4318 = vmatpush.msra.mxu1 %v675_v46  ;;  %688 = vmatpush.msrb.mxu0 %v675_v46  ;;  %v490_v21 = vsel %vm5675_vm12, %v5527_v5, %v486_v56  ;;  %v475_v10 = vsel %vm5699_vm14, %v5544_v12, %v471_v60  ;;  %v668_v12 = vld [vmem:[%s7649_s4 + $0x10] sm:$0xff]  ;;  %s5037_s4 = smov 96  }
  0xb8   :  { %4336 = vmatpush.msra.mxu2 %v5639_v55  ;;  %v495_v16 = vsel %vm492_vm15, %v494_v7, %v490_v21 }
  0xb9   :  { %4319 = vmatpush.msra.mxu1 %v674_v48  ;;  %689 = vmatpush.msrb.mxu0 %v674_v48  ;;  %v496_v23 = vmul.f32 %v495_v16, %v79_v9 }
  0xba   :  { %4337 = vmatpush.msra.mxu2 %v5650_v57 }
  0xbb   :  { %4320 = vmatpush.msra.mxu1 %v673_v53  ;;  %690 = vmatpush.msrb.mxu0 %v673_v53 }
  0xbc   :  { %4338 = vmatpush.msra.mxu2 %v5664_v44 }
  0xbd   :  { %4321 = vmatpush.msra.mxu1 %v672_v49  ;;  %691 = vmatpush.msrb.mxu0 %v672_v49 }
  0xbe   :  { %4339 = vmatpush.msra.mxu2 %v751_v34 }
  0xbf   :  { %4322 = vmatpush.msra.mxu1 %v671_v63  ;;  %692 = vmatpush.msrb.mxu0 %v671_v63 }
  0xc0   :  { %4340 = vmatpush.msra.mxu2 %v750_v13 }
  0xc1   :  { %4323 = vmatpush.msra.mxu1 %v670_v28  ;;  %693 = vmatpush.msrb.mxu0 %v670_v28 }
  0xc2   :  { %650 = vmatmul.bf16.gmra.mxu3 %v550_v3  ;;  %v476_v3 = vand.u32 2147483647, %v5506_v62  ;;  %v62_v62 = vld [vmem:[%s7648_s0 + $0xf0] sm:$0xff]  ;;  %4341 = vmatpush.msra.mxu2 %v749_v6 }
  0xc3   :  { %v78_v18 = vadd.f32 %v62_v62, %v46_v58  ;;  %4324 = vmatpush.msra.mxu1 %v669_v11  ;;  %694 = vmatpush.msrb.mxu0 %v669_v11 }
  0xc4   :  { %vm477_vm0 = vcmp.eq.f32.partialorder %v476_v3, 8.507059e+37  ;;  %4342 = vmatpush.msra.mxu2 %v748_v25 }
  0xc5   :  { %v480_v20 = vsel %vm477_vm0, %v479_v14, %v475_v10  ;;  %4325 = vmatpush.msra.mxu1 %v668_v12  ;;  %695 = vmatpush.msrb.mxu0 %v668_v12 }
  0xc6   :  { %v481_v26 = vmul.f32 %v480_v20, %v78_v18  ;;  %4343 = vmatpush.msra.mxu2 %v747_v32 }
  0xc7   :  { %4326 = vmatpush.msra.mxu1 %v667_v24  ;;  %696 = vmatpush.msrb.mxu0 %v667_v24 }
  0xc8   :  { %v552_v29 = vpack.c.bf16 %v496_v23, %v481_v26 }
  0xc9   :  { %4327 = vmatpush.msra.mxu1 %v666_v31  ;;  %697 = vmatpush.msrb.mxu0 %v666_v31 }
  0xcb   :  { %763 = vmatpush.msra.mxu0 %v5522_v4 }
  0xcd   :  { %764 = vmatpush.msra.mxu0 %v5542_v2 }
  0xcf   :  { %765 = vmatpush.msra.mxu0 %v5561_v19 }
  0xd1   :  { %766 = vmatpush.msra.mxu0 %v5590_v30 }
  0xd2   :  { %655 = vmatmul.bf16.gmra.mxu3 %v551_v51 }
  0xd3   :  { %767 = vmatpush.msra.mxu0 %v5601_v35 }
  0xd5   :  { %768 = vmatpush.msra.mxu0 %v5610_v43 }
  0xd7   :  { %769 = vmatpush.msra.mxu0 %v5619_v8 }
  0xd9   :  { %770 = vmatpush.msra.mxu0 %v5629_v50 }
  0xdb   :  { %771 = vmatpush.msra.mxu0 %v5639_v55 }
  0xdd   :  { %772 = vmatpush.msra.mxu0 %v5650_v57 }
  0xdf   :  { %773 = vmatpush.msra.mxu0 %v5664_v44 }
  0xe1   :  { %774 = vmatpush.msra.mxu0 %v751_v34 }
  0xe2   :  { %660 = vmatmul.bf16.gmra.mxu3 %v552_v29 }
  0xe3   :  { %775 = vmatpush.msra.mxu0 %v750_v13  ;;  %v7668_v13 = vmov 1  }
  0xe4   :  { %4360 = vset.pattern.permute.xlu0 %v7668_v13 }
  0xe5   :  { %776 = vmatpush.msra.mxu0 %v749_v6 }
  0xe7   :  { %777 = vmatpush.msra.mxu0 %v748_v25 }
  0xe9   :  { %778 = vmatpush.msra.mxu0 %v747_v32 }
 0x103   :  { %v636_v4 = vpop.f32.mrf.mxu3 }
 0x104   :  { %710 = vmatmul.f32.vlgmr.msra.gmra.mxu1 %v636_v4  ;;  %791 = vmatmul.f32.vlgmr.msra.gmra.mxu2 %v636_v4  ;;  %v832_v41 = vpack.c.bf16 %v636_v4, %v636_v4 }
 0x106   :  { %v1193_v15 = vunpack.c.l.b16 %v832_v41 }
 0x10b   :  { %v638_v2 = vpop.f32.mrf.mxu3 }
 0x10c   :  { %713 = vmatmul.f32.gmra.mxu1 %v638_v2  ;;  %794 = vmatmul.f32.gmra.mxu2 %v638_v2  ;;  %v833_v39 = vpack.c.bf16 %v638_v2, %v638_v2 }
 0x10e   :  { %v1194_v43 = vunpack.c.l.b16 %v833_v39 }
 0x110   :  { %v5746_v36 = vpack.c.b16 %v1194_v43, %v1193_v15 }
 0x112   :  { %7755 = vst [vmem:[#allocation3_spill] sm:$0xff] %v5746_v36 }
 0x117   :  { %v626_v19 = vpop.f32.mrf.mxu0 }
 0x118   :  { %698 = vmatmul.f32.vlgmr.msrb.gmra.mxu0 %v626_v19  ;;  %v828_v30 = vpack.c.bf16 %v626_v19, %v626_v19 }
 0x11a   :  { %v1189_v17 = vunpack.c.l.b16 %v828_v30 }
 0x11f   :  { %v628_v33 = vpop.f32.mrf.mxu0 }
 0x120   :  { %v829_v37 = vpack.c.bf16 %v628_v33, %v628_v33  ;;  %701 = vmatmul.f32.gmra.mxu0 %v628_v33 }
 0x122   :  { %v1190_v38 = vunpack.c.l.b16 %v829_v37 }
 0x124   :  { %v5742_v35 = vpack.c.b16 %v1190_v38, %v1189_v17 }
 0x125   :  { %v641_v40 = vpop.f32.mrf.mxu3 }
 0x126   :  { %7754 = vst [vmem:[#allocation2_spill] sm:$0xff] %v5742_v35  ;;  %716 = vmatmul.f32.gmra.mxu1 %v641_v40  ;;  %797 = vmatmul.f32.gmra.mxu2 %v641_v40  ;;  %v834_v55 = vpack.c.bf16 %v641_v40, %v641_v40 }
 0x127   :  { %1759 = vrot.lane.b32.xlu2 %v5742_v35, %s5037_s4  ;;  %v631_v42 = vpop.f32.mrf.mxu0 }
 0x128   :  { %704 = vmatmul.f32.gmra.mxu0 %v631_v42  ;;  %v830_v46 = vpack.c.bf16 %v631_v42, %v631_v42  ;;  %v1195_v49 = vunpack.c.l.b16 %v834_v55 }
 0x12a   :  { %v1191_v48 = vunpack.c.l.b16 %v830_v46 }
 0x12d   :  { %v643_v45 = vpop.f32.mrf.mxu3 }
 0x12e   :  { %719 = vmatmul.f32.gmra.mxu1 %v643_v45  ;;  %800 = vmatmul.f32.gmra.mxu2 %v643_v45  ;;  %v835_v52 = vpack.c.bf16 %v643_v45, %v643_v45 }
 0x12f   :  { %1763 = vrot.lane.b32.xlu2 %v5746_v36, %s5037_s4  ;;  %v633_v8 = vpop.f32.mrf.mxu0 }
 0x130   :  { %v831_v47 = vpack.c.bf16 %v633_v8, %v633_v8  ;;  %707 = vmatmul.f32.gmra.mxu0 %v633_v8  ;;  %v1196_v56 = vunpack.c.l.b16 %v835_v52 }
 0x132   :  { %v1192_v50 = vunpack.c.l.b16 %v831_v47  ;;  %v5754_v60 = vpack.c.b16 %v1196_v56, %v1195_v49 }
 0x134   :  { %v5750_v51 = vpack.c.b16 %v1192_v50, %v1191_v48  ;;  %7757 = vst [vmem:[#allocation5_spill] sm:$0xff] %v5754_v60 }
 0x135   :  { %v646_v53 = vpop.f32.mrf.mxu3 }
 0x136   :  { %7756 = vst [vmem:[#allocation4_spill] sm:$0xff] %v5750_v51  ;;  %722 = vmatmul.f32.gmra.mxu1 %v646_v53  ;;  %803 = vmatmul.f32.gmra.mxu2 %v646_v53  ;;  %v836_v57 = vpack.c.bf16 %v646_v53, %v646_v53 }
 0x137   :  { %1761 = vrot.lane.b32.xlu0 %v5750_v51, %s5037_s4 }
 0x138   :  { %779 = vmatmul.f32.vlgmr.msra.gmra.mxu0 %v626_v19  ;;  %v1197_v63 = vunpack.c.l.b16 %v836_v57 }
 0x13d   :  { %v648_v59 = vpop.f32.mrf.mxu3 }
 0x13e   :  { %v837_v22 = vpack.c.bf16 %v648_v59, %v648_v59  ;;  %725 = vmatmul.f32.gmra.mxu1 %v648_v59  ;;  %806 = vmatmul.f32.gmra.mxu2 %v648_v59 }
 0x13f   :  { %1765 = vrot.lane.b32.xlu0 %v5754_v60, %s5037_s4 }
 0x140   :  { %v1198_v44 = vunpack.c.l.b16 %v837_v22  ;;  %782 = vmatmul.f32.gmra.mxu0 %v628_v33 }
 0x142   :  { %v5758_v1 = vpack.c.b16 %v1198_v44, %v1197_v63 }
 0x144   :  { %7758 = vst [vmem:[#allocation6_spill] sm:$0xff] %v5758_v1  ;;  %1767 = vrot.lane.b32.xlu2 %v5758_v1, %s5037_s4 }
 0x145   :  { %v651_v27 = vpop.f32.mrf.mxu3 }
 0x146   :  { %728 = vmatmul.f32.gmra.mxu1 %v651_v27  ;;  %809 = vmatmul.f32.gmra.mxu2 %v651_v27  ;;  %v838_v61 = vpack.c.bf16 %v651_v27, %v651_v27 }
 0x148   :  { %785 = vmatmul.f32.gmra.mxu0 %v631_v42  ;;  %v1199_v21 = vunpack.c.l.b16 %v838_v61 }
 0x14d   :  { %v653_v54 = vpop.f32.mrf.mxu3 }
 0x14e   :  { %v839_v3 = vpack.c.bf16 %v653_v54, %v653_v54  ;;  %731 = vmatmul.f32.gmra.mxu1 %v653_v54  ;;  %812 = vmatmul.f32.gmra.mxu2 %v653_v54 }
 0x150   :  { %v1200_v28 = vunpack.c.l.b16 %v839_v3  ;;  %788 = vmatmul.f32.gmra.mxu0 %v633_v8 }
 0x152   :  { %v5762_v34 = vpack.c.b16 %v1200_v28, %v1199_v21 }
 0x154   :  { %7759 = vst [vmem:[#allocation7_spill] sm:$0xff] %v5762_v34  ;;  %1769 = vrot.lane.b32.xlu0 %v5762_v34, %s5037_s4 }
 0x155   :  { %v656_v58 = vpop.f32.mrf.mxu3 }
 0x156   :  { %734 = vmatmul.f32.gmra.mxu1 %v656_v58  ;;  %815 = vmatmul.f32.gmra.mxu2 %v656_v58  ;;  %v840_v62 = vpack.c.bf16 %v656_v58, %v656_v58 }
 0x158   :  { %v1201_v9 = vunpack.c.l.b16 %v840_v62 }
 0x15d   :  { %v658_v5 = vpop.f32.mrf.mxu3 }
 0x15e   :  { %v841_v7 = vpack.c.bf16 %v658_v5, %v658_v5  ;;  %737 = vmatmul.f32.gmra.mxu1 %v658_v5  ;;  %818 = vmatmul.f32.gmra.mxu2 %v658_v5 }
 0x160   :  { %v1202_v10 = vunpack.c.l.b16 %v841_v7 }
 0x162   :  { %v5766_v11 = vpack.c.b16 %v1202_v10, %v1201_v9 }
 0x164   :  { %7760 = vst [vmem:[#allocation8_spill] sm:$0xff] %v5766_v11  ;;  %1771 = vrot.lane.b32.xlu2 %v5766_v11, %s5037_s4 }
 0x165   :  { %v661_v14 = vpop.f32.mrf.mxu3 }
 0x166   :  { %740 = vmatmul.f32.gmra.mxu1 %v661_v14  ;;  %821 = vmatmul.f32.gmra.mxu2 %v661_v14  ;;  %v842_v16 = vpack.c.bf16 %v661_v14, %v661_v14 }
 0x168   :  { %v1203_v6 = vunpack.c.l.b16 %v842_v16 }
 0x16d   :  { %v663_v18 = vpop.f32.mrf.mxu3 }
 0x16e   :  { %v843_v12 = vpack.c.bf16 %v663_v18, %v663_v18  ;;  %743 = vmatmul.f32.gmra.mxu1 %v663_v18  ;;  %824 = vmatmul.f32.gmra.mxu2 %v663_v18 }
 0x170   :  { %v1204_v20 = vunpack.c.l.b16 %v843_v12 }
 0x172   :  { %v5771_v23 = vpack.c.b16 %v1204_v20, %v1203_v6 }
 0x174   :  { %7761 = vst [vmem:[#allocation9_spill] sm:$0xff] %v5771_v23  ;;  %1773 = vrot.lane.b32.xlu1 %v5771_v23, %s5037_s4  ;;  %1221 = vmatpush.bf16.msrb.mxu3 %v5771_v23 }
 0x178   :  { %1222 = vmatpush.bf16.msrb.mxu3 %v5766_v11 }
 0x17c   :  { %1223 = vmatpush.bf16.msrb.mxu3 %v5762_v34 }
 0x180   :  { %1224 = vmatpush.bf16.msrb.mxu3 %v5758_v1 }
 0x181   :  { %v5779_v24 = vpop.f32.mrf.mxu1  ;;  %v1760_v17 = vpop.permute.xlu2 %1759 }
 0x182   :  { %7762 = vst [vmem:[#allocation10_spill] sm:$0xff] %v5779_v24  ;;  %1495 = vperm.xlu0 %4360, %v5779_v24  }
 0x184   :  { %1225 = vmatpush.bf16.msrb.mxu3 %v5754_v60 }
 0x187   :  { %v5790_v26 = vpop.f32.mrf.mxu2 }
 0x188   :  { %1226 = vmatpush.bf16.msrb.mxu3 %v5746_v36 }
 0x189   :  { %v5815_v2 = vpop.f32.mrf.mxu1  ;;  %v1764_v41 = vpop.permute.xlu2 %1763 }
 0x18a   :  { %4361 = vset.pattern.permute.xlu0 %v7656_v0  ;;  %7765 = vst [vmem:[#allocation13_spill] sm:$0xff] %v5815_v2 }
 0x18c   :  { %1227 = vmatpush.bf16.msrb.mxu3 %v5750_v51 }
 0x18f   :  { %v5797_v31 = vpop.f32.mrf.mxu2 }
 0x190   :  { %1228 = vmatpush.bf16.msrb.mxu3 %v5742_v35 }
 0x195   :  { %v5787_v25 = vpop.f32.mrf.mxu0 }
 0x196   :  { %7763 = vst [vmem:[#allocation11_spill] sm:$0xff] %v5787_v25  ;;  %878 = vperm.xlu2 %4357, %v5787_v25  }
 0x19d   :  { %v5792_v29 = vpop.f32.mrf.mxu0 }
 0x19e   :  { %7764 = vst [vmem:[#allocation12_spill] sm:$0xff] %v5792_v29  ;;  %4358 = vset.pattern.permute.xlu2 %v7668_v13  ;;  %883 = vperm.xlu0 %4361, %v5792_v29   ;;  %v1768_v15 = vpop.permute.xlu2 %1767 }
 0x19f   :  { %1479 = vperm.xlu2 %4358, %v5787_v25  }
 0x1a3   :  { %v5840_v38 = vpop.f32.mrf.mxu1 }
 0x1a4   :  { %7767 = vst [vmem:[#allocation15_spill] sm:$0xff] %v5840_v38 }
 0x1a5   :  { %v5825_v30 = vpop.f32.mrf.mxu0 }
 0x1a6   :  { %4362 = vset.pattern.permute.xlu0 %v7668_v13  ;;  %7766 = vst [vmem:[#allocation14_spill] sm:$0xff] %v5825_v30 }
 0x1a7   :  { %4359 = vset.pattern.permute.xlu2 %v7656_v0  ;;  %1483 = vperm.xlu0 %4362, %v5792_v29   ;;  %v498_v29 = vld [vmem:[%s7651_s2 + $0x8] sm:$0xff] }
 0x1a8   :  { %898 = vperm.xlu2 %4359, %v5779_v24   ;;  %vm514_vm1 = vcmp.gt.f32.partialorder %v498_v29, 0.0  ;;  %v501_v29 = vld [vmem:[%s7651_s2 + $0x20] sm:$0xff] }
 0x1a9   :  { %v5803_v32 = vpop.f32.mrf.mxu2  ;;  %v1762_v43 = vpop.permute.xlu0 %1761  ;;  %vm517_vm5 = vcmp.gt.f32.partialorder %v501_v29, 0.0 }
 0x1ab   :  { %v5867_v50 = vpop.f32.mrf.mxu1 }
 0x1ac   :  { %7769 = vst [vmem:[#allocation17_spill] sm:$0xff] %v5867_v50 }
 0x1ad   :  { %v5848_v40 = vpop.f32.mrf.mxu0 }
 0x1ae   :  { %7768 = vst [vmem:[#allocation16_spill] sm:$0xff] %v5848_v40 }
 0x1af   :  { %1406 = vrot.lane.b32.xlu0 %v5790_v26, %s5039_s5 }
 0x1b0   :  { %2498 = vrot.lane.b32.xlu2 %v5790_v26, %s5040_s14  ;;  %4363 = vset.pattern.permute.xlu0 %v7656_v0 }
 0x1b1   :  { %v5810_v4 = vpop.f32.mrf.mxu2  ;;  %4364 = vset.pattern.permute.xlu2 %v7668_v13  ;;  %v1766_v46 = vpop.permute.xlu0 %1765 }
 0x1b2   :  { %1958 = vrot.lane.b32.xlu1 %v5810_v4, %s5041_s15 }
 0x1b3   :  { %v5885_v49 = vpop.f32.mrf.mxu1 }
 0x1b4   :  { %7770 = vst [vmem:[#allocation18_spill] sm:$0xff] %v5885_v49 }
 0x1b5   :  { %v780_v53 = vpop.f32.mrf.mxu0 }
 0x1b7   :  { %1952 = vrot.lane.b32.xlu0 %v5790_v26, %s5041_s15 }
 0x1b8   :  { %1499 = vperm.xlu2 %4364, %v5815_v2  }
 0x1b9   :  { %v5820_v19 = vpop.f32.mrf.mxu2 }
 0x1ba   :  { %1414 = vrot.lane.b32.xlu1 %v5820_v19, %s5039_s5 }
 0x1bb   :  { %v5907_v54 = vpop.f32.mrf.mxu1 }
 0x1bc   :  { %7772 = vst [vmem:[#allocation20_spill] sm:$0xff] %v5907_v54 }
 0x1bd   :  { %v783_v22 = vpop.f32.mrf.mxu0 }
 0x1be   :  { %v1772_v47 = vpop.permute.xlu2 %1771 }
 0x1bf   :  { %903 = vperm.xlu0 %4363, %v5815_v2  }
 0x1c0   :  { %4365 = vset.pattern.permute.xlu2 %v7656_v0 }
 0x1c1   :  { %v5828_v33 = vpop.f32.mrf.mxu2  ;;  %888 = vperm.xlu2 %4365, %v5825_v30  }
 0x1c3   :  { %v5951_v12 = vpop.f32.mrf.mxu1 }
 0x1c4   :  { %7774 = vst [vmem:[#allocation22_spill] sm:$0xff] %v5951_v12 }
 0x1c5   :  { %v786_v21 = vpop.f32.mrf.mxu0 }
 0x1c6   :  { %v1770_v48 = vpop.permute.xlu0 %1769 }
 0x1c7   :  { %2500 = vrot.lane.b32.xlu0 %v5797_v31, %s5040_s14 }
 0x1c8   :  { %4368 = vset.pattern.permute.xlu0 %v7668_v13 }
 0x1c9   :  { %v5834_v37 = vpop.f32.mrf.mxu2  ;;  %4366 = vset.pattern.permute.xlu2 %v7668_v13 }
 0x1ca   :  { %1964 = vrot.lane.b32.xlu1 %v5834_v37, %s5041_s15  ;;  %1487 = vperm.xlu2 %4366, %v5825_v30  }
 0x1cd   :  { %v789_v5 = vpop.f32.mrf.mxu0 }
 0x1cf   :  { %1503 = vperm.xlu0 %4368, %v5840_v38  }
 0x1d1   :  { %v5843_v39 = vpop.f32.mrf.mxu2 }
 0x1d2   :  { %1408 = vrot.lane.b32.xlu2 %v5797_v31, %s5039_s5 }
 0x1d3   :  { %4367 = vset.pattern.permute.xlu2 %v7656_v0 }
 0x1d7   :  { %4369 = vset.pattern.permute.xlu0 %v7656_v0 }
 0x1d8   :  { %893 = vperm.xlu0 %4369, %v5848_v40  }
 0x1d9   :  { %v5852_v42 = vpop.f32.mrf.mxu2 }
 0x1da   :  { %1954 = vrot.lane.b32.xlu2 %v5797_v31, %s5041_s15 }
 0x1e0   :  { %1410 = vrot.lane.b32.xlu0 %v5803_v32, %s5039_s5 }
 0x1e1   :  { %v5858_v45 = vpop.f32.mrf.mxu2 }
 0x1e2   :  { %1970 = vrot.lane.b32.xlu1 %v5858_v45, %s5041_s15  ;;  %908 = vperm.xlu2 %4367, %v5840_v38   ;;  %v7785_v38 = vmov 0  }
 0x1e6   :  { %v1774_v8 = vpop.permute.xlu1 %1773 }
 0x1e7   :  { %1783 = vmatpush.bf16.msrb.mxu0 %v1774_v8 }
 0x1e8   :  { %1956 = vrot.lane.b32.xlu0 %v5803_v32, %s5041_s15 }
 0x1ea   :  { %4370 = vset.pattern.permute.xlu2 %v7668_v13 }
 0x1eb   :  { %1784 = vmatpush.bf16.msrb.mxu0 %v1772_v47  ;;  %1491 = vperm.xlu2 %4370, %v5848_v40  }
 0x1ef   :  { %1785 = vmatpush.bf16.msrb.mxu0 %v1770_v48 }
 0x1f0   :  { %v5869_v52 = vpop.permute.xlu2 %878  ;;  %913 = vperm.xlu0 %4369, %v5867_v50  }
 0x1f3   :  { %1786 = vmatpush.bf16.msrb.mxu0 %v1768_v15  ;;  %2502 = vrot.lane.b32.xlu2 %v5803_v32, %s5040_s14 }
 0x1f4   :  { %v5887_v57 = vpop.permute.xlu0 %1495 }
 0x1f7   :  { %1787 = vmatpush.bf16.msrb.mxu0 %v1766_v46 }
 0x1f8   :  { %1944 = vrot.lane.b32.xlu0 %v780_v53, %s5041_s15 }
 0x1f9   :  { %v5875_v55 = vpop.permute.xlu2 %1479  ;;  %4372 = vset.pattern.permute.xlu0 %v7668_v13 }
 0x1fb   :  { %1788 = vmatpush.bf16.msrb.mxu0 %v1764_v41  ;;  %1507 = vperm.xlu2 %4370, %v5867_v50  }
 0x1ff   :  { %1789 = vmatpush.bf16.msrb.mxu0 %v1762_v43 }
 0x200   :  { %2504 = vrot.lane.b32.xlu0 %v5810_v4, %s5040_s14 }
 0x202   :  { %v5881_v56 = vpop.permute.xlu2 %898 }
 0x203   :  { %1790 = vmatpush.bf16.msrb.mxu0 %v1760_v17  ;;  %1398 = vrot.lane.b32.xlu2 %v780_v53, %s5039_s5  ;;  %v5972_v17 = vpop.f32.mrf.mxu1 }
 0x204   :  { %4371 = vset.pattern.permute.xlu2 %v7656_v0  ;;  %7776 = vst [vmem:[#allocation24_spill] sm:$0xff] %v5972_v17 }
 0x208   :  { %1511 = vperm.xlu0 %4372, %v5885_v49  }
 0x20a   :  { %v5890_v59 = vpop.permute.xlu2 %2498 }
 0x20b   :  { %7771 = vst [vmem:[#allocation19_spill] sm:$0xff] %v5890_v59  ;;  %2490 = vrot.lane.b32.xlu2 %v780_v53, %s5040_s14  ;;  %v6000_v8 = vpop.f32.mrf.mxu1  ;;  %v503_v59 = vld [vmem:[%s7651_s2 + $0x30] sm:$0xff] }
 0x20c   :  { %7779 = vst [vmem:[#allocation27_spill] sm:$0xff] %v6000_v8  ;;  %vm519_vm9 = vcmp.gt.f32.partialorder %v503_v59, 0.0 }
 0x210   :  { %v5893_v63 = vpop.permute.xlu0 %883  ;;  %1400 = vrot.lane.b32.xlu0 %v783_v22, %s5039_s5 }
 0x211   :  { %4373 = vset.pattern.permute.xlu0 %v7656_v0 }
 0x212   :  { %v5897_v44 = vpop.permute.xlu2 %1499 }
 0x213   :  { %1412 = vrot.lane.b32.xlu2 %v5810_v4, %s5039_s5 }
 0x217   :  { %844 = vxpose.xlu1.b32.start [1/16] (narrow) %v780_v53, 8  ;;  %v822_v53 = vpop.f32.mrf.mxu2 }
 0x218   :  { %2492 = vrot.lane.b32.xlu0 %v783_v22, %s5040_s14 }
 0x219   :  { %v5902_v27 = vpop.permute.xlu0 %1483 }
 0x21b   :  { %v5904_v61 = vpop.permute.xlu2 %888  ;;  %918 = vperm.xlu2 %4371, %v5885_v49  }
 0x21f   :  { %845 = vxpose.xlu1.b32.cont [2/16] (narrow) %v783_v22, 8 }
 0x220   :  { %923 = vperm.xlu0 %4373, %v5907_v54  }
 0x221   :  { %v5910_v3 = vpop.permute.xlu0 %1406 }
 0x223   :  { %1946 = vrot.lane.b32.xlu2 %v783_v22, %s5041_s15 }
 0x224   :  { %v5913_v28 = vpop.permute.xlu2 %1487  ;;  %4374 = vset.pattern.permute.xlu2 %v7668_v13 }
 0x227   :  { %846 = vxpose.xlu1.b32.cont [3/16] (narrow) %v786_v21, 8 }
 0x228   :  { %1402 = vrot.lane.b32.xlu0 %v786_v21, %s5039_s5 }
 0x229   :  { %v5917_v58 = vpop.permute.xlu0 %1952  ;;  %4376 = vset.pattern.permute.xlu0 %v7668_v13 }
 0x22b   :  { %1960 = vrot.lane.b32.xlu2 %v5820_v19, %s5041_s15 }
 0x22c   :  { %v5922_v62 = vpop.permute.xlu2 %1408 }
 0x22f   :  { %847 = vxpose.xlu1.b32.cont [4/16] (narrow) %v789_v5, 8 }
 0x230   :  { %1948 = vrot.lane.b32.xlu0 %v786_v21, %s5041_s15 }
 0x231   :  { %v5925_v7 = vpop.permute.xlu0 %903 }
 0x233   :  { %2506 = vrot.lane.b32.xlu2 %v5820_v19, %s5040_s14 }
 0x234   :  { %v5929_v9 = vpop.permute.xlu2 %1954 }
 0x237   :  { %848 = vxpose.xlu1.b32.cont [5/16] (narrow) %v5790_v26, 8 }
 0x238   :  { %1416 = vrot.lane.b32.xlu0 %v5828_v33, %s5039_s5 }
 0x239   :  { %v5934_v10 = vpop.permute.xlu0 %2500 }
 0x23a   :  { %7773 = vst [vmem:[#allocation21_spill] sm:$0xff] %v5934_v10 }
 0x23b   :  { %1515 = vperm.xlu2 %4374, %v5907_v54  }
 0x23c   :  { %v5937_v14 = vpop.permute.xlu2 %908 }
 0x23f   :  { %849 = vxpose.xlu1.b32.cont [6/16] (narrow) %v5797_v31, 8 }
 0x240   :  { %1962 = vrot.lane.b32.xlu0 %v5828_v33, %s5041_s15 }
 0x241   :  { %v5942_v16 = vpop.permute.xlu0 %1503 }
 0x243   :  { %2494 = vrot.lane.b32.xlu2 %v786_v21, %s5040_s14  ;;  %v6018_v21 = vpop.f32.mrf.mxu1 }
 0x244   :  { %4375 = vset.pattern.permute.xlu2 %v7656_v0  ;;  %7780 = vst [vmem:[#allocation28_spill] sm:$0xff] %v6018_v21 }
 0x245   :  { %v5946_v18 = vpop.permute.xlu2 %1491 }
 0x247   :  { %850 = vxpose.xlu1.b32.cont [7/16] (narrow) %v5803_v32, 8 }
 0x248   :  { %2508 = vrot.lane.b32.xlu0 %v5828_v33, %s5040_s14 }
 0x24a   :  { %v5953_v6 = vpop.permute.xlu0 %893 }
 0x24b   :  { %928 = vperm.xlu2 %4375, %v5951_v12   ;;  %v6042_v54 = vpop.f32.mrf.mxu1 }
 0x24c   :  { %7784 = vst [vmem:[#allocation32_spill] sm:$0xff] %v6042_v54 }
 0x24d   :  { %v5956_v20 = vpop.permute.xlu2 %2502 }
 0x24e   :  { %7775 = vst [vmem:[#allocation23_spill] sm:$0xff] %v5956_v20 }
 0x24f   :  { %851 = vxpose.xlu1.b32.cont [8/16] (narrow) %v5810_v4, 8 }
 0x250   :  { %1519 = vperm.xlu0 %4376, %v5951_v12  }
 0x252   :  { %v5960_v26 = vpop.permute.xlu0 %1410 }
 0x253   :  { %1404 = vrot.lane.b32.xlu2 %v789_v5, %s5039_s5 }
 0x254   :  { %4378 = vset.pattern.permute.xlu2 %v7668_v13 }
 0x255   :  { %v5964_v31 = vpop.permute.xlu2 %1507 }
 0x257   :  { %852 = vxpose.xlu1.b32.cont [9/16] (narrow) %v5820_v19, 8 }
 0x258   :  { %2496 = vrot.lane.b32.xlu0 %v789_v5, %s5040_s14 }
 0x259   :  { %4377 = vset.pattern.permute.xlu0 %v7656_v0 }
 0x25a   :  { %v5969_v32 = vpop.permute.xlu0 %1956 }
 0x25b   :  { %1950 = vrot.lane.b32.xlu2 %v789_v5, %s5041_s15 }
 0x25d   :  { %v1399_v4 = vpop.permute.xlu2 %1398 }
 0x25f   :  { %853 = vxpose.xlu1.b32.cont [10/16] (narrow) %v5828_v33, 8 }
 0x260   :  { %933 = vperm.xlu0 %4377, %v5972_v17  }
 0x262   :  { %v5976_v41 = vpop.permute.xlu0 %913 }
 0x263   :  { %1418 = vrot.lane.b32.xlu2 %v5834_v37, %s5039_s5 }
 0x265   :  { %v5980_v19 = vpop.permute.xlu2 %2490 }
 0x266   :  { %7777 = vst [vmem:[#allocation25_spill] sm:$0xff] %v5980_v19 }
 0x267   :  { %854 = vxpose.xlu1.b32.cont [11/16] (narrow) %v5834_v37, 8 }
 0x268   :  { %1420 = vrot.lane.b32.xlu0 %v5843_v39, %s5039_s5 }
 0x269   :  { %4380 = vset.pattern.permute.xlu0 %v7668_v13 }
 0x26a   :  { %v5986_v43 = vpop.permute.xlu0 %1944 }
 0x26b   :  { %2510 = vrot.lane.b32.xlu2 %v5834_v37, %s5040_s14 }
 0x26d   :  { %v5990_v33 = vpop.permute.xlu2 %1412 }
 0x26f   :  { %855 = vxpose.xlu1.b32.cont [12/16] (narrow) %v5843_v39, 8 }
 0x270   :  { %2512 = vrot.lane.b32.xlu0 %v5843_v39, %s5040_s14 }
 0x272   :  { %v5995_v15 = vpop.permute.xlu0 %2504 }
 0x273   :  { %7778 = vst [vmem:[#allocation26_spill] sm:$0xff] %v5995_v15  ;;  %1523 = vperm.xlu2 %4378, %v5972_v17  }
 0x275   :  { %v5998_v46 = vpop.permute.xlu2 %918 }
 0x277   :  { %856 = vxpose.xlu1.b32.cont [13/16] (narrow) %v5852_v42, 8 }
 0x278   :  { %1527 = vperm.xlu0 %4380, %v6000_v8  }
 0x27a   :  { %v6004_v37 = vpop.permute.xlu0 %1511 }
 0x27b   :  { %1966 = vrot.lane.b32.xlu2 %v5843_v39, %s5041_s15 }
 0x27c   :  { %4379 = vset.pattern.permute.xlu2 %v7656_v0 }
 0x27d   :  { %v6009_v47 = vpop.permute.xlu2 %1946 }
 0x27f   :  { %857 = vxpose.xlu1.b32.cont [14/16] (narrow) %v5858_v45, 8 }
 0x280   :  { %1968 = vrot.lane.b32.xlu0 %v5852_v42, %s5041_s15 }
 0x281   :  { %4381 = vset.pattern.permute.xlu0 %v7656_v0  ;;  %v825_v0 = vpop.f32.mrf.mxu2 }
 0x282   :  { %v1401_v48 = vpop.permute.xlu0 %1400 }
 0x283   :  { %938 = vperm.xlu2 %4379, %v6000_v8  }
 0x285   :  { %v6016_v22 = vpop.permute.xlu2 %1960 }
 0x287   :  { %858 = vxpose.xlu1.b32.cont [15/16] (narrow) %v822_v53, 8 }
 0x288   :  { %943 = vperm.xlu0 %4381, %v6018_v21  }
 0x28a   :  { %v6021_v39 = vpop.permute.xlu0 %2492 }
 0x28b   :  { %7781 = vst [vmem:[#allocation29_spill] sm:$0xff] %v6021_v39  ;;  %1422 = vrot.lane.b32.xlu2 %v5852_v42, %s5039_s5 }
 0x28c   :  { %4382 = vset.pattern.permute.xlu2 %v7668_v13 }
 0x28d   :  { %v6026_v5 = vpop.permute.xlu2 %2506 }
 0x28e   :  { %7782 = vst [vmem:[#allocation30_spill] sm:$0xff] %v6026_v5 }
 0x28f   :  { %859 = vxpose.xlu1.b32.end [16/16] (narrow) %v825_v0, 8 }
 0x290   :  { %1424 = vrot.lane.b32.xlu0 %v5858_v45, %s5039_s5 }
 0x291   :  { %4384 = vset.pattern.permute.xlu0 %v7668_v13 }
 0x292   :  { %v6031_v8 = vpop.permute.xlu0 %923 }
 0x293   :  { %2514 = vrot.lane.b32.xlu2 %v5852_v42, %s5040_s14 }
 0x295   :  { %v6035_v12 = vpop.permute.xlu2 %1515 }
 0x297   :  { %1446 = vxpose.xlu1.b32.start [1/16] (narrow) %v1399_v4, 8 }
 0x298   :  { %2516 = vrot.lane.b32.xlu0 %v5858_v45, %s5040_s14  ;;  %v6051_v45 = vpop.f32.mrf.mxu1 }
 0x299   :  { %7786 = vst [vmem:[#allocation33_spill] sm:$0xff] %v6051_v45 }
 0x29a   :  { %v1403_v49 = vpop.permute.xlu0 %1402 }
 0x29b   :  { %1531 = vperm.xlu2 %4382, %v6018_v21   ;;  %v7787_v21 = vmov 1  }
 0x29d   :  { %v6040_v17 = vpop.permute.xlu2 %2494 }
 0x29e   :  { %7783 = vst [vmem:[#allocation31_spill] sm:$0xff] %v6040_v17 }
 0x29f   :  { %1447 = vxpose.xlu1.b32.cont [2/16] (narrow) %v1401_v48, 8 }
 0x2a0   :  { %1535 = vperm.xlu0 %4384, %v6042_v54  }
 0x2a2   :  { %v6045_v13 = vpop.permute.xlu0 %1948 }
 0x2a3   :  { %4383 = vset.pattern.permute.xlu2 %v7785_v38 }
 0x2a4   :  { %948 = vperm.xlu2 %4383, %v6042_v54  }
 0x2a5   :  { %v6049_v42 = vpop.permute.xlu2 %928 }
 0x2a7   :  { %1448 = vxpose.xlu1.b32.cont [3/16] (narrow) %v1403_v49, 8  ;;  %v6061_v49 = vpop.permute.xlu1 %1958 }
 0x2a8   :  { %4385 = vset.pattern.permute.xlu0 %v7785_v38 }
 0x2a9   :  { %953 = vperm.xlu0 %4385, %v6051_v45  }
 0x2aa   :  { %v1417_v4 = vpop.permute.xlu0 %1416 }
 0x2ac   :  { %1426 = vrot.lane.b32.xlu2 %v822_v53, %s5039_s5 }
 0x2ad   :  { %v1405_v48 = vpop.permute.xlu2 %1404  ;;  %4386 = vset.pattern.permute.xlu2 %v7787_v21 }
 0x2af   :  { %1449 = vxpose.xlu1.b32.cont [4/16] (narrow) %v1405_v48, 8  ;;  %v1415_v48 = vpop.permute.xlu1 %1414 }
 0x2b1   :  { %1428 = vrot.lane.b32.xlu0 %v825_v0, %s5039_s5 }
 0x2b2   :  { %v6058_v2 = vpop.permute.xlu0 %1962 }
 0x2b4   :  { %1972 = vrot.lane.b32.xlu2 %v822_v53, %s5041_s15 }
 0x2b5   :  { %v6063_v54 = vpop.permute.xlu2 %1950 }
 0x2b7   :  { %1450 = vxpose.xlu1.b32.cont [5/16] (narrow) %v5910_v3, 8  ;;  %v6077_v35 = vpop.permute.xlu1 %1964 }
 0x2b9   :  { %1974 = vrot.lane.b32.xlu0 %v825_v0, %s5041_s15 }
 0x2ba   :  { %v6067_v38 = vpop.permute.xlu0 %2508 }
 0x2bb   :  { %7788 = vst [vmem:[#allocation34_spill] sm:$0xff] %v6067_v38 }
 0x2bc   :  { %2518 = vrot.lane.b32.xlu2 %v822_v53, %s5040_s14 }
 0x2bd   :  { %v1419_v21 = vpop.permute.xlu2 %1418 }
 0x2bf   :  { %1451 = vxpose.xlu1.b32.cont [6/16] (narrow) %v5922_v62, 8  ;;  %v6084_v53 = vpop.permute.xlu1 %1970 }
 0x2c0   :  { %7791 = vst [vmem:[#allocation37_spill] sm:$0xff] %v6084_v53 }
 0x2c1   :  { %2520 = vrot.lane.b32.xlu0 %v825_v0, %s5040_s14 }
 0x2c2   :  { %v6072_v24 = vpop.permute.xlu0 %1519 }
 0x2c4   :  { %1539 = vperm.xlu2 %4386, %v6051_v45  }
 0x2c5   :  { %v6075_v30 = vpop.permute.xlu2 %2510 }
 0x2c6   :  { %7789 = vst [vmem:[#allocation35_spill] sm:$0xff] %v6075_v30 }
 0x2c7   :  { %1452 = vxpose.xlu1.b32.cont [7/16] (narrow) %v5960_v26, 8  ;;  %v860_v51 = vpop.trf.xlu1 }
 0x2c8   :  { %v6091_v45 = vperm.slane %v860_v51, 0  ;;  %v497_v51 = vld [vmem:[%s7651_s2] sm:$0xff] }
 0x2c9   :  { %vm513_vm3 = vcmp.gt.f32.partialorder %v497_v51, 0.0 }
 0x2ca   :  { %v6080_v3 = vpop.permute.xlu0 %2496  ;;  %v958_v26 = vadd.f32 %v6091_v45, %v5893_v63  ;;  %v5042_v63 = vmov -9e+15   ;;  %v959_v51 = vadd.f32 %v6091_v45, %v5904_v61 }
 0x2cb   :  { %7790 = vst [vmem:[#allocation36_spill] sm:$0xff] %v6080_v3  ;;  %v505_v3 = vld [vmem:[%s7651_s2 + $0x40] sm:$0xff] }
 0x2cc   :  { %v990_v30 = vmul.f32 0.2, %v958_v26  ;;  %vm974_vm2 = vcmp.gt.f32.partialorder %v958_v26, 0.0  ;;  %vm975_vm8 = vcmp.gt.f32.partialorder %v959_v51, 0.0  ;;  %vm521_vm13 = vcmp.gt.f32.partialorder %v505_v3, 0.0  ;;  %v507_v3 = vld [vmem:[%s7651_s2 + $0x50] sm:$0xff] }
 0x2cd   :  { %v6082_v36 = vpop.permute.xlu2 %1523 }
 0x2ce   :  { %v1006_v5 = vsel %vm974_vm2, %v958_v26, %v990_v30  ;;  %v991_v26 = vmul.f32 0.2, %v959_v51 }
 0x2cf   :  { %1453 = vxpose.xlu1.b32.cont [8/16] (narrow) %v5990_v33, 8  ;;  %v957_v33 = vadd.f32 %v6091_v45, %v5869_v52  ;;  %v961_v52 = vadd.f32 %v6091_v45, %v5881_v56  ;;  %v499_v56 = vld [vmem:[%s7651_s2 + $0x10] sm:$0xff] }
 0x2d0   :  { %vm515_vm7 = vcmp.gt.f32.partialorder %v499_v56, 0.0  ;;  %v1007_v29 = vsel %vm975_vm8, %v959_v51, %v991_v26  ;;  %v960_v56 = vadd.f32 %v6091_v45, %v5953_v6 }
 0x2d1   :  { %vm973_vm4 = vcmp.gt.f32.partialorder %v957_v33, 0.0  ;;  %v993_v30 = vmul.f32 0.2, %v961_v52  ;;  %vm977_vm6 = vcmp.gt.f32.partialorder %v961_v52, 0.0 }
 0x2d2   :  { %v6087_v62 = vpop.permute.xlu0 %933  ;;  %v992_v51 = vmul.f32 0.2, %v960_v56  ;;  %vm976_vm12 = vcmp.gt.f32.partialorder %v960_v56, 0.0 }
 0x2d4   :  { %v1008_v59 = vsel %vm976_vm12, %v960_v56, %v992_v51  ;;  %v967_v51 = vadd.f32 %v6091_v45, %v6049_v42  ;;  %v504_v42 = vld [vmem:[%s7651_s2 + $0x38] sm:$0xff] }
 0x2d5   :  { %v6089_v0 = vpop.permute.xlu2 %1966 }
 0x2d6   :  { %vm983_vm2 = vcmp.gt.f32.partialorder %v967_v51, 0.0 }
 0x2d7   :  { %1454 = vxpose.xlu1.b32.cont [9/16] (narrow) %v1415_v48, 8  ;;  %v989_v48 = vmul.f32 0.2, %v957_v33 }
 0x2d9   :  { %v1005_v15 = vsel %vm973_vm4, %v957_v33, %v989_v48  ;;  %v1009_v33 = vsel %vm977_vm6, %v961_v52, %v993_v30  ;;  %v963_v48 = vadd.f32 %v6091_v45, %v5937_v14  ;;  %v6164_v30 = vsel %vm519_vm9, 0.0, %v5042_v63 }
 0x2da   :  { %v1421_v50 = vpop.permute.xlu0 %1420  ;;  %7798 = vst [vmem:[#allocation44_spill] sm:$0xff] %v6164_v30 }
 0x2db   :  { %v995_v52 = vmul.f32 0.2, %v963_v48  ;;  %vm979_vm10 = vcmp.gt.f32.partialorder %v963_v48, 0.0 }
 0x2dd   :  { %v6093_v40 = vpop.permute.xlu2 %938  ;;  %v1011_v26 = vsel %vm979_vm10, %v963_v48, %v995_v52 }
 0x2de   :  { %v6177_v17 = vadd.f32 %v1011_v26, %v6164_v30 }
 0x2df   :  { %1455 = vxpose.xlu1.b32.cont [10/16] (narrow) %v1417_v4, 8  ;;  %v6108_v4 = vsel %vm514_vm1, 0.0, %v5042_v63  ;;  %vm523_vm1 = vcmp.gt.f32.partialorder %v507_v3, 0.0  ;;  %v966_v3 = vadd.f32 %v6091_v45, %v6031_v8 }
 0x2e0   :  { %7793 = vst [vmem:[#allocation39_spill] sm:$0xff] %v6108_v4  ;;  %v6121_v20 = vadd.f32 %v1006_v5, %v6108_v4  ;;  %v6136_v5 = vsel %vm517_vm5, 0.0, %v5042_v63 }
 0x2e1   :  { %7796 = vst [vmem:[#allocation42_spill] sm:$0xff] %v6136_v5  ;;  %v998_v8 = vmul.f32 0.2, %v966_v3  ;;  %vm982_vm8 = vcmp.gt.f32.partialorder %v966_v3, 0.0 }
 0x2e2   :  { %v6102_v25 = vpop.permute.xlu0 %2512 }
 0x2e3   :  { %7792 = vst [vmem:[#allocation38_spill] sm:$0xff] %v6102_v25  ;;  %v6113_v25 = vsel %vm513_vm3, 0.0, %v5042_v63  ;;  %vm520_vm3 = vcmp.gt.f32.partialorder %v504_v42, 0.0 }
 0x2e4   :  { %7794 = vst [vmem:[#allocation40_spill] sm:$0xff] %v6113_v25  ;;  %v6219_v11 = vsel %vm520_vm3, 0.0, %v5042_v63 }
 0x2e5   :  { %v1423_v38 = vpop.permute.xlu2 %1422  ;;  %7803 = vst [vmem:[#allocation49_spill] sm:$0xff] %v6219_v11 }
 0x2e7   :  { %1456 = vxpose.xlu1.b32.cont [11/16] (narrow) %v1419_v21, 8  ;;  %v6130_v21 = vadd.f32 %v1005_v15, %v6113_v25  ;;  %v6141_v15 = vsel %vm515_vm7, 0.0, %v5042_v63 }
 0x2e8   :  { %7797 = vst [vmem:[#allocation43_spill] sm:$0xff] %v6141_v15  ;;  %v6158_v14 = vadd.f32 %v1007_v29, %v6141_v15 }
 0x2ea   :  { %v6123_v10 = vpop.permute.xlu0 %1527 }
 0x2eb   :  { %1039 = vmax.xlane.f32.xlu0 %v6121_v20 }
 0x2ed   :  { %1037 = vmax.xlane.f32.xlu2 %v6130_v21  ;;  %v6133_v61 = vpop.permute.xlu2 %2514 }
 0x2ee   :  { %7795 = vst [vmem:[#allocation41_spill] sm:$0xff] %v6133_v61  ;;  %v6149_v61 = vadd.f32 %v1009_v33, %v6136_v5  ;;  %v965_v33 = vadd.f32 %v6091_v45, %v5998_v46 }
 0x2ef   :  { %1457 = vxpose.xlu1.b32.cont [12/16] (narrow) %v1421_v50, 8  ;;  %v500_v50 = vld [vmem:[%s7651_s2 + $0x18] sm:$0xff] }
 0x2f0   :  { %vm516_vm11 = vcmp.gt.f32.partialorder %v500_v50, 0.0  ;;  %v962_v50 = vadd.f32 %v6091_v45, %v5925_v7  ;;  %v997_v48 = vmul.f32 0.2, %v965_v33  ;;  %vm981_vm14 = vcmp.gt.f32.partialorder %v965_v33, 0.0 }
 0x2f1   :  { %v6169_v29 = vsel %vm516_vm11, 0.0, %v5042_v63  ;;  %v6190_v7 = vsel %vm521_vm13, 0.0, %v5042_v63 }
 0x2f2   :  { %v6151_v60 = vpop.permute.xlu0 %1968  ;;  %7799 = vst [vmem:[#allocation45_spill] sm:$0xff] %v6169_v29  ;;  %v6186_v46 = vadd.f32 %v1008_v59, %v6169_v29  ;;  %v994_v56 = vmul.f32 0.2, %v962_v50  ;;  %vm978_vm0 = vcmp.gt.f32.partialorder %v962_v50, 0.0  ;;  %v1013_v52 = vsel %vm981_vm14, %v965_v33, %v997_v48 }
 0x2f3   :  { %1045 = vmax.xlane.f32.xlu0 %v6149_v61  ;;  %7800 = vst [vmem:[#allocation46_spill] sm:$0xff] %v6190_v7  ;;  %v6203_v19 = vadd.f32 %v1013_v52, %v6190_v7  ;;  %v999_v33 = vmul.f32 0.2, %v967_v51 }
 0x2f4   :  { %v1010_v59 = vsel %vm978_vm0, %v962_v50, %v994_v56  ;;  %v6216_v56 = vsel %vm523_vm1, 0.0, %v5042_v63 }
 0x2f5   :  { %1041 = vmax.xlane.f32.xlu2 %v6158_v14  ;;  %v6161_v6 = vpop.permute.xlu2 %1531  ;;  %7802 = vst [vmem:[#allocation48_spill] sm:$0xff] %v6203_v19  ;;  %v1015_v52 = vsel %vm983_vm2, %v967_v51, %v999_v33  ;;  %v506_v51 = vld [vmem:[%s7651_s2 + $0x48] sm:$0xff] }
 0x2f6   :  { %v6227_v42 = vadd.f32 %v1015_v52, %v6216_v56  ;;  %vm522_vm7 = vcmp.gt.f32.partialorder %v506_v51, 0.0 }
 0x2f7   :  { %1458 = vxpose.xlu1.b32.cont [13/16] (narrow) %v1423_v38, 8  ;;  %v502_v38 = vld [vmem:[%s7651_s2 + $0x28] sm:$0xff] }
 0x2f8   :  { %vm518_vm15 = vcmp.gt.f32.partialorder %v502_v38, 0.0  ;;  %v964_v38 = vadd.f32 %v6091_v45, %v5976_v41  ;;  %v969_v41 = vadd.f32 %v6091_v45, %v6093_v40  ;;  %7804 = vst [vmem:[#allocation50_spill] sm:$0xff] %v6227_v42 }
 0x2f9   :  { %v6195_v39 = vsel %vm518_vm15, 0.0, %v5042_v63 }
 0x2fa   :  { %v6179_v1 = vpop.permute.xlu0 %943  ;;  %7801 = vst [vmem:[#allocation47_spill] sm:$0xff] %v6195_v39  ;;  %v6210_v50 = vadd.f32 %v1010_v59, %v6195_v39  ;;  %v996_v48 = vmul.f32 0.2, %v964_v38  ;;  %vm980_vm4 = vcmp.gt.f32.partialorder %v964_v38, 0.0  ;;  %v509_v59 = vld [vmem:[%s7651_s2 + $0x60] sm:$0xff]  ;;  %vm985_vm5 = vcmp.gt.f32.partialorder %v969_v41, 0.0 }
 0x2fb   :  { %1049 = vmax.xlane.f32.xlu0 %v6177_v17  ;;  %v1001_v23 = vmul.f32 0.2, %v969_v41  ;;  %vm525_vm6 = vcmp.gt.f32.partialorder %v509_v59, 0.0  ;;  %v511_v59 = vld [vmem:[%s7651_s2 + $0x70] sm:$0xff] }
 0x2fc   :  { %vm527_vm10 = vcmp.gt.f32.partialorder %v511_v59, 0.0  ;;  %v510_v59 = vld [vmem:[%s7651_s2 + $0x68] sm:$0xff] }
 0x2fd   :  { %1043 = vmax.xlane.f32.xlu2 %v6186_v46  ;;  %v1017_v52 = vsel %vm985_vm5, %v969_v41, %v1001_v23  ;;  %v508_v23 = vld [vmem:[%s7651_s2 + $0x58] sm:$0xff]  ;;  %vm526_vm14 = vcmp.gt.f32.partialorder %v510_v59, 0.0 }
 0x2fe   :  { %v949_v26 = vpop.permute.xlu2 %948  ;;  %vm524_vm12 = vcmp.gt.f32.partialorder %v508_v23, 0.0 }
 0x2ff   :  { %v971_v33 = vadd.f32 %v6091_v45, %v949_v26  ;;  %v6270_v53 = vsel %vm524_vm12, 0.0, %v5042_v63 }
 0x300   :  { %7809 = vst [vmem:[#allocation55_spill] sm:$0xff] %v6270_v53 }
 0x301   :  { %vm987_vm9 = vcmp.gt.f32.partialorder %v971_v33, 0.0 }
 0x302   :  { %v1425_v34 = vpop.permute.xlu0 %1424 }
 0x303   :  { %1053 = vmax.xlane.f32.xlu0 %v6203_v19  ;;  %1459 = vxpose.xlu1.b32.cont [14/16] (narrow) %v1425_v34, 8  ;;  %v1012_v34 = vsel %vm980_vm4, %v964_v38, %v996_v48  ;;  %v6241_v48 = vsel %vm525_vm6, 0.0, %v5042_v63 }
 0x304   :  { %v6236_v38 = vadd.f32 %v1012_v34, %v6219_v11  ;;  %v1014_v34 = vsel %vm982_vm8, %v966_v3, %v998_v8  ;;  %v6252_v51 = vadd.f32 %v1017_v52, %v6241_v48  ;;  %v6265_v3 = vsel %vm527_vm10, 0.0, %v5042_v63 }
 0x305   :  { %1047 = vmax.xlane.f32.xlu2 %v6210_v50  ;;  %v970_v52 = vadd.f32 %v6091_v45, %v6179_v1 }
 0x306   :  { %v1427_v40 = vpop.permute.xlu2 %1426  ;;  %7807 = vst [vmem:[#allocation53_spill] sm:$0xff] %v6252_v51 }
 0x307   :  { %vm986_vm13 = vcmp.gt.f32.partialorder %v970_v52, 0.0 }
 0x30a   :  { %v6229_v19 = vpop.permute.xlu0 %2516 }
 0x30b   :  { %7805 = vst [vmem:[#allocation51_spill] sm:$0xff] %v6229_v19  ;;  %1057 = vmax.xlane.f32.xlu0 %v6227_v42  ;;  %1460 = vxpose.xlu1.b32.cont [15/16] (narrow) %v1427_v40, 8  ;;  %v968_v19 = vadd.f32 %v6091_v45, %v6087_v62  ;;  %v6246_v40 = vsel %vm522_vm7, 0.0, %v5042_v63  ;;  %v1003_v42 = vmul.f32 0.2, %v971_v33 }
 0x30c   :  { %7806 = vst [vmem:[#allocation52_spill] sm:$0xff] %v6246_v40  ;;  %v6261_v62 = vadd.f32 %v1014_v34, %v6246_v40 }
 0x30d   :  { %1051 = vmax.xlane.f32.xlu2 %v6236_v38  ;;  %v1000_v41 = vmul.f32 0.2, %v968_v19  ;;  %vm984_vm11 = vcmp.gt.f32.partialorder %v968_v19, 0.0  ;;  %v1019_v8 = vsel %vm987_vm9, %v971_v33, %v1003_v42  ;;  %v1002_v42 = vmul.f32 0.2, %v970_v52 }
 0x30e   :  { %7808 = vst [vmem:[#allocation54_spill] sm:$0xff] %v6261_v62  ;;  %v6273_v34 = vadd.f32 %v1019_v8, %v6265_v3  ;;  %v6304_v59 = vpop.permute.xlu2 %1972 }
 0x30f   :  { %v1018_v33 = vsel %vm986_vm13, %v970_v52, %v1002_v42 }
 0x310   :  { %7810 = vst [vmem:[#allocation56_spill] sm:$0xff] %v6273_v34 }
 0x312   :  { %v6254_v26 = vpop.permute.xlu0 %1535 }
 0x313   :  { %1061 = vmax.xlane.f32.xlu0 %v6252_v51  ;;  %v1016_v51 = vsel %vm984_vm11, %v968_v19, %v1000_v41  ;;  %v6285_v19 = vsel %vm526_vm14, 0.0, %v5042_v63  ;;  %v512_v41 = vld [vmem:[%s7651_s2 + $0x78] sm:$0xff]  ;;  %s5043_s2 = smov 32  }
 0x314   :  { %v6280_v23 = vadd.f32 %v1016_v51, %v6270_v53  ;;  %vm528_vm0 = vcmp.gt.f32.partialorder %v512_v41, 0.0 }
 0x315   :  { %1055 = vmax.xlane.f32.xlu2 %v6261_v62 }
 0x31b   :  { %v954_v62 = vpop.permute.xlu0 %953  ;;  %1065 = vmax.xlane.f32.xlu0 %v6273_v34  ;;  %v6291_v34 = vadd.f32 %v1018_v33, %v6285_v19 }
 0x31c   :  { %v972_v1 = vadd.f32 %v6091_v45, %v954_v62  ;;  %v6295_v45 = vsel %vm528_vm0, 0.0, %v5042_v63  ;;  %v6310_v63 = vpop.permute.xlu2 %2518 }
 0x31d   :  { %1059 = vmax.xlane.f32.xlu2 %v6280_v23  ;;  %7811 = vst [vmem:[#allocation57_spill] sm:$0xff] %v6310_v63 }
 0x31e   :  { %v1004_v51 = vmul.f32 0.2, %v972_v1  ;;  %vm988_vm15 = vcmp.gt.f32.partialorder %v972_v1, 0.0 }
 0x320   :  { %v1020_v62 = vsel %vm988_vm15, %v972_v1, %v1004_v51 }
 0x321   :  { %v6298_v52 = vadd.f32 %v1020_v62, %v6295_v45 }
 0x323   :  { %v1429_v8 = vpop.permute.xlu0 %1428 }
 0x324   :  { %1461 = vxpose.xlu1.b32.end [16/16] (narrow) %v1429_v8, 8 }
 0x325   :  { %1063 = vmax.xlane.f32.xlu2 %v6291_v34 }
 0x32b   :  { %v6307_v42 = vpop.permute.xlu0 %1974 }
 0x32c   :  { %1992 = vxpose.xlu1.b32.start [1/16] (narrow) %v5986_v43, 8 }
 0x32d   :  { %1067 = vmax.xlane.f32.xlu2 %v6298_v52 }
 0x333   :  { %v6323_v8 = vpop.permute.xlu0 %2520 }
 0x334   :  { %1993 = vxpose.xlu1.b32.cont [2/16] (narrow) %v6009_v47, 8  ;;  %7812 = vst [vmem:[#allocation58_spill] sm:$0xff] %v6323_v8 }
 0x33c   :  { %1994 = vxpose.xlu1.b32.cont [3/16] (narrow) %v6045_v13, 8 }
 0x344   :  { %1995 = vxpose.xlu1.b32.cont [4/16] (narrow) %v6063_v54, 8 }
 0x34c   :  { %1996 = vxpose.xlu1.b32.cont [5/16] (narrow) %v5917_v58, 8 }
 0x350   :  { %v1462_v1 = vpop.trf.xlu1 }
 0x351   :  { %v6312_v33 = vperm.slane %v1462_v1, 0 }
 0x353   :  { %v1544_v43 = vadd.f32 %v6312_v33, %v5902_v27  ;;  %v1543_v47 = vadd.f32 %v6312_v33, %v5875_v55  ;;  %v1546_v13 = vadd.f32 %v6312_v33, %v5946_v18  ;;  %v1545_v54 = vadd.f32 %v6312_v33, %v5913_v28  ;;  %v6325_v27 = vpop.permute.xlu2 %1539 }
 0x354   :  { %1997 = vxpose.xlu1.b32.cont [6/16] (narrow) %v5929_v9, 8  ;;  %v1548_v28 = vadd.f32 %v6312_v33, %v5897_v44 }
 0x355   :  { %vm1560_vm1 = vcmp.gt.f32.partialorder %v1544_v43, 0.0  ;;  %v1576_v58 = vmul.f32 0.2, %v1544_v43  ;;  %vm1559_vm2 = vcmp.gt.f32.partialorder %v1543_v47, 0.0  ;;  %v1575_v41 = vmul.f32 0.2, %v1543_v47 }
 0x356   :  { %v1578_v18 = vmul.f32 0.2, %v1546_v13  ;;  %v1577_v1 = vmul.f32 0.2, %v1545_v54  ;;  %vm1562_vm3 = vcmp.gt.f32.partialorder %v1546_v13, 0.0  ;;  %vm1561_vm4 = vcmp.gt.f32.partialorder %v1545_v54, 0.0 }
 0x357   :  { %v1592_v51 = vsel %vm1560_vm1, %v1544_v43, %v1576_v58  ;;  %v1591_v62 = vsel %vm1559_vm2, %v1543_v47, %v1575_v41  ;;  %v1547_v58 = vadd.f32 %v6312_v33, %v5887_v57  ;;  %v1580_v8 = vmul.f32 0.2, %v1548_v28 }
 0x358   :  { %v6328_v55 = vadd.f32 %v1592_v51, %v6108_v4  ;;  %v6331_v9 = vadd.f32 %v1591_v62, %v6113_v25  ;;  %v1594_v43 = vsel %vm1562_vm3, %v1546_v13, %v1578_v18  ;;  %v1593_v47 = vsel %vm1561_vm4, %v1545_v54, %v1577_v1 }
 0x359   :  { %v6342_v4 = vadd.f32 %v1594_v43, %v6169_v29  ;;  %v6345_v25 = vadd.f32 %v1593_v47, %v6141_v15  ;;  %vm1564_vm5 = vcmp.gt.f32.partialorder %v1548_v28, 0.0  ;;  %v1579_v44 = vmul.f32 0.2, %v1547_v58 }
 0x35a   :  { %1625 = vmax.xlane.f32.xlu2 %v6328_v55  ;;  %1623 = vmax.xlane.f32.xlu0 %v6331_v9  ;;  %vm1563_vm6 = vcmp.gt.f32.partialorder %v1547_v58, 0.0  ;;  %v1550_v54 = vadd.f32 %v6312_v33, %v5964_v31 }
 0x35b   :  { %v1595_v13 = vsel %vm1563_vm6, %v1547_v58, %v1579_v44  ;;  %v1552_v58 = vadd.f32 %v6312_v33, %v6035_v12 }
 0x35c   :  { %1998 = vxpose.xlu1.b32.cont [7/16] (narrow) %v5969_v32, 8  ;;  %v6359_v43 = vadd.f32 %v1595_v13, %v6136_v5  ;;  %vm1566_vm7 = vcmp.gt.f32.partialorder %v1550_v54, 0.0 }
 0x35d   :  { %vm1568_vm9 = vcmp.gt.f32.partialorder %v1552_v58, 0.0 }
 0x35e   :  { %v1040_v41 = vpop.xlane.xlu0 %1039 }
 0x35f   :  { %v1070_v51 = vsub.f32 %v6121_v20, %v1040_v41  ;;  %v1596_v20 = vsel %vm1564_vm5, %v1548_v28, %v1580_v8 }
 0x360   :  { %v1038_v62 = vpop.xlane.xlu2 %1037  ;;  %v6356_v1 = vadd.f32 %v1596_v20, %v6195_v39 }
 0x361   :  { %v1087_v32 = vmul.f32 1.442695, %v1070_v51  ;;  %v1069_v63 = vsub.f32 %v6130_v21, %v1038_v62  ;;  %v1549_v21 = vadd.f32 %v6312_v33, %v5942_v16  ;;  %v1551_v51 = vadd.f32 %v6312_v33, %v6004_v37 }
 0x362   :  { %1629 = vmax.xlane.f32.xlu2 %v6342_v4  ;;  %1627 = vmax.xlane.f32.xlu0 %v6345_v25  ;;  %v1554_v37 = vadd.f32 %v6312_v33, %v6082_v36 }
 0x363   :  { %v1085_v57 = vmul.f32 1.442695, %v1069_v63  ;;  %4556 = vpow2.f32 %v1087_v32  ;;  %v1582_v63 = vmul.f32 0.2, %v1550_v54  ;;  %v1581_v47 = vmul.f32 0.2, %v1549_v21 }
 0x364   :  { %1999 = vxpose.xlu1.b32.cont [8/16] (narrow) %v6061_v49, 8  ;;  %vm1565_vm8 = vcmp.gt.f32.partialorder %v1549_v21, 0.0  ;;  %v1583_v20 = vmul.f32 0.2, %v1551_v51  ;;  %vm1567_vm10 = vcmp.gt.f32.partialorder %v1551_v51, 0.0  ;;  %vm1570_vm11 = vcmp.gt.f32.partialorder %v1554_v37, 0.0 }
 0x365   :  { %4558 = vpow2.f32 %v1085_v57  ;;  %v1598_v8 = vsel %vm1566_vm7, %v1550_v54, %v1582_v63  ;;  %v1597_v28 = vsel %vm1565_vm8, %v1549_v21, %v1581_v47  ;;  %v1584_v57 = vmul.f32 0.2, %v1552_v58 }
 0x366   :  { %v6376_v44 = vadd.f32 %v1598_v8, %v6219_v11  ;;  %v1599_v54 = vsel %vm1567_vm10, %v1551_v51, %v1583_v20  ;;  %v1586_v47 = vmul.f32 0.2, %v1554_v37 }
 0x367   :  { %v1600_v13 = vsel %vm1568_vm9, %v1552_v58, %v1584_v57  ;;  %v6393_v63 = vadd.f32 %v1599_v54, %v6190_v7 }
 0x368   :  { %v1042_v18 = vpop.xlane.xlu2 %1041 }
 0x369   :  { %v6361_v41 = vpop.eup %4556  ;;  %v1071_v16 = vsub.f32 %v6158_v14, %v1042_v18  ;;  %v6379_v14 = vadd.f32 %v1597_v28, %v6164_v30  ;;  %v6390_v18 = vadd.f32 %v1600_v13, %v6246_v40  ;;  %v1602_v28 = vsel %vm1570_vm11, %v1554_v37, %v1586_v47 }
 0x36a   :  { %1633 = vmax.xlane.f32.xlu2 %v6356_v1  ;;  %1631 = vmax.xlane.f32.xlu0 %v6359_v43  ;;  %v6411_v57 = vadd.f32 %v1602_v28, %v6270_v53  ;;  %v1558_v37 = vadd.f32 %v6312_v33, %v6325_v27 }
 0x36b   :  { %v6365_v31 = vpop.eup %4558  ;;  %v1089_v62 = vmul.f32 1.442695, %v1071_v16 }
 0x36c   :  { %2000 = vxpose.xlu1.b32.cont [9/16] (narrow) %v6016_v22, 8  ;;  %v1165_v49 = vpack.c.bf16 %v6361_v41, %v6365_v31  ;;  %vm1574_vm0 = vcmp.gt.f32.partialorder %v1558_v37, 0.0 }
 0x36d   :  { %4560 = vpow2.f32 %v1089_v62  ;;  %v1556_v62 = vadd.f32 %v6312_v33, %v6161_v6 }
 0x36e   :  { %1229 = vmatmul.bf16.vlgmr.msrb.gmra.mxu3 %v1165_v49  ;;  %v1046_v49 = vpop.xlane.xlu0 %1045 }
 0x36f   :  { %v1073_v58 = vsub.f32 %v6149_v61, %v1046_v49  ;;  %v1588_v20 = vmul.f32 0.2, %v1556_v62  ;;  %vm1572_vm13 = vcmp.gt.f32.partialorder %v1556_v62, 0.0 }
 0x370   :  { %v1044_v32 = vpop.xlane.xlu2 %1043 }
 0x371   :  { %v1072_v22 = vsub.f32 %v6186_v46, %v1044_v32  ;;  %v1553_v46 = vadd.f32 %v6312_v33, %v6072_v24  ;;  %v1555_v32 = vadd.f32 %v6312_v33, %v6123_v10  ;;  %v1557_v10 = vadd.f32 %v6312_v33, %v6254_v26 }
 0x372   :  { %1637 = vmax.xlane.f32.xlu2 %v6376_v44  ;;  %1635 = vmax.xlane.f32.xlu0 %v6379_v14  ;;  %v1604_v61 = vsel %vm1572_vm13, %v1556_v62, %v1588_v20 }
 0x373   :  { %v1091_v12 = vmul.f32 1.442695, %v1072_v22  ;;  %v1585_v16 = vmul.f32 0.2, %v1553_v46  ;;  %vm1569_vm12 = vcmp.gt.f32.partialorder %v1553_v46, 0.0  ;;  %vm1571_vm14 = vcmp.gt.f32.partialorder %v1555_v32, 0.0 }
 0x374   :  { %2001 = vxpose.xlu1.b32.cont [10/16] (narrow) %v6058_v2, 8  ;;  %v6395_v2 = vpop.eup %4560  ;;  %v6424_v54 = vadd.f32 %v1604_v61, %v6285_v19  ;;  %v1589_v47 = vmul.f32 0.2, %v1557_v10  ;;  %vm1573_vm15 = vcmp.gt.f32.partialorder %v1557_v10, 0.0 }
 0x375   :  { %4562 = vpow2.f32 %v1091_v12  ;;  %v1601_v51 = vsel %vm1569_vm12, %v1553_v46, %v1585_v16  ;;  %v1587_v12 = vmul.f32 0.2, %v1555_v32  ;;  %v1590_v16 = vmul.f32 0.2, %v1558_v37 }
 0x377   :  { %v1603_v6 = vsel %vm1571_vm14, %v1555_v32, %v1587_v12 }
 0x378   :  { %v1048_v21 = vpop.xlane.xlu2 %1047  ;;  %v6427_v46 = vadd.f32 %v1603_v6, %v6241_v48 }
 0x379   :  { %v1074_v24 = vsub.f32 %v6210_v50, %v1048_v21  ;;  %v1093_v50 = vmul.f32 1.442695, %v1073_v58 }
 0x37a   :  { %1641 = vmax.xlane.f32.xlu2 %v6390_v18  ;;  %1639 = vmax.xlane.f32.xlu0 %v6393_v63 }
 0x37b   :  { %v6399_v36 = vpop.eup %4562  ;;  %v1095_v22 = vmul.f32 1.442695, %v1074_v24  ;;  %v1605_v24 = vsel %vm1573_vm15, %v1557_v10, %v1589_v47  ;;  %v7815_v10 = vld [vmem:[#allocation48_spill] sm:$0xff]  ;;  %v7816_v47 = vld [vmem:[#allocation50_spill] sm:$0xff] }
 0x37c   :  { %2002 = vxpose.xlu1.b32.cont [11/16] (narrow) %v6077_v35, 8  ;;  %v1166_v8 = vpack.c.bf16 %v6399_v36, %v6395_v2  ;;  %v6414_v35 = vadd.f32 %v1601_v51, %v6216_v56  ;;  %v6435_v58 = vadd.f32 %v1605_v24, %v6265_v3 }
 0x37d   :  { %4564 = vpow2.f32 %v1095_v22 }
 0x37e   :  { %1234 = vmatmul.bf16.gmra.mxu3 %v1166_v8  ;;  %4566 = vpow2.f32 %v1093_v50  ;;  %v1606_v8 = vsel %vm1574_vm0, %v1558_v37, %v1590_v16  ;;  %v7814_v50 = vld [vmem:[#allocation54_spill] sm:$0xff] }
 0x37f   :  { %v6438_v51 = vadd.f32 %v1606_v8, %v6295_v45 }
 0x380   :  { %v1052_v13 = vpop.xlane.xlu2 %1051 }
 0x381   :  { %v1076_v33 = vsub.f32 %v6236_v38, %v1052_v13 }
 0x382   :  { %1645 = vmax.xlane.f32.xlu2 %v6411_v57  ;;  %1643 = vmax.xlane.f32.xlu0 %v6414_v35 }
 0x383   :  { %v4565_v21 = vpop.eup %4564  ;;  %v1099_v28 = vmul.f32 1.442695, %v1076_v33 }
 0x384   :  { %2003 = vxpose.xlu1.b32.cont [12/16] (narrow) %v6089_v0, 8  ;;  %v1050_v0 = vpop.xlane.xlu0 %1049  ;;  %v4567_v26 = vpop.eup %4566 }
 0x385   :  { %v1167_v27 = vpack.c.bf16 %v4565_v21, %v4567_v26  ;;  %v1075_v49 = vsub.f32 %v6177_v17, %v1050_v0  ;;  %4568 = vpow2.f32 %v1099_v28 }
 0x387   :  { %v1097_v62 = vmul.f32 1.442695, %v1075_v49 }
 0x388   :  { %v1056_v17 = vpop.xlane.xlu2 %1055 }
 0x389   :  { %4570 = vpow2.f32 %v1097_v62  ;;  %v1078_v20 = vsub.f32 %v7814_v50, %v1056_v17 }
 0x38a   :  { %1649 = vmax.xlane.f32.xlu2 %v6424_v54  ;;  %1647 = vmax.xlane.f32.xlu0 %v6427_v46 }
 0x38b   :  { %v4569_v38 = vpop.eup %4568  ;;  %v1103_v6 = vmul.f32 1.442695, %v1078_v20 }
 0x38c   :  { %2004 = vxpose.xlu1.b32.cont [13/16] (narrow) %v6151_v60, 8  ;;  %v7813_v60 = vld [vmem:[#allocation37_spill] sm:$0xff]  ;;  %v1054_v32 = vpop.xlane.xlu0 %1053 }
 0x38d   :  { %v1077_v61 = vsub.f32 %v7815_v10, %v1054_v32  ;;  %4572 = vpow2.f32 %v1103_v6 }
 0x38e   :  { %1239 = vmatmul.bf16.gmra.mxu3 %v1167_v27 }
 0x38f   :  { %v4571_v22 = vpop.eup %4570  ;;  %v1101_v37 = vmul.f32 1.442695, %v1077_v61 }
 0x390   :  { %v1168_v12 = vpack.c.bf16 %v4569_v38, %v4571_v22 }
 0x391   :  { %4574 = vpow2.f32 %v1101_v37 }
 0x392   :  { %1651 = vmax.xlane.f32.xlu0 %v6435_v58  ;;  %1653 = vmax.xlane.f32.xlu2 %v6438_v51 }
 0x394   :  { %2005 = vxpose.xlu1.b32.cont [14/16] (narrow) %v7813_v60, 8  ;;  %v1058_v13 = vpop.xlane.xlu0 %1057 }
 0x395   :  { %v1079_v16 = vsub.f32 %v7816_v47, %v1058_v13 }
 0x397   :  { %v1105_v49 = vmul.f32 1.442695, %v1079_v16 }
 0x399   :  { %4576 = vpow2.f32 %v1105_v49 }
 0x39a   :  { %1119 = vadd.xlane.f32.xlu2 %v6361_v41  ;;  %1117 = vadd.xlane.f32.xlu0 %v6365_v31  ;;  %v1060_v41 = vpop.xlane.xlu2 %1059  ;;  %v4573_v31 = vpop.eup %4572 }
 0x39b   :  { %v1080_v0 = vsub.f32 %v6280_v23, %v1060_v41 }
 0x39c   :  { %2006 = vxpose.xlu1.b32.cont [15/16] (narrow) %v6304_v59, 8  ;;  %v4575_v59 = vpop.eup %4574  ;;  %v1062_v27 = vpop.xlane.xlu0 %1061 }
 0x39d   :  { %v1169_v33 = vpack.c.bf16 %v4573_v31, %v4575_v59 }
 0x39e   :  { %1244 = vmatmul.bf16.gmra.mxu3 %v1168_v12 }
 0x39f   :  { %v4577_v62 = vpop.eup %4576 }
 0x3a2   :  { %1125 = vadd.xlane.f32.xlu2 %v4567_v26  ;;  %1121 = vadd.xlane.f32.xlu0 %v6395_v2  ;;  %v1107_v26 = vmul.f32 1.442695, %v1080_v0  ;;  %v7817_v2 = vld [vmem:[#allocation53_spill] sm:$0xff]  ;;  %v1064_v24 = vpop.xlane.xlu2 %1063 }
 0x3a3   :  { %v1082_v23 = vsub.f32 %v6291_v34, %v1064_v24 }
 0x3a4   :  { %2007 = vxpose.xlu1.b32.end [16/16] (narrow) %v6307_v42, 8  ;;  %v1081_v42 = vsub.f32 %v7817_v2, %v1062_v27  ;;  %4578 = vpow2.f32 %v1107_v26  ;;  %v1066_v28 = vpop.xlane.xlu0 %1065 }
 0x3a5   :  { %v1111_v50 = vmul.f32 1.442695, %v1082_v23 }
 0x3a6   :  { %v1109_v8 = vmul.f32 1.442695, %v1081_v42 }
 0x3a8   :  { %4580 = vpow2.f32 %v1109_v8 }
 0x3aa   :  { %1129 = vadd.xlane.f32.xlu2 %v4571_v22  ;;  %1127 = vadd.xlane.f32.xlu0 %v4565_v21  ;;  %v4579_v60 = vpop.eup %4578  ;;  %v7818_v21 = vld [vmem:[#allocation56_spill] sm:$0xff] }
 0x3ab   :  { %v1083_v17 = vsub.f32 %v7818_v21, %v1066_v28  ;;  %v1170_v32 = vpack.c.bf16 %v4579_v60, %v4577_v62 }
 0x3ad   :  { %v1113_v22 = vmul.f32 1.442695, %v1083_v17 }
 0x3ae   :  { %1249 = vmatmul.bf16.gmra.mxu3 %v1169_v33  ;;  %v4581_v20 = vpop.eup %4580 }
 0x3af   :  { %4582 = vpow2.f32 %v1113_v22 }
 0x3b0   :  { %4584 = vpow2.f32 %v1111_v50 }
 0x3b2   :  { %1133 = vadd.xlane.f32.xlu2 %v4575_v59  ;;  %1131 = vadd.xlane.f32.xlu0 %v4569_v38  ;;  %v1068_v38 = vpop.xlane.xlu2 %1067 }
 0x3b3   :  { %v1084_v12 = vsub.f32 %v6298_v52, %v1068_v38 }
 0x3b5   :  { %v1115_v10 = vmul.f32 1.442695, %v1084_v12  ;;  %v4583_v61 = vpop.eup %4582 }
 0x3b6   :  { %v4585_v6 = vpop.eup %4584 }
 0x3b7   :  { %4586 = vpow2.f32 %v1115_v10  ;;  %v1171_v37 = vpack.c.bf16 %v4585_v6, %v4581_v20 }
 0x3ba   :  { %1137 = vadd.xlane.f32.xlu2 %v4577_v62  ;;  %1135 = vadd.xlane.f32.xlu0 %v4573_v31 }
 0x3bd   :  { %v4587_v59 = vpop.eup %4586 }
 0x3be   :  { %1254 = vmatmul.bf16.gmra.mxu3 %v1170_v32 }
 0x3c2   :  { %1141 = vadd.xlane.f32.xlu2 %v4581_v20  ;;  %1139 = vadd.xlane.f32.xlu0 %v4579_v60 }
 0x3ca   :  { %1145 = vadd.xlane.f32.xlu2 %v4583_v61  ;;  %1143 = vadd.xlane.f32.xlu0 %v4585_v6 }
 0x3cd   :  { %v1624_v34 = vpop.xlane.xlu0 %1623  ;;  %v1626_v13 = vpop.xlane.xlu2 %1625 }
 0x3ce   :  { %v1655_v41 = vsub.f32 %v6331_v9, %v1624_v34  ;;  %v1656_v31 = vsub.f32 %v6328_v55, %v1626_v13  ;;  %1259 = vmatmul.bf16.gmra.mxu3 %v1171_v37  ;;  %v1172_v55 = vpack.c.bf16 %v4587_v59, %v4583_v61 }
 0x3d0   :  { %v1671_v47 = vmul.f32 1.442695, %v1655_v41  ;;  %v1673_v16 = vmul.f32 1.442695, %v1656_v31 }
 0x3d2   :  { %4588 = vpow2.f32 %v1671_v47  ;;  %1147 = vadd.xlane.f32.xlu0 %v4587_v59 }
 0x3d3   :  { %4590 = vpow2.f32 %v1673_v16 }
 0x3d5   :  { %v1628_v52 = vpop.xlane.xlu0 %1627  ;;  %v1630_v0 = vpop.xlane.xlu2 %1629 }
 0x3d6   :  { %v1658_v33 = vsub.f32 %v6342_v4, %v1630_v0  ;;  %v1657_v2 = vsub.f32 %v6345_v25, %v1628_v52 }
 0x3d8   :  { %v4589_v27 = vpop.eup %4588  ;;  %v1677_v49 = vmul.f32 1.442695, %v1658_v33  ;;  %v1675_v42 = vmul.f32 1.442695, %v1657_v2 }
 0x3d9   :  { %v4591_v26 = vpop.eup %4590 }
 0x3da   :  { %1705 = vadd.xlane.f32.xlu2 %v4591_v26  ;;  %1703 = vadd.xlane.f32.xlu0 %v4589_v27  ;;  %v1751_v9 = vpack.c.bf16 %v4591_v26, %v4589_v27  ;;  %4592 = vpow2.f32 %v1677_v49 }
 0x3db   :  { %4594 = vpow2.f32 %v1675_v42 }
 0x3dc   :  { %1791 = vmatmul.bf16.vlgmr.msrb.gmra.mxu0 %v1751_v9 }
 0x3dd   :  { %v1632_v24 = vpop.xlane.xlu0 %1631  ;;  %v1634_v8 = vpop.xlane.xlu2 %1633 }
 0x3de   :  { %v1659_v28 = vsub.f32 %v6359_v43, %v1632_v24  ;;  %v1660_v62 = vsub.f32 %v6356_v1, %v1634_v8  ;;  %1264 = vmatmul.bf16.gmra.mxu3 %v1172_v55 }
 0x3e0   :  { %v1679_v4 = vmul.f32 1.442695, %v1659_v28  ;;  %v1681_v60 = vmul.f32 1.442695, %v1660_v62  ;;  %v4593_v21 = vpop.eup %4592 }
 0x3e1   :  { %v4595_v22 = vpop.eup %4594 }
 0x3e2   :  { %4596 = vpow2.f32 %v1679_v4  ;;  %1709 = vadd.xlane.f32.xlu0 %v4593_v21  ;;  %v1752_v1 = vpack.c.bf16 %v4593_v21, %v4595_v22  ;;  %v7823_v21 = vld [vmem:[#allocation8_spill] sm:$0xff] }
 0x3e3   :  { %4598 = vpow2.f32 %v1681_v60 }
 0x3e5   :  { %v1636_v25 = vpop.xlane.xlu0 %1635  ;;  %v1638_v17 = vpop.xlane.xlu2 %1637 }
 0x3e6   :  { %v1661_v23 = vsub.f32 %v6379_v14, %v1636_v25  ;;  %v1662_v32 = vsub.f32 %v6376_v44, %v1638_v17 }
 0x3e8   :  { %v4597_v50 = vpop.eup %4596  ;;  %v1683_v38 = vmul.f32 1.442695, %v1661_v23  ;;  %v1685_v43 = vmul.f32 1.442695, %v1662_v32 }
 0x3e9   :  { %v4599_v20 = vpop.eup %4598  ;;  %1711 = vadd.xlane.f32.xlu2 %v4597_v50 }
 0x3ea   :  { %4600 = vpow2.f32 %v1683_v38  ;;  %1713 = vadd.xlane.f32.xlu0 %v4599_v20  ;;  %v7827_v38 = vld [vmem:[#allocation25_spill] sm:$0xff] }
 0x3eb   :  { %4602 = vpow2.f32 %v1685_v43 }
 0x3ec   :  { %1796 = vmatmul.bf16.gmra.mxu0 %v1752_v1 }
 0x3ed   :  { %v1640_v12 = vpop.xlane.xlu0 %1639  ;;  %v1642_v10 = vpop.xlane.xlu2 %1641 }
 0x3ee   :  { %v1663_v61 = vsub.f32 %v6393_v63, %v1640_v12  ;;  %v1664_v6 = vsub.f32 %v6390_v18, %v1642_v10  ;;  %v1753_v18 = vpack.c.bf16 %v4599_v20, %v4597_v50  ;;  %v7829_v12 = vld [vmem:[#allocation29_spill] sm:$0xff] }
 0x3f0   :  { %v4601_v14 = vpop.eup %4600  ;;  %v1687_v37 = vmul.f32 1.442695, %v1663_v61  ;;  %v1689_v44 = vmul.f32 1.442695, %v1664_v6  ;;  %v7831_v61 = vld [vmem:[#allocation6_spill] sm:$0xff] }
 0x3f1   :  { %v4603_v34 = vpop.eup %4602  ;;  %1715 = vadd.xlane.f32.xlu2 %v4601_v14 }
 0x3f2   :  { %4604 = vpow2.f32 %v1687_v37  ;;  %1717 = vadd.xlane.f32.xlu0 %v4603_v34 }
 0x3f3   :  { %4606 = vpow2.f32 %v1689_v44  ;;  %v7833_v44 = vld [vmem:[#allocation36_spill] sm:$0xff] }
 0x3f5   :  { %v1644_v13 = vpop.xlane.xlu0 %1643  ;;  %v1646_v41 = vpop.xlane.xlu2 %1645 }
 0x3f6   :  { %v1665_v31 = vsub.f32 %v6414_v35, %v1644_v13  ;;  %v1666_v47 = vsub.f32 %v6411_v57, %v1646_v41  ;;  %v7834_v13 = vld [vmem:[#allocation5_spill] sm:$0xff]  ;;  %v7835_v41 = vld [vmem:[#allocation19_spill] sm:$0xff] }
 0x3f8   :  { %v4605_v16 = vpop.eup %4604  ;;  %v1691_v59 = vmul.f32 1.442695, %v1665_v31  ;;  %v1693_v52 = vmul.f32 1.442695, %v1666_v47  ;;  %v7836_v47 = vld [vmem:[#allocation21_spill] sm:$0xff] }
 0x3f9   :  { %v4607_v63 = vpop.eup %4606  ;;  %1719 = vadd.xlane.f32.xlu2 %v4605_v16 }
 0x3fa   :  { %4608 = vpow2.f32 %v1691_v59  ;;  %1721 = vadd.xlane.f32.xlu0 %v4607_v63  ;;  %v1755_v4 = vpack.c.bf16 %v4607_v63, %v4605_v16  ;;  %v7837_v59 = vld [vmem:[#allocation23_spill] sm:$0xff] }
 0x3fb   :  { %4610 = vpow2.f32 %v1693_v52  ;;  %v7838_v52 = vld [vmem:[#allocation26_spill] sm:$0xff] }
 0x3fc   :  { %1801 = vmatmul.bf16.gmra.mxu0 %v1753_v18  ;;  %v7839_v18 = vld [vmem:[#allocation30_spill] sm:$0xff] }
 0x3fd   :  { %v1648_v0 = vpop.xlane.xlu0 %1647  ;;  %v1650_v33 = vpop.xlane.xlu2 %1649 }
 0x3fe   :  { %v1667_v27 = vsub.f32 %v6427_v46, %v1648_v0  ;;  %v1668_v49 = vsub.f32 %v6424_v54, %v1650_v33  ;;  %v1754_v54 = vpack.c.bf16 %v4603_v34, %v4601_v14  ;;  %v7840_v33 = vld [vmem:[#allocation34_spill] sm:$0xff] }
 0x400   :  { %v4609_v26 = vpop.eup %4608  ;;  %v1695_v35 = vmul.f32 1.442695, %v1667_v27  ;;  %v1697_v2 = vmul.f32 1.442695, %v1668_v49  ;;  %v7842_v49 = vld [vmem:[#allocation35_spill] sm:$0xff] }
 0x401   :  { %v4611_v57 = vpop.eup %4610  ;;  %1723 = vadd.xlane.f32.xlu2 %v4609_v26 }
 0x402   :  { %4612 = vpow2.f32 %v1695_v35  ;;  %1725 = vadd.xlane.f32.xlu0 %v4611_v57  ;;  %v1756_v25 = vpack.c.bf16 %v4611_v57, %v4609_v26  ;;  %v7843_v35 = vld [vmem:[#allocation38_spill] sm:$0xff]  ;;  %v7844_v57 = vld [vmem:[#allocation41_spill] sm:$0xff] }
 0x403   :  { %4614 = vpow2.f32 %v1697_v2 }
 0x404   :  { %1123 = vadd.xlane.f32.xlu1 %v6399_v36 }
 0x405   :  { %v1652_v9 = vpop.xlane.xlu0 %1651  ;;  %v1654_v32 = vpop.xlane.xlu2 %1653 }
 0x406   :  { %v1669_v55 = vsub.f32 %v6435_v58, %v1652_v9  ;;  %v7821_v58 = vld [vmem:[#allocation9_spill] sm:$0xff]  ;;  %v1670_v50 = vsub.f32 %v6438_v51, %v1654_v32  ;;  %v7832_v51 = vld [vmem:[#allocation31_spill] sm:$0xff] }
 0x408   :  { %v4613_v42 = vpop.eup %4612  ;;  %v1699_v24 = vmul.f32 1.442695, %v1669_v55  ;;  %v1701_v20 = vmul.f32 1.442695, %v1670_v50  ;;  %v7845_v55 = vld [vmem:[#allocation51_spill] sm:$0xff] }
 0x409   :  { %v4615_v8 = vpop.eup %4614  ;;  %1727 = vadd.xlane.f32.xlu2 %v4613_v42 }
 0x40a   :  { %4616 = vpow2.f32 %v1699_v24  ;;  %1729 = vadd.xlane.f32.xlu0 %v4615_v8  ;;  %v1757_v43 = vpack.c.bf16 %v4615_v8, %v4613_v42  ;;  %v7846_v24 = vld [vmem:[#allocation57_spill] sm:$0xff] }
 0x40b   :  { %4618 = vpow2.f32 %v1701_v20 }
 0x40c   :  { %1806 = vmatmul.bf16.gmra.mxu0 %v1754_v54  ;;  %1707 = vadd.xlane.f32.xlu1 %v4595_v22  ;;  %v7826_v22 = vld [vmem:[#allocation7_spill] sm:$0xff]  ;;  %v7847_v54 = vld [vmem:[#allocation58_spill] sm:$0xff] }
 0x40d   :  { %v6472_v46 = vpop.xlane.xlu0 %1117  ;;  %v6541_v32 = vpop.xlane.xlu2 %1119 }
 0x410   :  { %v4617_v28 = vpop.eup %4616 }
 0x411   :  { %1731 = vadd.xlane.f32.xlu2 %v4617_v28  ;;  %v6503_v6 = vpop.eup %4618 }
 0x412   :  { %v1758_v14 = vpack.c.bf16 %v6503_v6, %v4617_v28 }
 0x415   :  { %v6474_v62 = vpop.xlane.xlu0 %1121 }
 0x416   :  { %7819 = vst [vmem:[#allocation37_spill] sm:$0xff] %v6474_v62 }
 0x41c   :  { %1811 = vmatmul.bf16.gmra.mxu0 %v1755_v4  ;;  %v7717_v4 = vmov 3  }
 0x41d   :  { %v6476_v36 = vpop.xlane.xlu0 %1127  ;;  %4391 = vset.pattern.permute.xlu0 %v7717_v4 }
 0x41e   :  { %7820 = vst [vmem:[#allocation54_spill] sm:$0xff] %v6476_v36  ;;  %2865 = vrot.lane.b32.xlu0 %v7821_v58, %s5043_s2 }
 0x425   :  { %v6480_v60 = vpop.xlane.xlu0 %1131 }
 0x426   :  { %7822 = vst [vmem:[#allocation48_spill] sm:$0xff] %v6480_v60  ;;  %2863 = vrot.lane.b32.xlu0 %v7823_v21, %s5043_s2 }
 0x42c   :  { %1816 = vmatmul.bf16.gmra.mxu0 %v1756_v25 }
 0x42d   :  { %v6484_v17 = vpop.xlane.xlu0 %1135 }
 0x42e   :  { %7824 = vst [vmem:[#allocation50_spill] sm:$0xff] %v6484_v17  ;;  %2319 = vrot.lane.b32.xlu0 %v7821_v58, %s5044_s23 }
 0x435   :  { %v6488_v23 = vpop.xlane.xlu0 %1139 }
 0x436   :  { %7825 = vst [vmem:[#allocation53_spill] sm:$0xff] %v6488_v23  ;;  %2861 = vrot.lane.b32.xlu0 %v7826_v22, %s5043_s2 }
 0x43a   :  { %2538 = vxpose.xlu2.b32.start [1/16] (narrow) %v7827_v38, 8  ;;  %v7719_v38 = vmov 2  }
 0x43b   :  { %4394 = vset.pattern.permute.xlu1 %v7719_v38 }
 0x43c   :  { %1821 = vmatmul.bf16.gmra.mxu0 %v1757_v43 }
 0x43d   :  { %v6494_v1 = vpop.xlane.xlu0 %1143 }
 0x43e   :  { %7828 = vst [vmem:[#allocation56_spill] sm:$0xff] %v6494_v1  ;;  %2317 = vrot.lane.b32.xlu0 %v7823_v21, %s5044_s23 }
 0x442   :  { %2539 = vxpose.xlu2.b32.cont [2/16] (narrow) %v7829_v12, 8 }
 0x445   :  { %v6499_v10 = vpop.xlane.xlu0 %1147 }
 0x446   :  { %7830 = vst [vmem:[#allocation9_spill] sm:$0xff] %v6499_v10  ;;  %2859 = vrot.lane.b32.xlu0 %v7831_v61, %s5043_s2 }
 0x44a   :  { %2540 = vxpose.xlu2.b32.cont [3/16] (narrow) %v7832_v51, 8 }
 0x44c   :  { %1826 = vmatmul.bf16.gmra.mxu0 %v1758_v14 }
 0x44d   :  { %v6507_v37 = vpop.xlane.xlu0 %1703 }
 0x44e   :  { %2315 = vrot.lane.b32.xlu0 %v7826_v22, %s5044_s23  ;;  %v6543_v22 = vpop.xlane.xlu2 %1125 }
 0x44f   :  { %7848 = vst [vmem:[#allocation7_spill] sm:$0xff] %v6543_v22 }
 0x452   :  { %2541 = vxpose.xlu2.b32.cont [4/16] (narrow) %v7833_v44, 8  ;;  %v7855_v44 = vld [vmem:[#allocation12_spill] sm:$0xff] }
 0x455   :  { %v6512_v34 = vpop.xlane.xlu0 %1709 }
 0x456   :  { %2857 = vrot.lane.b32.xlu0 %v7834_v13, %s5043_s2  ;;  %v6545_v50 = vpop.xlane.xlu2 %1129 }
 0x457   :  { %7849 = vst [vmem:[#allocation25_spill] sm:$0xff] %v6545_v50 }
 0x45a   :  { %2542 = vxpose.xlu2.b32.cont [5/16] (narrow) %v7835_v41, 8 }
 0x45d   :  { %v6519_v31 = vpop.xlane.xlu0 %1713 }
 0x45e   :  { %2313 = vrot.lane.b32.xlu0 %v7831_v61, %s5044_s23  ;;  %v6548_v43 = vpop.xlane.xlu2 %1133  ;;  %v7853_v61 = vld [vmem:[#allocation11_spill] sm:$0xff] }
 0x45f   :  { %7850 = vst [vmem:[#allocation29_spill] sm:$0xff] %v6548_v43 }
 0x462   :  { %2543 = vxpose.xlu2.b32.cont [6/16] (narrow) %v7836_v47, 8  ;;  %v7856_v47 = vld [vmem:[#allocation16_spill] sm:$0xff] }
 0x465   :  { %v6522_v16 = vpop.xlane.xlu0 %1717 }
 0x466   :  { %v6550_v20 = vpop.xlane.xlu2 %1137 }
 0x467   :  { %7851 = vst [vmem:[#allocation6_spill] sm:$0xff] %v6550_v20 }
 0x46a   :  { %2544 = vxpose.xlu2.b32.cont [7/16] (narrow) %v7837_v59, 8 }
 0x46d   :  { %v6526_v63 = vpop.xlane.xlu0 %1721 }
 0x46e   :  { %v6553_v12 = vpop.xlane.xlu2 %1141 }
 0x46f   :  { %7852 = vst [vmem:[#allocation31_spill] sm:$0xff] %v6553_v12 }
 0x472   :  { %2545 = vxpose.xlu2.b32.cont [8/16] (narrow) %v7838_v52, 8 }
 0x475   :  { %v6529_v0 = vpop.xlane.xlu0 %1725 }
 0x476   :  { %v6556_v51 = vpop.xlane.xlu2 %1145 }
 0x477   :  { %7854 = vst [vmem:[#allocation36_spill] sm:$0xff] %v6556_v51 }
 0x47a   :  { %2546 = vxpose.xlu2.b32.cont [9/16] (narrow) %v7839_v18, 8  ;;  %v7857_v18 = vld [vmem:[#allocation17_spill] sm:$0xff] }
 0x47d   :  { %v6532_v27 = vpop.xlane.xlu0 %1729 }
 0x47e   :  { %7841 = vst [vmem:[#allocation8_spill] sm:$0xff] %v6532_v27  ;;  %v6560_v14 = vpop.xlane.xlu2 %1705 }
 0x482   :  { %2547 = vxpose.xlu2.b32.cont [10/16] (narrow) %v7840_v33, 8 }
 0x486   :  { %v6563_v41 = vpop.xlane.xlu2 %1711 }
 0x48a   :  { %2548 = vxpose.xlu2.b32.cont [11/16] (narrow) %v7842_v49, 8  ;;  %v7858_v49 = vld [vmem:[#allocation4_spill] sm:$0xff] }
 0x48e   :  { %v6567_v59 = vpop.xlane.xlu2 %1715 }
 0x490   :  { %v2866_v26 = vpop.permute.xlu0 %2865 }
 0x491   :  { %2875 = vmatpush.bf16.msrb.mxu2 %v2866_v26  ;;  %v7859_v26 = vld [vmem:[#allocation3_spill] sm:$0xff] }
 0x492   :  { %2549 = vxpose.xlu2.b32.cont [12/16] (narrow) %v7843_v35, 8 }
 0x496   :  { %v6571_v52 = vpop.xlane.xlu2 %1719 }
 0x498   :  { %v2864_v2 = vpop.permute.xlu0 %2863 }
 0x499   :  { %2876 = vmatpush.bf16.msrb.mxu2 %v2864_v2  ;;  %v7861_v2 = vld [vmem:[#allocation2_spill] sm:$0xff] }
 0x49a   :  { %2550 = vxpose.xlu2.b32.cont [13/16] (narrow) %v7844_v57, 8 }
 0x49e   :  { %v6575_v33 = vpop.xlane.xlu2 %1723 }
 0x4a0   :  { %v2320_v9 = vpop.permute.xlu0 %2319 }
 0x4a1   :  { %2329 = vmatpush.bf16.msrb.mxu1 %v2320_v9 }
 0x4a2   :  { %2551 = vxpose.xlu2.b32.cont [14/16] (narrow) %v7845_v55, 8 }
 0x4a6   :  { %v6582_v35 = vpop.xlane.xlu2 %1727 }
 0x4a7   :  { %7860 = vst [vmem:[#allocation5_spill] sm:$0xff] %v6582_v35 }
 0x4a8   :  { %v2862_v42 = vpop.permute.xlu0 %2861 }
 0x4a9   :  { %2877 = vmatpush.bf16.msrb.mxu2 %v2862_v42 }
 0x4aa   :  { %2552 = vxpose.xlu2.b32.cont [15/16] (narrow) %v7846_v24, 8 }
 0x4ae   :  { %v6586_v57 = vpop.xlane.xlu2 %1731 }
 0x4af   :  { %7862 = vst [vmem:[#allocation19_spill] sm:$0xff] %v6586_v57 }
 0x4b0   :  { %v2318_v8 = vpop.permute.xlu0 %2317 }
 0x4b1   :  { %2330 = vmatpush.bf16.msrb.mxu1 %v2318_v8 }
 0x4b2   :  { %2553 = vxpose.xlu2.b32.end [16/16] (narrow) %v7847_v54, 8 }
 0x4b8   :  { %v2860_v28 = vpop.permute.xlu0 %2859 }
 0x4b9   :  { %2878 = vmatpush.bf16.msrb.mxu2 %v2860_v28  ;;  %v7863_v28 = vld [vmem:[#allocation40_spill] sm:$0xff] }
 0x4c0   :  { %v2316_v58 = vpop.permute.xlu0 %2315 }
 0x4c1   :  { %2331 = vmatpush.bf16.msrb.mxu1 %v2316_v58 }
 0x4c8   :  { %v2858_v21 = vpop.permute.xlu0 %2857 }
 0x4c9   :  { %2879 = vmatpush.bf16.msrb.mxu2 %v2858_v21  ;;  %v7864_v21 = vld [vmem:[#allocation14_spill] sm:$0xff] }
 0x4d0   :  { %v2314_v25 = vpop.permute.xlu0 %2313 }
 0x4d1   :  { %2332 = vmatpush.bf16.msrb.mxu1 %v2314_v25  ;;  %v7865_v25 = vld [vmem:[#allocation10_spill] sm:$0xff] }
 0x4d3   :  { %v2554_v9 = vpop.trf.xlu2 }
 0x4d4   :  { %v6588_v55 = vperm.slane %v2554_v9, 0  ;;  %v2008_v9 = vpop.trf.xlu1 }
 0x514   :  { %4387 = vset.pattern.permute.xlu2 %v7717_v4 }
 0x51b   :  { %2571 = vperm.xlu2 %4387, %v7853_v61  }
 0x523   :  { %4388 = vset.pattern.permute.xlu2 %v7719_v38 }
 0x524   :  { %2025 = vperm.xlu2 %4388, %v7853_v61   ;;  %v7866_v61 = vld [vmem:[#allocation13_spill] sm:$0xff] }
 0x52c   :  { %2029 = vperm.xlu2 %4388, %v7855_v44  }
 0x534   :  { %4389 = vset.pattern.permute.xlu2 %v7717_v4 }
 0x535   :  { %2583 = vperm.xlu2 %4389, %v7856_v47  }
 0x53d   :  { %4390 = vset.pattern.permute.xlu2 %v7719_v38 }
 0x53e   :  { %2037 = vperm.xlu2 %4390, %v7856_v47   ;;  %v7867_v47 = vld [vmem:[#allocation15_spill] sm:$0xff] }
 0x546   :  { %4392 = vset.pattern.permute.xlu2 %v7717_v4 }
 0x547   :  { %2599 = vperm.xlu2 %4392, %v7857_v18  }
 0x54f   :  { %2853 = vrot.lane.b32.xlu2 %v7858_v49, %s5043_s2 }
 0x550   :  { %4395 = vset.pattern.permute.xlu2 %v7719_v38 }
 0x557   :  { %2309 = vrot.lane.b32.xlu2 %v7859_v26, %s5044_s23 }
 0x55f   :  { %2851 = vrot.lane.b32.xlu2 %v7861_v2, %s5043_s2 }
 0x575   :  { %v2572_v42 = vpop.permute.xlu2 %2571 }
 0x576   :  { %v2635_v24 = vadd.f32 %v6588_v55, %v2572_v42  ;;  %v6604_v42 = vperm.slane %v2008_v9, 0 }
 0x578   :  { %vm2651_vm1 = vcmp.gt.f32.partialorder %v2635_v24, 0.0  ;;  %v2667_v8 = vmul.f32 0.2, %v2635_v24 }
 0x57a   :  { %v2683_v54 = vsel %vm2651_vm1, %v2635_v24, %v2667_v8 }
 0x57b   :  { %v6592_v58 = vadd.f32 %v2683_v54, %v7863_v28 }
 0x57d   :  { %2715 = vmax.xlane.f32.xlu0 %v6592_v58 }
 0x57e   :  { %v2026_v24 = vpop.permute.xlu2 %2025 }
 0x585   :  { %1733 = vadd.xlane.f32.xlu0 %v6503_v6  ;;  %v2089_v6 = vadd.f32 %v6604_v42, %v2026_v24 }
 0x586   :  { %v2030_v10 = vpop.permute.xlu2 %2029 }
 0x587   :  { %vm2105_vm2 = vcmp.gt.f32.partialorder %v2089_v6, 0.0 }
 0x58f   :  { %v2584_v9 = vpop.permute.xlu2 %2583 }
 0x599   :  { %2575 = vperm.xlu0 %4391, %v7855_v44   ;;  %v2121_v44 = vmul.f32 0.2, %v2089_v6 }
 0x59b   :  { %v2137_v8 = vsel %vm2105_vm2, %v2089_v6, %v2121_v44  ;;  %v7869_v44 = vld [vmem:[#allocation39_spill] sm:$0xff] }
 0x59c   :  { %v6608_v54 = vadd.f32 %v2137_v8, %v7863_v28  ;;  %v2038_v28 = vpop.permute.xlu2 %2037 }
 0x5a1   :  { %2579 = vperm.xlu0 %4391, %v7864_v21  }
 0x5a9   :  { %2587 = vperm.xlu0 %4391, %v7865_v25  }
 0x5b1   :  { %2591 = vperm.xlu0 %4391, %v7866_v61  }
 0x5b9   :  { %2595 = vperm.xlu0 %4391, %v7867_v47  }
 0x5c1   :  { %2311 = vrot.lane.b32.xlu0 %v7834_v13, %s5044_s23 }
 0x5c2   :  { %4393 = vset.pattern.permute.xlu0 %v7719_v38 }
 0x5eb   :  { %2169 = vmax.xlane.f32.xlu0 %v6608_v54 }
 0x5f0   :  { %v6611_v4 = vpop.xlane.xlu0 %2715 }
 0x5f8   :  { %v6614_v13 = vpop.xlane.xlu0 %1733 }
 0x5f9   :  { %7868 = vst [vmem:[#allocation21_spill] sm:$0xff] %v6614_v13 }
 0x5ff   :  { %2033 = vperm.xlu0 %4393, %v7864_v21  }
 0x607   :  { %2041 = vperm.xlu0 %4393, %v7865_v25   ;;  %v2092_v25 = vadd.f32 %v6604_v42, %v2038_v28  ;;  %v6636_v28 = vpop.permute.xlu2 %2599 }
 0x609   :  { %vm2108_vm5 = vcmp.gt.f32.partialorder %v2092_v25, 0.0 }
 0x60b   :  { %v2576_v38 = vpop.permute.xlu0 %2575 }
 0x60c   :  { %v2636_v24 = vadd.f32 %v6588_v55, %v2576_v38 }
 0x60e   :  { %v2668_v51 = vmul.f32 0.2, %v2636_v24  ;;  %vm2652_vm3 = vcmp.gt.f32.partialorder %v2636_v24, 0.0 }
 0x60f   :  { %2049 = vperm.xlu0 %4393, %v7867_v47  }
 0x610   :  { %v2684_v6 = vsel %vm2652_vm3, %v2636_v24, %v2668_v51  ;;  %v2124_v51 = vmul.f32 0.2, %v2092_v25 }
 0x611   :  { %v6620_v8 = vadd.f32 %v2684_v6, %v7869_v44 }
 0x612   :  { %v2140_v6 = vsel %vm2108_vm5, %v2092_v25, %v2124_v51 }
 0x613   :  { %2717 = vmax.xlane.f32.xlu1 %v6620_v8  ;;  %v2580_v21 = vpop.permute.xlu0 %2579 }
 0x614   :  { %v2637_v1 = vadd.f32 %v6588_v55, %v2580_v21  ;;  %v6634_v21 = vadd.f32 %v2140_v6, %v6169_v29 }
 0x616   :  { %vm2653_vm4 = vcmp.gt.f32.partialorder %v2637_v1, 0.0  ;;  %v2669_v12 = vmul.f32 0.2, %v2637_v1 }
 0x617   :  { %2307 = vrot.lane.b32.xlu0 %v7858_v49, %s5044_s23 }
 0x618   :  { %v2685_v38 = vsel %vm2653_vm4, %v2637_v1, %v2669_v12  ;;  %v2854_v1 = vpop.permute.xlu2 %2853 }
 0x619   :  { %v6628_v47 = vadd.f32 %v2685_v38, %v6141_v15  ;;  %v2638_v38 = vadd.f32 %v6588_v55, %v2584_v9 }
 0x61b   :  { %2719 = vmax.xlane.f32.xlu2 %v6628_v47  ;;  %v6631_v24 = vpop.permute.xlu0 %2587  ;;  %v2670_v17 = vmul.f32 0.2, %v2638_v38  ;;  %vm2654_vm6 = vcmp.gt.f32.partialorder %v2638_v38, 0.0 }
 0x61d   :  { %v2686_v51 = vsel %vm2654_vm6, %v2638_v38, %v2670_v17 }
 0x61e   :  { %v6644_v6 = vadd.f32 %v2686_v51, %v6169_v29 }
 0x620   :  { %v2310_v20 = vpop.permute.xlu2 %2309 }
 0x623   :  { %v2592_v23 = vpop.permute.xlu0 %2591  ;;  %2175 = vmax.xlane.f32.xlu2 %v6634_v21 }
 0x624   :  { %v2640_v25 = vadd.f32 %v6588_v55, %v2592_v23 }
 0x626   :  { %v2672_v43 = vmul.f32 0.2, %v2640_v25  ;;  %vm2656_vm7 = vcmp.gt.f32.partialorder %v2640_v25, 0.0 }
 0x628   :  { %v2688_v57 = vsel %vm2656_vm7, %v2640_v25, %v2672_v43 }
 0x629   :  { %v6649_v9 = vadd.f32 %v2688_v57, %v6195_v39 }
 0x62b   :  { %v2596_v49 = vpop.permute.xlu0 %2595 }
 0x62c   :  { %2855 = vrot.lane.b32.xlu1 %v7859_v26, %s5043_s2  ;;  %v2641_v26 = vadd.f32 %v6588_v55, %v2596_v49 }
 0x62e   :  { %vm2657_vm8 = vcmp.gt.f32.partialorder %v2641_v26, 0.0 }
 0x633   :  { %v2312_v12 = vpop.permute.xlu0 %2311 }
 0x634   :  { %2333 = vmatpush.bf16.msrb.mxu1 %v2312_v12  ;;  %v2673_v12 = vmul.f32 0.2, %v2641_v26 }
 0x636   :  { %v2689_v17 = vsel %vm2657_vm8, %v2641_v26, %v2673_v12 }
 0x637   :  { %v6654_v38 = vadd.f32 %v2689_v17, %v6164_v30  ;;  %v7870_v17 = vmov 3  }
 0x638   :  { %2334 = vmatpush.bf16.msrb.mxu1 %v2310_v20  ;;  %v2090_v20 = vadd.f32 %v6604_v42, %v2030_v10 }
 0x63a   :  { %v2122_v23 = vmul.f32 0.2, %v2090_v20  ;;  %vm2106_vm9 = vcmp.gt.f32.partialorder %v2090_v20, 0.0 }
 0x63c   :  { %v2138_v51 = vsel %vm2106_vm9, %v2090_v20, %v2122_v23 }
 0x63d   :  { %v6658_v43 = vadd.f32 %v2138_v51, %v7869_v44 }
 0x641   :  { %2721 = vmax.xlane.f32.xlu0 %v6644_v6 }
 0x649   :  { %2725 = vmax.xlane.f32.xlu0 %v6649_v9 }
 0x651   :  { %2727 = vmax.xlane.f32.xlu0 %v6654_v38 }
 0x656   :  { %2171 = vmax.xlane.f32.xlu1 %v6658_v43 }
 0x65e   :  { %v6661_v57 = vpop.xlane.xlu0 %2169 }
 0x66f   :  { %2045 = vperm.xlu1 %4394, %v7866_v61   ;;  %v6673_v61 = vpop.xlane.xlu1 %1123 }
 0x670   :  { %7871 = vst [vmem:[#allocation23_spill] sm:$0xff] %v6673_v61 }
 0x671   :  { %v2034_v10 = vpop.permute.xlu0 %2033 }
 0x672   :  { %v2091_v29 = vadd.f32 %v6604_v42, %v2034_v10 }
 0x674   :  { %v2123_v13 = vmul.f32 0.2, %v2091_v29  ;;  %vm2107_vm11 = vcmp.gt.f32.partialorder %v2091_v29, 0.0 }
 0x677   :  { %2053 = vperm.xlu1 %4394, %v7857_v18   ;;  %v6675_v51 = vpop.xlane.xlu1 %1707 }
 0x679   :  { %v2042_v49 = vpop.permute.xlu0 %2041 }
 0x67a   :  { %v2093_v25 = vadd.f32 %v6604_v42, %v2042_v49 }
 0x67c   :  { %vm2109_vm10 = vcmp.gt.f32.partialorder %v2093_v25, 0.0  ;;  %v2125_v26 = vmul.f32 0.2, %v2093_v25 }
 0x67e   :  { %v2141_v12 = vsel %vm2109_vm10, %v2093_v25, %v2125_v26  ;;  %v7872_v26 = vld [vmem:[#allocation20_spill] sm:$0xff] }
 0x67f   :  { %2305 = vrot.lane.b32.xlu1 %v7861_v2, %s5044_s23  ;;  %v6669_v20 = vadd.f32 %v2141_v12, %v6136_v5  ;;  %v2747_v2 = vsub.f32 %v6592_v58, %v6611_v4  ;;  %v2852_v58 = vpop.permute.xlu2 %2851 }
 0x680   :  { %4396 = vset.pattern.permute.xlu1 %v7870_v17 }
 0x681   :  { %v2050_v23 = vpop.permute.xlu0 %2049  ;;  %2177 = vmax.xlane.f32.xlu2 %v6669_v20  ;;  %v2763_v44 = vmul.f32 1.442695, %v2747_v2 }
 0x686   :  { %v2718_v49 = vpop.xlane.xlu1 %2717 }
 0x687   :  { %v2748_v25 = vsub.f32 %v6620_v8, %v2718_v49  ;;  %v2639_v8 = vadd.f32 %v6588_v55, %v6631_v24  ;;  %v2139_v49 = vsel %vm2107_vm11, %v2091_v29, %v2123_v13 }
 0x688   :  { %v6690_v10 = vadd.f32 %v2139_v49, %v6141_v15  ;;  %v2095_v15 = vadd.f32 %v6604_v42, %v2050_v23 }
 0x689   :  { %v2308_v18 = vpop.permute.xlu0 %2307  ;;  %v2765_v12 = vmul.f32 1.442695, %v2748_v25  ;;  %vm2655_vm12 = vcmp.gt.f32.partialorder %v2639_v8, 0.0 }
 0x68a   :  { %2335 = vmatpush.bf16.msrb.mxu1 %v2308_v18  ;;  %v7873_v18 = vld [vmem:[#allocation24_spill] sm:$0xff]  ;;  %vm2111_vm13 = vcmp.gt.f32.partialorder %v2095_v15, 0.0 }
 0x68b   :  { %4620 = vpow2.f32 %v2765_v12 }
 0x68c   :  { %4622 = vpow2.f32 %v2763_v44 }
 0x68e   :  { %v2720_v13 = vpop.xlane.xlu2 %2719 }
 0x691   :  { %v6685_v4 = vpop.eup %4620 }
 0x692   :  { %v6687_v25 = vpop.eup %4622 }
 0x693   :  { %v2843_v44 = vpack.c.bf16 %v6685_v4, %v6687_v25 }
 0x699   :  { %2061 = vperm.xlu2 %4395, %v7872_v26  }
 0x69e   :  { %v2856_v60 = vpop.permute.xlu1 %2855 }
 0x69f   :  { %2880 = vmatpush.bf16.msrb.mxu2 %v2856_v60  ;;  %v2671_v60 = vmul.f32 0.2, %v2639_v8 }
 0x6a1   :  { %2069 = vperm.xlu2 %4395, %v7873_v18   ;;  %v2687_v29 = vsel %vm2655_vm12, %v2639_v8, %v2671_v60 }
 0x6a2   :  { %v6697_v24 = vadd.f32 %v2687_v29, %v6136_v5 }
 0x6a3   :  { %2881 = vmatpush.bf16.msrb.mxu2 %v2854_v1  ;;  %v2749_v1 = vsub.f32 %v6628_v47, %v2720_v13 }
 0x6a5   :  { %v2767_v2 = vmul.f32 1.442695, %v2749_v1 }
 0x6a7   :  { %2882 = vmatpush.bf16.msrb.mxu2 %v2852_v58  ;;  %4624 = vpow2.f32 %v2767_v2  ;;  %v2642_v2 = vadd.f32 %v6588_v55, %v6636_v28 }
 0x6a9   :  { %2173 = vmax.xlane.f32.xlu1 %v6690_v10  ;;  %4397 = vset.pattern.permute.xlu2 %v7870_v17  ;;  %vm2658_vm15 = vcmp.gt.f32.partialorder %v2642_v2, 0.0 }
 0x6aa   :  { %2883 = vmatmul.bf16.vlgmr.msrb.gmra.mxu2 %v2843_v44  ;;  %v2127_v44 = vmul.f32 0.2, %v2095_v15 }
 0x6ac   :  { %v2143_v47 = vsel %vm2111_vm13, %v2095_v15, %v2127_v44  ;;  %v2674_v44 = vmul.f32 0.2, %v2642_v2 }
 0x6ad   :  { %v6703_v50 = vpop.eup %4624  ;;  %v6710_v29 = vadd.f32 %v2143_v47, %v6164_v30 }
 0x6b1   :  { %2723 = vmax.xlane.f32.xlu1 %v6697_v24 }
 0x6b4   :  { %v2722_v12 = vpop.xlane.xlu0 %2721 }
 0x6b5   :  { %v2750_v49 = vsub.f32 %v6644_v6, %v2722_v12  ;;  %v2201_v12 = vsub.f32 %v6608_v54, %v6661_v57  ;;  %v2690_v54 = vsel %vm2658_vm15, %v2642_v2, %v2674_v44  ;;  %v2176_v44 = vpop.xlane.xlu2 %2175 }
 0x6b7   :  { %v2769_v58 = vmul.f32 1.442695, %v2750_v49  ;;  %v2217_v47 = vmul.f32 1.442695, %v2201_v12 }
 0x6b9   :  { %4626 = vpow2.f32 %v2769_v58 }
 0x6bf   :  { %v6705_v8 = vpop.eup %4626 }
 0x6c0   :  { %v2844_v60 = vpack.c.bf16 %v6705_v8, %v6703_v50 }
 0x6c2   :  { %2888 = vmatmul.bf16.gmra.mxu2 %v2844_v60 }
 0x6c9   :  { %v2172_v6 = vpop.xlane.xlu1 %2171 }
 0x6ca   :  { %2181 = vmax.xlane.f32.xlu2 %v6710_v29  ;;  %v2202_v23 = vsub.f32 %v6658_v43, %v2172_v6 }
 0x6cc   :  { %v2219_v15 = vmul.f32 1.442695, %v2202_v23  ;;  %v6728_v23 = vadd.f32 %v2690_v54, %v6219_v11  ;;  %v2726_v54 = vpop.xlane.xlu0 %2725 }
 0x6ce   :  { %4628 = vpow2.f32 %v2219_v15  ;;  %v7874_v15 = vld [vmem:[#allocation18_spill] sm:$0xff] }
 0x6cf   :  { %4630 = vpow2.f32 %v2217_v47  ;;  %v7876_v47 = vld [vmem:[#allocation28_spill] sm:$0xff] }
 0x6e1   :  { %v2046_v13 = vpop.permute.xlu1 %2045 }
 0x6e2   :  { %v2094_v1 = vadd.f32 %v6604_v42, %v2046_v13 }
 0x6e4   :  { %v2126_v49 = vmul.f32 0.2, %v2094_v1  ;;  %vm2110_vm14 = vcmp.gt.f32.partialorder %v2094_v1, 0.0 }
 0x6e6   :  { %v2142_v58 = vsel %vm2110_vm14, %v2094_v1, %v2126_v49  ;;  %v6730_v1 = vpop.eup %4628 }
 0x6e7   :  { %v6720_v60 = vadd.f32 %v2142_v58, %v6195_v39  ;;  %v6734_v49 = vpop.eup %4630  ;;  %v7875_v58 = vld [vmem:[#allocation22_spill] sm:$0xff] }
 0x6e8   :  { %v2297_v2 = vpack.c.bf16 %v6730_v1, %v6734_v49 }
 0x6e9   :  { %2179 = vmax.xlane.f32.xlu1 %v6720_v60  ;;  %v2054_v43 = vpop.permute.xlu1 %2053 }
 0x6ea   :  { %v2096_v6 = vadd.f32 %v6604_v42, %v2054_v43  ;;  %v2204_v43 = vsub.f32 %v6634_v21, %v2176_v44 }
 0x6ec   :  { %vm2112_vm0 = vcmp.gt.f32.partialorder %v2096_v6, 0.0  ;;  %v2128_v28 = vmul.f32 0.2, %v2096_v6 }
 0x6ee   :  { %v2144_v57 = vsel %vm2112_vm0, %v2096_v6, %v2128_v28  ;;  %v2223_v6 = vmul.f32 1.442695, %v2204_v43  ;;  %v7878_v43 = vmov 0  }
 0x6ef   :  { %v6725_v13 = vadd.f32 %v2144_v57, %v6219_v11 }
 0x6f0   :  { %4632 = vpow2.f32 %v2223_v6 }
 0x6f1   :  { %v2306_v12 = vpop.permute.xlu1 %2305  ;;  %2183 = vmax.xlane.f32.xlu0 %v6725_v13  ;;  %2729 = vmax.xlane.f32.xlu1 %v6728_v23 }
 0x6f2   :  { %2336 = vmatpush.bf16.msrb.mxu1 %v2306_v12  ;;  %v7877_v12 = vld [vmem:[#allocation32_spill] sm:$0xff] }
 0x6f5   :  { %2337 = vmatmul.bf16.vlgmr.msrb.gmra.mxu1 %v2297_v2 }
 0x6f6   :  { %v6751_v44 = vpop.eup %4632 }
 0x705   :  { %2057 = vperm.xlu0 %4393, %v7874_v15  }
 0x70a   :  { %2603 = vperm.xlu1 %4396, %v7874_v15  }
 0x70d   :  { %2065 = vperm.xlu0 %4393, %v7875_v58  }
 0x712   :  { %2607 = vperm.xlu1 %4396, %v7872_v26   ;;  %v2752_v26 = vsub.f32 %v6649_v9, %v2726_v54  ;;  %v7879_v9 = vmov 2   ;;  %v2178_v54 = vpop.xlane.xlu2 %2177 }
 0x714   :  { %v2773_v15 = vmul.f32 1.442695, %v2752_v26  ;;  %v2728_v26 = vpop.xlane.xlu0 %2727 }
 0x715   :  { %2077 = vperm.xlu0 %4393, %v7876_v47   ;;  %v2753_v11 = vsub.f32 %v6654_v38, %v2728_v26 }
 0x717   :  { %v2775_v39 = vmul.f32 1.442695, %v2753_v11 }
 0x71a   :  { %2615 = vperm.xlu1 %4396, %v7873_v18  }
 0x71c   :  { %v2174_v28 = vpop.xlane.xlu1 %2173 }
 0x71d   :  { %v2203_v57 = vsub.f32 %v6690_v10, %v2174_v28  ;;  %4398 = vset.pattern.permute.xlu0 %v7870_v17 }
 0x71e   :  { %2627 = vperm.xlu0 %4398, %v7877_v12  }
 0x71f   :  { %v2221_v2 = vmul.f32 1.442695, %v2203_v57  ;;  %v2062_v57 = vpop.permute.xlu2 %2061 }
 0x721   :  { %4634 = vpow2.f32 %v2221_v2  ;;  %v2205_v2 = vsub.f32 %v6669_v20, %v2178_v54 }
 0x722   :  { %2623 = vperm.xlu1 %4396, %v7876_v47   ;;  %4636 = vpow2.f32 %v2773_v15 }
 0x723   :  { %v2225_v15 = vmul.f32 1.442695, %v2205_v2 }
 0x724   :  { %v2724_v21 = vpop.xlane.xlu1 %2723 }
 0x725   :  { %v2751_v18 = vsub.f32 %v6697_v24, %v2724_v21 }
 0x726   :  { %4521 = vset.pattern.permute.xlu0 %v7878_v43 }
 0x727   :  { %v6754_v10 = vpop.eup %4634  ;;  %v2771_v17 = vmul.f32 1.442695, %v2751_v18 }
 0x728   :  { %v2298_v6 = vpack.c.bf16 %v6751_v44, %v6754_v10  ;;  %v6759_v47 = vpop.eup %4636 }
 0x729   :  { %4638 = vpow2.f32 %v2771_v17  ;;  %v2070_v17 = vpop.permute.xlu2 %2069 }
 0x72a   :  { %2342 = vmatmul.bf16.gmra.mxu1 %v2298_v6  ;;  %4399 = vset.pattern.permute.xlu1 %v7879_v9  ;;  %4640 = vpow2.f32 %v2225_v15 }
 0x72f   :  { %v6761_v28 = vpop.eup %4638 }
 0x730   :  { %v2845_v24 = vpack.c.bf16 %v6759_v47, %v6761_v28  ;;  %v6769_v27 = vpop.eup %4640 }
 0x732   :  { %2893 = vmatmul.bf16.gmra.mxu2 %v2845_v24 }
 0x73d   :  { %v2182_v35 = vpop.xlane.xlu2 %2181 }
 0x73e   :  { %v2207_v38 = vsub.f32 %v6710_v29, %v2182_v35 }
 0x740   :  { %v2229_v11 = vmul.f32 1.442695, %v2207_v38 }
 0x75c   :  { %v2180_v21 = vpop.xlane.xlu1 %2179 }
 0x75d   :  { %v2206_v18 = vsub.f32 %v6720_v60, %v2180_v21 }
 0x75f   :  { %v2227_v6 = vmul.f32 1.442695, %v2206_v18 }
 0x761   :  { %4642 = vpow2.f32 %v2227_v6 }
 0x762   :  { %4644 = vpow2.f32 %v2775_v39 }
 0x764   :  { %v2184_v30 = vpop.xlane.xlu0 %2183  ;;  %v2730_v5 = vpop.xlane.xlu1 %2729 }
 0x765   :  { %v2754_v24 = vsub.f32 %v6728_v23, %v2730_v5  ;;  %v2208_v54 = vsub.f32 %v6725_v13, %v2184_v30 }
 0x767   :  { %v6771_v20 = vpop.eup %4642  ;;  %v2777_v2 = vmul.f32 1.442695, %v2754_v24  ;;  %v2231_v26 = vmul.f32 1.442695, %v2208_v54 }
 0x768   :  { %v2299_v60 = vpack.c.bf16 %v6771_v20, %v6769_v27  ;;  %v6777_v15 = vpop.eup %4644 }
 0x769   :  { %4646 = vpow2.f32 %v2777_v2  ;;  %v2098_v2 = vadd.f32 %v6604_v42, %v2062_v57 }
 0x76a   :  { %2347 = vmatmul.bf16.gmra.mxu1 %v2299_v60  ;;  %4648 = vpow2.f32 %v2231_v26 }
 0x76b   :  { %4650 = vpow2.f32 %v2229_v11  ;;  %vm2114_vm4 = vcmp.gt.f32.partialorder %v2098_v2, 0.0 }
 0x76f   :  { %v6779_v5 = vpop.eup %4646 }
 0x770   :  { %v2846_v30 = vpack.c.bf16 %v6779_v5, %v6777_v15  ;;  %v6783_v13 = vpop.eup %4648 }
 0x771   :  { %v6785_v23 = vpop.eup %4650 }
 0x772   :  { %2898 = vmatmul.bf16.gmra.mxu2 %v2846_v30  ;;  %v2300_v29 = vpack.c.bf16 %v6783_v13, %v6785_v23  ;;  %v2100_v30 = vadd.f32 %v6604_v42, %v2070_v17 }
 0x774   :  { %v2132_v36 = vmul.f32 0.2, %v2100_v30  ;;  %vm2116_vm5 = vcmp.gt.f32.partialorder %v2100_v30, 0.0 }
 0x777   :  { %v2058_v39 = vpop.permute.xlu0 %2057 }
 0x778   :  { %v2097_v35 = vadd.f32 %v6604_v42, %v2058_v39 }
 0x77a   :  { %vm2113_vm1 = vcmp.gt.f32.partialorder %v2097_v35, 0.0  ;;  %v2129_v21 = vmul.f32 0.2, %v2097_v35  ;;  %2352 = vmatmul.bf16.gmra.mxu1 %v2300_v29 }
 0x77c   :  { %v2604_v18 = vpop.permute.xlu1 %2603  ;;  %v2145_v6 = vsel %vm2113_vm1, %v2097_v35, %v2129_v21  ;;  %v2130_v35 = vmul.f32 0.2, %v2098_v2 }
 0x77d   :  { %v2643_v24 = vadd.f32 %v6588_v55, %v2604_v18  ;;  %v2161_v54 = vadd.f32 %v2145_v6, %v6190_v7 }
 0x77e   :  { %v2146_v17 = vsel %vm2114_vm4, %v2098_v2, %v2130_v35 }
 0x77f   :  { %v2675_v60 = vmul.f32 0.2, %v2643_v24  ;;  %2185 = vmax.xlane.f32.xlu0 %v2161_v54  ;;  %v2066_v38 = vpop.permute.xlu0 %2065  ;;  %vm2659_vm2 = vcmp.gt.f32.partialorder %v2643_v24, 0.0 }
 0x780   :  { %v2099_v26 = vadd.f32 %v6604_v42, %v2066_v38 }
 0x781   :  { %v2691_v11 = vsel %vm2659_vm2, %v2643_v24, %v2675_v60 }
 0x782   :  { %vm2115_vm3 = vcmp.gt.f32.partialorder %v2099_v26, 0.0  ;;  %v2131_v39 = vmul.f32 0.2, %v2099_v26  ;;  %v2707_v29 = vadd.f32 %v2691_v11, %v6190_v7  ;;  %v2162_v11 = vadd.f32 %v2146_v17, %v6246_v40 }
 0x783   :  { %v2148_v7 = vsel %vm2116_vm5, %v2100_v30, %v2132_v36 }
 0x784   :  { %2731 = vmax.xlane.f32.xlu1 %v2707_v29  ;;  %v2608_v21 = vpop.permute.xlu1 %2607  ;;  %v2147_v18 = vsel %vm2115_vm3, %v2099_v26, %v2131_v39  ;;  %v2164_v26 = vadd.f32 %v2148_v7, %v6270_v53  ;;  %v7880_v39 = vld [vmem:[#allocation27_spill] sm:$0xff] }
 0x785   :  { %v2644_v57 = vadd.f32 %v6588_v55, %v2608_v21  ;;  %v6798_v6 = vadd.f32 %v2147_v18, %v6216_v56  ;;  %v7881_v21 = vld [vmem:[#allocation33_spill] sm:$0xff] }
 0x787   :  { %vm2660_vm6 = vcmp.gt.f32.partialorder %v2644_v57, 0.0  ;;  %v2676_v24 = vmul.f32 0.2, %v2644_v57  ;;  %2189 = vmax.xlane.f32.xlu0 %v6798_v6  ;;  %v2078_v35 = vpop.permute.xlu0 %2077 }
 0x789   :  { %v2692_v60 = vsel %vm2660_vm6, %v2644_v57, %v2676_v24 }
 0x78a   :  { %v2708_v38 = vadd.f32 %v2692_v60, %v6246_v40 }
 0x78c   :  { %2733 = vmax.xlane.f32.xlu2 %v2708_v38  ;;  %2187 = vmax.xlane.f32.xlu1 %v2162_v11  ;;  %v2616_v7 = vpop.permute.xlu1 %2615 }
 0x78d   :  { %v2646_v36 = vadd.f32 %v6588_v55, %v2616_v7 }
 0x78f   :  { %2191 = vmax.xlane.f32.xlu0 %v2164_v26  ;;  %vm2662_vm7 = vcmp.gt.f32.partialorder %v2646_v36, 0.0 }
 0x790   :  { %v6818_v18 = vpop.permute.xlu0 %2627 }
 0x794   :  { %v2624_v57 = vpop.permute.xlu1 %2623 }
 0x7a4   :  { %2611 = vperm.xlu2 %4397, %v7875_v58   ;;  %v2678_v58 = vmul.f32 0.2, %v2646_v36 }
 0x7a5   :  { %2073 = vperm.xlu1 %4399, %v7880_v39  }
 0x7a6   :  { %v2694_v2 = vsel %vm2662_vm7, %v2646_v36, %v2678_v58 }
 0x7a7   :  { %v6815_v30 = vadd.f32 %v2694_v2, %v6270_v53 }
 0x7ac   :  { %2619 = vperm.xlu2 %4397, %v7880_v39  }
 0x7ad   :  { %2085 = vperm.xlu1 %4399, %v7881_v21  }
 0x7b4   :  { %2631 = vperm.xlu2 %4397, %v7881_v21  }
 0x7b5   :  { %4523 = vset.pattern.permute.xlu1 %v7878_v43 }
 0x7bc   :  { %4400 = vset.pattern.permute.xlu2 %v7879_v9 }
 0x7bd   :  { %2081 = vperm.xlu2 %4400, %v7877_v12  }
 0x7c5   :  { %4522 = vset.pattern.permute.xlu2 %v7878_v43 }
 0x7d7   :  { %2737 = vmax.xlane.f32.xlu1 %v6815_v30 }
 0x7f2   :  { %v2186_v9 = vpop.xlane.xlu0 %2185 }
 0x7f3   :  { %v2209_v12 = vsub.f32 %v2161_v54, %v2186_v9 }
 0x7f5   :  { %v2233_v60 = vmul.f32 1.442695, %v2209_v12 }
 0x7f7   :  { %v2732_v24 = vpop.xlane.xlu1 %2731  ;;  %4652 = vpow2.f32 %v2233_v60 }
 0x7f8   :  { %v2755_v17 = vsub.f32 %v2707_v29, %v2732_v24 }
 0x7fa   :  { %v2190_v43 = vpop.xlane.xlu0 %2189  ;;  %v2779_v39 = vmul.f32 1.442695, %v2755_v17 }
 0x7fb   :  { %v2211_v12 = vsub.f32 %v6798_v6, %v2190_v43  ;;  %v2102_v6 = vadd.f32 %v6604_v42, %v2078_v35 }
 0x7fc   :  { %4654 = vpow2.f32 %v2779_v39 }
 0x7fd   :  { %v6820_v22 = vpop.eup %4652  ;;  %vm2118_vm11 = vcmp.gt.f32.partialorder %v2102_v6, 0.0 }
 0x7ff   :  { %v2188_v21 = vpop.xlane.xlu1 %2187  ;;  %v2734_v40 = vpop.xlane.xlu2 %2733 }
 0x800   :  { %v2210_v7 = vsub.f32 %v2162_v11, %v2188_v21  ;;  %v2756_v36 = vsub.f32 %v2708_v38, %v2734_v40  ;;  %v2648_v40 = vadd.f32 %v6588_v55, %v2624_v57  ;;  %v2237_v57 = vmul.f32 1.442695, %v2211_v12 }
 0x802   :  { %v2235_v58 = vmul.f32 1.442695, %v2210_v7  ;;  %v2781_v2 = vmul.f32 1.442695, %v2756_v36  ;;  %v2192_v53 = vpop.xlane.xlu0 %2191  ;;  %v6822_v62 = vpop.eup %4654  ;;  %vm2664_vm9 = vcmp.gt.f32.partialorder %v2648_v40, 0.0 }
 0x803   :  { %v2212_v9 = vsub.f32 %v2164_v26, %v2192_v53  ;;  %v2680_v26 = vmul.f32 0.2, %v2648_v40 }
 0x804   :  { %4656 = vpow2.f32 %v2235_v58 }
 0x805   :  { %4658 = vpow2.f32 %v2781_v2  ;;  %v2696_v7 = vsel %vm2664_vm9, %v2648_v40, %v2680_v26 }
 0x806   :  { %v6842_v58 = vadd.f32 %v2696_v7, %v6285_v19 }
 0x807   :  { %v2612_v61 = vpop.permute.xlu2 %2611 }
 0x808   :  { %v2645_v54 = vadd.f32 %v6588_v55, %v2612_v61  ;;  %v2239_v61 = vmul.f32 1.442695, %v2212_v9 }
 0x80a   :  { %v6825_v29 = vpop.eup %4656  ;;  %vm2661_vm8 = vcmp.gt.f32.partialorder %v2645_v54, 0.0  ;;  %v2677_v38 = vmul.f32 0.2, %v2645_v54  ;;  %4660 = vpow2.f32 %v2239_v61 }
 0x80b   :  { %v6827_v11 = vpop.eup %4658  ;;  %v2301_v24 = vpack.c.bf16 %v6825_v29, %v6820_v22  ;;  %4662 = vpow2.f32 %v2237_v57 }
 0x80c   :  { %v2847_v17 = vpack.c.bf16 %v6827_v11, %v6822_v62  ;;  %v2693_v60 = vsel %vm2661_vm8, %v2645_v54, %v2677_v38  ;;  %v2134_v54 = vmul.f32 0.2, %v2102_v6  ;;  %4664 = vrcp.f32 %v6560_v14 }
 0x80d   :  { %2357 = vmatmul.bf16.gmra.mxu1 %v2301_v24  ;;  %v6836_v53 = vadd.f32 %v2693_v60, %v6216_v56  ;;  %4666 = vrcp.f32 %v6507_v37 }
 0x80e   :  { %2903 = vmatmul.bf16.gmra.mxu2 %v2847_v17  ;;  %v2649_v17 = vadd.f32 %v6588_v55, %v6818_v18  ;;  %v2150_v26 = vsel %vm2118_vm11, %v2102_v6, %v2134_v54 }
 0x80f   :  { %2735 = vmax.xlane.f32.xlu2 %v6836_v53  ;;  %v2620_v39 = vpop.permute.xlu2 %2619 }
 0x810   :  { %v2647_v21 = vadd.f32 %v6588_v55, %v2620_v39  ;;  %v6847_v38 = vpop.eup %4660  ;;  %vm2665_vm13 = vcmp.gt.f32.partialorder %v2649_v17, 0.0 }
 0x811   :  { %v6852_v40 = vpop.eup %4662 }
 0x812   :  { %vm2663_vm10 = vcmp.gt.f32.partialorder %v2647_v21, 0.0  ;;  %v2679_v43 = vmul.f32 0.2, %v2647_v21  ;;  %v2302_v61 = vpack.c.bf16 %v6847_v38, %v6852_v40 }
 0x814   :  { %v2695_v36 = vsel %vm2663_vm10, %v2647_v21, %v2679_v43  ;;  %v6863_v21 = vadd.f32 %v2150_v26, %v6285_v19  ;;  %v2681_v43 = vmul.f32 0.2, %v2649_v17 }
 0x815   :  { %v6845_v2 = vadd.f32 %v2695_v36, %v6241_v48 }
 0x817   :  { %v2074_v9 = vpop.permute.xlu1 %2073  ;;  %2741 = vmax.xlane.f32.xlu2 %v6842_v58  ;;  %2739 = vmax.xlane.f32.xlu0 %v6845_v2  ;;  %v2632_v35 = vpop.permute.xlu2 %2631 }
 0x818   :  { %v2101_v24 = vadd.f32 %v6604_v42, %v2074_v9  ;;  %v2650_v60 = vadd.f32 %v6588_v55, %v2632_v35  ;;  %v2697_v9 = vsel %vm2665_vm13, %v2649_v17, %v2681_v43 }
 0x81a   :  { %vm2117_vm12 = vcmp.gt.f32.partialorder %v2101_v24, 0.0  ;;  %v2133_v12 = vmul.f32 0.2, %v2101_v24  ;;  %v2682_v7 = vmul.f32 0.2, %v2650_v60  ;;  %vm2666_vm14 = vcmp.gt.f32.partialorder %v2650_v60, 0.0 }
 0x81c   :  { %v2149_v57 = vsel %vm2117_vm12, %v2101_v24, %v2133_v12  ;;  %v2698_v24 = vsel %vm2666_vm14, %v2650_v60, %v2682_v7  ;;  %v1792_v60 = vpop.f32.mrf.mxu0 }
 0x81d   :  { %2362 = vmatmul.bf16.gmra.mxu1 %v2302_v61  ;;  %v6860_v39 = vadd.f32 %v2149_v57, %v6241_v48  ;;  %v6873_v61 = vadd.f32 %v2697_v9, %v6265_v3  ;;  %v6876_v26 = vadd.f32 %v2698_v24, %v6295_v45 }
 0x81f   :  { %v2086_v36 = vpop.permute.xlu1 %2085  ;;  %2195 = vmax.xlane.f32.xlu2 %v6863_v21  ;;  %2193 = vmax.xlane.f32.xlu0 %v6860_v39  ;;  %v2082_v55 = vpop.permute.xlu2 %2081 }
 0x820   :  { %v2104_v18 = vadd.f32 %v6604_v42, %v2086_v36  ;;  %v2103_v54 = vadd.f32 %v6604_v42, %v2082_v55 }
 0x822   :  { %v2136_v6 = vmul.f32 0.2, %v2104_v18  ;;  %vm2120_vm15 = vcmp.gt.f32.partialorder %v2104_v18, 0.0  ;;  %v2135_v57 = vmul.f32 0.2, %v2103_v54  ;;  %vm2119_vm0 = vcmp.gt.f32.partialorder %v2103_v54, 0.0 }
 0x824   :  { %v2152_v35 = vsel %vm2120_vm15, %v2104_v18, %v2136_v6  ;;  %v2151_v42 = vsel %vm2119_vm0, %v2103_v54, %v2135_v57 }
 0x825   :  { %v6870_v12 = vadd.f32 %v2152_v35, %v6295_v45  ;;  %v6882_v17 = vadd.f32 %v2151_v42, %v6265_v3  ;;  %v2884_v42 = vpop.f32.mrf.mxu2 }
 0x827   :  { %2199 = vmax.xlane.f32.xlu1 %v6870_v12  ;;  %2743 = vmax.xlane.f32.xlu0 %v6873_v61 }
 0x828   :  { %2745 = vmax.xlane.f32.xlu2 %v6876_v26 }
 0x82f   :  { %2795 = vadd.xlane.f32.xlu1 %v6687_v25  ;;  %2197 = vmax.xlane.f32.xlu0 %v6882_v17  ;;  %v4665_v25 = vpop.eup %4664 }
 0x830   :  { %2249 = vadd.xlane.f32.xlu2 %v6734_v49  ;;  %v4667_v49 = vpop.eup %4666 }
 0x837   :  { %2255 = vadd.xlane.f32.xlu1 %v6751_v44  ;;  %2251 = vadd.xlane.f32.xlu0 %v6730_v1 }
 0x838   :  { %2797 = vadd.xlane.f32.xlu2 %v6685_v4  ;;  %v1794_v4 = vpop.f32.mrf.mxu0 }
 0x839   :  { %v1833_v1 = vmul.f32 %v4665_v25, %v1794_v4 }
 0x83b   :  { %vm1849_vm1 = vcmp.gt.f32.partialorder %v1833_v1, 0.0 }
 0x83f   :  { %2257 = vadd.xlane.f32.xlu1 %v6769_v27  ;;  %2253 = vadd.xlane.f32.xlu0 %v6754_v10  ;;  %v1832_v27 = vmul.f32 %v4667_v49, %v1792_v60 }
 0x840   :  { %2799 = vadd.xlane.f32.xlu2 %v6703_v50  ;;  %v1865_v50 = vmin.f32 %v1833_v1, 0.0  ;;  %v6907_v43 = vpop.f32.mrf.mxu0 }
 0x841   :  { %v1864_v14 = vmin.f32 %v1832_v27, 0.0  ;;  %vm1848_vm2 = vcmp.gt.f32.partialorder %v1832_v27, 0.0 }
 0x842   :  { %v1882_v44 = vmul.f32 1.442695, %v1865_v50 }
 0x843   :  { %v1880_v10 = vmul.f32 1.442695, %v1864_v14 }
 0x844   :  { %4668 = vpow2.f32 %v1882_v44 }
 0x845   :  { %4670 = vpow2.f32 %v1880_v10 }
 0x847   :  { %2805 = vadd.xlane.f32.xlu1 %v6759_v47  ;;  %2801 = vadd.xlane.f32.xlu0 %v6705_v8 }
 0x848   :  { %2259 = vadd.xlane.f32.xlu2 %v6771_v20  ;;  %v6910_v54 = vpop.f32.mrf.mxu0 }
 0x84a   :  { %v4669_v37 = vpop.eup %4668 }
 0x84b   :  { %v4671_v8 = vpop.eup %4670  ;;  %v4161_v47 = vadd.f32 -1.0, %v4669_v37 }
 0x84c   :  { %v4160_v20 = vadd.f32 -1.0, %v4671_v8 }
 0x84f   :  { %2807 = vadd.xlane.f32.xlu1 %v6777_v15  ;;  %2803 = vadd.xlane.f32.xlu0 %v6761_v28  ;;  %v1929_v15 = vsel %vm1849_vm1, %v1833_v1, %v4161_v47  ;;  %v1928_v28 = vsel %vm1848_vm2, %v1832_v27, %v4160_v20 }
 0x850   :  { %2261 = vadd.xlane.f32.xlu2 %v6785_v23  ;;  %v4401_v23 = vpack.i.bf16 %v1929_v15, %v1928_v28  ;;  %v1802_v49 = vpop.f32.mrf.mxu0 }
 0x857   :  { %2263 = vadd.xlane.f32.xlu0 %v6783_v13 }
 0x858   :  { %2809 = vadd.xlane.f32.xlu2 %v6779_v5  ;;  %v2738_v5 = vpop.xlane.xlu1 %2737  ;;  %v1804_v15 = vpop.f32.mrf.mxu0 }
 0x859   :  { %v2758_v13 = vsub.f32 %v6815_v30, %v2738_v5 }
 0x85b   :  { %v2785_v7 = vmul.f32 1.442695, %v2758_v13 }
 0x85d   :  { %4672 = vpow2.f32 %v2785_v7 }
 0x860   :  { %2265 = vadd.xlane.f32.xlu2 %v6820_v22 }
 0x868   :  { %2267 = vadd.xlane.f32.xlu2 %v6825_v29  ;;  %v6912_v29 = vpop.eup %4672 }
 0x86b   :  { %4402 = vrot.lane.b32.xlu0 %v4401_v23, %s5043_s2 }
 0x882   :  { %v2736_v36 = vpop.xlane.xlu2 %2735 }
 0x883   :  { %v2757_v22 = vsub.f32 %v6836_v53, %v2736_v36 }
 0x885   :  { %v2783_v18 = vmul.f32 1.442695, %v2757_v22 }
 0x887   :  { %4674 = vpow2.f32 %v2783_v18 }
 0x88a   :  { %v2740_v55 = vpop.xlane.xlu0 %2739  ;;  %v2742_v6 = vpop.xlane.xlu2 %2741 }
 0x88b   :  { %v2759_v9 = vsub.f32 %v6845_v2, %v2740_v55  ;;  %v2760_v30 = vsub.f32 %v6842_v58, %v2742_v6 }
 0x88d   :  { %v4675_v24 = vpop.eup %4674  ;;  %v2787_v57 = vmul.f32 1.442695, %v2759_v9  ;;  %v2789_v53 = vmul.f32 1.442695, %v2760_v30 }
 0x88e   :  { %v2848_v35 = vpack.c.bf16 %v6912_v29, %v4675_v24 }
 0x88f   :  { %4676 = vpow2.f32 %v2787_v57 }
 0x890   :  { %2908 = vmatmul.bf16.gmra.mxu2 %v2848_v35  ;;  %4678 = vpow2.f32 %v2789_v53 }
 0x892   :  { %v2194_v60 = vpop.xlane.xlu0 %2193  ;;  %v2196_v4 = vpop.xlane.xlu2 %2195 }
 0x893   :  { %v2213_v25 = vsub.f32 %v6860_v39, %v2194_v60  ;;  %v2214_v1 = vsub.f32 %v6863_v21, %v2196_v4  ;;  %v2338_v39 = vpop.f32.mrf.mxu1  ;;  %v6925_v21 = vpop.f32.mrf.mxu2 }
 0x895   :  { %v2241_v27 = vmul.f32 1.442695, %v2213_v25  ;;  %v2243_v2 = vmul.f32 1.442695, %v2214_v1  ;;  %2811 = vadd.xlane.f32.xlu0 %v6822_v62  ;;  %v6920_v50 = vpop.eup %4676 }
 0x896   :  { %v6922_v10 = vpop.eup %4678 }
 0x897   :  { %4680 = vpow2.f32 %v2241_v27 }
 0x898   :  { %4682 = vpow2.f32 %v2243_v2 }
 0x899   :  { %4684 = vrcp.f32 %v6519_v31  ;;  %v2849_v31 = vpack.c.bf16 %v6922_v10, %v6920_v50 }
 0x89a   :  { %v2200_v58 = vpop.xlane.xlu1 %2199  ;;  %v2744_v14 = vpop.xlane.xlu0 %2743  ;;  %4686 = vrcp.f32 %v6563_v41 }
 0x89b   :  { %v2746_v44 = vpop.xlane.xlu2 %2745  ;;  %v2761_v37 = vsub.f32 %v6873_v61, %v2744_v14  ;;  %v2216_v20 = vsub.f32 %v6870_v12, %v2200_v58  ;;  %4688 = vrcp.f32 %v6675_v51  ;;  %v6944_v22 = vpop.f32.mrf.mxu2 }
 0x89c   :  { %v2762_v62 = vsub.f32 %v6876_v26, %v2746_v44  ;;  %v2340_v55 = vpop.f32.mrf.mxu1 }
 0x89d   :  { %v6928_v8 = vpop.eup %4680  ;;  %2271 = vadd.xlane.f32.xlu0 %v6847_v38  ;;  %v2791_v61 = vmul.f32 1.442695, %v2761_v37  ;;  %v2247_v41 = vmul.f32 1.442695, %v2216_v20 }
 0x89e   :  { %v6932_v47 = vpop.eup %4682  ;;  %v2793_v26 = vmul.f32 1.442695, %v2762_v62 }
 0x89f   :  { %v2303_v28 = vpack.c.bf16 %v6932_v47, %v6928_v8  ;;  %v4685_v23 = vpop.eup %4684 }
 0x8a0   :  { %2913 = vmatmul.bf16.gmra.mxu2 %v2849_v31  ;;  %v6941_v5 = vmul.f32 %v4685_v23, %v1804_v15  ;;  %v4687_v36 = vpop.eup %4686 }
 0x8a1   :  { %2367 = vmatmul.bf16.gmra.mxu1 %v2303_v28  ;;  %v6946_v18 = vmul.f32 %v4687_v36, %v1802_v49  ;;  %v4689_v9 = vpop.eup %4688 }
 0x8a2   :  { %v2796_v38 = vpop.xlane.xlu1 %2795  ;;  %v2198_v12 = vpop.xlane.xlu0 %2197  ;;  %v1869_v6 = vmin.f32 %v6941_v5, 0.0  ;;  %v6973_v62 = vmul.f32 %v4689_v9, %v6907_v43  ;;  %vm1853_vm3 = vcmp.gt.f32.partialorder %v6941_v5, 0.0 }
 0x8a3   :  { %4690 = vrcp.f32 %v2796_v38  ;;  %v2250_v13 = vpop.xlane.xlu2 %2249  ;;  %v2215_v7 = vsub.f32 %v6882_v17, %v2198_v12  ;;  %v1868_v17 = vmin.f32 %v6946_v18, 0.0  ;;  %vm1852_vm4 = vcmp.gt.f32.partialorder %v6946_v18, 0.0 }
 0x8a4   :  { %4692 = vrcp.f32 %v2250_v13  ;;  %v1890_v4 = vmul.f32 1.442695, %v1869_v6  ;;  %v2343_v14 = vpop.f32.mrf.mxu1  ;;  %vm1850_vm9 = vcmp.gt.f32.partialorder %v6973_v62, 0.0 }
 0x8a5   :  { %4694 = vpow2.f32 %v2791_v61  ;;  %v2245_v51 = vmul.f32 1.442695, %v2215_v7  ;;  %2815 = vadd.xlane.f32.xlu0 %v4675_v24  ;;  %v1888_v58 = vmul.f32 1.442695, %v1868_v17 }
 0x8a6   :  { %4696 = vpow2.f32 %v2793_v26 }
 0x8a7   :  { %4698 = vpow2.f32 %v2247_v41  ;;  %v1866_v41 = vmin.f32 %v6973_v62, 0.0 }
 0x8a8   :  { %4700 = vpow2.f32 %v2245_v51 }
 0x8a9   :  { %v4691_v30 = vpop.eup %4690  ;;  %4702 = vrcp.f32 %v6512_v34  ;;  %v6966_v34 = vpop.f32.mrf.mxu2 }
 0x8aa   :  { %v4693_v35 = vpop.eup %4692  ;;  %v6950_v57 = vmul.f32 %v4691_v30, %v2884_v42  ;;  %v2256_v53 = vpop.xlane.xlu1 %2255  ;;  %v1884_v30 = vmul.f32 1.442695, %v1866_v41 }
 0x8ab   :  { %v6952_v60 = vpop.eup %4694  ;;  %v6955_v25 = vmul.f32 %v4693_v35, %v2338_v39  ;;  %v2252_v24 = vpop.xlane.xlu0 %2251 }
 0x8ac   :  { %v2798_v1 = vpop.xlane.xlu2 %2797  ;;  %v6957_v49 = vpop.eup %4696  ;;  %4704 = vrcp.f32 %v2252_v24  ;;  %v2956_v2 = vmin.f32 %v6950_v57, 0.0  ;;  %vm2940_vm7 = vcmp.gt.f32.partialorder %v6950_v57, 0.0 }
 0x8ad   :  { %v6959_v27 = vpop.eup %4698  ;;  %4706 = vrcp.f32 %v2798_v1  ;;  %v2410_v44 = vmin.f32 %v6955_v25, 0.0  ;;  %2817 = vadd.xlane.f32.xlu0 %v6912_v29  ;;  %v2850_v37 = vpack.c.bf16 %v6957_v49, %v6952_v60  ;;  %vm2394_vm5 = vcmp.gt.f32.partialorder %v6955_v25, 0.0 }
 0x8ae   :  { %v6962_v42 = vpop.eup %4700  ;;  %4708 = vpow2.f32 %v1890_v4  ;;  %v2972_v31 = vmul.f32 1.442695, %v2956_v2 }
 0x8af   :  { %v2304_v39 = vpack.c.bf16 %v6959_v27, %v6962_v42  ;;  %4710 = vrcp.f32 %v2256_v53  ;;  %v4703_v20 = vpop.eup %4702  ;;  %v2426_v61 = vmul.f32 1.442695, %v2410_v44 }
 0x8b0   :  { %2918 = vmatmul.bf16.gmra.mxu2 %v2850_v37  ;;  %v6976_v28 = vmul.f32 %v4703_v20, %v6910_v54  ;;  %4712 = vpow2.f32 %v1888_v58 }
 0x8b1   :  { %2372 = vmatmul.bf16.gmra.mxu1 %v2304_v39  ;;  %v6983_v51 = vpop.f32.mrf.mxu2 }
 0x8b2   :  { %v4705_v15 = vpop.eup %4704  ;;  %v6978_v29 = vpop.xlane.xlu1 %2257  ;;  %v1867_v54 = vmin.f32 %v6976_v28, 0.0  ;;  %vm1851_vm10 = vcmp.gt.f32.partialorder %v6976_v28, 0.0 }
 0x8b3   :  { %v4707_v23 = vpop.eup %4706  ;;  %v2379_v26 = vmul.f32 %v4705_v15, %v2340_v55  ;;  %v2254_v38 = vpop.xlane.xlu0 %2253 }
 0x8b4   :  { %v2925_v43 = vmul.f32 %v4707_v23, %v6925_v21  ;;  %4714 = vrcp.f32 %v2254_v38  ;;  %v4709_v12 = vpop.eup %4708  ;;  %v2345_v55 = vpop.f32.mrf.mxu1  ;;  %v1886_v4 = vmul.f32 1.442695, %v1867_v54 }
 0x8b5   :  { %4716 = vpow2.f32 %v2972_v31  ;;  %v2411_v13 = vmin.f32 %v2379_v26, 0.0  ;;  %v4711_v7 = vpop.eup %4710  ;;  %v4165_v17 = vadd.f32 -1.0, %v4709_v12  ;;  %vm2395_vm6 = vcmp.gt.f32.partialorder %v2379_v26, 0.0 }
 0x8b6   :  { %v2957_v36 = vmin.f32 %v2925_v43, 0.0  ;;  %4718 = vpow2.f32 %v2426_v61  ;;  %v4713_v9 = vpop.eup %4712  ;;  %v6985_v53 = vmul.f32 %v4711_v7, %v2345_v55  ;;  %vm2941_vm8 = vcmp.gt.f32.partialorder %v2925_v43, 0.0 }
 0x8b7   :  { %v2428_v6 = vmul.f32 1.442695, %v2411_v13  ;;  %v4164_v2 = vadd.f32 -1.0, %v4713_v9  ;;  %v1933_v37 = vsel %vm1853_vm3, %v6941_v5, %v4165_v17 }
 0x8b8   :  { %v2974_v35 = vmul.f32 1.442695, %v2957_v36  ;;  %v2413_v20 = vmin.f32 %v6985_v53, 0.0  ;;  %vm2397_vm12 = vcmp.gt.f32.partialorder %v6985_v53, 0.0 }
 0x8b9   :  { %4720 = vpow2.f32 %v2428_v6  ;;  %v2896_v5 = vpop.f32.mrf.mxu2 }
 0x8ba   :  { %v4715_v21 = vpop.eup %4714  ;;  %4722 = vpow2.f32 %v2974_v35  ;;  %v2806_v24 = vpop.xlane.xlu1 %2805  ;;  %v2432_v54 = vmul.f32 1.442695, %v2413_v20 }
 0x8bb   :  { %v4717_v1 = vpop.eup %4716  ;;  %v6987_v58 = vmul.f32 %v4715_v21, %v2343_v14  ;;  %4724 = vrcp.f32 %v2806_v24  ;;  %v6989_v44 = vpop.xlane.xlu0 %2801  ;;  %v1932_v14 = vsel %vm1852_vm4, %v6946_v18, %v4164_v2 }
 0x8bc   :  { %v4719_v39 = vpop.eup %4718  ;;  %4726 = vpow2.f32 %v1884_v30  ;;  %v4192_v38 = vadd.f32 -1.0, %v4717_v1  ;;  %v4431_v12 = vpack.i.bf16 %v1933_v37, %v1932_v14 }
 0x8bd   :  { %v2412_v31 = vmin.f32 %v6987_v58, 0.0  ;;  %4728 = vpow2.f32 %v1886_v4  ;;  %v4176_v15 = vadd.f32 -1.0, %v4719_v39  ;;  %vm2396_vm11 = vcmp.gt.f32.partialorder %v6987_v58, 0.0 }
 0x8be   :  { %v3020_v17 = vsel %vm2940_vm7, %v6950_v57, %v4192_v38 }
 0x8bf   :  { %v4721_v61 = vpop.eup %4720  ;;  %v2430_v23 = vmul.f32 1.442695, %v2412_v31  ;;  %v2474_v18 = vsel %vm2394_vm5, %v6955_v25, %v4176_v15 }
 0x8c0   :  { %v4723_v41 = vpop.eup %4722  ;;  %v4177_v13 = vadd.f32 -1.0, %v4721_v61 }
 0x8c1   :  { %v4725_v7 = vpop.eup %4724  ;;  %v4193_v36 = vadd.f32 -1.0, %v4723_v41  ;;  %4432 = vrot.lane.b32.xlu0 %v4431_v12, %s5043_s2  ;;  %4730 = vpow2.f32 %v2430_v23 }
 0x8c2   :  { %v4727_v6 = vpop.eup %4726  ;;  %v2929_v9 = vmul.f32 %v4725_v7, %v2896_v5  ;;  %v2475_v30 = vsel %vm2395_vm6, %v2379_v26, %v4177_v13 }
 0x8c3   :  { %v2804_v55 = vpop.xlane.xlu0 %2803  ;;  %v4406_v35 = vpack.i.bf16 %v2475_v30, %v2474_v18  ;;  %v3021_v21 = vsel %vm2941_vm8, %v2925_v43, %v4193_v36  ;;  %v4729_v4 = vpop.eup %4728  ;;  %v4162_v2 = vadd.f32 -1.0, %v4727_v6 }
 0x8c4   :  { %4732 = vrcp.f32 %v2804_v55  ;;  %v4411_v24 = vpack.i.bf16 %v3021_v21, %v3020_v17  ;;  %v2961_v1 = vmin.f32 %v2929_v9, 0.0  ;;  %v4163_v39 = vadd.f32 -1.0, %v4729_v4  ;;  %v2800_v6 = vpop.xlane.xlu2 %2799 }
 0x8c5   :  { %4407 = vrot.lane.b32.xlu1 %v4406_v35, %s5044_s23  ;;  %4734 = vpow2.f32 %v2432_v54  ;;  %v1930_v37 = vsel %vm1850_vm9, %v6973_v62, %v4162_v2  ;;  %vm2945_vm14 = vcmp.gt.f32.partialorder %v2929_v9, 0.0  ;;  %v1807_v35 = vpop.f32.mrf.mxu0  ;;  %vm3228_vm9 = vcmask 261120  }
 0x8c6   :  { %4412 = vrot.lane.b32.xlu2 %v4411_v24, %s5037_s4  ;;  %v2982_v26 = vmul.f32 1.442695, %v2961_v1  ;;  %v1931_v57 = vsel %vm1851_vm10, %v6976_v28, %v4163_v39 }
 0x8c7   :  { %v4731_v25 = vpop.eup %4730  ;;  %v4416_v15 = vpack.i.bf16 %v1931_v57, %v1930_v37 }
 0x8c8   :  { %4736 = vpow2.f32 %v2982_v26  ;;  %v4178_v14 = vadd.f32 -1.0, %v4731_v25 }
 0x8ca   :  { %v4733_v20 = vpop.eup %4732  ;;  %v2476_v62 = vsel %vm2396_vm11, %v6987_v58, %v4178_v14 }
 0x8cb   :  { %v2928_v43 = vmul.f32 %v4733_v20, %v6983_v51  ;;  %v4735_v31 = vpop.eup %4734  ;;  %v7021_v20 = vpop.f32.mrf.mxu2 }
 0x8cc   :  { %v4179_v38 = vadd.f32 -1.0, %v4735_v31  ;;  %v2260_v58 = vpop.xlane.xlu2 %2259 }
 0x8cd   :  { %v2960_v61 = vmin.f32 %v2928_v43, 0.0  ;;  %vm2944_vm13 = vcmp.gt.f32.partialorder %v2928_v43, 0.0  ;;  %v1809_v26 = vpop.f32.mrf.mxu0 }
 0x8ce   :  { %4417 = vrot.lane.b32.xlu2 %v4416_v15, %s5043_s2  ;;  %v4737_v41 = vpop.eup %4736  ;;  %v2477_v28 = vsel %vm2397_vm12, %v6985_v53, %v4179_v38  ;;  %v2348_v53 = vpop.f32.mrf.mxu1  ;;  %vm3262_vm12 = vcmask 785408  }
 0x8cf   :  { %v2980_v23 = vmul.f32 1.442695, %v2960_v61  ;;  %v4421_v51 = vpack.i.bf16 %v2477_v28, %v2476_v62  ;;  %v4197_v12 = vadd.f32 -1.0, %v4737_v41 }
 0x8d1   :  { %4738 = vpow2.f32 %v2980_v23  ;;  %v3025_v54 = vsel %vm2945_vm14, %v2929_v9, %v4197_v12 }
 0x8d2   :  { %4740 = vrcp.f32 %v6989_v44 }
 0x8d3   :  { %4742 = vrcp.f32 %v2800_v6  ;;  %v7028_v62 = vpop.f32.mrf.mxu2 }
 0x8d4   :  { %4744 = vrcp.f32 %v2260_v58  ;;  %v2262_v12 = vpop.xlane.xlu2 %2261 }
 0x8d5   :  { %4746 = vrcp.f32 %v6978_v29  ;;  %v2264_v29 = vpop.xlane.xlu0 %2263  ;;  %v1812_v15 = vpop.f32.mrf.mxu0 }
 0x8d6   :  { %4422 = vrot.lane.b32.xlu2 %v4421_v51, %s5044_s23  ;;  %v2350_v44 = vpop.f32.mrf.mxu1 }
 0x8d7   :  { %v4739_v13 = vpop.eup %4738 }
 0x8d8   :  { %v4196_v7 = vadd.f32 -1.0, %v4739_v13  ;;  %v4741_v18 = vpop.eup %4740 }
 0x8d9   :  { %v4743_v30 = vpop.eup %4742  ;;  %v2927_v55 = vmul.f32 %v4741_v18, %v6966_v34 }
 0x8da   :  { %v3024_v5 = vsel %vm2944_vm13, %v2928_v43, %v4196_v7  ;;  %v2926_v17 = vmul.f32 %v4743_v30, %v6944_v22  ;;  %v4745_v21 = vpop.eup %4744 }
 0x8db   :  { %v4441_v36 = vpack.i.bf16 %v3025_v54, %v3024_v5  ;;  %v2959_v9 = vmin.f32 %v2927_v55, 0.0  ;;  %v4747_v24 = vpop.eup %4746  ;;  %v2383_v1 = vmul.f32 %v4745_v21, %v2350_v44  ;;  %vm2943_vm15 = vcmp.gt.f32.partialorder %v2927_v55, 0.0  ;;  %v7044_v6 = vpop.f32.mrf.mxu2 }
 0x8dc   :  { %v2958_v4 = vmin.f32 %v2926_v17, 0.0  ;;  %v2382_v39 = vmul.f32 %v4747_v24, %v2348_v53  ;;  %vm2942_vm0 = vcmp.gt.f32.partialorder %v2926_v17, 0.0  ;;  %v1230_v44 = vpop.f32.mrf.mxu3 }
 0x8dd   :  { %4442 = vrot.lane.b32.xlu0 %v4441_v36, %s5037_s4  ;;  %v2978_v2 = vmul.f32 1.442695, %v2959_v9  ;;  %v2415_v37 = vmin.f32 %v2383_v1, 0.0  ;;  %v7024_v61 = vpop.permute.xlu0 %4402  ;;  %v1814_v54 = vpop.f32.mrf.mxu0  ;;  %vm2399_vm1 = vcmp.gt.f32.partialorder %v2383_v1, 0.0 }
 0x8de   :  { %v2976_v25 = vmul.f32 1.442695, %v2958_v4  ;;  %v2414_v34 = vmin.f32 %v2382_v39, 0.0  ;;  %vm2398_vm2 = vcmp.gt.f32.partialorder %v2382_v39, 0.0 }
 0x8df   :  { %4748 = vpow2.f32 %v2978_v2  ;;  %v2436_v22 = vmul.f32 1.442695, %v2415_v37 }
 0x8e0   :  { %4750 = vpow2.f32 %v2976_v25  ;;  %v2434_v43 = vmul.f32 1.442695, %v2414_v34 }
 0x8e1   :  { %4752 = vpow2.f32 %v2436_v22  ;;  %v4300_v22 = vld [vmem:[%s7652_s6 + $0x20] sm:$0xff] }
 0x8e2   :  { %4754 = vpow2.f32 %v2434_v43 }
 0x8e3   :  { %4756 = vrcp.f32 %v6522_v16 }
 0x8e4   :  { %4758 = vrcp.f32 %v6567_v59  ;;  %v4303_v59 = vld [vmem:[%s7652_s6 + $0x38] sm:$0xff] }
 0x8e5   :  { %v4749_v57 = vpop.eup %4748  ;;  %4760 = vrcp.f32 %v6526_v63  ;;  %3351 = vmatpush.bf16.msra.mxu3 %v4303_v59 }
 0x8e6   :  { %v4751_v31 = vpop.eup %4750  ;;  %4762 = vrcp.f32 %v6571_v52 }
 0x8e7   :  { %v4194_v14 = vadd.f32 -1.0, %v4751_v31  ;;  %v4753_v38 = vpop.eup %4752  ;;  %4764 = vrcp.f32 %v2264_v29 }
 0x8e8   :  { %v4755_v28 = vpop.eup %4754  ;;  %v4181_v16 = vadd.f32 -1.0, %v4753_v38  ;;  %4766 = vrcp.f32 %v2262_v12  ;;  %v4298_v12 = vld [vmem:[%s7652_s6 + $0x10] sm:$0xff] }
 0x8e9   :  { %v3022_v41 = vsel %vm2942_vm0, %v2926_v17, %v4194_v14  ;;  %v4757_v13 = vpop.eup %4756  ;;  %v4180_v5 = vadd.f32 -1.0, %v4755_v28  ;;  %4768 = vrcp.f32 %v6541_v32 }
 0x8ea   :  { %v7038_v7 = vmul.f32 %v4757_v13, %v1809_v26  ;;  %v4759_v52 = vpop.eup %4758  ;;  %4770 = vrcp.f32 %v6472_v46 }
 0x8eb   :  { %v4761_v36 = vpop.eup %4760  ;;  %v2478_v30 = vsel %vm2398_vm2, %v2382_v39, %v4180_v5 }
 0x8ec   :  { %v4763_v58 = vpop.eup %4762  ;;  %v1871_v18 = vmin.f32 %v7038_v7, 0.0  ;;  %v7047_v53 = vmul.f32 %v4761_v36, %v1814_v54  ;;  %vm1855_vm3 = vcmp.gt.f32.partialorder %v7038_v7, 0.0 }
 0x8ed   :  { %v7050_v21 = vmul.f32 %v4763_v58, %v1812_v15  ;;  %v4299_v15 = vld [vmem:[%s7652_s6 + $0x18] sm:$0xff] }
 0x8ee   :  { %v1873_v2 = vmin.f32 %v7047_v53, 0.0  ;;  %vm1857_vm5 = vcmp.gt.f32.partialorder %v7047_v53, 0.0 }
 0x8ef   :  { %2813 = vadd.xlane.f32.xlu1 %v6827_v11  ;;  %v4195_v11 = vadd.f32 -1.0, %v4749_v57  ;;  %v1872_v26 = vmin.f32 %v7050_v21, 0.0  ;;  %v7075_v57 = vpop.f32.mrf.mxu2  ;;  %vm1856_vm6 = vcmp.gt.f32.partialorder %v7050_v21, 0.0 }
 0x8f0   :  { %v1898_v34 = vmul.f32 1.442695, %v1873_v2 }
 0x8f1   :  { %v3023_v23 = vsel %vm2943_vm15, %v2927_v55, %v4195_v11  ;;  %v4765_v55 = vpop.eup %4764  ;;  %v1896_v32 = vmul.f32 1.442695, %v1872_v26  ;;  %vm3245_vm15 = vcmask 523264  }
 0x8f2   :  { %v4426_v51 = vpack.i.bf16 %v3023_v23, %v3022_v41  ;;  %v4767_v4 = vpop.eup %4766  ;;  %v7082_v23 = vpop.xlane.xlu2 %2809 }
 0x8f3   :  { %v4769_v31 = vpop.eup %4768  ;;  %v1232_v41 = vpop.f32.mrf.mxu3 }
 0x8f4   :  { %v4771_v14 = vpop.eup %4770 }
 0x8ff   :  { %2269 = vadd.xlane.f32.xlu2 %v6852_v40  ;;  %v2353_v40 = vpop.f32.mrf.mxu1 }
 0x900   :  { %v7068_v37 = vmul.f32 %v4767_v4, %v2353_v40  ;;  %v7084_v40 = vmul.f32 %v4769_v31, %v1232_v41 }
 0x902   :  { %v2416_v43 = vmin.f32 %v7068_v37, 0.0  ;;  %vm2400_vm8 = vcmp.gt.f32.partialorder %v7068_v37, 0.0  ;;  %vm1287_vm10 = vcmp.gt.f32.partialorder %v7084_v40, 0.0 }
 0x904   :  { %v2438_v28 = vmul.f32 1.442695, %v2416_v43 }
 0x907   :  { %2273 = vadd.xlane.f32.xlu2 %v6928_v8  ;;  %2821 = vadd.xlane.f32.xlu0 %v6922_v10  ;;  %v7042_v10 = vmul.f32 %v4759_v52, %v1807_v35  ;;  %v2479_v8 = vsel %vm2399_vm1, %v2383_v1, %v4181_v16  ;;  %v4302_v35 = vld [vmem:[%s7652_s6 + $0x30] sm:$0xff]  ;;  %v2355_v24 = vpop.f32.mrf.mxu1  ;;  %v1894_v1 = vmul.f32 1.442695, %v1871_v18  ;;  %v1303_v52 = vmin.f32 %v7084_v40, 0.0 }
 0x908   :  { %4427 = vrot.lane.b32.xlu1 %v4426_v51, %s5037_s4  ;;  %v7040_v63 = vpop.xlane.xlu0 %2811  ;;  %v4436_v17 = vpack.i.bf16 %v2479_v8, %v2478_v30  ;;  %v7059_v39 = vmul.f32 %v4765_v55, %v2355_v24  ;;  %3352 = vmatpush.bf16.msra.mxu3 %v4302_v35  ;;  %v7086_v51 = vmul.f32 %v4771_v14, %v1230_v44  ;;  %v4297_v30 = vld [vmem:[%s7652_s6 + $0x8] sm:$0xff] }
 0x909   :  { %v1870_v9 = vmin.f32 %v7042_v10, 0.0  ;;  %4772 = vpow2.f32 %v1894_v1  ;;  %vm1854_vm4 = vcmp.gt.f32.partialorder %v7042_v10, 0.0  ;;  %v1320_v4 = vmul.f32 1.442695, %v1303_v52  ;;  %v7103_v1 = vpop.xlane.xlu2 %2265  ;;  %v7123_v52 = vpop.f32.mrf.mxu3 }
 0x90a   :  { %v2417_v29 = vmin.f32 %v7059_v39, 0.0  ;;  %v1302_v36 = vmin.f32 %v7086_v51, 0.0  ;;  %vm2401_vm7 = vcmp.gt.f32.partialorder %v7059_v39, 0.0  ;;  %vm1286_vm11 = vcmp.gt.f32.partialorder %v7086_v51, 0.0 }
 0x90c   :  { %v2440_v46 = vmul.f32 1.442695, %v2417_v29 }
 0x90f   :  { %2819 = vadd.xlane.f32.xlu2 %v6920_v50  ;;  %2823 = vadd.xlane.f32.xlu0 %v6952_v60  ;;  %v4301_v50 = vld [vmem:[%s7652_s6 + $0x28] sm:$0xff]  ;;  %v1892_v60 = vmul.f32 1.442695, %v1870_v9  ;;  %v4773_v38 = vpop.eup %4772 }
 0x910   :  { %4437 = vrot.lane.b32.xlu1 %v4436_v17, %s5044_s23  ;;  %v7061_v25 = vpop.xlane.xlu0 %2271  ;;  %3353 = vmatpush.bf16.msra.mxu3 %v4301_v50  ;;  %v4167_v16 = vadd.f32 -1.0, %v4773_v38  ;;  %v1318_v50 = vmul.f32 1.442695, %v1302_v36 }
 0x911   :  { %4774 = vpow2.f32 %v1892_v60  ;;  %v2268_v41 = vpop.xlane.xlu2 %2267 }
 0x912   :  { %4776 = vpow2.f32 %v1898_v34  ;;  %v1935_v55 = vsel %vm1855_vm3, %v7038_v7, %v4167_v16  ;;  %v4296_v7 = vld [vmem:[%s7652_s6] sm:$0xff] }
 0x913   :  { %v2909_v59 = vpop.f32.mrf.mxu2 }
 0x914   :  { %3354 = vmatpush.bf16.msra.mxu3 %v4300_v22 }
 0x917   :  { %2825 = vadd.xlane.f32.xlu0 %v6957_v49  ;;  %v4775_v49 = vpop.eup %4774 }
 0x918   :  { %v2816_v11 = vpop.xlane.xlu0 %2815  ;;  %3355 = vmatpush.bf16.msra.mxu3 %v4299_v15  ;;  %v4777_v13 = vpop.eup %4776  ;;  %v4166_v54 = vadd.f32 -1.0, %v4775_v49 }
 0x919   :  { %4778 = vrcp.f32 %v2816_v11  ;;  %v4169_v17 = vadd.f32 -1.0, %v4777_v13  ;;  %v2808_v49 = vpop.xlane.xlu1 %2807  ;;  %v4404_v13 = vunpack.i.l.bf16 %v7024_v61 }
 0x91a   :  { %4780 = vpow2.f32 %v1896_v32  ;;  %v1934_v24 = vsel %vm1854_vm4, %v7042_v10, %v4166_v54 }
 0x91b   :  { %4782 = vpow2.f32 %v2440_v46  ;;  %v4446_v60 = vpack.i.bf16 %v1935_v55, %v1934_v24  ;;  %v1937_v26 = vsel %vm1857_vm5, %v7047_v53, %v4169_v17  ;;  %v2911_v32 = vpop.f32.mrf.mxu2 }
 0x91c   :  { %4784 = vpow2.f32 %v2438_v28  ;;  %3356 = vmatpush.bf16.msra.mxu3 %v4298_v12 }
 0x91f   :  { %v4779_v5 = vpop.eup %4778 }
 0x920   :  { %v4781_v8 = vpop.eup %4780  ;;  %v7094_v58 = vmul.f32 %v4779_v5, %v2909_v59  ;;  %v2818_v18 = vpop.xlane.xlu0 %2817  ;;  %3357 = vmatpush.bf16.msra.mxu3 %v4297_v30  ;;  %v4405_v59 = vunpack.i.h.bf16 %v7024_v61 }
 0x921   :  { %4786 = vrcp.f32 %v2818_v18  ;;  %v4783_v9 = vpop.eup %4782  ;;  %v4168_v44 = vadd.f32 -1.0, %v4781_v8  ;;  %v4413_v18 = vpop.permute.xlu2 %4412 }
 0x922   :  { %v2966_v35 = vmin.f32 %v7094_v58, 0.0  ;;  %v4785_v2 = vpop.eup %4784  ;;  %v4183_v34 = vadd.f32 -1.0, %v4783_v9  ;;  %4788 = vpow2.f32 %v1320_v4  ;;  %vm2950_vm13 = vcmp.gt.f32.partialorder %v7094_v58, 0.0 }
 0x923   :  { %v1936_v22 = vsel %vm1856_vm6, %v7050_v21, %v4168_v44  ;;  %v4182_v43 = vadd.f32 -1.0, %v4785_v2  ;;  %4790 = vpow2.f32 %v1318_v50  ;;  %v4414_v4 = vunpack.i.l.bf16 %v4413_v18  ;;  %v2358_v44 = vpop.f32.mrf.mxu1 }
 0x924   :  { %v2992_v29 = vmul.f32 1.442695, %v2966_v35  ;;  %v4461_v31 = vpack.i.bf16 %v1937_v26, %v1936_v22  ;;  %3358 = vmatpush.bf16.msra.mxu3 %v4296_v7  ;;  %v2481_v53 = vsel %vm2401_vm7, %v7059_v39, %v4183_v34 }
 0x925   :  { %v2480_v15 = vsel %vm2400_vm8, %v7068_v37, %v4182_v43 }
 0x926   :  { %4792 = vpow2.f32 %v2992_v29  ;;  %v4451_v21 = vpack.i.bf16 %v2481_v53, %v2480_v15  ;;  %v7140_v29 = vpop.f32.mrf.mxu3 }
 0x927   :  { %4447 = vrot.lane.b32.xlu2 %v4446_v60, %s5043_s2  ;;  %v4787_v10 = vpop.eup %4786 }
 0x928   :  { %v2935_v46 = vmul.f32 %v4787_v10, %v2911_v32  ;;  %v4789_v38 = vpop.eup %4788 }
 0x929   :  { %v4791_v28 = vpop.eup %4790  ;;  %v4145_v16 = vadd.f32 -1.0, %v4789_v38 }
 0x92a   :  { %v2967_v11 = vmin.f32 %v2935_v46, 0.0  ;;  %v4144_v39 = vadd.f32 -1.0, %v4791_v28  ;;  %vm2951_vm14 = vcmp.gt.f32.partialorder %v2935_v46, 0.0 }
 0x92b   :  { %4462 = vrot.lane.b32.xlu0 %v4461_v31, %s5043_s2  ;;  %v1367_v54 = vsel %vm1287_vm10, %v7084_v40, %v4145_v16  ;;  %v4415_v40 = vunpack.i.h.bf16 %v4413_v18  ;;  %v2360_v31 = vpop.f32.mrf.mxu1 }
 0x92c   :  { %v2994_v14 = vmul.f32 1.442695, %v2967_v11  ;;  %v4793_v12 = vpop.eup %4792  ;;  %v1366_v8 = vsel %vm1286_vm11, %v7086_v51, %v4144_v39  ;;  %v3230_v36 = vsel %vm3228_vm9, %v1367_v54, %v4405_v59 }
 0x92d   :  { %v4202_v37 = vadd.f32 -1.0, %v4793_v12  ;;  %v3229_v61 = vsel %vm3228_vm9, %v1366_v8, %v4404_v13  ;;  %v7882_v13 = vld [vmem:[#allocation37_spill] sm:$0xff]  ;;  %v7883_v8 = vld [vmem:[#allocation23_spill] sm:$0xff] }
 0x92e   :  { %4794 = vpow2.f32 %v2994_v14 }
 0x92f   :  { %4452 = vrot.lane.b32.xlu2 %v4451_v21, %s5044_s23  ;;  %4796 = vrcp.f32 %v7082_v23  ;;  %v3030_v9 = vsel %vm2950_vm13, %v7094_v58, %v4202_v37 }
 0x930   :  { %4798 = vrcp.f32 %v2808_v49 }
 0x931   :  { %4800 = vrcp.f32 %v2268_v41 }
 0x932   :  { %4802 = vrcp.f32 %v7103_v1 }
 0x934   :  { %v4795_v5 = vpop.eup %4794 }
 0x935   :  { %v4203_v30 = vadd.f32 -1.0, %v4795_v5  ;;  %v4797_v24 = vpop.eup %4796 }
 0x936   :  { %v4799_v58 = vpop.eup %4798  ;;  %v2931_v34 = vmul.f32 %v4797_v24, %v7028_v62  ;;  %v7144_v62 = vpop.f32.mrf.mxu3  ;;  %v7884_v24 = vld [vmem:[#allocation7_spill] sm:$0xff] }
 0x937   :  { %v4408_v23 = vpop.permute.xlu1 %4407  ;;  %v3031_v35 = vsel %vm2951_vm14, %v2935_v46, %v4203_v30  ;;  %v2930_v10 = vmul.f32 %v4799_v58, %v7021_v20  ;;  %v1817_v46 = vpop.f32.mrf.mxu0 }
 0x938   :  { %v4410_v55 = vunpack.i.h.bf16 %v4408_v23  ;;  %v4409_v17 = vunpack.i.l.bf16 %v4408_v23  ;;  %v4486_v51 = vpack.i.bf16 %v3031_v35, %v3030_v9  ;;  %v2963_v22 = vmin.f32 %v2931_v34, 0.0 }
 0x939   :  { %v2962_v32 = vmin.f32 %v2930_v10, 0.0  ;;  %vm2947_vm0 = vcmp.gt.f32.partialorder %v2931_v34, 0.0  ;;  %vm2946_vm1 = vcmp.gt.f32.partialorder %v2930_v10, 0.0 }
 0x93a   :  { %v3247_v2 = vsel %vm3245_vm15, %v3230_v36, %v4410_v55  ;;  %v3246_v50 = vsel %vm3245_vm15, %v3229_v61, %v4409_v17  ;;  %2275 = vadd.xlane.f32.xlu1 %v6932_v47  ;;  %4487 = vrot.lane.b32.xlu0 %v4486_v51, %s5037_s4  ;;  %v4801_v47 = vpop.eup %4800  ;;  %v2986_v11 = vmul.f32 1.442695, %v2963_v22 }
 0x93b   :  { %v3263_v60 = vsel %vm3262_vm12, %v3246_v50, %v4414_v4  ;;  %v3264_v7 = vsel %vm3262_vm12, %v3247_v2, %v4415_v40  ;;  %v4803_v43 = vpop.eup %4802  ;;  %v2387_v53 = vmul.f32 %v4801_v47, %v2360_v31  ;;  %v2984_v14 = vmul.f32 1.442695, %v2962_v32  ;;  %v7168_v2 = vpop.permute.xlu2 %4417 }
 0x93c   :  { %v3279_v26 = vpack.c.bf16 %v3264_v7, %v3263_v60  ;;  %v2386_v15 = vmul.f32 %v4803_v43, %v2358_v44  ;;  %4804 = vpow2.f32 %v2986_v11 }
 0x93d   :  { %v2419_v1 = vmin.f32 %v2387_v53, 0.0  ;;  %4806 = vrcp.f32 %v6529_v0  ;;  %vm2403_vm2 = vcmp.gt.f32.partialorder %v2387_v53, 0.0 }
 0x93e   :  { %3359 = vmatmul.bf16.vlgmr.msra.gmra.mxu3 %v3279_v26  ;;  %v2418_v21 = vmin.f32 %v2386_v15, 0.0  ;;  %4808 = vpow2.f32 %v2984_v14  ;;  %v1242_v59 = vpop.f32.mrf.mxu3  ;;  %vm2402_vm3 = vcmp.gt.f32.partialorder %v2386_v15, 0.0 }
 0x93f   :  { %4810 = vrcp.f32 %v6575_v33  ;;  %v2444_v20 = vmul.f32 1.442695, %v2419_v1  ;;  %v1819_v38 = vpop.f32.mrf.mxu0 }
 0x940   :  { %v2442_v41 = vmul.f32 1.442695, %v2418_v21 }
 0x941   :  { %4812 = vpow2.f32 %v2444_v20 }
 0x942   :  { %2277 = vadd.xlane.f32.xlu1 %v6962_v42  ;;  %v4805_v42 = vpop.eup %4804  ;;  %4814 = vpow2.f32 %v2442_v41  ;;  %v7886_v41 = vld [vmem:[#allocation5_spill] sm:$0xff] }
 0x943   :  { %v4807_v28 = vpop.eup %4806  ;;  %v4199_v16 = vadd.f32 -1.0, %v4805_v42  ;;  %4816 = vrcp.f32 %v7882_v13  ;;  %v7189_v42 = vpop.permute.xlu2 %4422 }
 0x944   :  { %v4809_v49 = vpop.eup %4808  ;;  %v7148_v12 = vmul.f32 %v4807_v28, %v1819_v38  ;;  %4818 = vrcp.f32 %v7040_v63 }
 0x945   :  { %v4811_v39 = vpop.eup %4810  ;;  %v4198_v37 = vadd.f32 -1.0, %v4809_v49  ;;  %v3027_v5 = vsel %vm2947_vm0, %v2931_v34, %v4199_v16  ;;  %4820 = vrcp.f32 %v7883_v8 }
 0x946   :  { %v7151_v0 = vmul.f32 %v4811_v39, %v1817_v46  ;;  %v1875_v33 = vmin.f32 %v7148_v12, 0.0  ;;  %v7162_v4 = vpop.f32.mrf.mxu3  ;;  %vm1859_vm4 = vcmp.gt.f32.partialorder %v7148_v12, 0.0 }
 0x947   :  { %v4813_v54 = vpop.eup %4812  ;;  %v3026_v18 = vsel %vm2946_vm1, %v2930_v10, %v4198_v37  ;;  %v7176_v10 = vpop.f32.mrf.mxu1 }
 0x948   :  { %v1874_v36 = vmin.f32 %v7151_v0, 0.0  ;;  %v4815_v30 = vpop.eup %4814  ;;  %v4456_v61 = vpack.i.bf16 %v3027_v5, %v3026_v18  ;;  %v1902_v55 = vmul.f32 1.442695, %v1875_v33  ;;  %v4185_v17 = vadd.f32 -1.0, %v4813_v54  ;;  %v1822_v21 = vpop.f32.mrf.mxu0  ;;  %v7887_v5 = vld [vmem:[#allocation8_spill] sm:$0xff] }
 0x949   :  { %v4817_v23 = vpop.eup %4816  ;;  %v4184_v35 = vadd.f32 -1.0, %v4815_v30  ;;  %vm1858_vm5 = vcmp.gt.f32.partialorder %v7151_v0, 0.0 }
 0x94a   :  { %v1900_v9 = vmul.f32 1.442695, %v1874_v36  ;;  %v4819_v40 = vpop.eup %4818  ;;  %v7160_v63 = vmul.f32 %v4817_v23, %v7123_v52  ;;  %4822 = vpow2.f32 %v1902_v55  ;;  %v7885_v52 = vld [vmem:[#allocation54_spill] sm:$0xff] }
 0x94b   :  { %v4821_v51 = vpop.eup %4820  ;;  %4824 = vrcp.f32 %v7884_v24  ;;  %v7166_v44 = vmul.f32 %v4819_v40, %v7044_v6  ;;  %v2482_v50 = vsel %vm2402_vm3, %v2386_v15, %v4184_v35  ;;  %v7209_v35 = vpop.f32.mrf.mxu2 }
 0x94c   :  { %4826 = vpow2.f32 %v1900_v9  ;;  %v1304_v60 = vmin.f32 %v7160_v63, 0.0  ;;  %v7173_v7 = vmul.f32 %v4821_v51, %v7140_v29  ;;  %vm1288_vm6 = vcmp.gt.f32.partialorder %v7160_v63, 0.0 }
 0x94d   :  { %4828 = vrcp.f32 %v7885_v52  ;;  %v2964_v6 = vmin.f32 %v7166_v44, 0.0  ;;  %vm2948_vm8 = vcmp.gt.f32.partialorder %v7166_v44, 0.0 }
 0x94e   :  { %v1322_v47 = vmul.f32 1.442695, %v1304_v60  ;;  %v1305_v32 = vmin.f32 %v7173_v7, 0.0  ;;  %v7181_v29 = vpop.f32.mrf.mxu3  ;;  %vm1289_vm7 = vcmp.gt.f32.partialorder %v7173_v7, 0.0 }
 0x94f   :  { %v2365_v37 = vpop.f32.mrf.mxu1 }
 0x950   :  { %v4823_v34 = vpop.eup %4822  ;;  %v1324_v14 = vmul.f32 1.442695, %v1305_v32  ;;  %v4425_v32 = vunpack.i.h.bf16 %v7189_v42 }
 0x951   :  { %v4825_v22 = vpop.eup %4824  ;;  %v4171_v46 = vadd.f32 -1.0, %v4823_v34  ;;  %v4419_v34 = vunpack.i.l.bf16 %v7168_v2 }
 0x952   :  { %v4827_v43 = vpop.eup %4826  ;;  %v7184_v15 = vmul.f32 %v4825_v22, %v7144_v62 }
 0x953   :  { %v4829_v31 = vpop.eup %4828  ;;  %v4170_v1 = vadd.f32 -1.0, %v4827_v43  ;;  %v1939_v28 = vsel %vm1859_vm4, %v7148_v12, %v4171_v46  ;;  %v4424_v43 = vunpack.i.l.bf16 %v7189_v42 }
 0x954   :  { %v7186_v20 = vmul.f32 %v4829_v31, %v1242_v59  ;;  %v1306_v16 = vmin.f32 %v7184_v15, 0.0  ;;  %vm1290_vm11 = vcmp.gt.f32.partialorder %v7184_v15, 0.0 }
 0x955   :  { %v1938_v39 = vsel %vm1858_vm5, %v7151_v0, %v4170_v1 }
 0x956   :  { %v1307_v59 = vmin.f32 %v7186_v20, 0.0  ;;  %v4476_v13 = vpack.i.bf16 %v1939_v28, %v1938_v39  ;;  %v1326_v8 = vmul.f32 1.442695, %v1306_v16  ;;  %v7204_v36 = vpop.f32.mrf.mxu3  ;;  %v2916_v16 = vpop.f32.mrf.mxu2  ;;  %vm1291_vm13 = vcmp.gt.f32.partialorder %v7186_v20, 0.0 }
 0x958   :  { %2279 = vadd.xlane.f32.xlu2 %v6959_v27  ;;  %v2483_v27 = vsel %vm2403_vm2, %v2387_v53, %v4185_v17  ;;  %v2988_v53 = vmul.f32 1.442695, %v2964_v6  ;;  %v1328_v30 = vmul.f32 1.442695, %v1307_v59  ;;  %v1824_v17 = vpop.f32.mrf.mxu0 }
 0x959   :  { %v4466_v58 = vpack.i.bf16 %v2483_v27, %v2482_v50 }
 0x95b   :  { %4457 = vrot.lane.b32.xlu1 %v4456_v61, %s5037_s4 }
 0x962   :  { %v2814_v26 = vpop.xlane.xlu1 %2813 }
 0x963   :  { %4830 = vrcp.f32 %v2814_v26  ;;  %4467 = vrot.lane.b32.xlu1 %v4466_v58, %s5044_s23  ;;  %v4420_v26 = vunpack.i.h.bf16 %v7168_v2 }
 0x964   :  { %4832 = vrcp.f32 %v7061_v25  ;;  %v7191_v25 = vpop.permute.xlu0 %4432 }
 0x965   :  { %4834 = vpow2.f32 %v1322_v47 }
 0x966   :  { %4836 = vrcp.f32 %v7886_v41 }
 0x967   :  { %4838 = vpow2.f32 %v2988_v53 }
 0x968   :  { %4840 = vpow2.f32 %v1324_v14 }
 0x969   :  { %v4831_v11 = vpop.eup %4830  ;;  %4842 = vrcp.f32 %v7887_v5 }
 0x96a   :  { %v2933_v38 = vmul.f32 %v4831_v11, %v7075_v57  ;;  %v4833_v49 = vpop.eup %4832 }
 0x96b   :  { %v4835_v57 = vpop.eup %4834  ;;  %v7201_v54 = vmul.f32 %v4833_v49, %v2365_v37 }
 0x96c   :  { %v2965_v62 = vmin.f32 %v2933_v38, 0.0  ;;  %v4837_v12 = vpop.eup %4836  ;;  %v4146_v0 = vadd.f32 -1.0, %v4835_v57  ;;  %v7206_v61 = vpop.permute.xlu0 %4442  ;;  %vm2949_vm10 = vcmp.gt.f32.partialorder %v2933_v38, 0.0 }
 0x96d   :  { %v4839_v18 = vpop.eup %4838  ;;  %v2421_v9 = vmin.f32 %v7201_v54, 0.0  ;;  %v7211_v40 = vmul.f32 %v4837_v12, %v1822_v21  ;;  %v3407_v12 = vld [vmem:[%s7653_s7 + $0x38] sm:$0xff]  ;;  %vm2405_vm14 = vcmp.gt.f32.partialorder %v7201_v54, 0.0 }
 0x96e   :  { %v2990_v33 = vmul.f32 1.442695, %v2965_v62  ;;  %v4841_v55 = vpop.eup %4840  ;;  %v4200_v27 = vadd.f32 -1.0, %v4839_v18  ;;  %v1368_v52 = vsel %vm1288_vm6, %v7160_v63, %v4146_v0  ;;  %3464 = vmatpush.msra.mxu0 %v3407_v12 }
 0x96f   :  { %v4843_v51 = vpop.eup %4842  ;;  %v4147_v60 = vadd.f32 -1.0, %v4841_v55  ;;  %v2448_v58 = vmul.f32 1.442695, %v2421_v9  ;;  %v1876_v22 = vmin.f32 %v7211_v40, 0.0  ;;  %v3231_v42 = vsel %vm3228_vm9, %v1368_v52, %v4419_v34 }
 0x970   :  { %4477 = vrot.lane.b32.xlu2 %v4476_v13, %s5043_s2  ;;  %4844 = vpow2.f32 %v2990_v33  ;;  %v7214_v50 = vmul.f32 %v4843_v51, %v1824_v17  ;;  %v3028_v63 = vsel %vm2948_vm8, %v7166_v44, %v4200_v27  ;;  %v3248_v39 = vsel %vm3245_vm15, %v3231_v42, %v4424_v43 }
 0x971   :  { %v1369_v2 = vsel %vm1289_vm7, %v7173_v7, %v4147_v60  ;;  %v1904_v62 = vmul.f32 1.442695, %v1876_v22  ;;  %v4435_v51 = vunpack.i.h.bf16 %v7191_v25  ;;  %v4434_v27 = vunpack.i.l.bf16 %v7191_v25 }
 0x972   :  { %v2270_v23 = vpop.xlane.xlu2 %2269  ;;  %v1877_v46 = vmin.f32 %v7214_v50, 0.0  ;;  %v3232_v41 = vsel %vm3228_vm9, %v1369_v2, %v4420_v26  ;;  %v4444_v42 = vunpack.i.l.bf16 %v7206_v61  ;;  %vm1861_vm1 = vcmp.gt.f32.partialorder %v7214_v50, 0.0 }
 0x973   :  { %4846 = vrcp.f32 %v2270_v23  ;;  %v3249_v59 = vsel %vm3245_vm15, %v3232_v41, %v4425_v32  ;;  %v2919_v32 = vpop.f32.mrf.mxu2  ;;  %v4445_v41 = vunpack.i.h.bf16 %v7206_v61  ;;  %vm1860_vm2 = vcmp.gt.f32.partialorder %v7211_v40, 0.0 }
 0x974   :  { %4848 = vpow2.f32 %v1326_v8  ;;  %v1906_v13 = vmul.f32 1.442695, %v1877_v46 }
 0x975   :  { %4850 = vpow2.f32 %v1328_v30 }
 0x976   :  { %v4845_v24 = vpop.eup %4844  ;;  %4852 = vpow2.f32 %v2448_v58 }
 0x977   :  { %v4201_v6 = vadd.f32 -1.0, %v4845_v24 }
 0x979   :  { %v4847_v47 = vpop.eup %4846  ;;  %v3029_v31 = vsel %vm2949_vm10, %v2933_v38, %v4201_v6 }
 0x97a   :  { %v7228_v53 = vmul.f32 %v4847_v47, %v7176_v10  ;;  %v7230_v11 = vpop.xlane.xlu2 %2273  ;;  %v2822_v14 = vpop.xlane.xlu0 %2821  ;;  %v4471_v1 = vpack.i.bf16 %v3029_v31, %v3028_v63 }
 0x97b   :  { %v4849_v21 = vpop.eup %4848  ;;  %v4428_v28 = vpop.permute.xlu1 %4427  ;;  %4854 = vrcp.f32 %v2822_v14 }
 0x97c   :  { %v4851_v44 = vpop.eup %4850  ;;  %v2420_v38 = vmin.f32 %v7228_v53, 0.0  ;;  %v4430_v49 = vunpack.i.h.bf16 %v4428_v28  ;;  %v4429_v7 = vunpack.i.l.bf16 %v4428_v28  ;;  %4472 = vrot.lane.b32.xlu1 %v4471_v1, %s5037_s4  ;;  %v7236_v10 = vpop.f32.mrf.mxu3  ;;  %v4148_v23 = vadd.f32 -1.0, %v4849_v21 }
 0x97d   :  { %v4853_v8 = vpop.eup %4852  ;;  %v4149_v55 = vadd.f32 -1.0, %v4851_v44  ;;  %vm2404_vm0 = vcmp.gt.f32.partialorder %v7228_v53, 0.0 }
 0x97e   :  { %v2446_v37 = vmul.f32 1.442695, %v2420_v38  ;;  %v3265_v33 = vsel %vm3262_vm12, %v3248_v39, %v4429_v7  ;;  %v3266_v57 = vsel %vm3262_vm12, %v3249_v59, %v4430_v49  ;;  %v4187_v58 = vadd.f32 -1.0, %v4853_v8 }
 0x97f   :  { %v3280_v5 = vpack.c.bf16 %v3266_v57, %v3265_v33  ;;  %v1370_v22 = vsel %vm1290_vm11, %v7184_v15, %v4148_v23  ;;  %v1371_v47 = vsel %vm1291_vm13, %v7186_v20, %v4149_v55 }
 0x980   :  { %4856 = vpow2.f32 %v2446_v37  ;;  %v3234_v63 = vsel %vm3228_vm9, %v1371_v47, %v4435_v51  ;;  %v3233_v31 = vsel %vm3228_vm9, %v1370_v22, %v4434_v27  ;;  %v2485_v20 = vsel %vm2405_vm14, %v7201_v54, %v4187_v58  ;;  %v3527_v58 = vld [vmem:[%s7654_s8 + $0x30] sm:$0xff] }
 0x981   :  { %4858 = vpow2.f32 %v1904_v62  ;;  %3364 = vmatmul.bf16.gmra.mxu3 %v3280_v5  ;;  %v4855_v18 = vpop.eup %4854  ;;  %v2921_v5 = vpop.f32.mrf.mxu2 }
 0x982   :  { %4860 = vpow2.f32 %v1906_v13  ;;  %v2820_v30 = vpop.xlane.xlu2 %2819  ;;  %v2824_v0 = vpop.xlane.xlu0 %2823  ;;  %v7245_v17 = vmul.f32 %v4855_v18, %v2916_v16 }
 0x983   :  { %4862 = vrcp.f32 %v2820_v30  ;;  %v4438_v9 = vpop.permute.xlu1 %4437 }
 0x984   :  { %4864 = vrcp.f32 %v2824_v0  ;;  %v2969_v24 = vmin.f32 %v7245_v17, 0.0  ;;  %v4440_v60 = vunpack.i.h.bf16 %v4438_v9  ;;  %v4439_v52 = vunpack.i.l.bf16 %v4438_v9  ;;  %v7252_v6 = vpop.f32.mrf.mxu3 }
 0x985   :  { %vm2953_vm4 = vcmp.gt.f32.partialorder %v7245_v17, 0.0 }
 0x986   :  { %v4857_v26 = vpop.eup %4856  ;;  %v2998_v46 = vmul.f32 1.442695, %v2969_v24  ;;  %v3251_v14 = vsel %vm3245_vm15, %v3234_v63, %v4440_v60  ;;  %v3250_v1 = vsel %vm3245_vm15, %v3233_v31, %v4439_v52  ;;  %v3406_v60 = vld [vmem:[%s7653_s7 + $0x30] sm:$0xff]  ;;  %v3528_v52 = vld [vmem:[%s7654_s8 + $0x38] sm:$0xff]  ;;  %v3404_v63 = vld [vmem:[%s7653_s7 + $0x20] sm:$0xff] }
 0x987   :  { %v4859_v34 = vpop.eup %4858  ;;  %v4186_v25 = vadd.f32 -1.0, %v4857_v26  ;;  %v3268_v54 = vsel %vm3262_vm12, %v3251_v14, %v4445_v41  ;;  %3465 = vmatpush.msra.mxu0 %v3406_v60  ;;  %3537 = vmatpush.msra.mxu1 %v3528_v52  ;;  %v3524_v14 = vld [vmem:[%s7654_s8 + $0x18] sm:$0xff]  ;;  %v3523_v41 = vld [vmem:[%s7654_s8 + $0x10] sm:$0xff] }
 0x988   :  { %v4861_v43 = vpop.eup %4860  ;;  %v4172_v16 = vadd.f32 -1.0, %v4859_v34 }
 0x989   :  { %v4863_v2 = vpop.eup %4862  ;;  %v2484_v15 = vsel %vm2404_vm0, %v7228_v53, %v4186_v25  ;;  %v4173_v49 = vadd.f32 -1.0, %v4861_v43  ;;  %v3267_v53 = vsel %vm3262_vm12, %v3250_v1, %v4444_v42  ;;  %3538 = vmatpush.msra.mxu1 %v3527_v58  ;;  %v3405_v25 = vld [vmem:[%s7653_s7 + $0x28] sm:$0xff]  ;;  %v7888_v1 = vld [vmem:[#allocation25_spill] sm:$0xff]  ;;  %v7890_v42 = vld [vmem:[#allocation48_spill] sm:$0xff] }
 0x98a   :  { %v4865_v21 = vpop.eup %4864  ;;  %v2936_v28 = vmul.f32 %v4863_v2, %v7209_v35  ;;  %v2826_v44 = vpop.xlane.xlu0 %2825  ;;  %v4481_v38 = vpack.i.bf16 %v2485_v20, %v2484_v15  ;;  %v3281_v59 = vpack.c.bf16 %v3268_v54, %v3267_v53  ;;  %v1940_v57 = vsel %vm1860_vm2, %v7211_v40, %v4172_v16  ;;  %v3526_v43 = vld [vmem:[%s7654_s8 + $0x28] sm:$0xff]  ;;  %3466 = vmatpush.msra.mxu0 %v3405_v25  ;;  %v3402_v15 = vld [vmem:[%s7653_s7 + $0x10] sm:$0xff]  ;;  %v3521_v53 = vld [vmem:[%s7654_s8] sm:$0xff] }
 0x98b   :  { %v2938_v7 = vmul.f32 %v4865_v21, %v2919_v32  ;;  %4866 = vrcp.f32 %v2826_v44  ;;  %v1941_v35 = vsel %vm1861_vm1, %v7214_v50, %v4173_v49  ;;  %3539 = vmatpush.msra.mxu1 %v3526_v43  ;;  %v1827_v2 = vpop.f32.mrf.mxu0  ;;  %v7889_v21 = vld [vmem:[#allocation21_spill] sm:$0xff]  ;;  %v2368_v44 = vpop.f32.mrf.mxu1 }
 0x98c   :  { %4868 = vpow2.f32 %v2998_v46  ;;  %v2968_v62 = vmin.f32 %v2936_v28, 0.0  ;;  %4482 = vrot.lane.b32.xlu1 %v4481_v38, %s5044_s23  ;;  %v7273_v33 = vpop.f32.mrf.mxu3  ;;  %v4491_v8 = vpack.i.bf16 %v1941_v35, %v1940_v57  ;;  %vm2952_vm3 = vcmp.gt.f32.partialorder %v2936_v28, 0.0  ;;  %v3403_v46 = vld [vmem:[%s7653_s7 + $0x18] sm:$0xff]  ;;  %3467 = vmatpush.msra.mxu0 %v3404_v63  ;;  %v3522_v38 = vld [vmem:[%s7654_s8 + $0x8] sm:$0xff]  ;;  %v7350_v60 = vpop.permute.xlu2 %4447 }
 0x98d   :  { %v2970_v39 = vmin.f32 %v2938_v7, 0.0  ;;  %vm2954_vm5 = vcmp.gt.f32.partialorder %v2938_v7, 0.0 }
 0x98e   :  { %v2996_v61 = vmul.f32 1.442695, %v2968_v62  ;;  %3468 = vmatpush.msra.mxu0 %v3403_v46  ;;  %v7891_v62 = vld [vmem:[#allocation19_spill] sm:$0xff] }
 0x98f   :  { %v3000_v13 = vmul.f32 1.442695, %v2970_v39 }
 0x990   :  { %4870 = vpow2.f32 %v2996_v61  ;;  %3469 = vmatpush.msra.mxu0 %v3402_v15 }
 0x991   :  { %v4867_v37 = vpop.eup %4866  ;;  %3369 = vmatmul.bf16.gmra.mxu3 %v3281_v59  ;;  %4872 = vpow2.f32 %v3000_v13 }
 0x992   :  { %v4869_v12 = vpop.eup %4868  ;;  %v2939_v18 = vmul.f32 %v4867_v37, %v2921_v5 }
 0x993   :  { %v4205_v50 = vadd.f32 -1.0, %v4869_v12  ;;  %v1829_v37 = vpop.f32.mrf.mxu0 }
 0x994   :  { %v2971_v30 = vmin.f32 %v2939_v18, 0.0  ;;  %4492 = vrot.lane.b32.xlu1 %v4491_v8, %s5043_s2  ;;  %v7279_v24 = vpop.f32.mrf.mxu3  ;;  %vm2955_vm6 = vcmp.gt.f32.partialorder %v2939_v18, 0.0 }
 0x995   :  { %v3033_v40 = vsel %vm2953_vm4, %v7245_v17, %v4205_v50 }
 0x996   :  { %v4871_v0 = vpop.eup %4870  ;;  %v3002_v23 = vmul.f32 1.442695, %v2971_v30 }
 0x997   :  { %v4204_v55 = vadd.f32 -1.0, %v4871_v0  ;;  %v4873_v51 = vpop.eup %4872  ;;  %v2370_v0 = vpop.f32.mrf.mxu1 }
 0x998   :  { %4874 = vpow2.f32 %v3002_v23  ;;  %v4206_v17 = vadd.f32 -1.0, %v4873_v51 }
 0x999   :  { %v3032_v9 = vsel %vm2952_vm3, %v2936_v28, %v4204_v55  ;;  %4876 = vrcp.f32 %v7230_v11  ;;  %v3525_v11 = vld [vmem:[%s7654_s8 + $0x20] sm:$0xff]  ;;  %v3401_v28 = vld [vmem:[%s7653_s7 + $0x8] sm:$0xff] }
 0x99a   :  { %v4501_v27 = vpack.i.bf16 %v3033_v40, %v3032_v9  ;;  %v3034_v22 = vsel %vm2954_vm5, %v2938_v7, %v4206_v17  ;;  %4878 = vrcp.f32 %v7888_v1  ;;  %3540 = vmatpush.msra.mxu1 %v3525_v11  ;;  %v3400_v7 = vld [vmem:[%s7653_s7] sm:$0xff]  ;;  %3470 = vmatpush.msra.mxu0 %v3401_v28  ;;  %v4453_v11 = vpop.permute.xlu2 %4452 }
 0x99b   :  { %4880 = vrcp.f32 %v7889_v21 }
 0x99c   :  { %4502 = vrot.lane.b32.xlu1 %v4501_v27, %s5037_s4  ;;  %v7305_v31 = vpop.f32.mrf.mxu3  ;;  %4882 = vrcp.f32 %v7890_v42  ;;  %3541 = vmatpush.msra.mxu1 %v3524_v14 }
 0x99d   :  { %4884 = vrcp.f32 %v7891_v62  ;;  %3471 = vmatpush.msra.mxu0 %v3400_v7 }
 0x99e   :  { %v4875_v26 = vpop.eup %4874  ;;  %3542 = vmatpush.msra.mxu1 %v3523_v41  ;;  %v7892_v41 = vld [vmem:[#allocation29_spill] sm:$0xff] }
 0x99f   :  { %v4207_v34 = vadd.f32 -1.0, %v4875_v26  ;;  %v4877_v20 = vpop.eup %4876  ;;  %v2373_v28 = vpop.f32.mrf.mxu1 }
 0x9a0   :  { %v2390_v49 = vmul.f32 %v4877_v20, %v2368_v44  ;;  %v4879_v54 = vpop.eup %4878  ;;  %3543 = vmatpush.msra.mxu1 %v3522_v38 }
 0x9a1   :  { %v3035_v47 = vsel %vm2955_vm6, %v2939_v18, %v4207_v34  ;;  %v4881_v39 = vpop.eup %4880  ;;  %v7338_v13 = vmul.f32 %v4879_v54, %v7162_v4 }
 0x9a2   :  { %v4516_v32 = vpack.i.bf16 %v3035_v47, %v3034_v22  ;;  %v4883_v61 = vpop.eup %4882  ;;  %v2422_v59 = vmin.f32 %v2390_v49, 0.0  ;;  %3544 = vmatpush.msra.mxu1 %v3521_v53  ;;  %v1847_v57 = vmul.f32 %v4881_v39, %v1829_v37  ;;  %vm2406_vm7 = vcmp.gt.f32.partialorder %v2390_v49, 0.0  ;;  %v7893_v39 = vld [vmem:[#allocation50_spill] sm:$0xff] }
 0x9a3   :  { %v4885_v5 = vpop.eup %4884  ;;  %v7341_v12 = vmul.f32 %v4883_v61, %v7181_v29  ;;  %v1308_v50 = vmin.f32 %v7338_v13, 0.0  ;;  %v4450_v53 = vunpack.i.h.bf16 %v7350_v60  ;;  %v4455_v61 = vunpack.i.h.bf16 %v4453_v11 }
 0x9a4   :  { %4517 = vrot.lane.b32.xlu1 %v4516_v32, %s5037_s4  ;;  %v7335_v35 = vpop.f32.mrf.mxu3  ;;  %v7343_v8 = vmul.f32 %v4885_v5, %v1827_v2  ;;  %v2450_v18 = vmul.f32 1.442695, %v2422_v59  ;;  %v1879_v23 = vmin.f32 %v1847_v57, 0.0  ;;  %vm1863_vm10 = vcmp.gt.f32.partialorder %v1847_v57, 0.0 }
 0x9a5   :  { %v1309_v9 = vmin.f32 %v7341_v12, 0.0  ;;  %v1330_v51 = vmul.f32 1.442695, %v1308_v50  ;;  %v4454_v59 = vunpack.i.l.bf16 %v4453_v11  ;;  %vm1292_vm13 = vcmp.gt.f32.partialorder %v7338_v13, 0.0 }
 0x9a6   :  { %v1878_v4 = vmin.f32 %v7343_v8, 0.0  ;;  %v1910_v29 = vmul.f32 1.442695, %v1879_v23  ;;  %vm1862_vm11 = vcmp.gt.f32.partialorder %v7343_v8, 0.0  ;;  %vm1293_vm14 = vcmp.gt.f32.partialorder %v7341_v12, 0.0 }
 0x9a7   :  { %v1332_v58 = vmul.f32 1.442695, %v1309_v9 }
 0x9a8   :  { %v1908_v17 = vmul.f32 1.442695, %v1878_v4 }
 0x9ac   :  { %v7348_v27 = vpop.f32.mrf.mxu3 }
 0x9ad   :  { %v2276_v16 = vpop.xlane.xlu1 %2275 }
 0x9ae   :  { %4886 = vrcp.f32 %v2276_v16 }
 0x9af   :  { %4888 = vpow2.f32 %v2450_v18 }
 0x9b4   :  { %v4887_v30 = vpop.eup %4886 }
 0x9b5   :  { %v2391_v55 = vmul.f32 %v4887_v30, %v2370_v0  ;;  %v4889_v26 = vpop.eup %4888  ;;  %v2278_v34 = vpop.xlane.xlu1 %2277 }
 0x9b6   :  { %v4188_v22 = vadd.f32 -1.0, %v4889_v26 }
 0x9b7   :  { %v2423_v40 = vmin.f32 %v2391_v55, 0.0  ;;  %vm2407_vm8 = vcmp.gt.f32.partialorder %v2391_v55, 0.0 }
 0x9b8   :  { %v2486_v2 = vsel %vm2406_vm7, %v2390_v49, %v4188_v22  ;;  %v4449_v49 = vunpack.i.l.bf16 %v7350_v60 }
 0x9b9   :  { %v2452_v52 = vmul.f32 1.442695, %v2423_v40 }
 0x9bb   :  { %4890 = vpow2.f32 %v2452_v52 }
 0x9bc   :  { %4892 = vpow2.f32 %v1330_v51 }
 0x9bd   :  { %4894 = vpow2.f32 %v1910_v29 }
 0x9be   :  { %4896 = vpow2.f32 %v1332_v58 }
 0x9bf   :  { %4898 = vpow2.f32 %v1908_v17  ;;  %v2375_v17 = vpop.f32.mrf.mxu1 }
 0x9c0   :  { %4900 = vrcp.f32 %v2278_v34 }
 0x9c1   :  { %v4891_v47 = vpop.eup %4890  ;;  %v7352_v32 = vpop.f32.mrf.mxu3  ;;  %4902 = vrcp.f32 %v7892_v41 }
 0x9c2   :  { %v4893_v25 = vpop.eup %4892  ;;  %4240 = vmatmul.msk.f32.vlgmr.msra.gmra.mxu0 %vm3245_vm15, %v7352_v32  ;;  %4256 = vmatmul.msk.f32.vlgmr.msra.gmra.mxu1 %vm3245_vm15, %v7352_v32  ;;  %v4189_v43 = vadd.f32 -1.0, %v4891_v47  ;;  %4904 = vrcp.f32 %v7893_v39  ;;  %v4463_v39 = vpop.permute.xlu0 %4462 }
 0x9c3   :  { %v4895_v63 = vpop.eup %4894  ;;  %v4150_v44 = vadd.f32 -1.0, %v4893_v25 }
 0x9c4   :  { %v4897_v46 = vpop.eup %4896  ;;  %v2487_v14 = vsel %vm2407_vm8, %v2391_v55, %v4189_v43  ;;  %v4175_v21 = vadd.f32 -1.0, %v4895_v63 }
 0x9c5   :  { %v4899_v1 = vpop.eup %4898  ;;  %v4496_v15 = vpack.i.bf16 %v2487_v14, %v2486_v2  ;;  %v4151_v38 = vadd.f32 -1.0, %v4897_v46  ;;  %v1372_v18 = vsel %vm1292_vm13, %v7338_v13, %v4150_v44  ;;  %v7894_v14 = vld [vmem:[#allocation6_spill] sm:$0xff] }
 0x9c6   :  { %v4901_v20 = vpop.eup %4900  ;;  %v4174_v42 = vadd.f32 -1.0, %v4899_v1  ;;  %v1943_v16 = vsel %vm1863_vm10, %v1847_v57, %v4175_v21  ;;  %v3235_v9 = vsel %vm3228_vm9, %v1372_v18, %v4449_v49  ;;  %v4465_v18 = vunpack.i.h.bf16 %v4463_v39 }
 0x9c7   :  { %4497 = vrot.lane.b32.xlu0 %v4496_v15, %s5044_s23  ;;  %v2392_v7 = vmul.f32 %v4901_v20, %v2373_v28  ;;  %v1373_v30 = vsel %vm1293_vm14, %v7341_v12, %v4151_v38  ;;  %v4903_v23 = vpop.eup %4902  ;;  %v3252_v51 = vsel %vm3245_vm15, %v3235_v9, %v4454_v59  ;;  %v7895_v20 = vld [vmem:[#allocation53_spill] sm:$0xff] }
 0x9c8   :  { %v1942_v5 = vsel %vm1862_vm11, %v7343_v8, %v4174_v42  ;;  %v3236_v55 = vsel %vm3228_vm9, %v1373_v30, %v4450_v53  ;;  %v4905_v8 = vpop.eup %4904  ;;  %v1278_v34 = vmul.f32 %v4903_v23, %v7204_v36 }
 0x9c9   :  { %v7360_v62 = vpop.f32.mrf.mxu3  ;;  %v2424_v50 = vmin.f32 %v2392_v7, 0.0  ;;  %v4506_v0 = vpack.i.bf16 %v1943_v16, %v1942_v5  ;;  %v3253_v29 = vsel %vm3245_vm15, %v3236_v55, %v4455_v61  ;;  %v1279_v22 = vmul.f32 %v4905_v8, %v7236_v10 }
 0x9ca   :  { %v3594_v54 = vpack.c.bf16 %v7360_v62, %v7352_v32  ;;  %4241 = vmatmul.msk.f32.gmra.mxu0 %vm3245_vm15, %v7360_v62  ;;  %4257 = vmatmul.msk.f32.gmra.mxu1 %vm3245_vm15, %v7360_v62  ;;  %v1310_v43 = vmin.f32 %v1278_v34, 0.0  ;;  %vm2408_vm0 = vcmp.gt.f32.partialorder %v2392_v7, 0.0  ;;  %vm1294_vm2 = vcmp.gt.f32.partialorder %v1278_v34, 0.0 }
 0x9cb   :  { %v2280_v37 = vpop.xlane.xlu2 %2279  ;;  %v2454_v60 = vmul.f32 1.442695, %v2424_v50  ;;  %v1311_v63 = vmin.f32 %v1279_v22, 0.0  ;;  %vm1295_vm3 = vcmp.gt.f32.partialorder %v1279_v22, 0.0 }
 0x9cc   :  { %4906 = vrcp.f32 %v2280_v37  ;;  %v1334_v46 = vmul.f32 1.442695, %v1310_v43 }
 0x9cd   :  { %v4458_v57 = vpop.permute.xlu1 %4457  ;;  %4908 = vpow2.f32 %v2454_v60  ;;  %v1336_v2 = vmul.f32 1.442695, %v1311_v63 }
 0x9ce   :  { %v4460_v4 = vunpack.i.h.bf16 %v4458_v57  ;;  %v4459_v40 = vunpack.i.l.bf16 %v4458_v57 }
 0x9cf   :  { %4507 = vrot.lane.b32.xlu0 %v4506_v0, %s5043_s2 }
 0x9d0   :  { %v3269_v13 = vsel %vm3262_vm12, %v3252_v51, %v4459_v40  ;;  %v3270_v12 = vsel %vm3262_vm12, %v3253_v29, %v4460_v4 }
 0x9d1   :  { %v3282_v52 = vpack.c.bf16 %v3270_v12, %v3269_v13 }
 0x9d2   :  { %v4907_v58 = vpop.eup %4906 }
 0x9d3   :  { %v2393_v26 = vmul.f32 %v4907_v58, %v2375_v17  ;;  %3374 = vmatmul.bf16.gmra.mxu3 %v3282_v52  ;;  %v4909_v11 = vpop.eup %4908  ;;  %v4478_v58 = vpop.permute.xlu2 %4477 }
 0x9d4   :  { %v4190_v1 = vadd.f32 -1.0, %v4909_v11 }
 0x9d5   :  { %v2425_v47 = vmin.f32 %v2393_v26, 0.0  ;;  %vm2409_vm1 = vcmp.gt.f32.partialorder %v2393_v26, 0.0  ;;  %v4468_v49 = vpop.permute.xlu1 %4467 }
 0x9d6   :  { %v2488_v36 = vsel %vm2408_vm0, %v2392_v7, %v4190_v1  ;;  %v4464_v7 = vunpack.i.l.bf16 %v4463_v39  ;;  %v4470_v30 = vunpack.i.h.bf16 %v4468_v49  ;;  %v4469_v50 = vunpack.i.l.bf16 %v4468_v49  ;;  %v7897_v49 = vld [vmem:[#allocation56_spill] sm:$0xff] }
 0x9d7   :  { %v2456_v25 = vmul.f32 1.442695, %v2425_v47  ;;  %v4488_v47 = vpop.permute.xlu0 %4487 }
 0x9d9   :  { %4910 = vpow2.f32 %v2456_v25 }
 0x9da   :  { %4912 = vrcp.f32 %v7894_v14  ;;  %v4489_v14 = vunpack.i.l.bf16 %v4488_v47 }
 0x9db   :  { %4914 = vrcp.f32 %v7895_v20 }
 0x9dc   :  { %4916 = vpow2.f32 %v1334_v46 }
 0x9dd   :  { %4918 = vpow2.f32 %v1336_v2  ;;  %v4490_v2 = vunpack.i.h.bf16 %v4488_v47 }
 0x9df   :  { %v4911_v15 = vpop.eup %4910 }
 0x9e0   :  { %v4191_v21 = vadd.f32 -1.0, %v4911_v15  ;;  %v4913_v42 = vpop.eup %4912 }
 0x9e1   :  { %v4915_v28 = vpop.eup %4914  ;;  %v1280_v44 = vmul.f32 %v4913_v42, %v7252_v6 }
 0x9e2   :  { %v2489_v10 = vsel %vm2409_vm1, %v2393_v26, %v4191_v21  ;;  %v4917_v38 = vpop.eup %4916  ;;  %v1281_v53 = vmul.f32 %v4915_v28, %v7273_v33 }
 0x9e3   :  { %v4511_v41 = vpack.i.bf16 %v2489_v10, %v2488_v36  ;;  %v4919_v16 = vpop.eup %4918  ;;  %v1312_v61 = vmin.f32 %v1280_v44, 0.0  ;;  %v4152_v59 = vadd.f32 -1.0, %v4917_v38  ;;  %vm1296_vm4 = vcmp.gt.f32.partialorder %v1280_v44, 0.0 }
 0x9e4   :  { %v4153_v37 = vadd.f32 -1.0, %v4919_v16  ;;  %v1313_v5 = vmin.f32 %v1281_v53, 0.0  ;;  %vm1297_vm5 = vcmp.gt.f32.partialorder %v1281_v53, 0.0 }
 0x9e5   :  { %4512 = vrot.lane.b32.xlu2 %v4511_v41, %s5044_s23  ;;  %v1338_v57 = vmul.f32 1.442695, %v1312_v61  ;;  %v1374_v6 = vsel %vm1294_vm2, %v1278_v34, %v4152_v59  ;;  %v4480_v34 = vunpack.i.h.bf16 %v4478_v58 }
 0x9e6   :  { %v1375_v0 = vsel %vm1295_vm3, %v1279_v22, %v4153_v37  ;;  %v1340_v23 = vmul.f32 1.442695, %v1313_v5  ;;  %v3237_v9 = vsel %vm3228_vm9, %v1374_v6, %v4464_v7  ;;  %v4479_v22 = vunpack.i.l.bf16 %v4478_v58  ;;  %v7899_v7 = vld [vmem:[#allocation9_spill] sm:$0xff] }
 0x9e7   :  { %v3238_v33 = vsel %vm3228_vm9, %v1375_v0, %v4465_v18  ;;  %v3254_v29 = vsel %vm3245_vm15, %v3237_v9, %v4469_v50  ;;  %4920 = vpow2.f32 %v1338_v57  ;;  %v7898_v18 = vld [vmem:[#allocation36_spill] sm:$0xff] }
 0x9e8   :  { %v3255_v51 = vsel %vm3245_vm15, %v3238_v33, %v4470_v30  ;;  %4922 = vpow2.f32 %v1340_v23 }
 0x9ed   :  { %v4921_v60 = vpop.eup %4920 }
 0x9ee   :  { %v4473_v55 = vpop.permute.xlu1 %4472  ;;  %v4923_v52 = vpop.eup %4922  ;;  %v4154_v17 = vadd.f32 -1.0, %v4921_v60 }
 0x9ef   :  { %v4475_v4 = vunpack.i.h.bf16 %v4473_v55  ;;  %v4474_v40 = vunpack.i.l.bf16 %v4473_v55  ;;  %v4155_v26 = vadd.f32 -1.0, %v4923_v52 }
 0x9f0   :  { %v1376_v43 = vsel %vm1296_vm4, %v1280_v44, %v4154_v17 }
 0x9f1   :  { %v3271_v13 = vsel %vm3262_vm12, %v3254_v29, %v4474_v40  ;;  %v3272_v12 = vsel %vm3262_vm12, %v3255_v51, %v4475_v4  ;;  %v1377_v63 = vsel %vm1297_vm5, %v1281_v53, %v4155_v26  ;;  %v3239_v15 = vsel %vm3228_vm9, %v1376_v43, %v4479_v22  ;;  %v7896_v53 = vld [vmem:[#allocation31_spill] sm:$0xff] }
 0x9f2   :  { %v3283_v8 = vpack.c.bf16 %v3272_v12, %v3271_v13  ;;  %v3240_v1 = vsel %vm3228_vm9, %v1377_v63, %v4480_v34  ;;  %4924 = vrcp.f32 %v7896_v53 }
 0x9f3   :  { %4926 = vrcp.f32 %v7897_v49 }
 0x9f4   :  { %3379 = vmatmul.bf16.gmra.mxu3 %v3283_v8  ;;  %4928 = vrcp.f32 %v7898_v18 }
 0x9f5   :  { %4930 = vrcp.f32 %v7899_v7 }
 0x9f8   :  { %v4925_v61 = vpop.eup %4924 }
 0x9f9   :  { %v4927_v59 = vpop.eup %4926  ;;  %v1282_v37 = vmul.f32 %v4925_v61, %v7279_v24 }
 0x9fa   :  { %v1283_v5 = vmul.f32 %v4927_v59, %v7305_v31  ;;  %v4929_v6 = vpop.eup %4928 }
 0x9fb   :  { %v1314_v30 = vmin.f32 %v1282_v37, 0.0  ;;  %v4931_v23 = vpop.eup %4930  ;;  %v1284_v55 = vmul.f32 %v4929_v6, %v7335_v35  ;;  %vm1298_vm6 = vcmp.gt.f32.partialorder %v1282_v37, 0.0 }
 0x9fc   :  { %v1315_v50 = vmin.f32 %v1283_v5, 0.0  ;;  %v1285_v33 = vmul.f32 %v4931_v23, %v7348_v27  ;;  %vm1299_vm7 = vcmp.gt.f32.partialorder %v1283_v5, 0.0 }
 0x9fd   :  { %v1342_v57 = vmul.f32 1.442695, %v1314_v30  ;;  %v1316_v9 = vmin.f32 %v1284_v55, 0.0  ;;  %vm1300_vm8 = vcmp.gt.f32.partialorder %v1284_v55, 0.0 }
 0x9fe   :  { %v4483_v25 = vpop.permute.xlu1 %4482  ;;  %v1344_v0 = vmul.f32 1.442695, %v1315_v50  ;;  %v1317_v4 = vmin.f32 %v1285_v33, 0.0  ;;  %vm1301_vm10 = vcmp.gt.f32.partialorder %v1285_v33, 0.0 }
 0x9ff   :  { %v4485_v11 = vunpack.i.h.bf16 %v4483_v25  ;;  %v4484_v46 = vunpack.i.l.bf16 %v4483_v25  ;;  %4932 = vpow2.f32 %v1342_v57  ;;  %v1346_v40 = vmul.f32 1.442695, %v1316_v9 }
 0xa00   :  { %4934 = vpow2.f32 %v1344_v0  ;;  %v1348_v29 = vmul.f32 1.442695, %v1317_v4 }
 0xa01   :  { %v3256_v20 = vsel %vm3245_vm15, %v3239_v15, %v4484_v46  ;;  %v3257_v21 = vsel %vm3245_vm15, %v3240_v1, %v4485_v11  ;;  %4936 = vpow2.f32 %v1346_v40 }
 0xa02   :  { %v3273_v36 = vsel %vm3262_vm12, %v3256_v20, %v4489_v14  ;;  %v3274_v10 = vsel %vm3262_vm12, %v3257_v21, %v4490_v2  ;;  %4938 = vpow2.f32 %v1348_v29 }
 0xa03   :  { %v3284_v41 = vpack.c.bf16 %v3274_v10, %v3273_v36 }
 0xa04   :  { %v7403_v42 = vpop.f32.mrf.mxu3 }
 0xa05   :  { %3384 = vmatmul.bf16.gmra.mxu3 %v3284_v41  ;;  %4242 = vmatmul.msk.f32.gmra.mxu0 %vm3245_vm15, %v7403_v42  ;;  %v4933_v31 = vpop.eup %4932 }
 0xa06   :  { %4258 = vmatmul.msk.f32.gmra.mxu1 %vm3245_vm15, %v7403_v42  ;;  %v4493_v24 = vpop.permute.xlu1 %4492  ;;  %v4935_v51 = vpop.eup %4934  ;;  %v4156_v13 = vadd.f32 -1.0, %v4933_v31 }
 0xa07   :  { %v4157_v12 = vadd.f32 -1.0, %v4935_v51  ;;  %v4495_v8 = vunpack.i.h.bf16 %v4493_v24  ;;  %v4494_v60 = vunpack.i.l.bf16 %v4493_v24  ;;  %v4937_v43 = vpop.eup %4936 }
 0xa08   :  { %v1378_v27 = vsel %vm1298_vm6, %v1282_v37, %v4156_v13  ;;  %v4939_v46 = vpop.eup %4938  ;;  %v4158_v20 = vadd.f32 -1.0, %v4937_v43 }
 0xa09   :  { %v1379_v58 = vsel %vm1299_vm7, %v1283_v5, %v4157_v12  ;;  %v3241_v22 = vsel %vm3228_vm9, %v1378_v27, %v4494_v60  ;;  %v4159_v21 = vadd.f32 -1.0, %v4939_v46 }
 0xa0a   :  { %v3242_v34 = vsel %vm3228_vm9, %v1379_v58, %v4495_v8  ;;  %v1380_v49 = vsel %vm1300_vm8, %v1284_v55, %v4158_v20 }
 0xa0b   :  { %v1381_v61 = vsel %vm1301_vm10, %v1285_v33, %v4159_v21 }
 0xa0c   :  { %v7409_v28 = vpop.f32.mrf.mxu3 }
 0xa0d   :  { %v3595_v44 = vpack.c.bf16 %v7409_v28, %v7403_v42  ;;  %4243 = vmatmul.msk.f32.gmra.mxu0 %vm3245_vm15, %v7409_v28 }
 0xa0e   :  { %4259 = vmatmul.msk.f32.gmra.mxu1 %vm3245_vm15, %v7409_v28  ;;  %v4503_v52 = vpop.permute.xlu1 %4502 }
 0xa0f   :  { %v4505_v47 = vunpack.i.h.bf16 %v4503_v52  ;;  %v4504_v25 = vunpack.i.l.bf16 %v4503_v52 }
 0xa14   :  { %v7417_v38 = vpop.f32.mrf.mxu3 }
 0xa15   :  { %4244 = vmatmul.msk.f32.gmra.mxu0 %vm3245_vm15, %v7417_v38 }
 0xa16   :  { %4260 = vmatmul.msk.f32.gmra.mxu1 %vm3245_vm15, %v7417_v38  ;;  %v4518_v5 = vpop.permute.xlu1 %4517 }
 0xa17   :  { %v4520_v6 = vunpack.i.h.bf16 %v4518_v5  ;;  %v4519_v0 = vunpack.i.l.bf16 %v4518_v5 }
 0xa1c   :  { %v7425_v16 = vpop.f32.mrf.mxu3 }
 0xa1d   :  { %v3596_v39 = vpack.c.bf16 %v7425_v16, %v7417_v38  ;;  %4245 = vmatmul.msk.f32.gmra.mxu0 %vm3245_vm15, %v7425_v16 }
 0xa1e   :  { %4261 = vmatmul.msk.f32.gmra.mxu1 %vm3245_vm15, %v7425_v16 }
 0xa39   :  { %v4498_v35 = vpop.permute.xlu0 %4497 }
 0xa3a   :  { %v4500_v17 = vunpack.i.h.bf16 %v4498_v35  ;;  %v4499_v26 = vunpack.i.l.bf16 %v4498_v35 }
 0xa3c   :  { %v3259_v63 = vsel %vm3245_vm15, %v3242_v34, %v4500_v17  ;;  %v3258_v11 = vsel %vm3245_vm15, %v3241_v22, %v4499_v26 }
 0xa3d   :  { %v3275_v2 = vsel %vm3262_vm12, %v3258_v11, %v4504_v25  ;;  %v3276_v14 = vsel %vm3262_vm12, %v3259_v63, %v4505_v47 }
 0xa3e   :  { %v3285_v1 = vpack.c.bf16 %v3276_v14, %v3275_v2 }
 0xa3f   :  { %v3473_v15 = vpop.f32.mrf.mxu0  ;;  %v4513_v53 = vpop.permute.xlu2 %4512 }
 0xa40   :  { %3389 = vmatmul.bf16.gmra.mxu3 %v3285_v1  ;;  %3636 = vperm.xlu0 %4521, %v3473_v15   ;;  %v4515_v18 = vunpack.i.h.bf16 %v4513_v53  ;;  %v4514_v7 = vunpack.i.l.bf16 %v4513_v53  ;;  %v3546_v52 = vpop.f32.mrf.mxu1 }
 0xa41   :  { %v4508_v36 = vpop.permute.xlu0 %4507 }
 0xa42   :  { %v4510_v10 = vunpack.i.h.bf16 %v4508_v36  ;;  %v4509_v41 = vunpack.i.l.bf16 %v4508_v36 }
 0xa44   :  { %v3244_v59 = vsel %vm3228_vm9, %v1381_v61, %v4510_v10  ;;  %v3243_v37 = vsel %vm3228_vm9, %v1380_v49, %v4509_v41 }
 0xa45   :  { %v3260_v50 = vsel %vm3245_vm15, %v3243_v37, %v4514_v7  ;;  %v3261_v57 = vsel %vm3245_vm15, %v3244_v59, %v4515_v18 }
 0xa46   :  { %v3277_v23 = vsel %vm3262_vm12, %v3260_v50, %v4519_v0  ;;  %v3278_v55 = vsel %vm3262_vm12, %v3261_v57, %v4520_v6  ;;  %v7900_v6 = vld [vmem:[#allocation39_spill] sm:$0xff] }
 0xa47   :  { %v3476_v30 = vpop.f32.mrf.mxu0  ;;  %v3286_v33 = vpack.c.bf16 %v3278_v55, %v3277_v23  ;;  %v7901_v23 = vld [vmem:[#allocation40_spill] sm:$0xff] }
 0xa48   :  { %3641 = vperm.xlu2 %4522, %v3476_v30   ;;  %v3549_v35 = vpop.f32.mrf.mxu1 }
 0xa50   :  { %3394 = vmatmul.bf16.gmra.mxu3 %v3286_v33 }
 0xa56   :  { %v3375_v9 = vpop.f32.mrf.mxu3 }
 0xa57   :  { %4246 = vmatmul.msk.f32.gmra.mxu0 %vm3245_vm15, %v3375_v9  ;;  %4262 = vmatmul.msk.f32.gmra.mxu1 %vm3245_vm15, %v3375_v9 }
 0xa5e   :  { %v3377_v24 = vpop.f32.mrf.mxu3 }
 0xa5f   :  { %v3597_v4 = vpack.c.bf16 %v3377_v24, %v3375_v9  ;;  %4247 = vmatmul.msk.f32.gmra.mxu0 %vm3245_vm15, %v3377_v24  ;;  %4263 = vmatmul.msk.f32.gmra.mxu1 %vm3245_vm15, %v3377_v24 }
 0xa77   :  { %v3380_v31 = vpop.f32.mrf.mxu3 }
 0xa78   :  { %4248 = vmatmul.msk.f32.gmra.mxu0 %vm3245_vm15, %v3380_v31  ;;  %4264 = vmatmul.msk.f32.gmra.mxu1 %vm3245_vm15, %v3380_v31 }
 0xa7f   :  { %v3382_v40 = vpop.f32.mrf.mxu3 }
 0xa80   :  { %v3598_v51 = vpack.c.bf16 %v3382_v40, %v3380_v31  ;;  %4249 = vmatmul.msk.f32.gmra.mxu0 %vm3245_vm15, %v3382_v40  ;;  %4265 = vmatmul.msk.f32.gmra.mxu1 %vm3245_vm15, %v3382_v40  ;;  %v7902_v40 = vld [vmem:[#allocation45_spill] sm:$0xff] }
 0xa82   :  { %v3479_v29 = vpop.f32.mrf.mxu0 }
 0xa83   :  { %3646 = vperm.xlu1 %4523, %v3479_v29   ;;  %v3552_v27 = vpop.f32.mrf.mxu1  ;;  %v7903_v29 = vld [vmem:[#allocation43_spill] sm:$0xff] }
 0xa88   :  { %v3385_v13 = vpop.f32.mrf.mxu3 }
 0xa89   :  { %4250 = vmatmul.msk.f32.gmra.mxu0 %vm3245_vm15, %v3385_v13  ;;  %4266 = vmatmul.msk.f32.gmra.mxu1 %vm3245_vm15, %v3385_v13 }
 0xa8a   :  { %v3482_v12 = vpop.f32.mrf.mxu0 }
 0xa8b   :  { %3651 = vperm.xlu2 %4522, %v3482_v12   ;;  %v3555_v17 = vpop.f32.mrf.mxu1 }
 0xa90   :  { %v3387_v8 = vpop.f32.mrf.mxu3 }
 0xa91   :  { %v3599_v60 = vpack.c.bf16 %v3387_v8, %v3385_v13  ;;  %4251 = vmatmul.msk.f32.gmra.mxu0 %vm3245_vm15, %v3387_v8  ;;  %4267 = vmatmul.msk.f32.gmra.mxu1 %vm3245_vm15, %v3387_v8 }
 0xa93   :  { %v3558_v34 = vpop.f32.mrf.mxu1 }
 0xa9b   :  { %v3561_v25 = vpop.f32.mrf.mxu1 }
 0xab2   :  { %v3637_v53 = vpop.permute.xlu0 %3636 }
 0xab8   :  { %3602 = vxpose.xlu1.b32.start [1/16] (narrow) %v3546_v52, 8 }
 0xac0   :  { %3603 = vxpose.xlu1.b32.cont [2/16] (narrow) %v3549_v35, 8 }
 0xac3   :  { %v3390_v58 = vpop.f32.mrf.mxu3 }
 0xac4   :  { %4252 = vmatmul.msk.f32.gmra.mxu0 %vm3245_vm15, %v3390_v58  ;;  %4268 = vmatmul.msk.f32.gmra.mxu1 %vm3245_vm15, %v3390_v58 }
 0xac8   :  { %3604 = vxpose.xlu1.b32.cont [3/16] (narrow) %v3552_v27, 8 }
 0xacb   :  { %v3392_v26 = vpop.f32.mrf.mxu3 }
 0xacc   :  { %4253 = vmatmul.msk.f32.gmra.mxu0 %vm3245_vm15, %v3392_v26  ;;  %4269 = vmatmul.msk.f32.gmra.mxu1 %vm3245_vm15, %v3392_v26  ;;  %v3600_v63 = vpack.c.bf16 %v3392_v26, %v3390_v58 }
 0xad0   :  { %3605 = vxpose.xlu1.b32.cont [4/16] (narrow) %v3555_v17, 8 }
 0xad3   :  { %v3395_v22 = vpop.f32.mrf.mxu3 }
 0xad4   :  { %4254 = vmatmul.msk.f32.gmra.mxu0 %vm3245_vm15, %v3395_v22  ;;  %4270 = vmatmul.msk.f32.gmra.mxu1 %vm3245_vm15, %v3395_v22  ;;  %v3564_v11 = vpop.f32.mrf.mxu1 }
 0xad8   :  { %3606 = vxpose.xlu1.b32.cont [5/16] (narrow) %v3558_v34, 8 }
 0xadb   :  { %v3397_v47 = vpop.f32.mrf.mxu3 }
 0xadc   :  { %v3601_v43 = vpack.c.bf16 %v3397_v47, %v3395_v22  ;;  %4255 = vmatmul.msk.f32.gmra.mxu0 %vm3245_vm15, %v3397_v47  ;;  %4271 = vmatmul.msk.f32.gmra.mxu1 %vm3245_vm15, %v3397_v47  ;;  %v3567_v46 = vpop.f32.mrf.mxu1 }
 0xade   :  { %3931 = vmatpush.bf16.msra.mxu2 %v3601_v43 }
 0xae0   :  { %3607 = vxpose.xlu1.b32.cont [6/16] (narrow) %v3561_v25, 8 }
 0xae2   :  { %3932 = vmatpush.bf16.msra.mxu2 %v3600_v63 }
 0xae6   :  { %3933 = vmatpush.bf16.msra.mxu2 %v3599_v60 }
 0xae8   :  { %3608 = vxpose.xlu1.b32.cont [7/16] (narrow) %v3564_v11, 8 }
 0xaea   :  { %3934 = vmatpush.bf16.msra.mxu2 %v3598_v51 }
 0xaee   :  { %3935 = vmatpush.bf16.msra.mxu2 %v3597_v4 }
 0xaf0   :  { %3609 = vxpose.xlu1.b32.cont [8/16] (narrow) %v3567_v46, 8 }
 0xaf2   :  { %3936 = vmatpush.bf16.msra.mxu2 %v3596_v39  ;;  %v3485_v39 = vpop.f32.mrf.mxu0 }
 0xaf5   :  { %v3570_v2 = vpop.f32.mrf.mxu1  ;;  %v3647_v62 = vpop.permute.xlu1 %3646 }
 0xaf6   :  { %3937 = vmatpush.bf16.msra.mxu2 %v3595_v44 }
 0xaf8   :  { %3610 = vxpose.xlu1.b32.cont [9/16] (narrow) %v3570_v2, 8 }
 0xafa   :  { %3938 = vmatpush.bf16.msra.mxu2 %v3594_v54  ;;  %v3488_v28 = vpop.f32.mrf.mxu0  ;;  %v3642_v54 = vpop.permute.xlu2 %3641 }
 0xafd   :  { %v3573_v14 = vpop.f32.mrf.mxu1 }
 0xb00   :  { %3611 = vxpose.xlu1.b32.cont [10/16] (narrow) %v3573_v14, 8 }
 0xb02   :  { %v3491_v44 = vpop.f32.mrf.mxu0  ;;  %v3652_v49 = vpop.permute.xlu2 %3651 }
 0xb06   :  { %v3576_v1 = vpop.f32.mrf.mxu1 }
 0xb08   :  { %3612 = vxpose.xlu1.b32.cont [11/16] (narrow) %v3576_v1, 8 }
 0xb0a   :  { %v3494_v21 = vpop.f32.mrf.mxu0 }
 0xb0e   :  { %v3579_v15 = vpop.f32.mrf.mxu1 }
 0xb10   :  { %3613 = vxpose.xlu1.b32.cont [12/16] (narrow) %v3579_v15, 8 }
 0xb12   :  { %v3497_v32 = vpop.f32.mrf.mxu0 }
 0xb1a   :  { %v3500_v36 = vpop.f32.mrf.mxu0 }
 0xb22   :  { %v3503_v18 = vpop.f32.mrf.mxu0 }
 0xb2a   :  { %v7488_v31 = vpop.f32.mrf.mxu0 }
 0xb41   :  { %v3582_v20 = vpop.f32.mrf.mxu1  ;;  %v7492_v12 = vpop.f32.mrf.mxu0 }
 0xb42   :  { %3614 = vxpose.xlu1.b32.cont [13/16] (narrow) %v3582_v20, 8 }
 0xb49   :  { %v3585_v38 = vpop.f32.mrf.mxu1  ;;  %v7494_v8 = vpop.f32.mrf.mxu0 }
 0xb4a   :  { %3615 = vxpose.xlu1.b32.cont [14/16] (narrow) %v3585_v38, 8 }
 0xb51   :  { %v3588_v16 = vpop.f32.mrf.mxu1  ;;  %v7496_v60 = vpop.f32.mrf.mxu0 }
 0xb52   :  { %3616 = vxpose.xlu1.b32.cont [15/16] (narrow) %v3588_v16, 8  ;;  %v7904_v16 = vld [vmem:[#allocation47_spill] sm:$0xff] }
 0xb59   :  { %v3591_v42 = vpop.f32.mrf.mxu1  ;;  %v3518_v52 = vpop.f32.mrf.mxu0 }
 0xb5a   :  { %3617 = vxpose.xlu1.b32.end [16/16] (narrow) %v3591_v42, 8 }
 0xb86   :  { %v3618_v10 = vpop.trf.xlu1 }
 0xb87   :  { %v7480_v41 = vperm.slane %v3618_v10, 0 }
 0xb89   :  { %v3716_v61 = vadd.f32 %v7480_v41, %v3642_v54  ;;  %v3715_v59 = vadd.f32 %v7480_v41, %v3637_v53  ;;  %v3718_v37 = vadd.f32 %v7480_v41, %v3652_v49  ;;  %v3717_v5 = vadd.f32 %v7480_v41, %v3647_v62 }
 0xb8b   :  { %vm3732_vm9 = vcmp.gt.f32.partialorder %v3716_v61, 0.0  ;;  %v3748_v7 = vmul.f32 0.2, %v3716_v61  ;;  %vm3731_vm12 = vcmp.gt.f32.partialorder %v3715_v59, 0.0  ;;  %v3747_v30 = vmul.f32 0.2, %v3715_v59 }
 0xb8c   :  { %v3750_v33 = vmul.f32 0.2, %v3718_v37  ;;  %v3749_v9 = vmul.f32 0.2, %v3717_v5  ;;  %vm3734_vm11 = vcmp.gt.f32.partialorder %v3718_v37, 0.0  ;;  %vm3733_vm13 = vcmp.gt.f32.partialorder %v3717_v5, 0.0 }
 0xb8d   :  { %v3764_v50 = vsel %vm3732_vm9, %v3716_v61, %v3748_v7  ;;  %v3763_v57 = vsel %vm3731_vm12, %v3715_v59, %v3747_v30 }
 0xb8e   :  { %v3780_v0 = vadd.f32 %v3764_v50, %v7900_v6  ;;  %v3779_v55 = vadd.f32 %v3763_v57, %v7901_v23  ;;  %v3766_v24 = vsel %vm3734_vm11, %v3718_v37, %v3750_v33  ;;  %v3765_v4 = vsel %vm3733_vm13, %v3717_v5, %v3749_v9  ;;  %v7908_v9 = vld [vmem:[#allocation46_spill] sm:$0xff] }
 0xb8f   :  { %v3782_v51 = vadd.f32 %v3766_v24, %v7902_v40  ;;  %v3781_v13 = vadd.f32 %v3765_v4, %v7903_v29 }
 0xb90   :  { %3797 = vmax.xlane.f32.xlu2 %v3780_v0  ;;  %3795 = vmax.xlane.f32.xlu0 %v3779_v55 }
 0xb98   :  { %3801 = vmax.xlane.f32.xlu2 %v3782_v51  ;;  %3799 = vmax.xlane.f32.xlu0 %v3781_v13 }
 0xbac   :  { %3656 = vperm.xlu0 %4521, %v3485_v39  }
 0xbb0   :  { %3661 = vperm.xlu2 %4522, %v3488_v28  }
 0xbb4   :  { %3686 = vperm.xlu1 %4523, %v3503_v18   ;;  %3666 = vperm.xlu0 %4521, %v3491_v44   ;;  %v7906_v18 = vld [vmem:[#allocation44_spill] sm:$0xff] }
 0xbb8   :  { %3671 = vperm.xlu2 %4522, %v3494_v21  }
 0xbbc   :  { %3676 = vperm.xlu0 %4521, %v3497_v32   ;;  %3711 = vperm.xlu1 %4523, %v3518_v52  }
 0xbc0   :  { %3681 = vperm.xlu2 %4522, %v3500_v36   ;;  %v7905_v36 = vld [vmem:[#allocation42_spill] sm:$0xff] }
 0xc03   :  { %v3798_v35 = vpop.xlane.xlu2 %3797  ;;  %v3796_v27 = vpop.xlane.xlu0 %3795 }
 0xc04   :  { %v3828_v58 = vsub.f32 %v3780_v0, %v3798_v35  ;;  %v3827_v17 = vsub.f32 %v3779_v55, %v3796_v27  ;;  %v7907_v55 = vld [vmem:[#allocation49_spill] sm:$0xff]  ;;  %v7909_v35 = vld [vmem:[#allocation52_spill] sm:$0xff] }
 0xc06   :  { %v3845_v26 = vmul.f32 1.442695, %v3828_v58  ;;  %v3843_v34 = vmul.f32 1.442695, %v3827_v17 }
 0xc08   :  { %4940 = vpow2.f32 %v3845_v26 }
 0xc09   :  { %4942 = vpow2.f32 %v3843_v34 }
 0xc0b   :  { %v3802_v22 = vpop.xlane.xlu2 %3801  ;;  %v3800_v47 = vpop.xlane.xlu0 %3799 }
 0xc0c   :  { %v3830_v43 = vsub.f32 %v3782_v51, %v3802_v22  ;;  %v3829_v11 = vsub.f32 %v3781_v13, %v3800_v47 }
 0xc0e   :  { %v7498_v25 = vpop.eup %4940  ;;  %v3849_v2 = vmul.f32 1.442695, %v3830_v43  ;;  %v3847_v14 = vmul.f32 1.442695, %v3829_v11 }
 0xc0f   :  { %v7500_v63 = vpop.eup %4942 }
 0xc10   :  { %v3923_v46 = vpack.c.bf16 %v7498_v25, %v7500_v63  ;;  %4944 = vpow2.f32 %v3849_v2 }
 0xc11   :  { %4946 = vpow2.f32 %v3847_v14 }
 0xc12   :  { %3939 = vmatmul.bf16.vlgmr.msra.gmra.mxu2 %v3923_v46 }
 0xc13   :  { %v3662_v1 = vpop.permute.xlu2 %3661 }
 0xc14   :  { %v3720_v15 = vadd.f32 %v7480_v41, %v3662_v1 }
 0xc16   :  { %vm3736_vm14 = vcmp.gt.f32.partialorder %v3720_v15, 0.0  ;;  %v3752_v20 = vmul.f32 0.2, %v3720_v15  ;;  %v7506_v42 = vpop.eup %4944 }
 0xc17   :  { %v7508_v28 = vpop.eup %4946 }
 0xc18   :  { %v3768_v38 = vsel %vm3736_vm14, %v3720_v15, %v3752_v20  ;;  %v3924_v32 = vpack.c.bf16 %v7506_v42, %v7508_v28 }
 0xc19   :  { %v3784_v39 = vadd.f32 %v3768_v38, %v7904_v16 }
 0xc1b   :  { %3805 = vmax.xlane.f32.xlu2 %v3784_v39  ;;  %v3672_v53 = vpop.permute.xlu2 %3671 }
 0xc1c   :  { %v3722_v59 = vadd.f32 %v7480_v41, %v3672_v53 }
 0xc1e   :  { %v3657_v44 = vpop.permute.xlu0 %3656  ;;  %v3754_v30 = vmul.f32 0.2, %v3722_v59  ;;  %vm3738_vm2 = vcmp.gt.f32.partialorder %v3722_v59, 0.0 }
 0xc1f   :  { %v3719_v21 = vadd.f32 %v7480_v41, %v3657_v44 }
 0xc20   :  { %v3770_v0 = vsel %vm3738_vm2, %v3722_v59, %v3754_v30 }
 0xc21   :  { %vm3735_vm0 = vcmp.gt.f32.partialorder %v3719_v21, 0.0  ;;  %v3751_v62 = vmul.f32 0.2, %v3719_v21  ;;  %v3786_v33 = vadd.f32 %v3770_v0, %v7907_v55 }
 0xc22   :  { %3944 = vmatmul.bf16.gmra.mxu2 %v3924_v32 }
 0xc23   :  { %v3767_v54 = vsel %vm3735_vm0, %v3719_v21, %v3751_v62  ;;  %v3682_v4 = vpop.permute.xlu2 %3681 }
 0xc24   :  { %v3783_v10 = vadd.f32 %v3767_v54, %v7905_v36  ;;  %v3724_v40 = vadd.f32 %v7480_v41, %v3682_v4 }
 0xc26   :  { %3803 = vmax.xlane.f32.xlu0 %v3783_v10  ;;  %v3667_v49 = vpop.permute.xlu0 %3666  ;;  %v3756_v51 = vmul.f32 0.2, %v3724_v40  ;;  %vm3740_vm4 = vcmp.gt.f32.partialorder %v3724_v40, 0.0  ;;  %v3687_v29 = vpop.permute.xlu1 %3686 }
 0xc27   :  { %v3721_v61 = vadd.f32 %v7480_v41, %v3667_v49  ;;  %v3725_v13 = vadd.f32 %v7480_v41, %v3687_v29 }
 0xc28   :  { %v3772_v52 = vsel %vm3740_vm4, %v3724_v40, %v3756_v51 }
 0xc29   :  { %vm3737_vm1 = vcmp.gt.f32.partialorder %v3721_v61, 0.0  ;;  %v3753_v37 = vmul.f32 0.2, %v3721_v61  ;;  %v7530_v27 = vadd.f32 %v3772_v52, %v7909_v35  ;;  %v3757_v58 = vmul.f32 0.2, %v3725_v13 }
 0xc2a   :  { %vm3741_vm5 = vcmp.gt.f32.partialorder %v3725_v13, 0.0 }
 0xc2b   :  { %v3769_v5 = vsel %vm3737_vm1, %v3721_v61, %v3753_v37  ;;  %v7910_v61 = vld [vmem:[#allocation55_spill] sm:$0xff] }
 0xc2c   :  { %v3785_v7 = vadd.f32 %v3769_v5, %v7906_v18 }
 0xc2e   :  { %3807 = vmax.xlane.f32.xlu2 %v3785_v7  ;;  %v3677_v50 = vpop.permute.xlu0 %3676  ;;  %v3712_v30 = vpop.permute.xlu1 %3711 }
 0xc2f   :  { %v3723_v57 = vadd.f32 %v7480_v41, %v3677_v50  ;;  %v3730_v0 = vadd.f32 %v7480_v41, %v3712_v30 }
 0xc31   :  { %vm3739_vm3 = vcmp.gt.f32.partialorder %v3723_v57, 0.0  ;;  %v3755_v6 = vmul.f32 0.2, %v3723_v57  ;;  %vm3746_vm9 = vcmp.gt.f32.partialorder %v3730_v0, 0.0 }
 0xc33   :  { %v3771_v23 = vsel %vm3739_vm3, %v3723_v57, %v3755_v6 }
 0xc34   :  { %v7520_v24 = vadd.f32 %v3771_v23, %v7908_v9 }
 0xc36   :  { %3809 = vmax.xlane.f32.xlu2 %v3786_v33  ;;  %3811 = vmax.xlane.f32.xlu0 %v7520_v24 }
 0xc4a   :  { %3691 = vperm.xlu0 %4521, %v7488_v31   ;;  %v3773_v31 = vsel %vm3741_vm5, %v3725_v13, %v3757_v58 }
 0xc4e   :  { %3701 = vperm.xlu2 %4522, %v7494_v8  }
 0xc52   :  { %3696 = vperm.xlu0 %4521, %v7492_v12   ;;  %v7534_v12 = vadd.f32 %v3773_v31, %v6216_v56 }
 0xc5a   :  { %3706 = vperm.xlu0 %4521, %v7496_v60  }
 0xc77   :  { %3813 = vmax.xlane.f32.xlu2 %v7530_v27 }
 0xc7f   :  { %3815 = vmax.xlane.f32.xlu2 %v7534_v12 }
 0xc8e   :  { %v3806_v8 = vpop.xlane.xlu2 %3805 }
 0xc8f   :  { %v3832_v60 = vsub.f32 %v3784_v39, %v3806_v8 }
 0xc91   :  { %v3853_v17 = vmul.f32 1.442695, %v3832_v60 }
 0xc93   :  { %4948 = vpow2.f32 %v3853_v17 }
 0xc99   :  { %v3804_v26 = vpop.xlane.xlu0 %3803  ;;  %v4949_v43 = vpop.eup %4948 }
 0xc9a   :  { %v3831_v34 = vsub.f32 %v3783_v10, %v3804_v26 }
 0xc9c   :  { %v3851_v22 = vmul.f32 1.442695, %v3831_v34 }
 0xc9e   :  { %4950 = vpow2.f32 %v3851_v22 }
 0xca1   :  { %v3808_v47 = vpop.xlane.xlu2 %3807 }
 0xca2   :  { %v3833_v46 = vsub.f32 %v3785_v7, %v3808_v47 }
 0xca4   :  { %v4951_v11 = vpop.eup %4950  ;;  %v3855_v14 = vmul.f32 1.442695, %v3833_v46 }
 0xca5   :  { %v3925_v2 = vpack.c.bf16 %v4949_v43, %v4951_v11 }
 0xca6   :  { %4952 = vpow2.f32 %v3855_v14 }
 0xca7   :  { %3949 = vmatmul.bf16.gmra.mxu2 %v3925_v2 }
 0xca9   :  { %v3810_v1 = vpop.xlane.xlu2 %3809  ;;  %v3812_v44 = vpop.xlane.xlu0 %3811 }
 0xcaa   :  { %v3834_v56 = vsub.f32 %v3786_v33, %v3810_v1  ;;  %v3835_v57 = vsub.f32 %v7520_v24, %v3812_v44 }
 0xcac   :  { %v3857_v15 = vmul.f32 1.442695, %v3834_v56  ;;  %v4953_v16 = vpop.eup %4952  ;;  %v3859_v55 = vmul.f32 1.442695, %v3835_v57 }
 0xcae   :  { %4954 = vpow2.f32 %v3857_v15 }
 0xcaf   :  { %4956 = vpow2.f32 %v3859_v55 }
 0xcb1   :  { %v3702_v20 = vpop.permute.xlu2 %3701 }
 0xcb2   :  { %v3728_v38 = vadd.f32 %v7480_v41, %v3702_v20 }
 0xcb4   :  { %v4955_v39 = vpop.eup %4954  ;;  %vm3744_vm6 = vcmp.gt.f32.partialorder %v3728_v38, 0.0  ;;  %v3760_v21 = vmul.f32 0.2, %v3728_v38 }
 0xcb5   :  { %v3926_v32 = vpack.c.bf16 %v4955_v39, %v4953_v16  ;;  %v4957_v4 = vpop.eup %4956 }
 0xcb6   :  { %v3776_v62 = vsel %vm3744_vm6, %v3728_v38, %v3760_v21 }
 0xcb7   :  { %3954 = vmatmul.bf16.gmra.mxu2 %v3926_v32  ;;  %v3792_v54 = vadd.f32 %v3776_v62, %v6285_v19 }
 0xcb9   :  { %3821 = vmax.xlane.f32.xlu2 %v3792_v54 }
 0xcbc   :  { %v3692_v36 = vpop.permute.xlu0 %3691 }
 0xcbd   :  { %v3726_v10 = vadd.f32 %v7480_v41, %v3692_v36 }
 0xcbf   :  { %vm3742_vm7 = vcmp.gt.f32.partialorder %v3726_v10, 0.0  ;;  %v3758_v53 = vmul.f32 0.2, %v3726_v10 }
 0xcc1   :  { %v3774_v49 = vsel %vm3742_vm7, %v3726_v10, %v3758_v53 }
 0xcc2   :  { %v7541_v59 = vadd.f32 %v3774_v49, %v7910_v61 }
 0xcc4   :  { %3817 = vmax.xlane.f32.xlu0 %v7541_v59  ;;  %v3697_v37 = vpop.permute.xlu0 %3696 }
 0xcc5   :  { %v3727_v5 = vadd.f32 %v7480_v41, %v3697_v37 }
 0xcc7   :  { %vm3743_vm8 = vcmp.gt.f32.partialorder %v3727_v5, 0.0  ;;  %v3759_v18 = vmul.f32 0.2, %v3727_v5 }
 0xcc9   :  { %v3775_v7 = vsel %vm3743_vm8, %v3727_v5, %v3759_v18 }
 0xcca   :  { %v7546_v19 = vadd.f32 %v3775_v7, %v6241_v48  ;;  %v3762_v48 = vmul.f32 0.2, %v3730_v0 }
 0xccc   :  { %3879 = vadd.xlane.f32.xlu0 %v7508_v28  ;;  %v3707_v50 = vpop.permute.xlu0 %3706  ;;  %3819 = vmax.xlane.f32.xlu1 %v7546_v19  ;;  %v3778_v28 = vsel %vm3746_vm9, %v3730_v0, %v3762_v48 }
 0xccd   :  { %v3729_v6 = vadd.f32 %v7480_v41, %v3707_v50  ;;  %v7558_v24 = vadd.f32 %v3778_v28, %v6295_v45 }
 0xccf   :  { %vm3745_vm10 = vcmp.gt.f32.partialorder %v3729_v6, 0.0  ;;  %v3761_v23 = vmul.f32 0.2, %v3729_v6 }
 0xcd1   :  { %v3777_v33 = vsel %vm3745_vm10, %v3729_v6, %v3761_v23 }
 0xcd2   :  { %v7554_v9 = vadd.f32 %v3777_v33, %v6265_v3 }
 0xcd4   :  { %3885 = vadd.xlane.f32.xlu0 %v4949_v43  ;;  %3823 = vmax.xlane.f32.xlu2 %v7554_v9 }
 0xcd5   :  { %3883 = vadd.xlane.f32.xlu1 %v4951_v11 }
 0xcdc   :  { %3891 = vadd.xlane.f32.xlu0 %v4957_v4  ;;  %3825 = vmax.xlane.f32.xlu2 %v7558_v24 }
 0xcdd   :  { %3889 = vadd.xlane.f32.xlu1 %v4955_v39 }
 0xce4   :  { %3875 = vadd.xlane.f32.xlu2 %v7500_v63  ;;  %v7566_v63 = vpop.f32.mrf.mxu2 }
 0xcea   :  { %v3814_v3 = vpop.xlane.xlu2 %3813 }
 0xceb   :  { %v3836_v41 = vsub.f32 %v7530_v27, %v3814_v3 }
 0xcec   :  { %3877 = vadd.xlane.f32.xlu2 %v7498_v25  ;;  %v7568_v27 = vpop.f32.mrf.mxu2 }
 0xced   :  { %v3861_v40 = vmul.f32 1.442695, %v3836_v41 }
 0xcef   :  { %4958 = vpow2.f32 %v3861_v40 }
 0xcf2   :  { %v3816_v51 = vpop.xlane.xlu2 %3815 }
 0xcf3   :  { %v3837_v29 = vsub.f32 %v7534_v12, %v3816_v51 }
 0xcf4   :  { %3881 = vadd.xlane.f32.xlu2 %v7506_v42  ;;  %v3945_v25 = vpop.f32.mrf.mxu2 }
 0xcf5   :  { %v4959_v45 = vpop.eup %4958  ;;  %v3863_v13 = vmul.f32 1.442695, %v3837_v29 }
 0xcf6   :  { %v3927_v52 = vpack.c.bf16 %v4959_v45, %v4957_v4 }
 0xcf7   :  { %4960 = vpow2.f32 %v3863_v13 }
 0xcf8   :  { %3959 = vmatmul.bf16.gmra.mxu2 %v3927_v52 }
 0xcfc   :  { %3887 = vadd.xlane.f32.xlu2 %v4953_v16  ;;  %v7570_v12 = vpop.f32.mrf.mxu2 }
 0xcfd   :  { %v4961_v35 = vpop.eup %4960 }
 0xcfe   :  { %3895 = vadd.xlane.f32.xlu1 %v4961_v35 }
 0xd04   :  { %3893 = vadd.xlane.f32.xlu2 %v4959_v45 }
 0xd2a   :  { %v3950_v26 = vpop.f32.mrf.mxu2 }
 0xd2c   :  { %v3822_v58 = vpop.xlane.xlu2 %3821 }
 0xd2d   :  { %v3840_v31 = vsub.f32 %v3792_v54, %v3822_v58 }
 0xd2f   :  { %v3869_v8 = vmul.f32 1.442695, %v3840_v31 }
 0xd31   :  { %4962 = vpow2.f32 %v3869_v8 }
 0xd32   :  { %v3952_v2 = vpop.f32.mrf.mxu2 }
 0xd37   :  { %v4963_v42 = vpop.eup %4962  ;;  %v3818_v60 = vpop.xlane.xlu0 %3817 }
 0xd38   :  { %v3838_v17 = vsub.f32 %v7541_v59, %v3818_v60  ;;  %3901 = vadd.xlane.f32.xlu1 %v4963_v42 }
 0xd3a   :  { %v3865_v34 = vmul.f32 1.442695, %v3838_v17  ;;  %v7575_v62 = vpop.f32.mrf.mxu2 }
 0xd3c   :  { %4964 = vpow2.f32 %v3865_v34 }
 0xd3f   :  { %v3880_v22 = vpop.xlane.xlu0 %3879  ;;  %v3820_v47 = vpop.xlane.xlu1 %3819 }
 0xd40   :  { %4966 = vrcp.f32 %v3880_v22  ;;  %v3839_v43 = vsub.f32 %v7546_v19, %v3820_v47 }
 0xd42   :  { %v4965_v11 = vpop.eup %4964  ;;  %v3867_v46 = vmul.f32 1.442695, %v3839_v43  ;;  %v3957_v55 = vpop.f32.mrf.mxu2 }
 0xd43   :  { %3897 = vadd.xlane.f32.xlu0 %v4965_v11  ;;  %v3928_v14 = vpack.c.bf16 %v4965_v11, %v4961_v35 }
 0xd44   :  { %4968 = vpow2.f32 %v3867_v46 }
 0xd45   :  { %3964 = vmatmul.bf16.gmra.mxu2 %v3928_v14 }
 0xd46   :  { %v4967_v1 = vpop.eup %4966 }
 0xd47   :  { %v3982_v56 = vmul.f32 %v4967_v1, %v3945_v25  ;;  %v3886_v15 = vpop.xlane.xlu0 %3885  ;;  %v3824_v20 = vpop.xlane.xlu2 %3823 }
 0xd48   :  { %4970 = vrcp.f32 %v3886_v15  ;;  %v3841_v38 = vsub.f32 %v7554_v9, %v3824_v20  ;;  %v3884_v16 = vpop.xlane.xlu1 %3883 }
 0xd49   :  { %v4014_v39 = vmin.f32 %v3982_v56, 0.0  ;;  %4972 = vrcp.f32 %v3884_v16  ;;  %vm3998_vm12 = vcmp.gt.f32.partialorder %v3982_v56, 0.0 }
 0xd4a   :  { %v4969_v44 = vpop.eup %4968  ;;  %v3871_v21 = vmul.f32 1.442695, %v3841_v38 }
 0xd4b   :  { %v4032_v32 = vmul.f32 1.442695, %v4014_v39  ;;  %3899 = vadd.xlane.f32.xlu2 %v4969_v44  ;;  %v3929_v50 = vpack.c.bf16 %v4963_v42, %v4969_v44 }
 0xd4c   :  { %4974 = vpow2.f32 %v3871_v21 }
 0xd4d   :  { %4976 = vpow2.f32 %v4032_v32 }
 0xd4e   :  { %v4971_v54 = vpop.eup %4970 }
 0xd4f   :  { %v4973_v36 = vpop.eup %4972  ;;  %v3985_v10 = vmul.f32 %v4971_v54, %v3952_v2  ;;  %v3826_v53 = vpop.xlane.xlu2 %3825 }
 0xd50   :  { %v3984_v49 = vmul.f32 %v4973_v36, %v3950_v26  ;;  %v3842_v61 = vsub.f32 %v7558_v24, %v3826_v53  ;;  %v3890_v59 = vpop.xlane.xlu1 %3889  ;;  %v3892_v2 = vpop.xlane.xlu0 %3891 }
 0xd51   :  { %v4017_v37 = vmin.f32 %v3985_v10, 0.0  ;;  %4978 = vrcp.f32 %v3890_v59  ;;  %vm4001_vm11 = vcmp.gt.f32.partialorder %v3985_v10, 0.0 }
 0xd52   :  { %v4975_v5 = vpop.eup %4974  ;;  %v4016_v18 = vmin.f32 %v3984_v49, 0.0  ;;  %v3873_v7 = vmul.f32 1.442695, %v3842_v61  ;;  %vm4000_vm13 = vcmp.gt.f32.partialorder %v3984_v49, 0.0 }
 0xd53   :  { %v4977_v19 = vpop.eup %4976  ;;  %v4038_v30 = vmul.f32 1.442695, %v4017_v37  ;;  %3903 = vadd.xlane.f32.xlu0 %v4975_v5 }
 0xd54   :  { %v4274_v57 = vadd.f32 -1.0, %v4977_v19  ;;  %v4036_v6 = vmul.f32 1.442695, %v4016_v18  ;;  %4980 = vpow2.f32 %v3873_v7 }
 0xd55   :  { %4982 = vpow2.f32 %v4038_v30  ;;  %3969 = vmatmul.bf16.gmra.mxu2 %v3929_v50 }
 0xd56   :  { %v4078_v0 = vsel %vm3998_vm12, %v3982_v56, %v4274_v57  ;;  %4984 = vpow2.f32 %v4036_v6 }
 0xd57   :  { %v4979_v23 = vpop.eup %4978  ;;  %4094 = vst.msk [vmem:[%s7655_s9 + $0x10] sm:$0xff] %vm3245_vm15, %v4078_v0  ;;  %v3876_v33 = vpop.xlane.xlu2 %3875 }
 0xd58   :  { %v3987_v9 = vmul.f32 %v4979_v23, %v3957_v55  ;;  %4986 = vrcp.f32 %v3876_v33 }
 0xd5a   :  { %v4981_v48 = vpop.eup %4980  ;;  %v4019_v28 = vmin.f32 %v3987_v9, 0.0  ;;  %vm4003_vm14 = vcmp.gt.f32.partialorder %v3987_v9, 0.0 }
 0xd5b   :  { %v4983_v24 = vpop.eup %4982  ;;  %3905 = vadd.xlane.f32.xlu2 %v4981_v48  ;;  %v3930_v58 = vpack.c.bf16 %v4981_v48, %v4975_v5 }
 0xd5c   :  { %v4985_v4 = vpop.eup %4984  ;;  %v4277_v3 = vadd.f32 -1.0, %v4983_v24  ;;  %v4042_v41 = vmul.f32 1.442695, %v4019_v28 }
 0xd5d   :  { %v4276_v40 = vadd.f32 -1.0, %v4985_v4 }
 0xd5e   :  { %v4987_v51 = vpop.eup %4986  ;;  %v4081_v29 = vsel %vm4001_vm11, %v3985_v10, %v4277_v3  ;;  %4988 = vpow2.f32 %v4042_v41 }
 0xd5f   :  { %4097 = vst.msk [vmem:[%s7655_s9 + $0x28] sm:$0xff] %vm3245_vm15, %v4081_v29  ;;  %v4080_v45 = vsel %vm4000_vm13, %v3984_v49, %v4276_v40  ;;  %v3980_v13 = vmul.f32 %v4987_v51, %v7566_v63  ;;  %v3878_v52 = vpop.xlane.xlu2 %3877 }
 0xd60   :  { %4096 = vst.msk [vmem:[%s7655_s9 + $0x20] sm:$0xff] %vm3245_vm15, %v4080_v45  ;;  %4990 = vrcp.f32 %v3878_v52 }
 0xd61   :  { %v4012_v35 = vmin.f32 %v3980_v13, 0.0  ;;  %vm3996_vm0 = vcmp.gt.f32.partialorder %v3980_v13, 0.0 }
 0xd63   :  { %v4028_v25 = vmul.f32 1.442695, %v4012_v35 }
 0xd64   :  { %v4989_v31 = vpop.eup %4988 }
 0xd65   :  { %v4279_v8 = vadd.f32 -1.0, %v4989_v31  ;;  %4992 = vpow2.f32 %v4028_v25  ;;  %3974 = vmatmul.bf16.gmra.mxu2 %v3930_v58 }
 0xd66   :  { %v4991_v42 = vpop.eup %4990 }
 0xd67   :  { %v4083_v60 = vsel %vm4003_vm14, %v3987_v9, %v4279_v8  ;;  %v3981_v17 = vmul.f32 %v4991_v42, %v7568_v27  ;;  %v3882_v63 = vpop.xlane.xlu2 %3881 }
 0xd68   :  { %4099 = vst.msk [vmem:[%s7655_s9 + $0x38] sm:$0xff] %vm3245_vm15, %v4083_v60  ;;  %4994 = vrcp.f32 %v3882_v63 }
 0xd69   :  { %v4013_v26 = vmin.f32 %v3981_v17, 0.0  ;;  %vm3997_vm1 = vcmp.gt.f32.partialorder %v3981_v17, 0.0 }
 0xd6b   :  { %v4993_v34 = vpop.eup %4992  ;;  %v4030_v22 = vmul.f32 1.442695, %v4013_v26 }
 0xd6c   :  { %v4272_v47 = vadd.f32 -1.0, %v4993_v34 }
 0xd6d   :  { %4996 = vpow2.f32 %v4030_v22 }
 0xd6e   :  { %v4995_v43 = vpop.eup %4994  ;;  %v4076_v11 = vsel %vm3996_vm0, %v3980_v13, %v4272_v47 }
 0xd6f   :  { %4092 = vst.msk [vmem:[%s7655_s9] sm:$0xff] %vm3245_vm15, %v4076_v11  ;;  %v3983_v27 = vmul.f32 %v4995_v43, %v7570_v12  ;;  %v3888_v46 = vpop.xlane.xlu2 %3887 }
 0xd70   :  { %4998 = vrcp.f32 %v3888_v46 }
 0xd71   :  { %v4015_v14 = vmin.f32 %v3983_v27, 0.0  ;;  %5000 = vrcp.f32 %v3892_v2  ;;  %vm3999_vm2 = vcmp.gt.f32.partialorder %v3983_v27, 0.0  ;;  %v3896_v33 = vpop.xlane.xlu1 %3895 }
 0xd73   :  { %v4997_v1 = vpop.eup %4996  ;;  %v4034_v56 = vmul.f32 1.442695, %v4015_v14 }
 0xd74   :  { %v4273_v15 = vadd.f32 -1.0, %v4997_v1 }
 0xd75   :  { %5002 = vpow2.f32 %v4034_v56 }
 0xd76   :  { %v4999_v20 = vpop.eup %4998  ;;  %v4077_v38 = vsel %vm3997_vm1, %v3981_v17, %v4273_v15 }
 0xd77   :  { %4093 = vst.msk [vmem:[%s7655_s9 + $0x8] sm:$0xff] %vm3245_vm15, %v4077_v38  ;;  %v3986_v16 = vmul.f32 %v4999_v20, %v7575_v62  ;;  %v3894_v39 = vpop.xlane.xlu2 %3893  ;;  %v5001_v44 = vpop.eup %5000 }
 0xd78   :  { %5004 = vrcp.f32 %v3894_v39 }
 0xd79   :  { %v4018_v12 = vmin.f32 %v3986_v16, 0.0  ;;  %vm4002_vm3 = vcmp.gt.f32.partialorder %v3986_v16, 0.0 }
 0xd7b   :  { %v5003_v21 = vpop.eup %5002  ;;  %v4040_v32 = vmul.f32 1.442695, %v4018_v12  ;;  %v3960_v54 = vpop.f32.mrf.mxu2 }
 0xd7c   :  { %v4275_v36 = vadd.f32 -1.0, %v5003_v21  ;;  %v3988_v10 = vmul.f32 %v5001_v44, %v3960_v54 }
 0xd7d   :  { %5006 = vpow2.f32 %v4040_v32 }
 0xd7e   :  { %v4079_v53 = vsel %vm3999_vm2, %v3983_v27, %v4275_v36  ;;  %v4020_v49 = vmin.f32 %v3988_v10, 0.0  ;;  %v5005_v62 = vpop.eup %5004  ;;  %vm4004_vm4 = vcmp.gt.f32.partialorder %v3988_v10, 0.0 }
 0xd7f   :  { %4095 = vst.msk [vmem:[%s7655_s9 + $0x18] sm:$0xff] %vm3245_vm15, %v4079_v53 }
 0xd80   :  { %v4044_v61 = vmul.f32 1.442695, %v4020_v49 }
 0xd82   :  { %5008 = vpow2.f32 %v4044_v61 }
 0xd83   :  { %v5007_v59 = vpop.eup %5006  ;;  %v3962_v37 = vpop.f32.mrf.mxu2 }
 0xd84   :  { %v4278_v5 = vadd.f32 -1.0, %v5007_v59  ;;  %v3989_v18 = vmul.f32 %v5005_v62, %v3962_v37 }
 0xd86   :  { %v4082_v7 = vsel %vm4002_vm3, %v3986_v16, %v4278_v5  ;;  %v4021_v19 = vmin.f32 %v3989_v18, 0.0  ;;  %vm4005_vm5 = vcmp.gt.f32.partialorder %v3989_v18, 0.0 }
 0xd87   :  { %4098 = vst.msk [vmem:[%s7655_s9 + $0x30] sm:$0xff] %vm3245_vm15, %v4082_v7 }
 0xd88   :  { %v5009_v30 = vpop.eup %5008  ;;  %v4046_v50 = vmul.f32 1.442695, %v4021_v19 }
 0xd89   :  { %v4280_v57 = vadd.f32 -1.0, %v5009_v30 }
 0xd8a   :  { %5010 = vpow2.f32 %v4046_v50 }
 0xd8b   :  { %v4084_v6 = vsel %vm4004_vm4, %v3988_v10, %v4280_v57  ;;  %5012 = vrcp.f32 %v3896_v33 }
 0xd8c   :  { %4100 = vst.msk [vmem:[%s7655_s9 + $0x40] sm:$0xff] %vm3245_vm15, %v4084_v6 }
 0xd90   :  { %v5011_v0 = vpop.eup %5010 }
 0xd91   :  { %v4281_v23 = vadd.f32 -1.0, %v5011_v0  ;;  %v5013_v48 = vpop.eup %5012 }
 0xd93   :  { %v4085_v55 = vsel %vm4005_vm5, %v3989_v18, %v4281_v23 }
 0xd94   :  { %4101 = vst.msk [vmem:[%s7655_s9 + $0x48] sm:$0xff] %vm3245_vm15, %v4085_v55 }
 0xdab   :  { %v3902_v25 = vpop.xlane.xlu1 %3901 }
 0xdb6   :  { %v3898_v9 = vpop.xlane.xlu0 %3897 }
 0xdb7   :  { %5014 = vrcp.f32 %v3898_v9 }
 0xdbd   :  { %v5015_v40 = vpop.eup %5014 }
 0xdbe   :  { %v3900_v41 = vpop.xlane.xlu2 %3899 }
 0xdc6   :  { %v3904_v34 = vpop.xlane.xlu0 %3903 }
 0xdc8   :  { %v3965_v28 = vpop.f32.mrf.mxu2 }
 0xdc9   :  { %v3990_v24 = vmul.f32 %v5013_v48, %v3965_v28 }
 0xdcb   :  { %v4022_v4 = vmin.f32 %v3990_v24, 0.0  ;;  %vm4006_vm6 = vcmp.gt.f32.partialorder %v3990_v24, 0.0 }
 0xdcd   :  { %v4048_v3 = vmul.f32 1.442695, %v4022_v4 }
 0xdce   :  { %v3906_v1 = vpop.xlane.xlu2 %3905 }
 0xdcf   :  { %5016 = vpow2.f32 %v4048_v3 }
 0xdd0   :  { %v3967_v51 = vpop.f32.mrf.mxu2  ;;  %5018 = vrcp.f32 %v3900_v41 }
 0xdd1   :  { %v3991_v29 = vmul.f32 %v5015_v40, %v3967_v51 }
 0xdd3   :  { %v4023_v45 = vmin.f32 %v3991_v29, 0.0  ;;  %vm4007_vm7 = vcmp.gt.f32.partialorder %v3991_v29, 0.0 }
 0xdd5   :  { %v5017_v13 = vpop.eup %5016  ;;  %v4050_v52 = vmul.f32 1.442695, %v4023_v45 }
 0xdd6   :  { %v4282_v35 = vadd.f32 -1.0, %v5017_v13  ;;  %v5019_v58 = vpop.eup %5018 }
 0xdd7   :  { %5020 = vpow2.f32 %v4050_v52 }
 0xdd8   :  { %v4086_v31 = vsel %vm4006_vm6, %v3990_v24, %v4282_v35  ;;  %v3970_v8 = vpop.f32.mrf.mxu2  ;;  %5022 = vrcp.f32 %v3902_v25 }
 0xdd9   :  { %4102 = vst.msk [vmem:[%s7655_s9 + $0x50] sm:$0xff] %vm3245_vm15, %v4086_v31  ;;  %v3992_v42 = vmul.f32 %v5019_v58, %v3970_v8 }
 0xddb   :  { %v4024_v60 = vmin.f32 %v3992_v42, 0.0  ;;  %vm4008_vm8 = vcmp.gt.f32.partialorder %v3992_v42, 0.0 }
 0xddd   :  { %v5021_v17 = vpop.eup %5020  ;;  %v4052_v63 = vmul.f32 1.442695, %v4024_v60 }
 0xdde   :  { %v4283_v26 = vadd.f32 -1.0, %v5021_v17  ;;  %v5023_v22 = vpop.eup %5022 }
 0xddf   :  { %5024 = vpow2.f32 %v4052_v63 }
 0xde0   :  { %v4087_v47 = vsel %vm4007_vm7, %v3991_v29, %v4283_v26  ;;  %v3972_v43 = vpop.f32.mrf.mxu2  ;;  %5026 = vrcp.f32 %v3904_v34 }
 0xde1   :  { %4103 = vst.msk [vmem:[%s7655_s9 + $0x58] sm:$0xff] %vm3245_vm15, %v4087_v47  ;;  %v3993_v11 = vmul.f32 %v5023_v22, %v3972_v43 }
 0xde3   :  { %v4025_v27 = vmin.f32 %v3993_v11, 0.0  ;;  %vm4009_vm10 = vcmp.gt.f32.partialorder %v3993_v11, 0.0 }
 0xde5   :  { %v5025_v46 = vpop.eup %5024  ;;  %v4054_v2 = vmul.f32 1.442695, %v4025_v27 }
 0xde6   :  { %v4284_v14 = vadd.f32 -1.0, %v5025_v46  ;;  %v5027_v56 = vpop.eup %5026 }
 0xde7   :  { %5028 = vpow2.f32 %v4054_v2 }
 0xde8   :  { %v4088_v15 = vsel %vm4008_vm8, %v3992_v42, %v4284_v14  ;;  %v3975_v20 = vpop.f32.mrf.mxu2  ;;  %5030 = vrcp.f32 %v3906_v1 }
 0xde9   :  { %4104 = vst.msk [vmem:[%s7655_s9 + $0x60] sm:$0xff] %vm3245_vm15, %v4088_v15  ;;  %v3994_v38 = vmul.f32 %v5027_v56, %v3975_v20 }
 0xdeb   :  { %v4026_v16 = vmin.f32 %v3994_v38, 0.0  ;;  %vm4010_vm9 = vcmp.gt.f32.partialorder %v3994_v38, 0.0 }
 0xded   :  { %v5029_v12 = vpop.eup %5028  ;;  %v4056_v39 = vmul.f32 1.442695, %v4026_v16 }
 0xdee   :  { %v4285_v44 = vadd.f32 -1.0, %v5029_v12  ;;  %v5031_v21 = vpop.eup %5030 }
 0xdef   :  { %5032 = vpow2.f32 %v4056_v39 }
 0xdf0   :  { %v4089_v32 = vsel %vm4009_vm10, %v3993_v11, %v4285_v44  ;;  %v3977_v54 = vpop.f32.mrf.mxu2 }
 0xdf1   :  { %4105 = vst.msk [vmem:[%s7655_s9 + $0x68] sm:$0xff] %vm3245_vm15, %v4089_v32  ;;  %v3995_v36 = vmul.f32 %v5031_v21, %v3977_v54 }
 0xdf3   :  { %v4027_v10 = vmin.f32 %v3995_v36, 0.0  ;;  %vm4011_vm12 = vcmp.gt.f32.partialorder %v3995_v36, 0.0 }
 0xdf5   :  { %v5033_v53 = vpop.eup %5032  ;;  %v4058_v49 = vmul.f32 1.442695, %v4027_v10 }
 0xdf6   :  { %v4286_v61 = vadd.f32 -1.0, %v5033_v53 }
 0xdf7   :  { %5034 = vpow2.f32 %v4058_v49 }
 0xdf8   :  { %v4090_v62 = vsel %vm4010_vm9, %v3994_v38, %v4286_v61 }
 0xdf9   :  { %4106 = vst.msk [vmem:[%s7655_s9 + $0x70] sm:$0xff] %vm3245_vm15, %v4090_v62 }
 0xdfd   :  { %v5035_v59 = vpop.eup %5034 }
 0xdfe   :  { %v4287_v37 = vadd.f32 -1.0, %v5035_v59 }
 0xe00   :  { %v4091_v5 = vsel %vm4011_vm12, %v3995_v36, %v4287_v37 }
 0xe01   :  { %4107 = vst.msk [vmem:[%s7655_s9 + $0x78] sm:$0xff] %vm3245_vm15, %v4091_v5 }

</bundles_post_ra>
